<compile_context>
chip_gen: v5e
topology: v5e:2x2
jax: 0.10.0
libtpu: 0.0.40
codegen_flags: <defaults>
</compile_context>

<pallas_src>
import functools

import jax
import jax.numpy as jnp
from jax.experimental import pallas as pl
from jax.experimental.pallas import tpu as pltpu


def _round_up(x, m):
    return ((x + m - 1) // m) * m


# ---------------------------------------------------------------------------
# Pallas kernels: one fused (matmul + epilogue) kernel invocation per layer.
# ---------------------------------------------------------------------------

def _matmul_act_kernel(a_ref, w_ref, o_ref, *, activation):
    """[Mp,K]x[K,N] bf16 matmul (f32 accum) with fused ReLU6 / sigmoid."""
    acc = jnp.dot(a_ref[...], w_ref[...], preferred_element_type=jnp.float32)
    if activation == "relu6":
        acc = jnp.minimum(jnp.maximum(acc, 0.0), 6.0)
    elif activation == "sigmoid":
        acc = jax.nn.sigmoid(acc)
    o_ref[...] = acc.astype(o_ref.dtype)


def _matmul_bn_relu6_kernel(a_ref, w_ref, g_ref, b_ref, o_ref, *, m_valid, eps):
    """Matmul + training-mode BatchNorm (stats over the true M rows) + ReLU6.

    Rows beyond m_valid (zero-padded patches) contribute zero to the sums and
    the divisor is the true M, so the batch statistics are unbiased; their
    (garbage) outputs are sliced off by the wrapper.
    """
    acc = jnp.dot(a_ref[...], w_ref[...], preferred_element_type=jnp.float32)
    inv_m = jnp.float32(1.0 / m_valid)
    mean = jnp.sum(acc, axis=0, keepdims=True) * inv_m
    ex2 = jnp.sum(acc * acc, axis=0, keepdims=True) * inv_m
    var = jnp.maximum(ex2 - mean * mean, 0.0)          # biased var, as PyTorch fwd
    y = (acc - mean) * jax.lax.rsqrt(var + eps) * g_ref[...] + b_ref[...]
    o_ref[...] = jnp.minimum(jnp.maximum(y, 0.0), 6.0).astype(o_ref.dtype)


# ---------------------------------------------------------------------------
# pallas_call wrapper: whole problem as a single VMEM-resident block.
# ---------------------------------------------------------------------------

def _fused_conv_matmul(patches_bf16, w2d_bf16, *, activation=None,
                       gamma=None, beta=None, eps=1e-5):
    M, K = patches_bf16.shape
    Kw, N = w2d_bf16.shape
    assert K == Kw
    Mp = _round_up(M, 8)
    a = patches_bf16
    if Mp != M:
        a = jnp.pad(a, ((0, Mp - M), (0, 0)))

    if gamma is None:
        kernel = functools.partial(_matmul_act_kernel, activation=activation)
        in_specs = [pl.BlockSpec((Mp, K), lambda i: (0, 0)),
                    pl.BlockSpec((K, N), lambda i: (0, 0))]
        args = (a, w2d_bf16)
    else:
        kernel = functools.partial(_matmul_bn_relu6_kernel, m_valid=M, eps=eps)
        in_specs = [pl.BlockSpec((Mp, K), lambda i: (0, 0)),
                    pl.BlockSpec((K, N), lambda i: (0, 0)),
                    pl.BlockSpec((1, N), lambda i: (0, 0)),
                    pl.BlockSpec((1, N), lambda i: (0, 0))]
        args = (a, w2d_bf16, gamma, beta)

    out = pl.pallas_call(
        kernel,
        out_shape=jax.ShapeDtypeStruct((Mp, N), jnp.float32),
        grid_spec=pltpu.PrefetchScalarGridSpec(
            num_scalar_prefetch=0,
            grid=(1,),
            in_specs=in_specs,
            out_specs=pl.BlockSpec((Mp, N), lambda i: (0, 0))),
        compiler_params=pltpu.CompilerParams(
            dimension_semantics=("arbitrary",)),
    )(*args)
    return out if Mp == M else out[:M]


# ---------------------------------------------------------------------------
# im2col glue (single XLA op per layer) + per-layer driver
# ---------------------------------------------------------------------------

def _extract_patches(x_nhwc, kh, kw, stride, pad):
    """NHWC -> [B*OH*OW, Cin*kh*kw] patch matrix, features ordered (Cin,kh,kw)."""
    B, H, W, C = x_nhwc.shape
    patches = jax.lax.conv_general_dilated_patches(
        x_nhwc,
        filter_shape=(kh, kw),
        window_strides=(stride, stride),
        padding=((pad, pad), (pad, pad)),
        dimension_numbers=("NHWC", "HWIO", "NHWC"),
    )
    OH = (H + 2 * pad - kh) // stride + 1
    OW = (W + 2 * pad - kw) // stride + 1
    return patches.reshape(B * OH * OW, C * kh * kw), OH, OW


def _conv_layer(x_nhwc, w2d_bf16, kh, kw, stride, pad, *,
                activation=None, gamma=None, beta=None):
    B = x_nhwc.shape[0]
    patches, OH, OW = _extract_patches(
        x_nhwc.astype(jnp.bfloat16), kh, kw, stride, pad)
    out = _fused_conv_matmul(patches, w2d_bf16, activation=activation,
                             gamma=gamma, beta=beta)          # [B*OH*OW, Cout] f32
    return out.reshape(B, OH, OW, -1)


# ---------------------------------------------------------------------------
# Discriminator forward (jitted)
# ---------------------------------------------------------------------------

def _discriminator_forward(x_nchw, p):
    x = jnp.transpose(x_nchw, (0, 2, 3, 1)).astype(jnp.float32)   # NHWC
    B = x.shape[0]

    # cnn1: Conv(1->64, k4, s2, p1) + ReLU6 (fused)
    x1 = _conv_layer(x, p["w1"], 4, 4, 2, 1, activation="relu6")
    # cnn2: Conv(64->128, k4, s2, p1) + BN + ReLU6 (all fused)
    x2 = _conv_layer(x1, p["w2"], 4, 4, 2, 1, gamma=p["g2"], beta=p["b2"])
    # cnn3: Conv(128->256, k3, s2, p1) + BN + ReLU6
    x3 = _conv_layer(x2, p["w3"], 3, 3, 2, 1, gamma=p["g3"], beta=p["b3"])
    # cnn4: Conv(256->512, k4, s2, p1) + BN + ReLU6
    x4 = _conv_layer(x3, p["w4"], 4, 4, 2, 1, gamma=p["g4"], beta=p["b4"])
    # cnn5: Conv(512->1, k2, s1, p0) + sigmoid (fused), final map is 1x1
    x5 = _conv_layer(x4, p["w5"], 2, 2, 1, 0, activation="sigmoid")

    prob = x5.reshape(B, 1)                      # same as PyTorch .view([B, 1])

    # Intermediate features returned in NCHW to match PyTorch semantics.
    feat2 = jnp.transpose(x2, (0, 3, 1, 2))
    feat3 = jnp.transpose(x3, (0, 3, 1, 2))
    feat4 = jnp.transpose(x4, (0, 3, 1, 2))
    return prob, [feat2, feat3, feat4]


discriminator_forward = jax.jit(_discriminator_forward)


# ---------------------------------------------------------------------------
# Parameters: PyTorch-layout init + one-time matmul-layout preparation
# ---------------------------------------------------------------------------

def init_params(key):
    ks = jax.random.split(key, 11)
    return {
        # Conv2d weights in PyTorch layout [Cout, Cin, KH, KW], bias=False.
        "w1": 0.02 * jax.random.normal(ks[0], (64, 1, 4, 4), jnp.float32),
        "w2": 0.02 * jax.random.normal(ks[1], (128, 64, 4, 4), jnp.float32),
        "w3": 0.02 * jax.random.normal(ks[2], (256, 128, 3, 3), jnp.float32),
        "w4": 0.02 * jax.random.normal(ks[3], (512, 256, 4, 4), jnp.float32),
        "w5": 0.02 * jax.random.normal(ks[4], (1, 512, 2, 2), jnp.float32),
        # BatchNorm affine params.
        "g2": 1.0 + 0.1 * jax.random.normal(ks[5], (128,), jnp.float32),
        "b2": 0.1 * jax.random.normal(ks[6], (128,), jnp.float32),
        "g3": 1.0 + 0.1 * jax.random.normal(ks[7], (256,), jnp.float32),
        "b3": 0.1 * jax.random.normal(ks[8], (256,), jnp.float32),
        "g4": 1.0 + 0.1 * jax.random.normal(ks[9], (512,), jnp.float32),
        "b4": 0.1 * jax.random.normal(ks[10], (512,), jnp.float32),
    }


def prepare_params(p):
    """One-time conversion (hoisted out of the forward path):
    Conv weights -> [Cin*KH*KW, Cout] bf16 matmul matrices (feature order
    matches the patch extractor: Cin slowest, then KH, KW); BN params -> (1,C)."""
    def w2d(w):
        cout = w.shape[0]
        return jnp.transpose(w.reshape(cout, -1), (1, 0)).astype(jnp.bfloat16)

    def vec(v):
        return v.reshape(1, -1).astype(jnp.float32)

    return {
        "w1": w2d(p["w1"]), "w2": w2d(p["w2"]), "w3": w2d(p["w3"]),
        "w4": w2d(p["w4"]), "w5": w2d(p["w5"]),
        "g2": vec(p["g2"]), "b2": vec(p["b2"]),
        "g3": vec(p["g3"]), "b3": vec(p["b3"]),
        "g4": vec(p["g4"]), "b4": vec(p["b4"]),
    }


if __name__ == "__main__":
    key = jax.random.PRNGKey(0)
    k_x, k_p = jax.random.split(key)

    # 1-channel 32x32 images so the final conv produces a 1x1 map and the
    # .view([B, 1]) equivalent is valid (matches the PyTorch module's use).
    x = jax.random.normal(k_x, (2, 1, 32, 32), jnp.float32)
    params = jax.block_until_ready(prepare_params(init_params(k_p)))

    prob, feats = discriminator_forward(x, params)
    prob = jax.block_until_ready(prob)
    feats = [jax.block_until_ready(f) for f in feats]

    assert prob.shape == (2, 1)
    assert feats[0].shape == (2, 128, 8, 8)
    assert feats[1].shape == (2, 256, 4, 4)
    assert feats[2].shape == (2, 512, 2, 2)
    assert bool(jnp.all((prob > 0.0) & (prob < 1.0)))
    assert all(bool(jnp.all(jnp.isfinite(f))) for f in feats)

    print("KERNEL_OK")
</pallas_src>

<mosaic_0001>
module attributes {stable_mosaic.version = 11 : i64} {
  func.func @_matmul_act_kernel(%arg0: i32, %arg1: memref<512x16xbf16, #tpu.memory_space<vmem>>, %arg2: memref<16x64xbf16, #tpu.memory_space<vmem>>, %arg3: memref<512x64xf32, #tpu.memory_space<vmem>>) attributes {dimension_semantics = [#tpu.dimension_semantics<arbitrary>], iteration_bounds = array<i64: 1>, scalar_prefetch = 0 : i64, scratch_operands = 0 : i64, tpu.core_type = #tpu.core_type<tc>, window_params = [{pipeline_mode = #tpu.pipeline_mode<synchronous>, transform_indices = @transform_0, window_bounds = array<i64: 512, 16>}, {pipeline_mode = #tpu.pipeline_mode<synchronous>, transform_indices = @transform_1, window_bounds = array<i64: 16, 64>}, {pipeline_mode = #tpu.pipeline_mode<synchronous>, transform_indices = @transform_2, window_bounds = array<i64: 512, 64>}]} {
    %c0 = arith.constant 0 : index
    %c0_0 = arith.constant 0 : index
    %0 = vector.load %arg1[%c0, %c0_0] : memref<512x16xbf16, #tpu.memory_space<vmem>>, vector<512x16xbf16>
    %c0_1 = arith.constant 0 : index
    %c0_2 = arith.constant 0 : index
    %1 = vector.load %arg2[%c0_1, %c0_2] : memref<16x64xbf16, #tpu.memory_space<vmem>>, vector<16x64xbf16>
    %cst = arith.constant dense<0.000000e+00> : vector<512x64xf32>
    %2 = tpu.matmul %0, %1, %cst {dimension_numbers = #tpu.dot_dimension_numbers<[1], [0], [0], [1], [0, 0, 1, 1], [], []>} : vector<512x16xbf16>, vector<16x64xbf16>, vector<512x64xf32> -> vector<512x64xf32>
    %cst_3 = arith.constant 0.000000e+00 : f32
    %3 = vector.broadcast %cst_3 : f32 to vector<512x64xf32>
    %4 = arith.maximumf %2, %3 : vector<512x64xf32>
    %cst_4 = arith.constant 6.000000e+00 : f32
    %5 = vector.broadcast %cst_4 : f32 to vector<512x64xf32>
    %6 = arith.minimumf %4, %5 : vector<512x64xf32>
    %c0_5 = arith.constant 0 : index
    %c0_6 = arith.constant 0 : index
    %7 = vector.load %arg3[%c0_5, %c0_6] : memref<512x64xf32, #tpu.memory_space<vmem>>, vector<512x64xf32>
    tpu.vector_store %arg3[%c0_5, %c0_6], %6 {strides = array<i32>} : memref<512x64xf32, #tpu.memory_space<vmem>>, vector<512x64xf32>,
    return
  }
  func.func @transform_0(%arg0: i32) -> (i32, i32) {
    %c0_i32 = arith.constant 0 : i32
    %c0_i32_0 = arith.constant 0 : i32
    %c0_i32_1 = arith.constant 0 : i32
    return %c0_i32, %c0_i32_0 : i32, i32
  }
  func.func @transform_1(%arg0: i32) -> (i32, i32) {
    %c0_i32 = arith.constant 0 : i32
    %c0_i32_0 = arith.constant 0 : i32
    %c0_i32_1 = arith.constant 0 : i32
    return %c0_i32, %c0_i32_0 : i32, i32
  }
  func.func @transform_2(%arg0: i32) -> (i32, i32) {
    %c0_i32 = arith.constant 0 : i32
    %c0_i32_0 = arith.constant 0 : i32
    %c0_i32_1 = arith.constant 0 : i32
    return %c0_i32, %c0_i32_0 : i32, i32
  }
}

module attributes {stable_mosaic.version = 11 : i64} {
  func.func @_matmul_bn_relu6_kernel(%arg0: i32, %arg1: memref<128x1024xbf16, #tpu.memory_space<vmem>>, %arg2: memref<1024x128xbf16, #tpu.memory_space<vmem>>, %arg3: memref<1x128xf32, #tpu.memory_space<vmem>>, %arg4: memref<1x128xf32, #tpu.memory_space<vmem>>, %arg5: memref<128x128xf32, #tpu.memory_space<vmem>>) attributes {dimension_semantics = [#tpu.dimension_semantics<arbitrary>], iteration_bounds = array<i64: 1>, scalar_prefetch = 0 : i64, scratch_operands = 0 : i64, tpu.core_type = #tpu.core_type<tc>, window_params = [{pipeline_mode = #tpu.pipeline_mode<synchronous>, transform_indices = @transform_0, window_bounds = array<i64: 128, 1024>}, {pipeline_mode = #tpu.pipeline_mode<synchronous>, transform_indices = @transform_1, window_bounds = array<i64: 1024, 128>}, {pipeline_mode = #tpu.pipeline_mode<synchronous>, transform_indices = @transform_2, window_bounds = array<i64: 1, 128>}, {pipeline_mode = #tpu.pipeline_mode<synchronous>, transform_indices = @transform_3, window_bounds = array<i64: 1, 128>}, {pipeline_mode = #tpu.pipeline_mode<synchronous>, transform_indices = @transform_4, window_bounds = array<i64: 128, 128>}]} {
    %c0 = arith.constant 0 : index
    %c0_0 = arith.constant 0 : index
    %0 = vector.load %arg1[%c0, %c0_0] : memref<128x1024xbf16, #tpu.memory_space<vmem>>, vector<128x1024xbf16>
    %c0_1 = arith.constant 0 : index
    %c0_2 = arith.constant 0 : index
    %1 = vector.load %arg2[%c0_1, %c0_2] : memref<1024x128xbf16, #tpu.memory_space<vmem>>, vector<1024x128xbf16>
    %cst = arith.constant dense<0.000000e+00> : vector<128x128xf32>
    %2 = tpu.matmul %0, %1, %cst {dimension_numbers = #tpu.dot_dimension_numbers<[1], [0], [0], [1], [0, 0, 1, 1], [], []>} : vector<128x1024xbf16>, vector<1024x128xbf16>, vector<128x128xf32> -> vector<128x128xf32>
    %cst_3 = arith.constant dense<0.000000e+00> : vector<128xf32>
    %3 = vector.multi_reduction <add>, %2, %cst_3 [0] : vector<128x128xf32> to vector<128xf32>
    %4 = vector.shape_cast %3 : vector<128xf32> to vector<1x128xf32>
    %cst_4 = arith.constant 7.812500e-03 : f32
    %5 = vector.broadcast %cst_4 : f32 to vector<1x128xf32>
    %6 = arith.mulf %4, %5 : vector<1x128xf32>
    %7 = arith.mulf %2, %2 : vector<128x128xf32>
    %cst_5 = arith.constant dense<0.000000e+00> : vector<128xf32>
    %8 = vector.multi_reduction <add>, %7, %cst_5 [0] : vector<128x128xf32> to vector<128xf32>
    %9 = vector.shape_cast %8 : vector<128xf32> to vector<1x128xf32>
    %cst_6 = arith.constant 7.812500e-03 : f32
    %10 = vector.broadcast %cst_6 : f32 to vector<1x128xf32>
    %11 = arith.mulf %9, %10 : vector<1x128xf32>
    %12 = arith.mulf %6, %6 : vector<1x128xf32>
    %13 = arith.subf %11, %12 : vector<1x128xf32>
    %cst_7 = arith.constant 0.000000e+00 : f32
    %14 = vector.broadcast %cst_7 : f32 to vector<1x128xf32>
    %15 = arith.maximumf %13, %14 : vector<1x128xf32>
    %16 = vector.broadcast %6 : vector<1x128xf32> to vector<128x128xf32>
    %17 = arith.subf %2, %16 : vector<128x128xf32>
    %cst_8 = arith.constant 9.99999974E-6 : f32
    %18 = vector.broadcast %cst_8 : f32 to vector<1x128xf32>
    %19 = arith.addf %15, %18 : vector<1x128xf32>
    %20 = math.rsqrt %19 : vector<1x128xf32>
    %21 = vector.broadcast %20 : vector<1x128xf32> to vector<128x128xf32>
    %22 = arith.mulf %17, %21 : vector<128x128xf32>
    %c0_9 = arith.constant 0 : index
    %c0_10 = arith.constant 0 : index
    %23 = vector.load %arg3[%c0_9, %c0_10] : memref<1x128xf32, #tpu.memory_space<vmem>>, vector<1x128xf32>
    %24 = vector.broadcast %23 : vector<1x128xf32> to vector<128x128xf32>
    %25 = arith.mulf %22, %24 : vector<128x128xf32>
    %c0_11 = arith.constant 0 : index
    %c0_12 = arith.constant 0 : index
    %26 = vector.load %arg4[%c0_11, %c0_12] : memref<1x128xf32, #tpu.memory_space<vmem>>, vector<1x128xf32>
    %27 = vector.broadcast %26 : vector<1x128xf32> to vector<128x128xf32>
    %28 = arith.addf %25, %27 : vector<128x128xf32>
    %cst_13 = arith.constant 0.000000e+00 : f32
    %29 = vector.broadcast %cst_13 : f32 to vector<128x128xf32>
    %30 = arith.maximumf %28, %29 : vector<128x128xf32>
    %cst_14 = arith.constant 6.000000e+00 : f32
    %31 = vector.broadcast %cst_14 : f32 to vector<128x128xf32>
    %32 = arith.minimumf %30, %31 : vector<128x128xf32>
    %c0_15 = arith.constant 0 : index
    %c0_16 = arith.constant 0 : index
    %33 = vector.load %arg5[%c0_15, %c0_16] : memref<128x128xf32, #tpu.memory_space<vmem>>, vector<128x128xf32>
    tpu.vector_store %arg5[%c0_15, %c0_16], %32 {strides = array<i32>} : memref<128x128xf32, #tpu.memory_space<vmem>>, vector<128x128xf32>,
    return
  }
  func.func @transform_0(%arg0: i32) -> (i32, i32) {
    %c0_i32 = arith.constant 0 : i32
    %c0_i32_0 = arith.constant 0 : i32
    %c0_i32_1 = arith.constant 0 : i32
    return %c0_i32, %c0_i32_0 : i32, i32
  }
  func.func @transform_1(%arg0: i32) -> (i32, i32) {
    %c0_i32 = arith.constant 0 : i32
    %c0_i32_0 = arith.constant 0 : i32
    %c0_i32_1 = arith.constant 0 : i32
    return %c0_i32, %c0_i32_0 : i32, i32
  }
  func.func @transform_2(%arg0: i32) -> (i32, i32) {
    %c0_i32 = arith.constant 0 : i32
    %c0_i32_0 = arith.constant 0 : i32
    %c0_i32_1 = arith.constant 0 : i32
    return %c0_i32, %c0_i32_0 : i32, i32
  }
  func.func @transform_3(%arg0: i32) -> (i32, i32) {
    %c0_i32 = arith.constant 0 : i32
    %c0_i32_0 = arith.constant 0 : i32
    %c0_i32_1 = arith.constant 0 : i32
    return %c0_i32, %c0_i32_0 : i32, i32
  }
  func.func @transform_4(%arg0: i32) -> (i32, i32) {
    %c0_i32 = arith.constant 0 : i32
    %c0_i32_0 = arith.constant 0 : i32
    %c0_i32_1 = arith.constant 0 : i32
    return %c0_i32, %c0_i32_0 : i32, i32
  }
}

module attributes {stable_mosaic.version = 11 : i64} {
  func.func @_matmul_bn_relu6_kernel(%arg0: i32, %arg1: memref<32x1152xbf16, #tpu.memory_space<vmem>>, %arg2: memref<1152x256xbf16, #tpu.memory_space<vmem>>, %arg3: memref<1x256xf32, #tpu.memory_space<vmem>>, %arg4: memref<1x256xf32, #tpu.memory_space<vmem>>, %arg5: memref<32x256xf32, #tpu.memory_space<vmem>>) attributes {dimension_semantics = [#tpu.dimension_semantics<arbitrary>], iteration_bounds = array<i64: 1>, scalar_prefetch = 0 : i64, scratch_operands = 0 : i64, tpu.core_type = #tpu.core_type<tc>, window_params = [{pipeline_mode = #tpu.pipeline_mode<synchronous>, transform_indices = @transform_0, window_bounds = array<i64: 32, 1152>}, {pipeline_mode = #tpu.pipeline_mode<synchronous>, transform_indices = @transform_1, window_bounds = array<i64: 1152, 256>}, {pipeline_mode = #tpu.pipeline_mode<synchronous>, transform_indices = @transform_2, window_bounds = array<i64: 1, 256>}, {pipeline_mode = #tpu.pipeline_mode<synchronous>, transform_indices = @transform_3, window_bounds = array<i64: 1, 256>}, {pipeline_mode = #tpu.pipeline_mode<synchronous>, transform_indices = @transform_4, window_bounds = array<i64: 32, 256>}]} {
    %c0 = arith.constant 0 : index
    %c0_0 = arith.constant 0 : index
    %0 = vector.load %arg1[%c0, %c0_0] : memref<32x1152xbf16, #tpu.memory_space<vmem>>, vector<32x1152xbf16>
    %c0_1 = arith.constant 0 : index
    %c0_2 = arith.constant 0 : index
    %1 = vector.load %arg2[%c0_1, %c0_2] : memref<1152x256xbf16, #tpu.memory_space<vmem>>, vector<1152x256xbf16>
    %cst = arith.constant dense<0.000000e+00> : vector<32x256xf32>
    %2 = tpu.matmul %0, %1, %cst {dimension_numbers = #tpu.dot_dimension_numbers<[1], [0], [0], [1], [0, 0, 1, 1], [], []>} : vector<32x1152xbf16>, vector<1152x256xbf16>, vector<32x256xf32> -> vector<32x256xf32>
    %cst_3 = arith.constant dense<0.000000e+00> : vector<256xf32>
    %3 = vector.multi_reduction <add>, %2, %cst_3 [0] : vector<32x256xf32> to vector<256xf32>
    %4 = vector.shape_cast %3 : vector<256xf32> to vector<1x256xf32>
    %cst_4 = arith.constant 3.125000e-02 : f32
    %5 = vector.broadcast %cst_4 : f32 to vector<1x256xf32>
    %6 = arith.mulf %4, %5 : vector<1x256xf32>
    %7 = arith.mulf %2, %2 : vector<32x256xf32>
    %cst_5 = arith.constant dense<0.000000e+00> : vector<256xf32>
    %8 = vector.multi_reduction <add>, %7, %cst_5 [0] : vector<32x256xf32> to vector<256xf32>
    %9 = vector.shape_cast %8 : vector<256xf32> to vector<1x256xf32>
    %cst_6 = arith.constant 3.125000e-02 : f32
    %10 = vector.broadcast %cst_6 : f32 to vector<1x256xf32>
    %11 = arith.mulf %9, %10 : vector<1x256xf32>
    %12 = arith.mulf %6, %6 : vector<1x256xf32>
    %13 = arith.subf %11, %12 : vector<1x256xf32>
    %cst_7 = arith.constant 0.000000e+00 : f32
    %14 = vector.broadcast %cst_7 : f32 to vector<1x256xf32>
    %15 = arith.maximumf %13, %14 : vector<1x256xf32>
    %16 = vector.broadcast %6 : vector<1x256xf32> to vector<32x256xf32>
    %17 = arith.subf %2, %16 : vector<32x256xf32>
    %cst_8 = arith.constant 9.99999974E-6 : f32
    %18 = vector.broadcast %cst_8 : f32 to vector<1x256xf32>
    %19 = arith.addf %15, %18 : vector<1x256xf32>
    %20 = math.rsqrt %19 : vector<1x256xf32>
    %21 = vector.broadcast %20 : vector<1x256xf32> to vector<32x256xf32>
    %22 = arith.mulf %17, %21 : vector<32x256xf32>
    %c0_9 = arith.constant 0 : index
    %c0_10 = arith.constant 0 : index
    %23 = vector.load %arg3[%c0_9, %c0_10] : memref<1x256xf32, #tpu.memory_space<vmem>>, vector<1x256xf32>
    %24 = vector.broadcast %23 : vector<1x256xf32> to vector<32x256xf32>
    %25 = arith.mulf %22, %24 : vector<32x256xf32>
    %c0_11 = arith.constant 0 : index
    %c0_12 = arith.constant 0 : index
    %26 = vector.load %arg4[%c0_11, %c0_12] : memref<1x256xf32, #tpu.memory_space<vmem>>, vector<1x256xf32>
    %27 = vector.broadcast %26 : vector<1x256xf32> to vector<32x256xf32>
    %28 = arith.addf %25, %27 : vector<32x256xf32>
    %cst_13 = arith.constant 0.000000e+00 : f32
    %29 = vector.broadcast %cst_13 : f32 to vector<32x256xf32>
    %30 = arith.maximumf %28, %29 : vector<32x256xf32>
    %cst_14 = arith.constant 6.000000e+00 : f32
    %31 = vector.broadcast %cst_14 : f32 to vector<32x256xf32>
    %32 = arith.minimumf %30, %31 : vector<32x256xf32>
    %c0_15 = arith.constant 0 : index
    %c0_16 = arith.constant 0 : index
    %33 = vector.load %arg5[%c0_15, %c0_16] : memref<32x256xf32, #tpu.memory_space<vmem>>, vector<32x256xf32>
    tpu.vector_store %arg5[%c0_15, %c0_16], %32 {strides = array<i32>} : memref<32x256xf32, #tpu.memory_space<vmem>>, vector<32x256xf32>,
    return
  }
  func.func @transform_0(%arg0: i32) -> (i32, i32) {
    %c0_i32 = arith.constant 0 : i32
    %c0_i32_0 = arith.constant 0 : i32
    %c0_i32_1 = arith.constant 0 : i32
    return %c0_i32, %c0_i32_0 : i32, i32
  }
  func.func @transform_1(%arg0: i32) -> (i32, i32) {
    %c0_i32 = arith.constant 0 : i32
    %c0_i32_0 = arith.constant 0 : i32
    %c0_i32_1 = arith.constant 0 : i32
    return %c0_i32, %c0_i32_0 : i32, i32
  }
  func.func @transform_2(%arg0: i32) -> (i32, i32) {
    %c0_i32 = arith.constant 0 : i32
    %c0_i32_0 = arith.constant 0 : i32
    %c0_i32_1 = arith.constant 0 : i32
    return %c0_i32, %c0_i32_0 : i32, i32
  }
  func.func @transform_3(%arg0: i32) -> (i32, i32) {
    %c0_i32 = arith.constant 0 : i32
    %c0_i32_0 = arith.constant 0 : i32
    %c0_i32_1 = arith.constant 0 : i32
    return %c0_i32, %c0_i32_0 : i32, i32
  }
  func.func @transform_4(%arg0: i32) -> (i32, i32) {
    %c0_i32 = arith.constant 0 : i32
    %c0_i32_0 = arith.constant 0 : i32
    %c0_i32_1 = arith.constant 0 : i32
    return %c0_i32, %c0_i32_0 : i32, i32
  }
}

module attributes {stable_mosaic.version = 11 : i64} {
  func.func @_matmul_bn_relu6_kernel(%arg0: i32, %arg1: memref<8x4096xbf16, #tpu.memory_space<vmem>>, %arg2: memref<4096x512xbf16, #tpu.memory_space<vmem>>, %arg3: memref<1x512xf32, #tpu.memory_space<vmem>>, %arg4: memref<1x512xf32, #tpu.memory_space<vmem>>, %arg5: memref<8x512xf32, #tpu.memory_space<vmem>>) attributes {dimension_semantics = [#tpu.dimension_semantics<arbitrary>], iteration_bounds = array<i64: 1>, scalar_prefetch = 0 : i64, scratch_operands = 0 : i64, tpu.core_type = #tpu.core_type<tc>, window_params = [{pipeline_mode = #tpu.pipeline_mode<synchronous>, transform_indices = @transform_0, window_bounds = array<i64: 8, 4096>}, {pipeline_mode = #tpu.pipeline_mode<synchronous>, transform_indices = @transform_1, window_bounds = array<i64: 4096, 512>}, {pipeline_mode = #tpu.pipeline_mode<synchronous>, transform_indices = @transform_2, window_bounds = array<i64: 1, 512>}, {pipeline_mode = #tpu.pipeline_mode<synchronous>, transform_indices = @transform_3, window_bounds = array<i64: 1, 512>}, {pipeline_mode = #tpu.pipeline_mode<synchronous>, transform_indices = @transform_4, window_bounds = array<i64: 8, 512>}]} {
    %c0 = arith.constant 0 : index
    %c0_0 = arith.constant 0 : index
    %0 = vector.load %arg1[%c0, %c0_0] : memref<8x4096xbf16, #tpu.memory_space<vmem>>, vector<8x4096xbf16>
    %c0_1 = arith.constant 0 : index
    %c0_2 = arith.constant 0 : index
    %1 = vector.load %arg2[%c0_1, %c0_2] : memref<4096x512xbf16, #tpu.memory_space<vmem>>, vector<4096x512xbf16>
    %cst = arith.constant dense<0.000000e+00> : vector<8x512xf32>
    %2 = tpu.matmul %0, %1, %cst {dimension_numbers = #tpu.dot_dimension_numbers<[1], [0], [0], [1], [0, 0, 1, 1], [], []>} : vector<8x4096xbf16>, vector<4096x512xbf16>, vector<8x512xf32> -> vector<8x512xf32>
    %cst_3 = arith.constant dense<0.000000e+00> : vector<512xf32>
    %3 = vector.multi_reduction <add>, %2, %cst_3 [0] : vector<8x512xf32> to vector<512xf32>
    %4 = vector.shape_cast %3 : vector<512xf32> to vector<1x512xf32>
    %cst_4 = arith.constant 1.250000e-01 : f32
    %5 = vector.broadcast %cst_4 : f32 to vector<1x512xf32>
    %6 = arith.mulf %4, %5 : vector<1x512xf32>
    %7 = arith.mulf %2, %2 : vector<8x512xf32>
    %cst_5 = arith.constant dense<0.000000e+00> : vector<512xf32>
    %8 = vector.multi_reduction <add>, %7, %cst_5 [0] : vector<8x512xf32> to vector<512xf32>
    %9 = vector.shape_cast %8 : vector<512xf32> to vector<1x512xf32>
    %cst_6 = arith.constant 1.250000e-01 : f32
    %10 = vector.broadcast %cst_6 : f32 to vector<1x512xf32>
    %11 = arith.mulf %9, %10 : vector<1x512xf32>
    %12 = arith.mulf %6, %6 : vector<1x512xf32>
    %13 = arith.subf %11, %12 : vector<1x512xf32>
    %cst_7 = arith.constant 0.000000e+00 : f32
    %14 = vector.broadcast %cst_7 : f32 to vector<1x512xf32>
    %15 = arith.maximumf %13, %14 : vector<1x512xf32>
    %16 = vector.broadcast %6 : vector<1x512xf32> to vector<8x512xf32>
    %17 = arith.subf %2, %16 : vector<8x512xf32>
    %cst_8 = arith.constant 9.99999974E-6 : f32
    %18 = vector.broadcast %cst_8 : f32 to vector<1x512xf32>
    %19 = arith.addf %15, %18 : vector<1x512xf32>
    %20 = math.rsqrt %19 : vector<1x512xf32>
    %21 = vector.broadcast %20 : vector<1x512xf32> to vector<8x512xf32>
    %22 = arith.mulf %17, %21 : vector<8x512xf32>
    %c0_9 = arith.constant 0 : index
    %c0_10 = arith.constant 0 : index
    %23 = vector.load %arg3[%c0_9, %c0_10] : memref<1x512xf32, #tpu.memory_space<vmem>>, vector<1x512xf32>
    %24 = vector.broadcast %23 : vector<1x512xf32> to vector<8x512xf32>
    %25 = arith.mulf %22, %24 : vector<8x512xf32>
    %c0_11 = arith.constant 0 : index
    %c0_12 = arith.constant 0 : index
    %26 = vector.load %arg4[%c0_11, %c0_12] : memref<1x512xf32, #tpu.memory_space<vmem>>, vector<1x512xf32>
    %27 = vector.broadcast %26 : vector<1x512xf32> to vector<8x512xf32>
    %28 = arith.addf %25, %27 : vector<8x512xf32>
    %cst_13 = arith.constant 0.000000e+00 : f32
    %29 = vector.broadcast %cst_13 : f32 to vector<8x512xf32>
    %30 = arith.maximumf %28, %29 : vector<8x512xf32>
    %cst_14 = arith.constant 6.000000e+00 : f32
    %31 = vector.broadcast %cst_14 : f32 to vector<8x512xf32>
    %32 = arith.minimumf %30, %31 : vector<8x512xf32>
    %c0_15 = arith.constant 0 : index
    %c0_16 = arith.constant 0 : index
    %33 = vector.load %arg5[%c0_15, %c0_16] : memref<8x512xf32, #tpu.memory_space<vmem>>, vector<8x512xf32>
    tpu.vector_store %arg5[%c0_15, %c0_16], %32 {strides = array<i32>} : memref<8x512xf32, #tpu.memory_space<vmem>>, vector<8x512xf32>,
    return
  }
  func.func @transform_0(%arg0: i32) -> (i32, i32) {
    %c0_i32 = arith.constant 0 : i32
    %c0_i32_0 = arith.constant 0 : i32
    %c0_i32_1 = arith.constant 0 : i32
    return %c0_i32, %c0_i32_0 : i32, i32
  }
  func.func @transform_1(%arg0: i32) -> (i32, i32) {
    %c0_i32 = arith.constant 0 : i32
    %c0_i32_0 = arith.constant 0 : i32
    %c0_i32_1 = arith.constant 0 : i32
    return %c0_i32, %c0_i32_0 : i32, i32
  }
  func.func @transform_2(%arg0: i32) -> (i32, i32) {
    %c0_i32 = arith.constant 0 : i32
    %c0_i32_0 = arith.constant 0 : i32
    %c0_i32_1 = arith.constant 0 : i32
    return %c0_i32, %c0_i32_0 : i32, i32
  }
  func.func @transform_3(%arg0: i32) -> (i32, i32) {
    %c0_i32 = arith.constant 0 : i32
    %c0_i32_0 = arith.constant 0 : i32
    %c0_i32_1 = arith.constant 0 : i32
    return %c0_i32, %c0_i32_0 : i32, i32
  }
  func.func @transform_4(%arg0: i32) -> (i32, i32) {
    %c0_i32 = arith.constant 0 : i32
    %c0_i32_0 = arith.constant 0 : i32
    %c0_i32_1 = arith.constant 0 : i32
    return %c0_i32, %c0_i32_0 : i32, i32
  }
}

module attributes {stable_mosaic.version = 11 : i64} {
  func.func @_matmul_act_kernel(%arg0: i32, %arg1: memref<8x2048xbf16, #tpu.memory_space<vmem>>, %arg2: memref<2048x1xbf16, #tpu.memory_space<vmem>>, %arg3: memref<8x1xf32, #tpu.memory_space<vmem>>) attributes {dimension_semantics = [#tpu.dimension_semantics<arbitrary>], iteration_bounds = array<i64: 1>, scalar_prefetch = 0 : i64, scratch_operands = 0 : i64, tpu.core_type = #tpu.core_type<tc>, window_params = [{pipeline_mode = #tpu.pipeline_mode<synchronous>, transform_indices = @transform_0, window_bounds = array<i64: 8, 2048>}, {pipeline_mode = #tpu.pipeline_mode<synchronous>, transform_indices = @transform_1, window_bounds = array<i64: 2048, 1>}, {pipeline_mode = #tpu.pipeline_mode<synchronous>, transform_indices = @transform_2, window_bounds = array<i64: 8, 1>}]} {
    %c0 = arith.constant 0 : index
    %c0_0 = arith.constant 0 : index
    %0 = vector.load %arg1[%c0, %c0_0] : memref<8x2048xbf16, #tpu.memory_space<vmem>>, vector<8x2048xbf16>
    %c0_1 = arith.constant 0 : index
    %c0_2 = arith.constant 0 : index
    %1 = vector.load %arg2[%c0_1, %c0_2] : memref<2048x1xbf16, #tpu.memory_space<vmem>>, vector<2048x1xbf16>
    %cst = arith.constant dense<0.000000e+00> : vector<8x1xf32>
    %2 = tpu.matmul %0, %1, %cst {dimension_numbers = #tpu.dot_dimension_numbers<[1], [0], [0], [1], [0, 0, 1, 1], [], []>} : vector<8x2048xbf16>, vector<2048x1xbf16>, vector<8x1xf32> -> vector<8x1xf32>
    %3 = arith.negf %2 : vector<8x1xf32>
    %4 = math.exp %3 : vector<8x1xf32>
    %cst_3 = arith.constant 1.000000e+00 : f32
    %5 = vector.broadcast %cst_3 : f32 to vector<8x1xf32>
    %6 = arith.addf %5, %4 : vector<8x1xf32>
    %7 = arith.divf %5, %6 : vector<8x1xf32>
    %c0_4 = arith.constant 0 : index
    %c0_5 = arith.constant 0 : index
    %8 = vector.load %arg3[%c0_4, %c0_5] : memref<8x1xf32, #tpu.memory_space<vmem>>, vector<8x1xf32>
    tpu.vector_store %arg3[%c0_4, %c0_5], %7 {strides = array<i32>} : memref<8x1xf32, #tpu.memory_space<vmem>>, vector<8x1xf32>,
    return
  }
  func.func @transform_0(%arg0: i32) -> (i32, i32) {
    %c0_i32 = arith.constant 0 : i32
    %c0_i32_0 = arith.constant 0 : i32
    %c0_i32_1 = arith.constant 0 : i32
    return %c0_i32, %c0_i32_0 : i32, i32
  }
  func.func @transform_1(%arg0: i32) -> (i32, i32) {
    %c0_i32 = arith.constant 0 : i32
    %c0_i32_0 = arith.constant 0 : i32
    %c0_i32_1 = arith.constant 0 : i32
    return %c0_i32, %c0_i32_0 : i32, i32
  }
  func.func @transform_2(%arg0: i32) -> (i32, i32) {
    %c0_i32 = arith.constant 0 : i32
    %c0_i32_0 = arith.constant 0 : i32
    %c0_i32_1 = arith.constant 0 : i32
    return %c0_i32, %c0_i32_0 : i32, i32
  }
}

</mosaic_0001>

<bundles_post_ra>
// kernel: _discriminator_forward.5
= control target key start
LH: loop header
LB: loop body
LE: loop exit
PB: predicated region body
PF: predicated region fallthrough
CT: control target
= control target key end

     0   :  { %7 = vsyncpa [#allocation3], 0  ;;  %s953_s12 = smov [#allocation2]   ;;  %s954_s14 = smov 64   ;;  %s1358_s0 = inlined_call_operand.vmem [shape: bf16[512,16], index: 0, kind: input, shape index: {}]   ;;  %s1359_s1 = inlined_call_operand.hbm [shape: bf16[16,64], index: 1, kind: input, shape index: {}]   ;;  %s1360_s2 = inlined_call_operand.vmem [shape: f32[512,64], index: 2, kind: output, shape index: {}]  }
   0x1   :  { %s14_s11 = sshll.u32 %s1359_s1, 4  ;;  %s16_s13 = sshll.u32 %s953_s12, 4  ;;  %s15_s11 = int_to_ptr.hbm [resolvable:$true] %s14_s11  ;;  %s17_s13 = int_to_ptr.vmem [resolvable:$true] %s16_s13 }
   0x2   :  { %s955_s15 = smov 4  }
   0x3   :  { %22 = dma.hbm_to_vmem [thread:$0]  %s15_s11, 128, %s17_s13, [#allocation3], %s954_s14, %s954_s14, %s955_s15  }
   0x4   :  { %951 = dma.done.wait [#allocation3], 128  }
   0x5   :  { %952 = vsyncadd [#allocation3], 4294967168  ;;  %v920_v0 = vld [vmem:[#allocation2] sm:$0xff]  ;;  %vm260_vm0 = vcmask 130048   ;;  %v889_v5 = vld [vmem:[%s1358_s0 + $0x8] sm:$0xff]  ;;  %vm654_vm1 = vcmask 523264  }
   0x6   :  { %v888_v1 = vld [vmem:[%s1358_s0] sm:$0xff]  ;;  %364 = vmatpush.bf16.msra.mxu0 %v920_v0  ;;  %921 = vmatpush.bf16.msra.mxu1 %v920_v0  ;;  %v897_v6 = vld [vmem:[%s1358_s0 + $0x48] sm:$0xff]  ;;  %v890_v9 = vld [vmem:[%s1358_s0 + $0x10] sm:$0xff] }
   0x7   :  { %v896_v2 = vld [vmem:[%s1358_s0 + $0x40] sm:$0xff]  ;;  %922 = vmatpush.bf16.msra.mxu2 %v920_v0  ;;  %923 = vmatpush.bf16.msra.mxu3 %v920_v0  ;;  %v905_v7 = vld [vmem:[%s1358_s0 + $0x88] sm:$0xff]  ;;  %v898_v10 = vld [vmem:[%s1358_s0 + $0x50] sm:$0xff] }
   0x8   :  { %v904_v3 = vld [vmem:[%s1358_s0 + $0x80] sm:$0xff]  ;;  %v913_v8 = vld [vmem:[%s1358_s0 + $0xc8] sm:$0xff]  ;;  %v906_v11 = vld [vmem:[%s1358_s0 + $0x90] sm:$0xff] }
   0x9   :  { %v912_v4 = vld [vmem:[%s1358_s0 + $0xc0] sm:$0xff]  ;;  %856 = vmatmul.msk.bf16.vlgmr.msra.gmra.mxu0 %vm260_vm0, %v888_v1  ;;  %864 = vmatmul.msk.bf16.vlgmr.msra.gmra.mxu1 %vm260_vm0, %v896_v2  ;;  %v914_v12 = vld [vmem:[%s1358_s0 + $0xd0] sm:$0xff]  ;;  %v891_v13 = vld [vmem:[%s1358_s0 + $0x18] sm:$0xff] }
   0xa   :  { %872 = vmatmul.msk.bf16.vlgmr.msra.gmra.mxu2 %vm260_vm0, %v904_v3  ;;  %880 = vmatmul.msk.bf16.vlgmr.msra.gmra.mxu3 %vm260_vm0, %v912_v4  ;;  %v899_v14 = vld [vmem:[%s1358_s0 + $0x58] sm:$0xff]  ;;  %v892_v17 = vld [vmem:[%s1358_s0 + $0x20] sm:$0xff]  ;;  %v893_v21 = vld [vmem:[%s1358_s0 + $0x28] sm:$0xff] }
   0xb   :  { %v907_v15 = vld [vmem:[%s1358_s0 + $0x98] sm:$0xff]  ;;  %v900_v18 = vld [vmem:[%s1358_s0 + $0x60] sm:$0xff]  ;;  %v901_v22 = vld [vmem:[%s1358_s0 + $0x68] sm:$0xff] }
   0xc   :  { %v915_v16 = vld [vmem:[%s1358_s0 + $0xd8] sm:$0xff]  ;;  %v908_v19 = vld [vmem:[%s1358_s0 + $0xa0] sm:$0xff]  ;;  %v909_v23 = vld [vmem:[%s1358_s0 + $0xa8] sm:$0xff] }
   0xd   :  { %v916_v20 = vld [vmem:[%s1358_s0 + $0xe0] sm:$0xff]  ;;  %v917_v24 = vld [vmem:[%s1358_s0 + $0xe8] sm:$0xff]  ;;  %v894_v25 = vld [vmem:[%s1358_s0 + $0x30] sm:$0xff] }
   0xe   :  { %v902_v26 = vld [vmem:[%s1358_s0 + $0x70] sm:$0xff]  ;;  %v895_v29 = vld [vmem:[%s1358_s0 + $0x38] sm:$0xff] }
   0xf   :  { %v910_v27 = vld [vmem:[%s1358_s0 + $0xb0] sm:$0xff]  ;;  %v903_v30 = vld [vmem:[%s1358_s0 + $0x78] sm:$0xff] }
  0x10   :  { %v918_v28 = vld [vmem:[%s1358_s0 + $0xf0] sm:$0xff]  ;;  %v911_v31 = vld [vmem:[%s1358_s0 + $0xb8] sm:$0xff] }
  0x11   :  { %v919_v32 = vld [vmem:[%s1358_s0 + $0xf8] sm:$0xff] }
  0x19   :  { %857 = vmatmul.msk.bf16.gmra.mxu0 %vm260_vm0, %v889_v5  ;;  %865 = vmatmul.msk.bf16.gmra.mxu1 %vm260_vm0, %v897_v6 }
  0x1a   :  { %873 = vmatmul.msk.bf16.gmra.mxu2 %vm260_vm0, %v905_v7  ;;  %881 = vmatmul.msk.bf16.gmra.mxu3 %vm260_vm0, %v913_v8 }
  0x29   :  { %858 = vmatmul.msk.bf16.gmra.mxu0 %vm260_vm0, %v890_v9  ;;  %866 = vmatmul.msk.bf16.gmra.mxu1 %vm260_vm0, %v898_v10 }
  0x2a   :  { %874 = vmatmul.msk.bf16.gmra.mxu2 %vm260_vm0, %v906_v11  ;;  %882 = vmatmul.msk.bf16.gmra.mxu3 %vm260_vm0, %v914_v12 }
  0x39   :  { %859 = vmatmul.msk.bf16.gmra.mxu0 %vm260_vm0, %v891_v13  ;;  %867 = vmatmul.msk.bf16.gmra.mxu1 %vm260_vm0, %v899_v14 }
  0x3a   :  { %875 = vmatmul.msk.bf16.gmra.mxu2 %vm260_vm0, %v907_v15  ;;  %883 = vmatmul.msk.bf16.gmra.mxu3 %vm260_vm0, %v915_v16 }
  0x49   :  { %860 = vmatmul.msk.bf16.gmra.mxu0 %vm260_vm0, %v892_v17  ;;  %868 = vmatmul.msk.bf16.gmra.mxu1 %vm260_vm0, %v900_v18 }
  0x4a   :  { %876 = vmatmul.msk.bf16.gmra.mxu2 %vm260_vm0, %v908_v19  ;;  %884 = vmatmul.msk.bf16.gmra.mxu3 %vm260_vm0, %v916_v20 }
  0x59   :  { %861 = vmatmul.msk.bf16.gmra.mxu0 %vm260_vm0, %v893_v21  ;;  %869 = vmatmul.msk.bf16.gmra.mxu1 %vm260_vm0, %v901_v22 }
  0x5a   :  { %877 = vmatmul.msk.bf16.gmra.mxu2 %vm260_vm0, %v909_v23  ;;  %885 = vmatmul.msk.bf16.gmra.mxu3 %vm260_vm0, %v917_v24 }
  0x69   :  { %862 = vmatmul.msk.bf16.gmra.mxu0 %vm260_vm0, %v894_v25  ;;  %870 = vmatmul.msk.bf16.gmra.mxu1 %vm260_vm0, %v902_v26 }
  0x6a   :  { %878 = vmatmul.msk.bf16.gmra.mxu2 %vm260_vm0, %v910_v27  ;;  %886 = vmatmul.msk.bf16.gmra.mxu3 %vm260_vm0, %v918_v28 }
  0x79   :  { %863 = vmatmul.msk.bf16.gmra.mxu0 %vm260_vm0, %v895_v29  ;;  %871 = vmatmul.msk.bf16.gmra.mxu1 %vm260_vm0, %v903_v30 }
  0x7a   :  { %879 = vmatmul.msk.bf16.gmra.mxu2 %vm260_vm0, %v911_v31  ;;  %887 = vmatmul.msk.bf16.gmra.mxu3 %vm260_vm0, %v919_v32 }
  0x86   :  { %v366_v33 = vpop.f32.mrf.mxu0  ;;  %v406_v34 = vpop.f32.mrf.mxu1 }
  0x87   :  { %v526_v35 = vmax.f32 %v366_v33, 0.0  ;;  %v542_v36 = vmax.f32 %v406_v34, 0.0 }
  0x89   :  { %v590_v37 = vmin.f32 %v526_v35, 6.0  ;;  %v606_v38 = vmin.f32 %v542_v36, 6.0 }
  0x8b   :  { %655 = vst.msk [vmem:[%s1360_s2] sm:$0xff] %vm654_vm1, %v590_v37 }
  0x8c   :  { %671 = vst.msk [vmem:[%s1360_s2 + $0x80] sm:$0xff] %vm654_vm1, %v606_v38 }
  0x8d   :  { %v446_v39 = vpop.f32.mrf.mxu2  ;;  %v486_v40 = vpop.f32.mrf.mxu3 }
  0x8e   :  { %v558_v41 = vmax.f32 %v446_v39, 0.0  ;;  %v574_v42 = vmax.f32 %v486_v40, 0.0  ;;  %v368_v43 = vpop.f32.mrf.mxu0  ;;  %v408_v44 = vpop.f32.mrf.mxu1 }
  0x8f   :  { %v527_v45 = vmax.f32 %v368_v43, 0.0  ;;  %v543_v46 = vmax.f32 %v408_v44, 0.0 }
  0x90   :  { %v622_v47 = vmin.f32 %v558_v41, 6.0  ;;  %v638_v48 = vmin.f32 %v574_v42, 6.0 }
  0x91   :  { %v591_v49 = vmin.f32 %v527_v45, 6.0  ;;  %v607_v50 = vmin.f32 %v543_v46, 6.0 }
  0x92   :  { %687 = vst.msk [vmem:[%s1360_s2 + $0x100] sm:$0xff] %vm654_vm1, %v622_v47 }
  0x93   :  { %703 = vst.msk [vmem:[%s1360_s2 + $0x180] sm:$0xff] %vm654_vm1, %v638_v48 }
  0x94   :  { %656 = vst.msk [vmem:[%s1360_s2 + $0x8] sm:$0xff] %vm654_vm1, %v591_v49 }
  0x95   :  { %672 = vst.msk [vmem:[%s1360_s2 + $0x88] sm:$0xff] %vm654_vm1, %v607_v50  ;;  %v448_v51 = vpop.f32.mrf.mxu2  ;;  %v488_v52 = vpop.f32.mrf.mxu3 }
  0x96   :  { %v559_v53 = vmax.f32 %v448_v51, 0.0  ;;  %v575_v54 = vmax.f32 %v488_v52, 0.0  ;;  %v371_v55 = vpop.f32.mrf.mxu0  ;;  %v411_v56 = vpop.f32.mrf.mxu1 }
  0x97   :  { %v528_v57 = vmax.f32 %v371_v55, 0.0  ;;  %v544_v58 = vmax.f32 %v411_v56, 0.0 }
  0x98   :  { %v623_v59 = vmin.f32 %v559_v53, 6.0  ;;  %v639_v60 = vmin.f32 %v575_v54, 6.0 }
  0x99   :  { %v592_v61 = vmin.f32 %v528_v57, 6.0  ;;  %v608_v62 = vmin.f32 %v544_v58, 6.0 }
  0x9a   :  { %688 = vst.msk [vmem:[%s1360_s2 + $0x108] sm:$0xff] %vm654_vm1, %v623_v59 }
  0x9b   :  { %704 = vst.msk [vmem:[%s1360_s2 + $0x188] sm:$0xff] %vm654_vm1, %v639_v60 }
  0x9c   :  { %657 = vst.msk [vmem:[%s1360_s2 + $0x10] sm:$0xff] %vm654_vm1, %v592_v61 }
  0x9d   :  { %673 = vst.msk [vmem:[%s1360_s2 + $0x90] sm:$0xff] %vm654_vm1, %v608_v62  ;;  %v451_v63 = vpop.f32.mrf.mxu2  ;;  %v491_v0 = vpop.f32.mrf.mxu3 }
  0x9e   :  { %v560_v1 = vmax.f32 %v451_v63, 0.0  ;;  %v576_v2 = vmax.f32 %v491_v0, 0.0  ;;  %v373_v3 = vpop.f32.mrf.mxu0  ;;  %v413_v4 = vpop.f32.mrf.mxu1 }
  0x9f   :  { %v529_v5 = vmax.f32 %v373_v3, 0.0  ;;  %v545_v6 = vmax.f32 %v413_v4, 0.0 }
  0xa0   :  { %v624_v7 = vmin.f32 %v560_v1, 6.0  ;;  %v640_v8 = vmin.f32 %v576_v2, 6.0 }
  0xa1   :  { %v593_v9 = vmin.f32 %v529_v5, 6.0  ;;  %v609_v10 = vmin.f32 %v545_v6, 6.0 }
  0xa2   :  { %689 = vst.msk [vmem:[%s1360_s2 + $0x110] sm:$0xff] %vm654_vm1, %v624_v7 }
  0xa3   :  { %705 = vst.msk [vmem:[%s1360_s2 + $0x190] sm:$0xff] %vm654_vm1, %v640_v8 }
  0xa4   :  { %658 = vst.msk [vmem:[%s1360_s2 + $0x18] sm:$0xff] %vm654_vm1, %v593_v9 }
  0xa5   :  { %674 = vst.msk [vmem:[%s1360_s2 + $0x98] sm:$0xff] %vm654_vm1, %v609_v10  ;;  %v453_v11 = vpop.f32.mrf.mxu2  ;;  %v493_v12 = vpop.f32.mrf.mxu3 }
  0xa6   :  { %v561_v13 = vmax.f32 %v453_v11, 0.0  ;;  %v577_v14 = vmax.f32 %v493_v12, 0.0  ;;  %v376_v15 = vpop.f32.mrf.mxu0  ;;  %v416_v16 = vpop.f32.mrf.mxu1 }
  0xa7   :  { %v530_v17 = vmax.f32 %v376_v15, 0.0  ;;  %v546_v18 = vmax.f32 %v416_v16, 0.0 }
  0xa8   :  { %v625_v19 = vmin.f32 %v561_v13, 6.0  ;;  %v641_v20 = vmin.f32 %v577_v14, 6.0 }
  0xa9   :  { %v594_v21 = vmin.f32 %v530_v17, 6.0  ;;  %v610_v22 = vmin.f32 %v546_v18, 6.0 }
  0xaa   :  { %690 = vst.msk [vmem:[%s1360_s2 + $0x118] sm:$0xff] %vm654_vm1, %v625_v19 }
  0xab   :  { %706 = vst.msk [vmem:[%s1360_s2 + $0x198] sm:$0xff] %vm654_vm1, %v641_v20 }
  0xac   :  { %659 = vst.msk [vmem:[%s1360_s2 + $0x20] sm:$0xff] %vm654_vm1, %v594_v21 }
  0xad   :  { %675 = vst.msk [vmem:[%s1360_s2 + $0xa0] sm:$0xff] %vm654_vm1, %v610_v22  ;;  %v456_v23 = vpop.f32.mrf.mxu2  ;;  %v496_v24 = vpop.f32.mrf.mxu3 }
  0xae   :  { %v562_v25 = vmax.f32 %v456_v23, 0.0  ;;  %v578_v26 = vmax.f32 %v496_v24, 0.0  ;;  %v378_v27 = vpop.f32.mrf.mxu0  ;;  %v418_v28 = vpop.f32.mrf.mxu1 }
  0xaf   :  { %v531_v29 = vmax.f32 %v378_v27, 0.0  ;;  %v547_v30 = vmax.f32 %v418_v28, 0.0 }
  0xb0   :  { %v626_v31 = vmin.f32 %v562_v25, 6.0  ;;  %v642_v32 = vmin.f32 %v578_v26, 6.0 }
  0xb1   :  { %v595_v33 = vmin.f32 %v531_v29, 6.0  ;;  %v611_v34 = vmin.f32 %v547_v30, 6.0 }
  0xb2   :  { %691 = vst.msk [vmem:[%s1360_s2 + $0x120] sm:$0xff] %vm654_vm1, %v626_v31 }
  0xb3   :  { %707 = vst.msk [vmem:[%s1360_s2 + $0x1a0] sm:$0xff] %vm654_vm1, %v642_v32 }
  0xb4   :  { %660 = vst.msk [vmem:[%s1360_s2 + $0x28] sm:$0xff] %vm654_vm1, %v595_v33 }
  0xb5   :  { %676 = vst.msk [vmem:[%s1360_s2 + $0xa8] sm:$0xff] %vm654_vm1, %v611_v34  ;;  %v458_v35 = vpop.f32.mrf.mxu2  ;;  %v498_v36 = vpop.f32.mrf.mxu3 }
  0xb6   :  { %v563_v37 = vmax.f32 %v458_v35, 0.0  ;;  %v579_v38 = vmax.f32 %v498_v36, 0.0  ;;  %v381_v39 = vpop.f32.mrf.mxu0  ;;  %v421_v40 = vpop.f32.mrf.mxu1 }
  0xb7   :  { %v532_v41 = vmax.f32 %v381_v39, 0.0  ;;  %v548_v42 = vmax.f32 %v421_v40, 0.0 }
  0xb8   :  { %v627_v43 = vmin.f32 %v563_v37, 6.0  ;;  %v643_v44 = vmin.f32 %v579_v38, 6.0 }
  0xb9   :  { %v596_v45 = vmin.f32 %v532_v41, 6.0  ;;  %v612_v46 = vmin.f32 %v548_v42, 6.0 }
  0xba   :  { %692 = vst.msk [vmem:[%s1360_s2 + $0x128] sm:$0xff] %vm654_vm1, %v627_v43 }
  0xbb   :  { %708 = vst.msk [vmem:[%s1360_s2 + $0x1a8] sm:$0xff] %vm654_vm1, %v643_v44 }
  0xbc   :  { %661 = vst.msk [vmem:[%s1360_s2 + $0x30] sm:$0xff] %vm654_vm1, %v596_v45 }
  0xbd   :  { %677 = vst.msk [vmem:[%s1360_s2 + $0xb0] sm:$0xff] %vm654_vm1, %v612_v46  ;;  %v461_v47 = vpop.f32.mrf.mxu2  ;;  %v501_v48 = vpop.f32.mrf.mxu3 }
  0xbe   :  { %v564_v49 = vmax.f32 %v461_v47, 0.0  ;;  %v580_v50 = vmax.f32 %v501_v48, 0.0  ;;  %v383_v51 = vpop.f32.mrf.mxu0  ;;  %v423_v52 = vpop.f32.mrf.mxu1 }
  0xbf   :  { %v533_v53 = vmax.f32 %v383_v51, 0.0  ;;  %v549_v54 = vmax.f32 %v423_v52, 0.0 }
  0xc0   :  { %v628_v55 = vmin.f32 %v564_v49, 6.0  ;;  %v644_v56 = vmin.f32 %v580_v50, 6.0 }
  0xc1   :  { %v597_v57 = vmin.f32 %v533_v53, 6.0  ;;  %v613_v58 = vmin.f32 %v549_v54, 6.0 }
  0xc2   :  { %693 = vst.msk [vmem:[%s1360_s2 + $0x130] sm:$0xff] %vm654_vm1, %v628_v55 }
  0xc3   :  { %709 = vst.msk [vmem:[%s1360_s2 + $0x1b0] sm:$0xff] %vm654_vm1, %v644_v56 }
  0xc4   :  { %662 = vst.msk [vmem:[%s1360_s2 + $0x38] sm:$0xff] %vm654_vm1, %v597_v57 }
  0xc5   :  { %678 = vst.msk [vmem:[%s1360_s2 + $0xb8] sm:$0xff] %vm654_vm1, %v613_v58  ;;  %v463_v59 = vpop.f32.mrf.mxu2  ;;  %v503_v60 = vpop.f32.mrf.mxu3 }
  0xc6   :  { %v565_v61 = vmax.f32 %v463_v59, 0.0  ;;  %v581_v62 = vmax.f32 %v503_v60, 0.0  ;;  %v386_v63 = vpop.f32.mrf.mxu0  ;;  %v426_v0 = vpop.f32.mrf.mxu1 }
  0xc7   :  { %v534_v1 = vmax.f32 %v386_v63, 0.0  ;;  %v550_v2 = vmax.f32 %v426_v0, 0.0 }
  0xc8   :  { %v629_v3 = vmin.f32 %v565_v61, 6.0  ;;  %v645_v4 = vmin.f32 %v581_v62, 6.0 }
  0xc9   :  { %v598_v5 = vmin.f32 %v534_v1, 6.0  ;;  %v614_v6 = vmin.f32 %v550_v2, 6.0 }
  0xca   :  { %694 = vst.msk [vmem:[%s1360_s2 + $0x138] sm:$0xff] %vm654_vm1, %v629_v3 }
  0xcb   :  { %710 = vst.msk [vmem:[%s1360_s2 + $0x1b8] sm:$0xff] %vm654_vm1, %v645_v4 }
  0xcc   :  { %663 = vst.msk [vmem:[%s1360_s2 + $0x40] sm:$0xff] %vm654_vm1, %v598_v5 }
  0xcd   :  { %679 = vst.msk [vmem:[%s1360_s2 + $0xc0] sm:$0xff] %vm654_vm1, %v614_v6  ;;  %v466_v7 = vpop.f32.mrf.mxu2  ;;  %v506_v8 = vpop.f32.mrf.mxu3 }
  0xce   :  { %v566_v9 = vmax.f32 %v466_v7, 0.0  ;;  %v582_v10 = vmax.f32 %v506_v8, 0.0  ;;  %v388_v11 = vpop.f32.mrf.mxu0  ;;  %v428_v12 = vpop.f32.mrf.mxu1 }
  0xcf   :  { %v535_v13 = vmax.f32 %v388_v11, 0.0  ;;  %v551_v14 = vmax.f32 %v428_v12, 0.0 }
  0xd0   :  { %v630_v15 = vmin.f32 %v566_v9, 6.0  ;;  %v646_v16 = vmin.f32 %v582_v10, 6.0 }
  0xd1   :  { %v599_v17 = vmin.f32 %v535_v13, 6.0  ;;  %v615_v18 = vmin.f32 %v551_v14, 6.0 }
  0xd2   :  { %695 = vst.msk [vmem:[%s1360_s2 + $0x140] sm:$0xff] %vm654_vm1, %v630_v15 }
  0xd3   :  { %711 = vst.msk [vmem:[%s1360_s2 + $0x1c0] sm:$0xff] %vm654_vm1, %v646_v16 }
  0xd4   :  { %664 = vst.msk [vmem:[%s1360_s2 + $0x48] sm:$0xff] %vm654_vm1, %v599_v17 }
  0xd5   :  { %680 = vst.msk [vmem:[%s1360_s2 + $0xc8] sm:$0xff] %vm654_vm1, %v615_v18  ;;  %v468_v19 = vpop.f32.mrf.mxu2  ;;  %v508_v20 = vpop.f32.mrf.mxu3 }
  0xd6   :  { %v567_v21 = vmax.f32 %v468_v19, 0.0  ;;  %v583_v22 = vmax.f32 %v508_v20, 0.0  ;;  %v391_v23 = vpop.f32.mrf.mxu0  ;;  %v431_v24 = vpop.f32.mrf.mxu1 }
  0xd7   :  { %v536_v25 = vmax.f32 %v391_v23, 0.0  ;;  %v552_v26 = vmax.f32 %v431_v24, 0.0 }
  0xd8   :  { %v631_v27 = vmin.f32 %v567_v21, 6.0  ;;  %v647_v28 = vmin.f32 %v583_v22, 6.0 }
  0xd9   :  { %v600_v29 = vmin.f32 %v536_v25, 6.0  ;;  %v616_v30 = vmin.f32 %v552_v26, 6.0 }
  0xda   :  { %696 = vst.msk [vmem:[%s1360_s2 + $0x148] sm:$0xff] %vm654_vm1, %v631_v27 }
  0xdb   :  { %712 = vst.msk [vmem:[%s1360_s2 + $0x1c8] sm:$0xff] %vm654_vm1, %v647_v28 }
  0xdc   :  { %665 = vst.msk [vmem:[%s1360_s2 + $0x50] sm:$0xff] %vm654_vm1, %v600_v29 }
  0xdd   :  { %681 = vst.msk [vmem:[%s1360_s2 + $0xd0] sm:$0xff] %vm654_vm1, %v616_v30  ;;  %v471_v31 = vpop.f32.mrf.mxu2  ;;  %v511_v32 = vpop.f32.mrf.mxu3 }
  0xde   :  { %v568_v33 = vmax.f32 %v471_v31, 0.0  ;;  %v584_v34 = vmax.f32 %v511_v32, 0.0  ;;  %v393_v35 = vpop.f32.mrf.mxu0  ;;  %v433_v36 = vpop.f32.mrf.mxu1 }
  0xdf   :  { %v537_v37 = vmax.f32 %v393_v35, 0.0  ;;  %v553_v38 = vmax.f32 %v433_v36, 0.0 }
  0xe0   :  { %v632_v39 = vmin.f32 %v568_v33, 6.0  ;;  %v648_v40 = vmin.f32 %v584_v34, 6.0 }
  0xe1   :  { %v601_v41 = vmin.f32 %v537_v37, 6.0  ;;  %v617_v42 = vmin.f32 %v553_v38, 6.0 }
  0xe2   :  { %697 = vst.msk [vmem:[%s1360_s2 + $0x150] sm:$0xff] %vm654_vm1, %v632_v39 }
  0xe3   :  { %713 = vst.msk [vmem:[%s1360_s2 + $0x1d0] sm:$0xff] %vm654_vm1, %v648_v40 }
  0xe4   :  { %666 = vst.msk [vmem:[%s1360_s2 + $0x58] sm:$0xff] %vm654_vm1, %v601_v41 }
  0xe5   :  { %682 = vst.msk [vmem:[%s1360_s2 + $0xd8] sm:$0xff] %vm654_vm1, %v617_v42  ;;  %v473_v43 = vpop.f32.mrf.mxu2  ;;  %v513_v44 = vpop.f32.mrf.mxu3 }
  0xe6   :  { %v569_v45 = vmax.f32 %v473_v43, 0.0  ;;  %v585_v46 = vmax.f32 %v513_v44, 0.0  ;;  %v396_v47 = vpop.f32.mrf.mxu0  ;;  %v436_v48 = vpop.f32.mrf.mxu1 }
  0xe7   :  { %v538_v49 = vmax.f32 %v396_v47, 0.0  ;;  %v554_v50 = vmax.f32 %v436_v48, 0.0 }
  0xe8   :  { %v633_v51 = vmin.f32 %v569_v45, 6.0  ;;  %v649_v52 = vmin.f32 %v585_v46, 6.0 }
  0xe9   :  { %v602_v53 = vmin.f32 %v538_v49, 6.0  ;;  %v618_v54 = vmin.f32 %v554_v50, 6.0 }
  0xea   :  { %698 = vst.msk [vmem:[%s1360_s2 + $0x158] sm:$0xff] %vm654_vm1, %v633_v51 }
  0xeb   :  { %714 = vst.msk [vmem:[%s1360_s2 + $0x1d8] sm:$0xff] %vm654_vm1, %v649_v52 }
  0xec   :  { %667 = vst.msk [vmem:[%s1360_s2 + $0x60] sm:$0xff] %vm654_vm1, %v602_v53 }
  0xed   :  { %683 = vst.msk [vmem:[%s1360_s2 + $0xe0] sm:$0xff] %vm654_vm1, %v618_v54  ;;  %v476_v55 = vpop.f32.mrf.mxu2  ;;  %v516_v56 = vpop.f32.mrf.mxu3 }
  0xee   :  { %v570_v57 = vmax.f32 %v476_v55, 0.0  ;;  %v586_v58 = vmax.f32 %v516_v56, 0.0  ;;  %v398_v59 = vpop.f32.mrf.mxu0  ;;  %v438_v60 = vpop.f32.mrf.mxu1 }
  0xef   :  { %v539_v61 = vmax.f32 %v398_v59, 0.0  ;;  %v555_v62 = vmax.f32 %v438_v60, 0.0 }
  0xf0   :  { %v634_v63 = vmin.f32 %v570_v57, 6.0  ;;  %v650_v0 = vmin.f32 %v586_v58, 6.0 }
  0xf1   :  { %v603_v1 = vmin.f32 %v539_v61, 6.0  ;;  %v619_v2 = vmin.f32 %v555_v62, 6.0 }
  0xf2   :  { %699 = vst.msk [vmem:[%s1360_s2 + $0x160] sm:$0xff] %vm654_vm1, %v634_v63 }
  0xf3   :  { %715 = vst.msk [vmem:[%s1360_s2 + $0x1e0] sm:$0xff] %vm654_vm1, %v650_v0 }
  0xf4   :  { %668 = vst.msk [vmem:[%s1360_s2 + $0x68] sm:$0xff] %vm654_vm1, %v603_v1 }
  0xf5   :  { %684 = vst.msk [vmem:[%s1360_s2 + $0xe8] sm:$0xff] %vm654_vm1, %v619_v2  ;;  %v478_v3 = vpop.f32.mrf.mxu2  ;;  %v518_v4 = vpop.f32.mrf.mxu3 }
  0xf6   :  { %v571_v5 = vmax.f32 %v478_v3, 0.0  ;;  %v587_v6 = vmax.f32 %v518_v4, 0.0  ;;  %v401_v7 = vpop.f32.mrf.mxu0  ;;  %v441_v8 = vpop.f32.mrf.mxu1 }
  0xf7   :  { %v540_v9 = vmax.f32 %v401_v7, 0.0  ;;  %v556_v10 = vmax.f32 %v441_v8, 0.0 }
  0xf8   :  { %v635_v11 = vmin.f32 %v571_v5, 6.0  ;;  %v651_v12 = vmin.f32 %v587_v6, 6.0 }
  0xf9   :  { %v604_v13 = vmin.f32 %v540_v9, 6.0  ;;  %v620_v14 = vmin.f32 %v556_v10, 6.0 }
  0xfa   :  { %700 = vst.msk [vmem:[%s1360_s2 + $0x168] sm:$0xff] %vm654_vm1, %v635_v11 }
  0xfb   :  { %716 = vst.msk [vmem:[%s1360_s2 + $0x1e8] sm:$0xff] %vm654_vm1, %v651_v12 }
  0xfc   :  { %669 = vst.msk [vmem:[%s1360_s2 + $0x70] sm:$0xff] %vm654_vm1, %v604_v13 }
  0xfd   :  { %685 = vst.msk [vmem:[%s1360_s2 + $0xf0] sm:$0xff] %vm654_vm1, %v620_v14  ;;  %v481_v15 = vpop.f32.mrf.mxu2  ;;  %v521_v16 = vpop.f32.mrf.mxu3 }
  0xfe   :  { %v572_v17 = vmax.f32 %v481_v15, 0.0  ;;  %v588_v18 = vmax.f32 %v521_v16, 0.0  ;;  %v403_v19 = vpop.f32.mrf.mxu0  ;;  %v443_v20 = vpop.f32.mrf.mxu1 }
  0xff   :  { %v541_v21 = vmax.f32 %v403_v19, 0.0  ;;  %v557_v22 = vmax.f32 %v443_v20, 0.0 }
 0x100   :  { %v636_v23 = vmin.f32 %v572_v17, 6.0  ;;  %v652_v24 = vmin.f32 %v588_v18, 6.0 }
 0x101   :  { %v605_v25 = vmin.f32 %v541_v21, 6.0  ;;  %v621_v26 = vmin.f32 %v557_v22, 6.0 }
 0x102   :  { %701 = vst.msk [vmem:[%s1360_s2 + $0x170] sm:$0xff] %vm654_vm1, %v636_v23 }
 0x103   :  { %717 = vst.msk [vmem:[%s1360_s2 + $0x1f0] sm:$0xff] %vm654_vm1, %v652_v24 }
 0x104   :  { %670 = vst.msk [vmem:[%s1360_s2 + $0x78] sm:$0xff] %vm654_vm1, %v605_v25 }
 0x105   :  { %686 = vst.msk [vmem:[%s1360_s2 + $0xf8] sm:$0xff] %vm654_vm1, %v621_v26  ;;  %v483_v27 = vpop.f32.mrf.mxu2  ;;  %v523_v28 = vpop.f32.mrf.mxu3 }
 0x106   :  { %v573_v29 = vmax.f32 %v483_v27, 0.0  ;;  %v589_v30 = vmax.f32 %v523_v28, 0.0 }
 0x108   :  { %v637_v31 = vmin.f32 %v573_v29, 6.0  ;;  %v653_v32 = vmin.f32 %v589_v30, 6.0 }
 0x10a   :  { %702 = vst.msk [vmem:[%s1360_s2 + $0x178] sm:$0xff] %vm654_vm1, %v637_v31 }
 0x10b   :  { %718 = vst.msk [vmem:[%s1360_s2 + $0x1f8] sm:$0xff] %vm654_vm1, %v653_v32 }
 0x10c   :  { %723 = vsyncpa [#allocation3], 1 }

// kernel: _discriminator_forward.6
= control target key start
LH: loop header
LB: loop body
LE: loop exit
PB: predicated region body
PF: predicated region fallthrough
CT: control target
= control target key end

     0   :  { %s2946_s1 = inlined_call_operand.vmem [shape: bf16[1024,128], index: 1, kind: input, shape index: {}]   ;;  %s2947_s0 = inlined_call_operand.vmem [shape: bf16[128,1024], index: 0, kind: input, shape index: {}]   ;;  %s2948_s2 = inlined_call_operand.vmem [shape: f32[1,128], index: 2, kind: input, shape index: {}]   ;;  %s2949_s3 = inlined_call_operand.vmem [shape: f32[1,128], index: 3, kind: input, shape index: {}]   ;;  %s2950_s4 = inlined_call_operand.vmem [shape: f32[128,128], index: 4, kind: output, shape index: {}]  }
   0x1   :  { %v2086_v0 = vld [vmem:[%s2946_s1 + $0x38] sm:$0xff]  ;;  %v2085_v4 = vld [vmem:[%s2946_s1 + $0x30] sm:$0xff]  ;;  %v2084_v8 = vld [vmem:[%s2946_s1 + $0x28] sm:$0xff] }
   0x2   :  { %v2094_v1 = vld [vmem:[%s2946_s1 + $0x78] sm:$0xff]  ;;  %913 = vmatpush.bf16.msra.mxu0 %v2086_v0  ;;  %v2093_v5 = vld [vmem:[%s2946_s1 + $0x70] sm:$0xff]  ;;  %v2092_v9 = vld [vmem:[%s2946_s1 + $0x68] sm:$0xff] }
   0x3   :  { %v2102_v2 = vld [vmem:[%s2946_s1 + $0xb8] sm:$0xff]  ;;  %962 = vmatpush.bf16.msra.mxu1 %v2094_v1  ;;  %v2101_v6 = vld [vmem:[%s2946_s1 + $0xb0] sm:$0xff]  ;;  %v2100_v10 = vld [vmem:[%s2946_s1 + $0xa8] sm:$0xff] }
   0x4   :  { %v2110_v3 = vld [vmem:[%s2946_s1 + $0xf8] sm:$0xff]  ;;  %1011 = vmatpush.bf16.msra.mxu2 %v2102_v2  ;;  %v2109_v7 = vld [vmem:[%s2946_s1 + $0xf0] sm:$0xff]  ;;  %v2108_v11 = vld [vmem:[%s2946_s1 + $0xe8] sm:$0xff] }
   0x5   :  { %1060 = vmatpush.bf16.msra.mxu3 %v2110_v3  ;;  %v2083_v12 = vld [vmem:[%s2946_s1 + $0x20] sm:$0xff]  ;;  %v2082_v16 = vld [vmem:[%s2946_s1 + $0x18] sm:$0xff]  ;;  %v2081_v20 = vld [vmem:[%s2946_s1 + $0x10] sm:$0xff] }
   0x6   :  { %914 = vmatpush.bf16.msra.mxu0 %v2085_v4  ;;  %v2091_v13 = vld [vmem:[%s2946_s1 + $0x60] sm:$0xff]  ;;  %v2090_v17 = vld [vmem:[%s2946_s1 + $0x58] sm:$0xff]  ;;  %v2089_v21 = vld [vmem:[%s2946_s1 + $0x50] sm:$0xff] }
   0x7   :  { %963 = vmatpush.bf16.msra.mxu1 %v2093_v5  ;;  %v2099_v14 = vld [vmem:[%s2946_s1 + $0xa0] sm:$0xff]  ;;  %v2098_v18 = vld [vmem:[%s2946_s1 + $0x98] sm:$0xff]  ;;  %v2097_v22 = vld [vmem:[%s2946_s1 + $0x90] sm:$0xff] }
   0x8   :  { %1012 = vmatpush.bf16.msra.mxu2 %v2101_v6  ;;  %v2107_v15 = vld [vmem:[%s2946_s1 + $0xe0] sm:$0xff]  ;;  %v2106_v19 = vld [vmem:[%s2946_s1 + $0xd8] sm:$0xff]  ;;  %v2105_v23 = vld [vmem:[%s2946_s1 + $0xd0] sm:$0xff] }
   0x9   :  { %1061 = vmatpush.bf16.msra.mxu3 %v2109_v7  ;;  %v2080_v24 = vld [vmem:[%s2946_s1 + $0x8] sm:$0xff]  ;;  %v2079_v28 = vld [vmem:[%s2946_s1] sm:$0xff]  ;;  %v2134_v40 = vld [vmem:[%s2946_s1 + $0x1b8] sm:$0xff] }
   0xa   :  { %915 = vmatpush.bf16.msra.mxu0 %v2084_v8  ;;  %v2088_v25 = vld [vmem:[%s2946_s1 + $0x48] sm:$0xff]  ;;  %v2087_v29 = vld [vmem:[%s2946_s1 + $0x40] sm:$0xff]  ;;  %v2118_v41 = vld [vmem:[%s2946_s1 + $0x138] sm:$0xff] }
   0xb   :  { %964 = vmatpush.bf16.msra.mxu1 %v2092_v9  ;;  %v2096_v26 = vld [vmem:[%s2946_s1 + $0x88] sm:$0xff]  ;;  %v2095_v30 = vld [vmem:[%s2946_s1 + $0x80] sm:$0xff]  ;;  %v2142_v46 = vld [vmem:[%s2946_s1 + $0x1f8] sm:$0xff] }
   0xc   :  { %1013 = vmatpush.bf16.msra.mxu2 %v2100_v10  ;;  %v2104_v27 = vld [vmem:[%s2946_s1 + $0xc8] sm:$0xff]  ;;  %v2103_v31 = vld [vmem:[%s2946_s1 + $0xc0] sm:$0xff]  ;;  %v2126_v47 = vld [vmem:[%s2946_s1 + $0x178] sm:$0xff] }
   0xd   :  { %1062 = vmatpush.bf16.msra.mxu3 %v2108_v11  ;;  %v1505_v32 = vld [vmem:[%s2947_s0] sm:$0xf]  ;;  %v2015_v34 = vld [vmem:[%s2947_s0 + $0x4] sm:$0xf]  ;;  %v1513_v36 = vld [vmem:[%s2947_s0 + $0x8] sm:$0xf] }
   0xe   :  { %916 = vmatpush.bf16.msra.mxu0 %v2083_v12  ;;  %v2019_v33 = vld [vmem:[%s2947_s0 + $0x1c] sm:$0xf0]  ;;  %v1507_v35 = vld [vmem:[%s2947_s0 + $0x20] sm:$0xf0]  ;;  %v2020_v37 = vld [vmem:[%s2947_s0 + $0x24] sm:$0xf0] }
   0xf   :  { %965 = vmatpush.bf16.msra.mxu1 %v2091_v13  ;;  %v2016_v38 = vld [vmem:[%s2947_s0 + $0xc] sm:$0xf]  ;;  %v1506_v42 = vor.u32 %v2019_v33, %v1505_v32  ;;  %v1510_v43 = vor.u32 %v2015_v34, %v1507_v35  ;;  %v1514_v44 = vor.u32 %v2020_v37, %v1513_v36  ;;  %v2133_v48 = vld [vmem:[%s2946_s1 + $0x1b0] sm:$0xff]  ;;  %v1537_v56 = vld [vmem:[%s2947_s0 + $0x40] sm:$0xf] }
  0x10   :  { %1014 = vmatpush.bf16.msra.mxu2 %v2099_v14  ;;  %v1515_v39 = vld [vmem:[%s2947_s0 + $0x28] sm:$0xf0]  ;;  %v2117_v49 = vld [vmem:[%s2946_s1 + $0x130] sm:$0xff]  ;;  %v2027_v57 = vld [vmem:[%s2947_s0 + $0x5c] sm:$0xf0] }
  0x11   :  { %1063 = vmatpush.bf16.msra.mxu3 %v2107_v15  ;;  %v1518_v45 = vor.u32 %v2016_v38, %v1515_v39  ;;  %v2141_v50 = vld [vmem:[%s2946_s1 + $0x1f0] sm:$0xff]  ;;  %v2132_v52 = vld [vmem:[%s2946_s1 + $0x1a8] sm:$0xff]  ;;  %v2023_v58 = vld [vmem:[%s2947_s0 + $0x44] sm:$0xf]  ;;  %v1538_v0 = vor.u32 %v2027_v57, %v1537_v56 }
  0x12   :  { %917 = vmatpush.bf16.msra.mxu0 %v2082_v16  ;;  %v2125_v51 = vld [vmem:[%s2946_s1 + $0x170] sm:$0xff]  ;;  %v2116_v53 = vld [vmem:[%s2946_s1 + $0x128] sm:$0xff]  ;;  %v1539_v59 = vld [vmem:[%s2947_s0 + $0x60] sm:$0xf0] }
  0x13   :  { %966 = vmatpush.bf16.msra.mxu1 %v2090_v17  ;;  %v2140_v54 = vld [vmem:[%s2946_s1 + $0x1e8] sm:$0xff]  ;;  %v1542_v1 = vor.u32 %v2023_v58, %v1539_v59  ;;  %v2131_v4 = vld [vmem:[%s2946_s1 + $0x1a0] sm:$0xff]  ;;  %v2129_v36 = vld [vmem:[%s2946_s1 + $0x190] sm:$0xff] }
  0x14   :  { %1015 = vmatpush.bf16.msra.mxu2 %v2098_v18  ;;  %v2124_v55 = vld [vmem:[%s2946_s1 + $0x168] sm:$0xff]  ;;  %v2115_v5 = vld [vmem:[%s2946_s1 + $0x120] sm:$0xff]  ;;  %v2113_v37 = vld [vmem:[%s2946_s1 + $0x110] sm:$0xff] }
  0x15   :  { %1064 = vmatpush.bf16.msra.mxu3 %v2106_v19  ;;  %v1545_v60 = vld [vmem:[%s2947_s0 + $0x48] sm:$0xf]  ;;  %v2024_v62 = vld [vmem:[%s2947_s0 + $0x4c] sm:$0xf]  ;;  %v2139_v6 = vld [vmem:[%s2946_s1 + $0x1e0] sm:$0xff] }
  0x16   :  { %918 = vmatpush.bf16.msra.mxu0 %v2081_v20  ;;  %v2028_v61 = vld [vmem:[%s2947_s0 + $0x64] sm:$0xf0]  ;;  %v1547_v63 = vld [vmem:[%s2947_s0 + $0x68] sm:$0xf0]  ;;  %v2123_v7 = vld [vmem:[%s2946_s1 + $0x160] sm:$0xff] }
  0x17   :  { %967 = vmatpush.bf16.msra.mxu1 %v2089_v21  ;;  %v1546_v2 = vor.u32 %v2028_v61, %v1545_v60  ;;  %v1550_v3 = vor.u32 %v2024_v62, %v1547_v63  ;;  %v1569_v8 = vld [vmem:[%s2947_s0 + $0x80] sm:$0xf]  ;;  %v2031_v10 = vld [vmem:[%s2947_s0 + $0x84] sm:$0xf]  ;;  %v1577_v12 = vld [vmem:[%s2947_s0 + $0x88] sm:$0xf] }
  0x18   :  { %1016 = vmatpush.bf16.msra.mxu2 %v2097_v22  ;;  %v2035_v9 = vld [vmem:[%s2947_s0 + $0x9c] sm:$0xf0]  ;;  %v1571_v11 = vld [vmem:[%s2947_s0 + $0xa0] sm:$0xf0]  ;;  %v2036_v13 = vld [vmem:[%s2947_s0 + $0xa4] sm:$0xf0] }
  0x19   :  { %1065 = vmatpush.bf16.msra.mxu3 %v2105_v23  ;;  %v2032_v14 = vld [vmem:[%s2947_s0 + $0x8c] sm:$0xf]  ;;  %v1570_v16 = vor.u32 %v2035_v9, %v1569_v8  ;;  %v1574_v17 = vor.u32 %v2031_v10, %v1571_v11  ;;  %v1578_v18 = vor.u32 %v2036_v13, %v1577_v12  ;;  %v2130_v20 = vld [vmem:[%s2946_s1 + $0x198] sm:$0xff]  ;;  %v2137_v38 = vld [vmem:[%s2946_s1 + $0x1d0] sm:$0xff] }
  0x1a   :  { %919 = vmatpush.bf16.msra.mxu0 %v2080_v24  ;;  %v1579_v15 = vld [vmem:[%s2947_s0 + $0xa8] sm:$0xf0]  ;;  %v2114_v21 = vld [vmem:[%s2946_s1 + $0x118] sm:$0xff]  ;;  %v1601_v24 = vld [vmem:[%s2947_s0 + $0xc0] sm:$0xf] }
  0x1b   :  { %968 = vmatpush.bf16.msra.mxu1 %v2088_v25  ;;  %v1582_v19 = vor.u32 %v2032_v14, %v1579_v15  ;;  %v2138_v22 = vld [vmem:[%s2946_s1 + $0x1d8] sm:$0xff]  ;;  %v2043_v25 = vld [vmem:[%s2947_s0 + $0xdc] sm:$0xf0]  ;;  %v2121_v39 = vld [vmem:[%s2946_s1 + $0x150] sm:$0xff] }
  0x1c   :  { %1017 = vmatpush.bf16.msra.mxu2 %v2096_v26  ;;  %v2122_v23 = vld [vmem:[%s2946_s1 + $0x158] sm:$0xff]  ;;  %v2039_v26 = vld [vmem:[%s2947_s0 + $0xc4] sm:$0xf]  ;;  %v1602_v32 = vor.u32 %v2043_v25, %v1601_v24  ;;  %v1665_v56 = vld [vmem:[%s2947_s0 + $0x140] sm:$0xf] }
  0x1d   :  { %1066 = vmatpush.bf16.msra.mxu3 %v2104_v27  ;;  %v1603_v27 = vld [vmem:[%s2947_s0 + $0xe0] sm:$0xf0]  ;;  %v2059_v57 = vld [vmem:[%s2947_s0 + $0x15c] sm:$0xf0]  ;;  %v1673_v60 = vld [vmem:[%s2947_s0 + $0x148] sm:$0xf] }
  0x1e   :  { %920 = vmatpush.bf16.msra.mxu0 %v2079_v28  ;;  %v1609_v28 = vld [vmem:[%s2947_s0 + $0xc8] sm:$0xf]  ;;  %v1606_v33 = vor.u32 %v2039_v26, %v1603_v27  ;;  %v2055_v58 = vld [vmem:[%s2947_s0 + $0x144] sm:$0xf]  ;;  %v2056_v62 = vld [vmem:[%s2947_s0 + $0x14c] sm:$0xf] }
  0x1f   :  { %969 = vmatpush.bf16.msra.mxu1 %v2087_v29  ;;  %v2044_v29 = vld [vmem:[%s2947_s0 + $0xe4] sm:$0xf0]  ;;  %v1667_v59 = vld [vmem:[%s2947_s0 + $0x160] sm:$0xf0]  ;;  %v1675_v63 = vld [vmem:[%s2947_s0 + $0x168] sm:$0xf0] }
  0x20   :  { %1018 = vmatpush.bf16.msra.mxu2 %v2095_v30  ;;  %v2040_v30 = vld [vmem:[%s2947_s0 + $0xcc] sm:$0xf]  ;;  %v1610_v34 = vor.u32 %v2044_v29, %v1609_v28  ;;  %v2060_v61 = vld [vmem:[%s2947_s0 + $0x164] sm:$0xf0]  ;;  %v1697_v8 = vld [vmem:[%s2947_s0 + $0x180] sm:$0xf] }
  0x21   :  { %1067 = vmatpush.bf16.msra.mxu3 %v2103_v31  ;;  %921 = vmatmul.bf16.vlgmr.msra.gmra.mxu0 %v1506_v42  ;;  %v1611_v31 = vld [vmem:[%s2947_s0 + $0xe8] sm:$0xf0]  ;;  %v2047_v42 = vld [vmem:[%s2947_s0 + $0x104] sm:$0xf]  ;;  %v2067_v9 = vld [vmem:[%s2947_s0 + $0x19c] sm:$0xf0] }
  0x22   :  { %1109 = vmatpush.bf16.msrb.mxu0 %v2118_v41  ;;  %970 = vmatmul.bf16.vlgmr.msra.gmra.mxu1 %v1510_v43  ;;  %v1614_v35 = vor.u32 %v2040_v30, %v1611_v31  ;;  %v2051_v41 = vld [vmem:[%s2947_s0 + $0x11c] sm:$0xf0]  ;;  %v1635_v43 = vld [vmem:[%s2947_s0 + $0x120] sm:$0xf0]  ;;  %v1705_v12 = vld [vmem:[%s2947_s0 + $0x188] sm:$0xf] }
  0x23   :  { %1019 = vmatmul.bf16.vlgmr.msra.gmra.mxu2 %v1514_v44  ;;  %1158 = vmatpush.bf16.msrb.mxu1 %v2126_v47  ;;  %v1641_v44 = vld [vmem:[%s2947_s0 + $0x108] sm:$0xf]  ;;  %v1643_v47 = vld [vmem:[%s2947_s0 + $0x128] sm:$0xf0]  ;;  %v2063_v10 = vld [vmem:[%s2947_s0 + $0x184] sm:$0xf] }
  0x24   :  { %1207 = vmatpush.bf16.msrb.mxu2 %v2134_v40  ;;  %1068 = vmatmul.bf16.vlgmr.msra.gmra.mxu3 %v1518_v45  ;;  %v1633_v40 = vld [vmem:[%s2947_s0 + $0x100] sm:$0xf]  ;;  %v2052_v45 = vld [vmem:[%s2947_s0 + $0x124] sm:$0xf0]  ;;  %v1699_v11 = vld [vmem:[%s2947_s0 + $0x1a0] sm:$0xf0] }
  0x25   :  { %1256 = vmatpush.bf16.msrb.mxu3 %v2142_v46  ;;  %v2048_v46 = vld [vmem:[%s2947_s0 + $0x10c] sm:$0xf]  ;;  %v2068_v13 = vld [vmem:[%s2947_s0 + $0x1a4] sm:$0xf0] }
  0x26   :  { %1110 = vmatpush.bf16.msrb.mxu0 %v2117_v49  ;;  %v1638_v49 = vor.u32 %v2047_v42, %v1635_v43  ;;  %v2064_v14 = vld [vmem:[%s2947_s0 + $0x18c] sm:$0xf]  ;;  %v1737_v24 = vld [vmem:[%s2947_s0 + $0x1c8] sm:$0xf] }
  0x27   :  { %1159 = vmatpush.bf16.msrb.mxu1 %v2125_v51  ;;  %v1646_v51 = vor.u32 %v2048_v46, %v1643_v47  ;;  %v1707_v15 = vld [vmem:[%s2947_s0 + $0x1a8] sm:$0xf0]  ;;  %v2076_v25 = vld [vmem:[%s2947_s0 + $0x1e4] sm:$0xf0] }
  0x28   :  { %1208 = vmatpush.bf16.msrb.mxu2 %v2133_v48  ;;  %v1634_v48 = vor.u32 %v2051_v41, %v1633_v40  ;;  %v2072_v26 = vld [vmem:[%s2947_s0 + $0x1cc] sm:$0xf]  ;;  %v1738_v30 = vor.u32 %v2076_v25, %v1737_v24 }
  0x29   :  { %1257 = vmatpush.bf16.msrb.mxu3 %v2141_v50  ;;  %v1642_v50 = vor.u32 %v2052_v45, %v1641_v44  ;;  %v1739_v27 = vld [vmem:[%s2947_s0 + $0x1e8] sm:$0xf0] }
  0x2a   :  { %1111 = vmatpush.bf16.msrb.mxu0 %v2116_v53  ;;  %v2112_v53 = vld [vmem:[%s2946_s1 + $0x108] sm:$0xff]  ;;  %v1742_v31 = vor.u32 %v2072_v26, %v1739_v27 }
  0x2b   :  { %1160 = vmatpush.bf16.msrb.mxu1 %v2124_v55  ;;  %v2120_v55 = vld [vmem:[%s2946_s1 + $0x148] sm:$0xff] }
  0x2c   :  { %1209 = vmatpush.bf16.msrb.mxu2 %v2132_v52  ;;  %v2128_v52 = vld [vmem:[%s2946_s1 + $0x188] sm:$0xff] }
  0x2d   :  { %1258 = vmatpush.bf16.msrb.mxu3 %v2140_v54  ;;  %v2136_v54 = vld [vmem:[%s2946_s1 + $0x1c8] sm:$0xff] }
  0x2e   :  { %1112 = vmatpush.bf16.msrb.mxu0 %v2115_v5  ;;  %v2111_v5 = vld [vmem:[%s2946_s1 + $0x100] sm:$0xff] }
  0x2f   :  { %1161 = vmatpush.bf16.msrb.mxu1 %v2123_v7  ;;  %v2119_v7 = vld [vmem:[%s2946_s1 + $0x140] sm:$0xff] }
  0x30   :  { %1210 = vmatpush.bf16.msrb.mxu2 %v2131_v4  ;;  %v2127_v4 = vld [vmem:[%s2946_s1 + $0x180] sm:$0xff] }
  0x31   :  { %926 = vmatmul.bf16.gmra.mxu0 %v1538_v0  ;;  %1259 = vmatpush.bf16.msrb.mxu3 %v2139_v6  ;;  %v1666_v0 = vor.u32 %v2059_v57, %v1665_v56  ;;  %v2135_v6 = vld [vmem:[%s2946_s1 + $0x1c0] sm:$0xff]  ;;  %v2025_v56 = vld [vmem:[%s2947_s0 + $0x54] sm:$0xf] }
  0x32   :  { %975 = vmatmul.bf16.gmra.mxu1 %v1542_v1  ;;  %1113 = vmatpush.bf16.msrb.mxu0 %v2114_v21  ;;  %v1670_v1 = vor.u32 %v2055_v58, %v1667_v59  ;;  %v2075_v21 = vld [vmem:[%s2947_s0 + $0x1dc] sm:$0xf0]  ;;  %v1555_v57 = vld [vmem:[%s2947_s0 + $0x70] sm:$0xf0]  ;;  %v1561_v58 = vld [vmem:[%s2947_s0 + $0x58] sm:$0xf] }
  0x33   :  { %1024 = vmatmul.bf16.gmra.mxu2 %v1546_v2  ;;  %1162 = vmatpush.bf16.msrb.mxu1 %v2122_v23  ;;  %v1674_v2 = vor.u32 %v2060_v61, %v1673_v60  ;;  %v1731_v23 = vld [vmem:[%s2947_s0 + $0x1e0] sm:$0xf0]  ;;  %v2030_v59 = vld [vmem:[%s2947_s0 + $0x74] sm:$0xf0]  ;;  %v2026_v60 = vld [vmem:[%s2947_s0 + $0x5c] sm:$0xf] }
  0x34   :  { %1073 = vmatmul.bf16.gmra.mxu3 %v1550_v3  ;;  %1211 = vmatpush.bf16.msrb.mxu2 %v2130_v20  ;;  %v1678_v3 = vor.u32 %v2056_v62, %v1675_v63  ;;  %v1729_v20 = vld [vmem:[%s2947_s0 + $0x1c0] sm:$0xf]  ;;  %v1563_v61 = vld [vmem:[%s2947_s0 + $0x78] sm:$0xf0] }
  0x35   :  { %1260 = vmatpush.bf16.msrb.mxu3 %v2138_v22  ;;  %v2071_v22 = vld [vmem:[%s2947_s0 + $0x1c4] sm:$0xf]  ;;  %v1730_v28 = vor.u32 %v2075_v21, %v1729_v20  ;;  %v1593_v20 = vld [vmem:[%s2947_s0 + $0x98] sm:$0xf] }
  0x36   :  { %1114 = vmatpush.bf16.msrb.mxu0 %v2113_v37  ;;  %v1734_v29 = vor.u32 %v2071_v22, %v1731_v23  ;;  %v2022_v37 = vld [vmem:[%s2947_s0 + $0x34] sm:$0xf0]  ;;  %v2034_v22 = vld [vmem:[%s2947_s0 + $0x9c] sm:$0xf] }
  0x37   :  { %1163 = vmatpush.bf16.msrb.mxu1 %v2121_v39  ;;  %v1531_v39 = vld [vmem:[%s2947_s0 + $0x38] sm:$0xf0]  ;;  %v2038_v21 = vld [vmem:[%s2947_s0 + $0xb4] sm:$0xf0] }
  0x38   :  { %1212 = vmatpush.bf16.msrb.mxu2 %v2129_v36  ;;  %v1529_v36 = vld [vmem:[%s2947_s0 + $0x18] sm:$0xf]  ;;  %v1595_v23 = vld [vmem:[%s2947_s0 + $0xb8] sm:$0xf0] }
  0x39   :  { %1261 = vmatpush.bf16.msrb.mxu3 %v2137_v38  ;;  %v2018_v38 = vld [vmem:[%s2947_s0 + $0x1c] sm:$0xf]  ;;  %v1530_v44 = vor.u32 %v2022_v37, %v1529_v36 }
  0x3a   :  { %1115 = vmatpush.bf16.msrb.mxu0 %v2112_v53  ;;  %v1534_v45 = vor.u32 %v2018_v38, %v1531_v39 }
  0x3b   :  { %1164 = vmatpush.bf16.msrb.mxu1 %v2120_v55  ;;  %v2029_v55 = vld [vmem:[%s2947_s0 + $0x6c] sm:$0xf0] }
  0x3c   :  { %1213 = vmatpush.bf16.msrb.mxu2 %v2128_v52 }
  0x3d   :  { %1262 = vmatpush.bf16.msrb.mxu3 %v2136_v54  ;;  %v1553_v54 = vld [vmem:[%s2947_s0 + $0x50] sm:$0xf] }
  0x3e   :  { %1116 = vmatpush.bf16.msrb.mxu0 %v2111_v5  ;;  %v1562_v5 = vor.u32 %v2030_v59, %v1561_v58 }
  0x3f   :  { %1165 = vmatpush.bf16.msrb.mxu1 %v2119_v7 }
  0x40   :  { %1214 = vmatpush.bf16.msrb.mxu2 %v2127_v4 }
  0x41   :  { %931 = vmatmul.bf16.gmra.mxu0 %v1570_v16  ;;  %1263 = vmatpush.bf16.msrb.mxu3 %v2135_v6  ;;  %v1698_v16 = vor.u32 %v2067_v9, %v1697_v8  ;;  %v1566_v6 = vor.u32 %v2026_v60, %v1563_v61 }
  0x42   :  { %980 = vmatmul.bf16.gmra.mxu1 %v1574_v17  ;;  %v1702_v17 = vor.u32 %v2063_v10, %v1699_v11 }
  0x43   :  { %1029 = vmatmul.bf16.gmra.mxu2 %v1578_v18  ;;  %v1706_v18 = vor.u32 %v2068_v13, %v1705_v12 }
  0x44   :  { %1078 = vmatmul.bf16.gmra.mxu3 %v1582_v19  ;;  %v1710_v19 = vor.u32 %v2064_v14, %v1707_v15 }
  0x51   :  { %936 = vmatmul.bf16.gmra.mxu0 %v1602_v32  ;;  %v1521_v32 = vld [vmem:[%s2947_s0 + $0x10] sm:$0xf] }
  0x52   :  { %985 = vmatmul.bf16.gmra.mxu1 %v1606_v33  ;;  %v2021_v33 = vld [vmem:[%s2947_s0 + $0x2c] sm:$0xf0] }
  0x53   :  { %1034 = vmatmul.bf16.gmra.mxu2 %v1610_v34  ;;  %v2017_v34 = vld [vmem:[%s2947_s0 + $0x14] sm:$0xf]  ;;  %v1522_v40 = vor.u32 %v2021_v33, %v1521_v32  ;;  %v1598_v32 = vor.u32 %v2034_v22, %v1595_v23 }
  0x54   :  { %1083 = vmatmul.bf16.gmra.mxu3 %v1614_v35  ;;  %v1523_v35 = vld [vmem:[%s2947_s0 + $0x30] sm:$0xf0] }
  0x55   :  { %v1526_v41 = vor.u32 %v2017_v34, %v1523_v35 }
  0x61   :  { %941 = vmatmul.bf16.gmra.mxu0 %v1634_v48 }
  0x62   :  { %990 = vmatmul.bf16.gmra.mxu1 %v1638_v49 }
  0x63   :  { %1039 = vmatmul.bf16.gmra.mxu2 %v1642_v50 }
  0x64   :  { %1088 = vmatmul.bf16.gmra.mxu3 %v1646_v51 }
  0x71   :  { %946 = vmatmul.bf16.gmra.mxu0 %v1666_v0  ;;  %v1554_v0 = vor.u32 %v2029_v55, %v1553_v54 }
  0x72   :  { %995 = vmatmul.bf16.gmra.mxu1 %v1670_v1  ;;  %v1558_v1 = vor.u32 %v2025_v56, %v1555_v57 }
  0x73   :  { %1044 = vmatmul.bf16.gmra.mxu2 %v1674_v2 }
  0x74   :  { %1093 = vmatmul.bf16.gmra.mxu3 %v1678_v3 }
  0x81   :  { %951 = vmatmul.bf16.gmra.mxu0 %v1698_v16  ;;  %v1585_v16 = vld [vmem:[%s2947_s0 + $0x90] sm:$0xf] }
  0x82   :  { %1000 = vmatmul.bf16.gmra.mxu1 %v1702_v17  ;;  %v2037_v17 = vld [vmem:[%s2947_s0 + $0xac] sm:$0xf0] }
  0x83   :  { %1049 = vmatmul.bf16.gmra.mxu2 %v1706_v18  ;;  %v2033_v18 = vld [vmem:[%s2947_s0 + $0x94] sm:$0xf]  ;;  %v1586_v26 = vor.u32 %v2037_v17, %v1585_v16 }
  0x84   :  { %1098 = vmatmul.bf16.gmra.mxu3 %v1710_v19  ;;  %v1587_v19 = vld [vmem:[%s2947_s0 + $0xb0] sm:$0xf0] }
  0x85   :  { %v1590_v27 = vor.u32 %v2033_v18, %v1587_v19 }
  0x91   :  { %956 = vmatmul.bf16.gmra.mxu0 %v1730_v28 }
  0x92   :  { %1005 = vmatmul.bf16.gmra.mxu1 %v1734_v29 }
  0x93   :  { %1054 = vmatmul.bf16.gmra.mxu2 %v1738_v30 }
  0x94   :  { %1103 = vmatmul.bf16.gmra.mxu3 %v1742_v31  ;;  %v1594_v31 = vor.u32 %v2038_v21, %v1593_v20 }
  0x9e   :  { %v922_v42 = vpop.f32.mrf.mxu0 }
  0x9f   :  { %v971_v43 = vpop.f32.mrf.mxu1 }
  0xa0   :  { %v972_v46 = vadd.f32 %v971_v43, %v922_v42  ;;  %v1617_v42 = vld [vmem:[%s2947_s0 + $0xd0] sm:$0xf] }
  0xa1   :  { %1117 = vmatmul.bf16.vlgmr.msrb.gmra.mxu0 %v1522_v40  ;;  %v2045_v43 = vld [vmem:[%s2947_s0 + $0xec] sm:$0xf0] }
  0xa2   :  { %1166 = vmatmul.bf16.vlgmr.msrb.gmra.mxu1 %v1526_v41 }
  0xa3   :  { %1215 = vmatmul.bf16.vlgmr.msrb.gmra.mxu2 %v1530_v44  ;;  %v2041_v44 = vld [vmem:[%s2947_s0 + $0xd4] sm:$0xf] }
  0xa4   :  { %1264 = vmatmul.bf16.vlgmr.msrb.gmra.mxu3 %v1534_v45  ;;  %v1619_v45 = vld [vmem:[%s2947_s0 + $0xf0] sm:$0xf0] }
  0xa5   :  { %v1622_v54 = vor.u32 %v2041_v44, %v1619_v45 }
  0xa6   :  { %v1020_v47 = vpop.f32.mrf.mxu2  ;;  %v924_v50 = vpop.f32.mrf.mxu0 }
  0xa7   :  { %v1069_v48 = vpop.f32.mrf.mxu3  ;;  %v1021_v49 = vadd.f32 %v1020_v47, %v972_v46  ;;  %v973_v51 = vpop.f32.mrf.mxu1  ;;  %v1625_v46 = vld [vmem:[%s2947_s0 + $0xd8] sm:$0xf] }
  0xa8   :  { %v974_v52 = vadd.f32 %v973_v51, %v924_v50  ;;  %v2046_v47 = vld [vmem:[%s2947_s0 + $0xf4] sm:$0xf0] }
  0xa9   :  { %v2580_v53 = vadd.f32 %v1069_v48, %v1021_v49  ;;  %v2042_v48 = vld [vmem:[%s2947_s0 + $0xdc] sm:$0xf]  ;;  %v1626_v58 = vor.u32 %v2046_v47, %v1625_v46 }
  0xaa   :  { %v1627_v49 = vld [vmem:[%s2947_s0 + $0xf8] sm:$0xf0] }
  0xab   :  { %v1630_v59 = vor.u32 %v2042_v48, %v1627_v49 }
  0xae   :  { %v1022_v62 = vpop.f32.mrf.mxu2  ;;  %v927_v3 = vpop.f32.mrf.mxu0 }
  0xaf   :  { %v1071_v63 = vpop.f32.mrf.mxu3  ;;  %v1023_v2 = vadd.f32 %v1022_v62, %v974_v52  ;;  %v976_v4 = vpop.f32.mrf.mxu1  ;;  %v1618_v52 = vor.u32 %v2045_v43, %v1617_v42  ;;  %v1691_v42 = vld [vmem:[%s2947_s0 + $0x178] sm:$0xf0] }
  0xb0   :  { %v977_v7 = vadd.f32 %v976_v4, %v927_v3 }
  0xb1   :  { %v2606_v8 = vadd.f32 %v1071_v63, %v1023_v2  ;;  %1122 = vmatmul.bf16.gmra.mxu0 %v1554_v0 }
  0xb2   :  { %1171 = vmatmul.bf16.gmra.mxu1 %v1558_v1 }
  0xb3   :  { %1220 = vmatmul.bf16.gmra.mxu2 %v1562_v5  ;;  %v1649_v5 = vld [vmem:[%s2947_s0 + $0x110] sm:$0xf] }
  0xb4   :  { %1269 = vmatmul.bf16.gmra.mxu3 %v1566_v6  ;;  %v2053_v6 = vld [vmem:[%s2947_s0 + $0x12c] sm:$0xf0] }
  0xb5   :  { %v1650_v17 = vor.u32 %v2053_v6, %v1649_v5  ;;  %v2070_v5 = vld [vmem:[%s2947_s0 + $0x1b4] sm:$0xf0]  ;;  %v2066_v6 = vld [vmem:[%s2947_s0 + $0x19c] sm:$0xf] }
  0xb6   :  { %v1025_v9 = vpop.f32.mrf.mxu2  ;;  %v929_v12 = vpop.f32.mrf.mxu0 }
  0xb7   :  { %v1074_v10 = vpop.f32.mrf.mxu3  ;;  %v1026_v11 = vadd.f32 %v1025_v9, %v977_v7  ;;  %v978_v13 = vpop.f32.mrf.mxu1  ;;  %v2049_v7 = vld [vmem:[%s2947_s0 + $0x114] sm:$0xf] }
  0xb8   :  { %v979_v14 = vadd.f32 %v978_v13, %v929_v12  ;;  %v1651_v9 = vld [vmem:[%s2947_s0 + $0x130] sm:$0xf0]  ;;  %v2050_v12 = vld [vmem:[%s2947_s0 + $0x11c] sm:$0xf] }
  0xb9   :  { %v2608_v15 = vadd.f32 %v1074_v10, %v1026_v11  ;;  %v1657_v10 = vld [vmem:[%s2947_s0 + $0x118] sm:$0xf]  ;;  %v1659_v13 = vld [vmem:[%s2947_s0 + $0x138] sm:$0xf0]  ;;  %v1654_v18 = vor.u32 %v2049_v7, %v1651_v9 }
  0xba   :  { %v2054_v11 = vld [vmem:[%s2947_s0 + $0x134] sm:$0xf0]  ;;  %v1662_v23 = vor.u32 %v2050_v12, %v1659_v13  ;;  %v1723_v7 = vld [vmem:[%s2947_s0 + $0x1b8] sm:$0xf0] }
  0xbb   :  { %v1658_v22 = vor.u32 %v2054_v11, %v1657_v10 }
  0xbe   :  { %v1027_v24 = vpop.f32.mrf.mxu2  ;;  %v932_v29 = vpop.f32.mrf.mxu0 }
  0xbf   :  { %v1076_v25 = vpop.f32.mrf.mxu3  ;;  %v1028_v28 = vadd.f32 %v1027_v24, %v979_v14  ;;  %v981_v30 = vpop.f32.mrf.mxu1 }
  0xc0   :  { %v982_v33 = vadd.f32 %v981_v30, %v932_v29 }
  0xc1   :  { %v2634_v34 = vadd.f32 %v1076_v25, %v1028_v28  ;;  %1127 = vmatmul.bf16.gmra.mxu0 %v1586_v26 }
  0xc2   :  { %1176 = vmatmul.bf16.gmra.mxu1 %v1590_v27 }
  0xc3   :  { %1225 = vmatmul.bf16.gmra.mxu2 %v1594_v31 }
  0xc4   :  { %1274 = vmatmul.bf16.gmra.mxu3 %v1598_v32 }
  0xc6   :  { %v1030_v35 = vpop.f32.mrf.mxu2  ;;  %v934_v38 = vpop.f32.mrf.mxu0 }
  0xc7   :  { %v1079_v36 = vpop.f32.mrf.mxu3  ;;  %v1031_v37 = vadd.f32 %v1030_v35, %v982_v33  ;;  %v983_v39 = vpop.f32.mrf.mxu1  ;;  %v1681_v33 = vld [vmem:[%s2947_s0 + $0x150] sm:$0xf] }
  0xc8   :  { %v984_v40 = vadd.f32 %v983_v39, %v934_v38  ;;  %v2061_v35 = vld [vmem:[%s2947_s0 + $0x16c] sm:$0xf0]  ;;  %v1689_v38 = vld [vmem:[%s2947_s0 + $0x158] sm:$0xf] }
  0xc9   :  { %v2636_v41 = vadd.f32 %v1079_v36, %v1031_v37  ;;  %v2057_v36 = vld [vmem:[%s2947_s0 + $0x154] sm:$0xf]  ;;  %v2062_v39 = vld [vmem:[%s2947_s0 + $0x174] sm:$0xf0]  ;;  %v1682_v45 = vor.u32 %v2061_v35, %v1681_v33 }
  0xca   :  { %v1683_v37 = vld [vmem:[%s2947_s0 + $0x170] sm:$0xf0]  ;;  %v1753_v35 = vld [vmem:[%s2947_s0 + $0x1d8] sm:$0xf] }
  0xcb   :  { %v1686_v46 = vor.u32 %v2057_v36, %v1683_v37  ;;  %v1747_v33 = vld [vmem:[%s2947_s0 + $0x1f0] sm:$0xf0]  ;;  %v2078_v36 = vld [vmem:[%s2947_s0 + $0x1f4] sm:$0xf0]  ;;  %v2074_v37 = vld [vmem:[%s2947_s0 + $0x1dc] sm:$0xf] }
  0xce   :  { %v1032_v50 = vpop.f32.mrf.mxu2  ;;  %v937_v56 = vpop.f32.mrf.mxu0 }
  0xcf   :  { %v1081_v51 = vpop.f32.mrf.mxu3  ;;  %v1033_v55 = vadd.f32 %v1032_v50, %v984_v40  ;;  %v986_v57 = vpop.f32.mrf.mxu1  ;;  %v2058_v40 = vld [vmem:[%s2947_s0 + $0x15c] sm:$0xf]  ;;  %v1690_v50 = vor.u32 %v2062_v39, %v1689_v38 }
  0xd0   :  { %v987_v60 = vadd.f32 %v986_v57, %v937_v56  ;;  %v1755_v38 = vld [vmem:[%s2947_s0 + $0x1f8] sm:$0xf0] }
  0xd1   :  { %v2662_v61 = vadd.f32 %v1081_v51, %v1033_v55  ;;  %1132 = vmatmul.bf16.gmra.mxu0 %v1618_v52  ;;  %v1694_v51 = vor.u32 %v2058_v40, %v1691_v42 }
  0xd2   :  { %1181 = vmatmul.bf16.gmra.mxu1 %v1622_v54 }
  0xd3   :  { %1230 = vmatmul.bf16.gmra.mxu2 %v1626_v58 }
  0xd4   :  { %1279 = vmatmul.bf16.gmra.mxu3 %v1630_v59 }
  0xd6   :  { %v1035_v62 = vpop.f32.mrf.mxu2  ;;  %v939_v1 = vpop.f32.mrf.mxu0 }
  0xd7   :  { %v1084_v63 = vpop.f32.mrf.mxu3  ;;  %v1036_v0 = vadd.f32 %v1035_v62, %v987_v60  ;;  %v988_v2 = vpop.f32.mrf.mxu1 }
  0xd8   :  { %v989_v3 = vadd.f32 %v988_v2, %v939_v1  ;;  %v2065_v1 = vld [vmem:[%s2947_s0 + $0x194] sm:$0xf] }
  0xd9   :  { %v2664_v4 = vadd.f32 %v1084_v63, %v1036_v0  ;;  %v1713_v63 = vld [vmem:[%s2947_s0 + $0x190] sm:$0xf]  ;;  %v1715_v2 = vld [vmem:[%s2947_s0 + $0x1b0] sm:$0xf0] }
  0xda   :  { %v2069_v0 = vld [vmem:[%s2947_s0 + $0x1ac] sm:$0xf0]  ;;  %v1718_v12 = vor.u32 %v2065_v1, %v1715_v2 }
  0xdb   :  { %v1714_v11 = vor.u32 %v2069_v0, %v1713_v63 }
  0xde   :  { %v1037_v14 = vpop.f32.mrf.mxu2  ;;  %v942_v20 = vpop.f32.mrf.mxu0 }
  0xdf   :  { %v1086_v16 = vpop.f32.mrf.mxu3  ;;  %v1038_v19 = vadd.f32 %v1037_v14, %v989_v3  ;;  %v991_v21 = vpop.f32.mrf.mxu1  ;;  %v1721_v3 = vld [vmem:[%s2947_s0 + $0x198] sm:$0xf] }
  0xe0   :  { %v992_v24 = vadd.f32 %v991_v21, %v942_v20 }
  0xe1   :  { %v2690_v25 = vadd.f32 %v1086_v16, %v1038_v19  ;;  %1137 = vmatmul.bf16.gmra.mxu0 %v1650_v17  ;;  %v1722_v17 = vor.u32 %v2070_v5, %v1721_v3 }
  0xe2   :  { %1186 = vmatmul.bf16.gmra.mxu1 %v1654_v18  ;;  %v1726_v18 = vor.u32 %v2066_v6, %v1723_v7 }
  0xe3   :  { %1235 = vmatmul.bf16.gmra.mxu2 %v1658_v22 }
  0xe4   :  { %1284 = vmatmul.bf16.gmra.mxu3 %v1662_v23 }
  0xe6   :  { %v1040_v26 = vpop.f32.mrf.mxu2  ;;  %v944_v29 = vpop.f32.mrf.mxu0 }
  0xe7   :  { %v1089_v27 = vpop.f32.mrf.mxu3  ;;  %v1041_v28 = vadd.f32 %v1040_v26, %v992_v24  ;;  %v993_v30 = vpop.f32.mrf.mxu1 }
  0xe8   :  { %v994_v31 = vadd.f32 %v993_v30, %v944_v29  ;;  %v1745_v29 = vld [vmem:[%s2947_s0 + $0x1d0] sm:$0xf] }
  0xe9   :  { %v2692_v32 = vadd.f32 %v1089_v27, %v1041_v28  ;;  %v2077_v30 = vld [vmem:[%s2947_s0 + $0x1ec] sm:$0xf0] }
  0xea   :  { %v1746_v42 = vor.u32 %v2077_v30, %v1745_v29 }
  0xee   :  { %v1042_v43 = vpop.f32.mrf.mxu2  ;;  %v947_v48 = vpop.f32.mrf.mxu0 }
  0xef   :  { %v1091_v44 = vpop.f32.mrf.mxu3  ;;  %v1043_v47 = vadd.f32 %v1042_v43, %v994_v31  ;;  %v996_v49 = vpop.f32.mrf.mxu1  ;;  %v2073_v31 = vld [vmem:[%s2947_s0 + $0x1d4] sm:$0xf] }
  0xf0   :  { %v997_v52 = vadd.f32 %v996_v49, %v947_v48  ;;  %v1750_v43 = vor.u32 %v2073_v31, %v1747_v33  ;;  %v1758_v48 = vor.u32 %v2074_v37, %v1755_v38 }
  0xf1   :  { %v2718_v54 = vadd.f32 %v1091_v44, %v1043_v47  ;;  %1142 = vmatmul.bf16.gmra.mxu0 %v1682_v45  ;;  %v1754_v47 = vor.u32 %v2078_v36, %v1753_v35 }
  0xf2   :  { %1191 = vmatmul.bf16.gmra.mxu1 %v1686_v46 }
  0xf3   :  { %1240 = vmatmul.bf16.gmra.mxu2 %v1690_v50 }
  0xf4   :  { %1289 = vmatmul.bf16.gmra.mxu3 %v1694_v51 }
  0xf6   :  { %v1045_v55 = vpop.f32.mrf.mxu2  ;;  %v949_v58 = vpop.f32.mrf.mxu0 }
  0xf7   :  { %v1094_v56 = vpop.f32.mrf.mxu3  ;;  %v1046_v57 = vadd.f32 %v1045_v55, %v997_v52  ;;  %v998_v59 = vpop.f32.mrf.mxu1 }
  0xf8   :  { %v999_v60 = vadd.f32 %v998_v59, %v949_v58 }
  0xf9   :  { %v2720_v62 = vadd.f32 %v1094_v56, %v1046_v57 }
  0xfe   :  { %v1047_v9 = vpop.f32.mrf.mxu2  ;;  %v952_v14 = vpop.f32.mrf.mxu0 }
  0xff   :  { %v1096_v10 = vpop.f32.mrf.mxu3  ;;  %v1048_v13 = vadd.f32 %v1047_v9, %v999_v60  ;;  %v1001_v16 = vpop.f32.mrf.mxu1 }
 0x100   :  { %v1002_v19 = vadd.f32 %v1001_v16, %v952_v14 }
 0x101   :  { %v2746_v20 = vadd.f32 %v1096_v10, %v1048_v13  ;;  %1147 = vmatmul.bf16.gmra.mxu0 %v1714_v11 }
 0x102   :  { %1196 = vmatmul.bf16.gmra.mxu1 %v1718_v12 }
 0x103   :  { %1245 = vmatmul.bf16.gmra.mxu2 %v1722_v17 }
 0x104   :  { %1294 = vmatmul.bf16.gmra.mxu3 %v1726_v18 }
 0x106   :  { %v1050_v21 = vpop.f32.mrf.mxu2  ;;  %v954_v24 = vpop.f32.mrf.mxu0 }
 0x107   :  { %v1099_v22 = vpop.f32.mrf.mxu3  ;;  %v1051_v23 = vadd.f32 %v1050_v21, %v1002_v19  ;;  %v1003_v26 = vpop.f32.mrf.mxu1 }
 0x108   :  { %v1004_v27 = vadd.f32 %v1003_v26, %v954_v24 }
 0x109   :  { %v2748_v28 = vadd.f32 %v1099_v22, %v1051_v23 }
 0x10e   :  { %v1052_v39 = vpop.f32.mrf.mxu2  ;;  %v957_v45 = vpop.f32.mrf.mxu0 }
 0x10f   :  { %v1101_v40 = vpop.f32.mrf.mxu3  ;;  %v1053_v44 = vadd.f32 %v1052_v39, %v1004_v27  ;;  %v1006_v46 = vpop.f32.mrf.mxu1 }
 0x110   :  { %v1007_v49 = vadd.f32 %v1006_v46, %v957_v45 }
 0x111   :  { %v2774_v50 = vadd.f32 %v1101_v40, %v1053_v44  ;;  %1152 = vmatmul.bf16.gmra.mxu0 %v1746_v42 }
 0x112   :  { %1201 = vmatmul.bf16.gmra.mxu1 %v1750_v43 }
 0x113   :  { %1250 = vmatmul.bf16.gmra.mxu2 %v1754_v47 }
 0x114   :  { %1299 = vmatmul.bf16.gmra.mxu3 %v1758_v48 }
 0x116   :  { %v1055_v51 = vpop.f32.mrf.mxu2  ;;  %v959_v56 = vpop.f32.mrf.mxu0 }
 0x117   :  { %v1104_v52 = vpop.f32.mrf.mxu3  ;;  %v1056_v55 = vadd.f32 %v1055_v51, %v1007_v49  ;;  %v1008_v57 = vpop.f32.mrf.mxu1 }
 0x118   :  { %v1009_v58 = vadd.f32 %v1008_v57, %v959_v56 }
 0x119   :  { %v2776_v59 = vadd.f32 %v1104_v52, %v1056_v55 }
 0x11e   :  { %v1057_v60 = vpop.f32.mrf.mxu2  ;;  %v1118_v1 = vpop.f32.mrf.mxu0 }
 0x11f   :  { %v1106_v63 = vpop.f32.mrf.mxu3  ;;  %v1058_v0 = vadd.f32 %v1057_v60, %v1009_v58  ;;  %v1167_v2 = vpop.f32.mrf.mxu1  ;;  %v1119_v3 = vadd.f32 %v1118_v1, %v2580_v53 }
 0x121   :  { %v2779_v5 = vadd.f32 %v1106_v63, %v1058_v0  ;;  %v1168_v6 = vadd.f32 %v1167_v2, %v1119_v3 }
 0x126   :  { %v1216_v7 = vpop.f32.mrf.mxu2  ;;  %v1120_v11 = vpop.f32.mrf.mxu0 }
 0x127   :  { %v1265_v9 = vpop.f32.mrf.mxu3  ;;  %v1217_v10 = vadd.f32 %v1216_v7, %v1168_v6  ;;  %v1169_v12 = vpop.f32.mrf.mxu1  ;;  %v1121_v13 = vadd.f32 %v1120_v11, %v2606_v8 }
 0x129   :  { %v2782_v14 = vadd.f32 %v1265_v9, %v1217_v10  ;;  %v1170_v16 = vadd.f32 %v1169_v12, %v1121_v13 }
 0x12b   :  { %v1327_v0 = vmul.f32 %v2782_v14, %v2782_v14 }
 0x12e   :  { %v1218_v17 = vpop.f32.mrf.mxu2  ;;  %v1123_v21 = vpop.f32.mrf.mxu0 }
 0x12f   :  { %v1267_v18 = vpop.f32.mrf.mxu3  ;;  %v1219_v19 = vadd.f32 %v1218_v17, %v1170_v16  ;;  %v1172_v22 = vpop.f32.mrf.mxu1  ;;  %v1124_v53 = vadd.f32 %v1123_v21, %v2608_v15 }
 0x131   :  { %v2785_v23 = vadd.f32 %v1267_v18, %v1219_v19  ;;  %v1173_v24 = vadd.f32 %v1172_v22, %v1124_v53 }
 0x133   :  { %v1305_v3 = vadd.f32 %v2785_v23, %v2782_v14 }
 0x136   :  { %v1221_v26 = vpop.f32.mrf.mxu2  ;;  %v1125_v30 = vpop.f32.mrf.mxu0 }
 0x137   :  { %v1270_v27 = vpop.f32.mrf.mxu3  ;;  %v1222_v29 = vadd.f32 %v1221_v26, %v1173_v24  ;;  %v1174_v31 = vpop.f32.mrf.mxu1  ;;  %v1126_v8 = vadd.f32 %v1125_v30, %v2634_v34 }
 0x139   :  { %v2788_v33 = vadd.f32 %v1270_v27, %v1222_v29  ;;  %v1175_v35 = vadd.f32 %v1174_v31, %v1126_v8 }
 0x13b   :  { %v1306_v10 = vadd.f32 %v1305_v3, %v2788_v33 }
 0x13e   :  { %v1223_v36 = vpop.f32.mrf.mxu2  ;;  %v1128_v39 = vpop.f32.mrf.mxu0 }
 0x13f   :  { %v1272_v37 = vpop.f32.mrf.mxu3  ;;  %v1224_v38 = vadd.f32 %v1223_v36, %v1175_v35  ;;  %v1177_v40 = vpop.f32.mrf.mxu1  ;;  %v1129_v15 = vadd.f32 %v1128_v39, %v2636_v41  ;;  %v1328_v41 = vmul.f32 %v2785_v23, %v2785_v23 }
 0x141   :  { %v2791_v42 = vadd.f32 %v1272_v37, %v1224_v38  ;;  %v1178_v43 = vadd.f32 %v1177_v40, %v1129_v15  ;;  %v1343_v9 = vadd.f32 %v1328_v41, %v1327_v0 }
 0x143   :  { %v1330_v11 = vmul.f32 %v2791_v42, %v2791_v42  ;;  %v1307_v17 = vadd.f32 %v1306_v10, %v2791_v42 }
 0x146   :  { %v1226_v44 = vpop.f32.mrf.mxu2  ;;  %v1130_v47 = vpop.f32.mrf.mxu0 }
 0x147   :  { %v1275_v45 = vpop.f32.mrf.mxu3  ;;  %v1227_v46 = vadd.f32 %v1226_v44, %v1178_v43  ;;  %v1179_v48 = vpop.f32.mrf.mxu1  ;;  %v1131_v52 = vadd.f32 %v1130_v47, %v2662_v61  ;;  %v1329_v61 = vmul.f32 %v2788_v33, %v2788_v33 }
 0x149   :  { %v2793_v49 = vadd.f32 %v1275_v45, %v1227_v46  ;;  %v1180_v58 = vadd.f32 %v1179_v48, %v1131_v52  ;;  %v1344_v16 = vadd.f32 %v1343_v9, %v1329_v61 }
 0x14b   :  { %v1331_v18 = vmul.f32 %v2793_v49, %v2793_v49  ;;  %v1345_v21 = vadd.f32 %v1344_v16, %v1330_v11  ;;  %v1308_v22 = vadd.f32 %v1307_v17, %v2793_v49 }
 0x14d   :  { %v1346_v29 = vadd.f32 %v1345_v21, %v1331_v18 }
 0x14e   :  { %v1228_v34 = vpop.f32.mrf.mxu2  ;;  %v1133_v55 = vpop.f32.mrf.mxu0 }
 0x14f   :  { %v1277_v51 = vpop.f32.mrf.mxu3  ;;  %v1182_v56 = vpop.f32.mrf.mxu1  ;;  %v1134_v57 = vadd.f32 %v1133_v55, %v2664_v4  ;;  %v1229_v60 = vadd.f32 %v1228_v34, %v1180_v58 }
 0x151   :  { %v1183_v63 = vadd.f32 %v1182_v56, %v1134_v57  ;;  %v2808_v12 = vadd.f32 %v1277_v51, %v1229_v60 }
 0x153   :  { %v1332_v53 = vmul.f32 %v2808_v12, %v2808_v12 }
 0x155   :  { %v1347_v36 = vadd.f32 %v1346_v29, %v1332_v53 }
 0x156   :  { %v1231_v1 = vpop.f32.mrf.mxu2  ;;  %v1135_v7 = vpop.f32.mrf.mxu0 }
 0x157   :  { %v1280_v2 = vpop.f32.mrf.mxu3  ;;  %v1232_v6 = vadd.f32 %v1231_v1, %v1183_v63  ;;  %v1184_v4 = vpop.f32.mrf.mxu1  ;;  %v1136_v13 = vadd.f32 %v1135_v7, %v2690_v25  ;;  %v1309_v25 = vadd.f32 %v1308_v22, %v2808_v12 }
 0x159   :  { %v2814_v19 = vadd.f32 %v1280_v2, %v1232_v6  ;;  %v1185_v24 = vadd.f32 %v1184_v4, %v1136_v13 }
 0x15b   :  { %v1333_v30 = vmul.f32 %v2814_v19, %v2814_v19  ;;  %v1310_v37 = vadd.f32 %v1309_v25, %v2814_v19 }
 0x15d   :  { %v1348_v40 = vadd.f32 %v1347_v36, %v1333_v30 }
 0x15e   :  { %v1233_v26 = vpop.f32.mrf.mxu2  ;;  %v1138_v8 = vpop.f32.mrf.mxu0 }
 0x15f   :  { %v1282_v27 = vpop.f32.mrf.mxu3  ;;  %v1234_v31 = vadd.f32 %v1233_v26, %v1185_v24  ;;  %v1187_v35 = vpop.f32.mrf.mxu1  ;;  %v1139_v39 = vadd.f32 %v1138_v8, %v2692_v32 }
 0x161   :  { %v2823_v38 = vadd.f32 %v1282_v27, %v1234_v31  ;;  %v1188_v45 = vadd.f32 %v1187_v35, %v1139_v39 }
 0x163   :  { %v1311_v15 = vadd.f32 %v1310_v37, %v2823_v38  ;;  %v1334_v43 = vmul.f32 %v2823_v38, %v2823_v38 }
 0x165   :  { %v1349_v44 = vadd.f32 %v1348_v40, %v1334_v43 }
 0x166   :  { %v1236_v46 = vpop.f32.mrf.mxu2  ;;  %v1140_v34 = vpop.f32.mrf.mxu0 }
 0x167   :  { %v1285_v47 = vpop.f32.mrf.mxu3  ;;  %v1237_v48 = vadd.f32 %v1236_v46, %v1188_v45  ;;  %v1189_v51 = vpop.f32.mrf.mxu1  ;;  %v1141_v55 = vadd.f32 %v1140_v34, %v2718_v54 }
 0x169   :  { %v2829_v52 = vadd.f32 %v1285_v47, %v1237_v48  ;;  %v1190_v58 = vadd.f32 %v1189_v51, %v1141_v55 }
 0x16b   :  { %v1312_v56 = vadd.f32 %v1311_v15, %v2829_v52  ;;  %v1335_v32 = vmul.f32 %v2829_v52, %v2829_v52 }
 0x16d   :  { %v1350_v57 = vadd.f32 %v1349_v44, %v1335_v32 }
 0x16e   :  { %v1238_v41 = vpop.f32.mrf.mxu2  ;;  %v1143_v0 = vpop.f32.mrf.mxu0 }
 0x16f   :  { %v1287_v60 = vpop.f32.mrf.mxu3  ;;  %v1239_v63 = vadd.f32 %v1238_v41, %v1190_v58  ;;  %v1192_v1 = vpop.f32.mrf.mxu1  ;;  %v1144_v3 = vadd.f32 %v1143_v0, %v2720_v62 }
 0x171   :  { %v2835_v2 = vadd.f32 %v1287_v60, %v1239_v63  ;;  %v1193_v7 = vadd.f32 %v1192_v1, %v1144_v3 }
 0x173   :  { %v1313_v61 = vadd.f32 %v1312_v56, %v2835_v2  ;;  %v1336_v54 = vmul.f32 %v2835_v2, %v2835_v2 }
 0x175   :  { %v1351_v6 = vadd.f32 %v1350_v57, %v1336_v54 }
 0x176   :  { %v1241_v4 = vpop.f32.mrf.mxu2  ;;  %v1145_v11 = vpop.f32.mrf.mxu0 }
 0x177   :  { %v1290_v9 = vpop.f32.mrf.mxu3  ;;  %v1242_v10 = vadd.f32 %v1241_v4, %v1193_v7  ;;  %v1194_v13 = vpop.f32.mrf.mxu1  ;;  %v1146_v17 = vadd.f32 %v1145_v11, %v2746_v20 }
 0x179   :  { %v2841_v16 = vadd.f32 %v1290_v9, %v1242_v10  ;;  %v1195_v22 = vadd.f32 %v1194_v13, %v1146_v17 }
 0x17b   :  { %v1314_v18 = vadd.f32 %v1313_v61, %v2841_v16  ;;  %v1337_v62 = vmul.f32 %v2841_v16, %v2841_v16 }
 0x17d   :  { %v1352_v21 = vadd.f32 %v1351_v6, %v1337_v62 }
 0x17e   :  { %v1243_v53 = vpop.f32.mrf.mxu2  ;;  %v1148_v27 = vpop.f32.mrf.mxu0 }
 0x17f   :  { %v1292_v24 = vpop.f32.mrf.mxu3  ;;  %v1244_v26 = vadd.f32 %v1243_v53, %v1195_v22  ;;  %v1197_v29 = vpop.f32.mrf.mxu1  ;;  %v1149_v30 = vadd.f32 %v1148_v27, %v2748_v28 }
 0x181   :  { %v2847_v25 = vadd.f32 %v1292_v24, %v1244_v26  ;;  %v1198_v35 = vadd.f32 %v1197_v29, %v1149_v30 }
 0x183   :  { %v1315_v31 = vadd.f32 %v1314_v18, %v2847_v25  ;;  %v1338_v20 = vmul.f32 %v2847_v25, %v2847_v25 }
 0x185   :  { %v1353_v8 = vadd.f32 %v1352_v21, %v1338_v20 }
 0x186   :  { %v1246_v36 = vpop.f32.mrf.mxu2  ;;  %v1150_v40 = vpop.f32.mrf.mxu0 }
 0x187   :  { %v1295_v37 = vpop.f32.mrf.mxu3  ;;  %v1247_v39 = vadd.f32 %v1246_v36, %v1198_v35  ;;  %v1199_v15 = vpop.f32.mrf.mxu1  ;;  %v1151_v44 = vadd.f32 %v1150_v40, %v2774_v50 }
 0x189   :  { %v2853_v43 = vadd.f32 %v1295_v37, %v1247_v39  ;;  %v1200_v47 = vadd.f32 %v1199_v15, %v1151_v44 }
 0x18b   :  { %v1316_v45 = vadd.f32 %v1315_v31, %v2853_v43  ;;  %v1339_v28 = vmul.f32 %v2853_v43, %v2853_v43 }
 0x18d   :  { %v1354_v46 = vadd.f32 %v1353_v8, %v1339_v28 }
 0x18e   :  { %v1248_v48 = vpop.f32.mrf.mxu2  ;;  %v1153_v55 = vpop.f32.mrf.mxu0 }
 0x18f   :  { %v1297_v34 = vpop.f32.mrf.mxu3  ;;  %v1249_v51 = vadd.f32 %v1248_v48, %v1200_v47  ;;  %v1154_v32 = vadd.f32 %v1153_v55, %v2776_v59  ;;  %v1202_v57 = vpop.f32.mrf.mxu1 }
 0x191   :  { %v2859_v56 = vadd.f32 %v1297_v34, %v1249_v51  ;;  %v1203_v60 = vadd.f32 %v1202_v57, %v1154_v32 }
 0x193   :  { %v1317_v58 = vadd.f32 %v1316_v45, %v2859_v56  ;;  %v1340_v50 = vmul.f32 %v2859_v56, %v2859_v56 }
 0x195   :  { %v1355_v41 = vadd.f32 %v1354_v46, %v1340_v50 }
 0x196   :  { %v1251_v63 = vpop.f32.mrf.mxu2  ;;  %v1155_v3 = vpop.f32.mrf.mxu0 }
 0x197   :  { %v1300_v0 = vpop.f32.mrf.mxu3  ;;  %v1252_v1 = vadd.f32 %v1251_v63, %v1203_v60  ;;  %v1156_v54 = vadd.f32 %v1155_v3, %v2779_v5  ;;  %v1204_v7 = vpop.f32.mrf.mxu1 }
 0x199   :  { %v2865_v61 = vadd.f32 %v1300_v0, %v1252_v1  ;;  %v1205_v9 = vadd.f32 %v1204_v7, %v1156_v54 }
 0x19b   :  { %v1318_v6 = vadd.f32 %v1317_v58, %v2865_v61  ;;  %v1341_v59 = vmul.f32 %v2865_v61, %v2865_v61 }
 0x19d   :  { %v1356_v4 = vadd.f32 %v1355_v41, %v1341_v59 }
 0x19e   :  { %v1253_v10 = vpop.f32.mrf.mxu2 }
 0x19f   :  { %v1254_v11 = vadd.f32 %v1253_v10, %v1205_v9  ;;  %v1302_v13 = vpop.f32.mrf.mxu3 }
 0x1a1   :  { %v2871_v17 = vadd.f32 %v1302_v13, %v1254_v11 }
 0x1a3   :  { %v1319_v18 = vadd.f32 %v1318_v6, %v2871_v17  ;;  %v1342_v62 = vmul.f32 %v2871_v17, %v2871_v17 }
 0x1a5   :  { %v1320_v21 = vrot.slane %v1319_v18, 4  ;;  %v1357_v5 = vadd.f32 %v1356_v4, %v1342_v62 }
 0x1a7   :  { %v1321_v22 = vadd.f32 %v1320_v21, %v1319_v18  ;;  %v1358_v53 = vrot.slane %v1357_v5, 4  ;;  %v2144_v18 = vld [vmem:[%s2949_s3] ss:$0 sm:$0xff] }
 0x1a9   :  { %v1322_v24 = vrot.slane %v1321_v22, 2  ;;  %v1359_v26 = vadd.f32 %v1358_v53, %v1357_v5 }
 0x1ab   :  { %v1323_v27 = vadd.f32 %v1322_v24, %v1321_v22  ;;  %v1360_v29 = vrot.slane %v1359_v26, 2 }
 0x1ad   :  { %v1324_v30 = vrot.slane %v1323_v27, 1  ;;  %v1361_v31 = vadd.f32 %v1360_v29, %v1359_v26 }
 0x1af   :  { %v1325_v20 = vadd.f32 %v1324_v30, %v1323_v27  ;;  %v1362_v8 = vrot.slane %v1361_v31, 1 }
 0x1b1   :  { %v1326_v35 = vmul.f32 0.0078125, %v1325_v20  ;;  %v1363_v36 = vadd.f32 %v1362_v8, %v1361_v31 }
 0x1b3   :  { %v1364_v37 = vmul.f32 0.0078125, %v1363_v36  ;;  %v1365_v39 = vmul.f32 %v1326_v35, %v1326_v35  ;;  %v1374_v15 = vsub.f32 %v2814_v19, %v1326_v35  ;;  %v1375_v44 = vsub.f32 %v2823_v38, %v1326_v35 }
 0x1b4   :  { %v1376_v45 = vsub.f32 %v2829_v52, %v1326_v35  ;;  %v1377_v28 = vsub.f32 %v2835_v2, %v1326_v35  ;;  %v1378_v46 = vsub.f32 %v2841_v16, %v1326_v35  ;;  %v1379_v47 = vsub.f32 %v2847_v25, %v1326_v35 }
 0x1b5   :  { %v1366_v40 = vsub.f32 %v1364_v37, %v1365_v39  ;;  %v1380_v48 = vsub.f32 %v2853_v43, %v1326_v35  ;;  %v1381_v51 = vsub.f32 %v2859_v56, %v1326_v35  ;;  %v1382_v55 = vsub.f32 %v2865_v61, %v1326_v35 }
 0x1b6   :  { %v1383_v32 = vsub.f32 %v2871_v17, %v1326_v35  ;;  %v1368_v25 = vsub.f32 %v2782_v14, %v1326_v35  ;;  %v1369_v43 = vsub.f32 %v2785_v23, %v1326_v35  ;;  %v1370_v56 = vsub.f32 %v2788_v33, %v1326_v35  ;;  %v2143_v14 = vld [vmem:[%s2948_s2] ss:$0 sm:$0xff] }
 0x1b7   :  { %v1367_v34 = vmax.f32 %v1366_v40, 0.0  ;;  %v1371_v50 = vsub.f32 %v2791_v42, %v1326_v35  ;;  %v1372_v41 = vsub.f32 %v2793_v49, %v1326_v35  ;;  %v1373_v60 = vsub.f32 %v2808_v12, %v1326_v35 }
 0x1b9   :  { %v1384_v19 = vadd.f32 1e-05, %v1367_v34 }
 0x1bb   :  { %2145 = vrsqrt.f32 %v1384_v19  ;;  %vm1391_vm1 = vweird.f32 %v1384_v19 }
 0x1c1   :  { %v2146_v38 = vpop.eup %2145 }
 0x1c2   :  { %v1386_v57 = vmul.f32 %v2146_v38, %v1384_v19  ;;  %vm1392_vm0 = vweird.f32 %v2146_v38 }
 0x1c3   :  { %vm1393_vm2 = vmor %vm1391_vm1, %vm1392_vm0 }
 0x1c4   :  { %v1387_v52 = vmul.f32 %v2146_v38, %v1386_v57 }
 0x1c6   :  { %v1388_v58 = vmul.f32 0.5, %v1387_v52 }
 0x1c8   :  { %v1389_v2 = vsub.f32 1.5, %v1388_v58 }
 0x1ca   :  { %v1390_v16 = vmul.f32 %v2146_v38, %v1389_v2 }
 0x1cc   :  { %v1394_v63 = vsel %vm1393_vm2, %v2146_v38, %v1390_v16 }
 0x1cd   :  { %v1395_v0 = vmul.f32 %v1394_v63, %v1368_v25  ;;  %v1396_v1 = vmul.f32 %v1394_v63, %v1369_v43  ;;  %v1397_v3 = vmul.f32 %v1394_v63, %v1370_v56  ;;  %v1398_v61 = vmul.f32 %v1394_v63, %v1371_v50 }
 0x1ce   :  { %v1399_v54 = vmul.f32 %v1394_v63, %v1372_v41  ;;  %v1400_v23 = vmul.f32 %v1394_v63, %v1373_v60  ;;  %v1401_v6 = vmul.f32 %v1394_v63, %v1374_v15  ;;  %v1402_v33 = vmul.f32 %v1394_v63, %v1375_v44 }
 0x1cf   :  { %v1403_v59 = vmul.f32 %v1394_v63, %v1376_v45  ;;  %v1404_v42 = vmul.f32 %v1394_v63, %v1377_v28  ;;  %v1405_v7 = vmul.f32 %v1394_v63, %v1378_v46  ;;  %v1406_v4 = vmul.f32 %v1394_v63, %v1379_v47 }
 0x1d0   :  { %v1407_v49 = vmul.f32 %v1394_v63, %v1380_v48  ;;  %v1408_v9 = vmul.f32 %v1394_v63, %v1381_v51  ;;  %v1409_v12 = vmul.f32 %v1394_v63, %v1382_v55  ;;  %v1410_v10 = vmul.f32 %v1394_v63, %v1383_v32 }
 0x1d1   :  { %v1415_v11 = vmul.f32 %v2143_v14, %v1395_v0  ;;  %v1416_v13 = vmul.f32 %v2143_v14, %v1396_v1  ;;  %v1417_v17 = vmul.f32 %v2143_v14, %v1397_v3  ;;  %v1418_v62 = vmul.f32 %v2143_v14, %v1398_v61 }
 0x1d2   :  { %v1419_v21 = vmul.f32 %v2143_v14, %v1399_v54  ;;  %v1420_v5 = vmul.f32 %v2143_v14, %v1400_v23  ;;  %v1421_v22 = vmul.f32 %v2143_v14, %v1401_v6  ;;  %v1422_v27 = vmul.f32 %v2143_v14, %v1402_v33 }
 0x1d3   :  { %v1435_v53 = vadd.f32 %v2144_v18, %v1415_v11  ;;  %v1436_v24 = vadd.f32 %v2144_v18, %v1416_v13  ;;  %v1437_v26 = vadd.f32 %v2144_v18, %v1417_v17  ;;  %v1438_v29 = vadd.f32 %v2144_v18, %v1418_v62 }
 0x1d4   :  { %v1423_v30 = vmul.f32 %v2143_v14, %v1403_v59  ;;  %v1439_v31 = vadd.f32 %v2144_v18, %v1419_v21  ;;  %v1424_v20 = vmul.f32 %v2143_v14, %v1404_v42  ;;  %v1425_v8 = vmul.f32 %v2143_v14, %v1405_v7 }
 0x1d5   :  { %v1440_v35 = vadd.f32 %v2144_v18, %v1420_v5  ;;  %v1441_v36 = vadd.f32 %v2144_v18, %v1421_v22  ;;  %v1451_v37 = vmax.f32 %v1435_v53, 0.0  ;;  %v1452_v39 = vmax.f32 %v1436_v24, 0.0 }
 0x1d6   :  { %v1453_v40 = vmax.f32 %v1437_v26, 0.0  ;;  %v1426_v15 = vmul.f32 %v2143_v14, %v1406_v4  ;;  %v1442_v44 = vadd.f32 %v2144_v18, %v1422_v27  ;;  %v1454_v45 = vmax.f32 %v1438_v29, 0.0 }
 0x1d7   :  { %v1427_v28 = vmul.f32 %v2143_v14, %v1407_v49  ;;  %v1428_v46 = vmul.f32 %v2143_v14, %v1408_v9  ;;  %v1443_v47 = vadd.f32 %v2144_v18, %v1423_v30  ;;  %v1455_v48 = vmax.f32 %v1439_v31, 0.0 }
 0x1d8   :  { %v1429_v34 = vmul.f32 %v2143_v14, %v1409_v12  ;;  %v1444_v51 = vadd.f32 %v2144_v18, %v1424_v20  ;;  %v1445_v55 = vadd.f32 %v2144_v18, %v1425_v8  ;;  %v1456_v32 = vmax.f32 %v1440_v35, 0.0 }
 0x1d9   :  { %v1457_v19 = vmax.f32 %v1441_v36, 0.0  ;;  %v1467_v38 = vmin.f32 %v1451_v37, 6.0  ;;  %v1468_v57 = vmin.f32 %v1452_v39, 6.0  ;;  %v1469_v52 = vmin.f32 %v1453_v40, 6.0 }
 0x1da   :  { %v1430_v58 = vmul.f32 %v2143_v14, %v1410_v10  ;;  %v1446_v2 = vadd.f32 %v2144_v18, %v1426_v15  ;;  %v1458_v16 = vmax.f32 %v1442_v44, 0.0  ;;  %v1470_v25 = vmin.f32 %v1454_v45, 6.0 }
 0x1db   :  { %v1447_v43 = vadd.f32 %v2144_v18, %v1427_v28  ;;  %v1459_v56 = vmax.f32 %v1443_v47, 0.0  ;;  %v1471_v50 = vmin.f32 %v1455_v48, 6.0  ;;  %1483 = vst [vmem:[%s2950_s4] sm:$0xff] %v1467_v38  ;;  %v1448_v41 = vadd.f32 %v2144_v18, %v1428_v46 }
 0x1dc   :  { %v1460_v60 = vmax.f32 %v1444_v51, 0.0  ;;  %v1472_v63 = vmin.f32 %v1456_v32, 6.0  ;;  %1484 = vst [vmem:[%s2950_s4 + $0x8] sm:$0xff] %v1468_v57  ;;  %v1449_v0 = vadd.f32 %v2144_v18, %v1429_v34  ;;  %v1461_v1 = vmax.f32 %v1445_v55, 0.0 }
 0x1dd   :  { %v1473_v3 = vmin.f32 %v1457_v19, 6.0  ;;  %1485 = vst [vmem:[%s2950_s4 + $0x10] sm:$0xff] %v1469_v52  ;;  %v1450_v61 = vadd.f32 %v2144_v18, %v1430_v58  ;;  %v1462_v14 = vmax.f32 %v1446_v2, 0.0  ;;  %v1474_v54 = vmin.f32 %v1458_v16, 6.0 }
 0x1de   :  { %1486 = vst [vmem:[%s2950_s4 + $0x18] sm:$0xff] %v1470_v25  ;;  %v1463_v23 = vmax.f32 %v1447_v43, 0.0  ;;  %v1475_v6 = vmin.f32 %v1459_v56, 6.0  ;;  %v1464_v33 = vmax.f32 %v1448_v41, 0.0  ;;  %v1476_v59 = vmin.f32 %v1460_v60, 6.0 }
 0x1df   :  { %1487 = vst [vmem:[%s2950_s4 + $0x20] sm:$0xff] %v1471_v50  ;;  %v1465_v42 = vmax.f32 %v1449_v0, 0.0  ;;  %v1477_v7 = vmin.f32 %v1461_v1, 6.0  ;;  %v1466_v4 = vmax.f32 %v1450_v61, 0.0  ;;  %v1478_v49 = vmin.f32 %v1462_v14, 6.0 }
 0x1e0   :  { %1488 = vst [vmem:[%s2950_s4 + $0x28] sm:$0xff] %v1472_v63  ;;  %v1479_v9 = vmin.f32 %v1463_v23, 6.0  ;;  %v1480_v12 = vmin.f32 %v1464_v33, 6.0 }
 0x1e1   :  { %1489 = vst [vmem:[%s2950_s4 + $0x30] sm:$0xff] %v1473_v3  ;;  %v1481_v10 = vmin.f32 %v1465_v42, 6.0  ;;  %v1482_v11 = vmin.f32 %v1466_v4, 6.0 }
 0x1e2   :  { %1490 = vst [vmem:[%s2950_s4 + $0x38] sm:$0xff] %v1474_v54 }
 0x1e3   :  { %1491 = vst [vmem:[%s2950_s4 + $0x40] sm:$0xff] %v1475_v6 }
 0x1e4   :  { %1492 = vst [vmem:[%s2950_s4 + $0x48] sm:$0xff] %v1476_v59 }
 0x1e5   :  { %1493 = vst [vmem:[%s2950_s4 + $0x50] sm:$0xff] %v1477_v7 }
 0x1e6   :  { %1494 = vst [vmem:[%s2950_s4 + $0x58] sm:$0xff] %v1478_v49 }
 0x1e7   :  { %1495 = vst [vmem:[%s2950_s4 + $0x60] sm:$0xff] %v1479_v9 }
 0x1e8   :  { %1496 = vst [vmem:[%s2950_s4 + $0x68] sm:$0xff] %v1480_v12 }
 0x1e9   :  { %1497 = vst [vmem:[%s2950_s4 + $0x70] sm:$0xff] %v1481_v10 }
 0x1ea   :  { %1498 = vst [vmem:[%s2950_s4 + $0x78] sm:$0xff] %v1482_v11 }

// kernel: _discriminator_forward.7
= control target key start
LH: loop header
LB: loop body
LE: loop exit
PB: predicated region body
PF: predicated region fallthrough
CT: control target
= control target key end

     0   :  { %s3477_s1 = inlined_call_operand.vmem [shape: bf16[1152,256], index: 1, kind: input, shape index: {}]   ;;  %s3478_s0 = inlined_call_operand.vmem [shape: bf16[32,1152], index: 0, kind: input, shape index: {}]   ;;  %s3479_s2 = inlined_call_operand.vmem [shape: f32[1,256], index: 2, kind: input, shape index: {}]   ;;  %s3480_s3 = inlined_call_operand.vmem [shape: f32[1,256], index: 3, kind: input, shape index: {}]   ;;  %s3481_s4 = inlined_call_operand.vmem [shape: f32[32,256], index: 4, kind: output, shape index: {}]  }
   0x1   :  { %v1613_v0 = vld [vmem:[%s3477_s1 + $0x70] sm:$0xf]  ;;  %v2164_v1 = vld [vmem:[%s3477_s1 + $0x74] sm:$0xf0]  ;;  %v1605_v11 = vld [vmem:[%s3477_s1 + $0x60] sm:$0xf] }
   0x2   :  { %v1677_v2 = vld [vmem:[%s3477_s1 + $0xf0] sm:$0xf]  ;;  %v1614_v3 = vor.u32 %v2164_v1, %v1613_v0  ;;  %v2180_v4 = vld [vmem:[%s3477_s1 + $0xf4] sm:$0xf0]  ;;  %v2162_v13 = vld [vmem:[%s3477_s1 + $0x64] sm:$0xf0] }
   0x3   :  { %v1741_v5 = vld [vmem:[%s3477_s1 + $0x170] sm:$0xf]  ;;  %v2196_v6 = vld [vmem:[%s3477_s1 + $0x174] sm:$0xf0]  ;;  %v1678_v7 = vor.u32 %v2180_v4, %v1677_v2  ;;  %v1669_v14 = vld [vmem:[%s3477_s1 + $0xe0] sm:$0xf]  ;;  %v1606_v16 = vor.u32 %v2162_v13, %v1605_v11 }
   0x4   :  { %v1742_v8 = vor.u32 %v2196_v6, %v1741_v5  ;;  %v1805_v9 = vld [vmem:[%s3477_s1 + $0x1f0] sm:$0xf]  ;;  %v2212_v10 = vld [vmem:[%s3477_s1 + $0x1f4] sm:$0xf0]  ;;  %993 = vmatpush.bf16.msra.mxu0 %v1614_v3  ;;  %v2178_v15 = vld [vmem:[%s3477_s1 + $0xe4] sm:$0xf0] }
   0x5   :  { %v1806_v12 = vor.u32 %v2212_v10, %v1805_v9  ;;  %1012 = vmatpush.bf16.msra.mxu1 %v1678_v7  ;;  %v1670_v17 = vor.u32 %v2178_v15, %v1669_v14  ;;  %v1733_v18 = vld [vmem:[%s3477_s1 + $0x160] sm:$0xf]  ;;  %v2194_v19 = vld [vmem:[%s3477_s1 + $0x164] sm:$0xf0]  ;;  %v1597_v23 = vld [vmem:[%s3477_s1 + $0x50] sm:$0xf] }
   0x6   :  { %1031 = vmatpush.bf16.msra.mxu2 %v1742_v8  ;;  %v1797_v20 = vld [vmem:[%s3477_s1 + $0x1e0] sm:$0xf]  ;;  %v1734_v21 = vor.u32 %v2194_v19, %v1733_v18  ;;  %v2210_v22 = vld [vmem:[%s3477_s1 + $0x1e4] sm:$0xf0]  ;;  %v2160_v24 = vld [vmem:[%s3477_s1 + $0x54] sm:$0xf0] }
   0x7   :  { %1050 = vmatpush.bf16.msra.mxu3 %v1806_v12  ;;  %v1798_v25 = vor.u32 %v2210_v22, %v1797_v20  ;;  %v1661_v26 = vld [vmem:[%s3477_s1 + $0xd0] sm:$0xf]  ;;  %v2176_v27 = vld [vmem:[%s3477_s1 + $0xd4] sm:$0xf0]  ;;  %v1598_v29 = vor.u32 %v2160_v24, %v1597_v23  ;;  %v1589_v35 = vld [vmem:[%s3477_s1 + $0x40] sm:$0xf] }
   0x8   :  { %v1725_v28 = vld [vmem:[%s3477_s1 + $0x150] sm:$0xf]  ;;  %994 = vmatpush.bf16.msra.mxu0 %v1606_v16  ;;  %v2192_v30 = vld [vmem:[%s3477_s1 + $0x154] sm:$0xf0]  ;;  %v1662_v33 = vor.u32 %v2176_v27, %v1661_v26  ;;  %v2158_v36 = vld [vmem:[%s3477_s1 + $0x44] sm:$0xf0] }
   0x9   :  { %v1789_v31 = vld [vmem:[%s3477_s1 + $0x1d0] sm:$0xf]  ;;  %v2208_v32 = vld [vmem:[%s3477_s1 + $0x1d4] sm:$0xf0]  ;;  %1013 = vmatpush.bf16.msra.mxu1 %v1670_v17  ;;  %v1726_v34 = vor.u32 %v2192_v30, %v1725_v28  ;;  %v1653_v37 = vld [vmem:[%s3477_s1 + $0xc0] sm:$0xf]  ;;  %v1590_v44 = vor.u32 %v2158_v36, %v1589_v35 }
   0xa   :  { %1032 = vmatpush.bf16.msra.mxu2 %v1734_v21  ;;  %v1790_v38 = vor.u32 %v2208_v32, %v1789_v31  ;;  %v2174_v39 = vld [vmem:[%s3477_s1 + $0xc4] sm:$0xf0]  ;;  %v1717_v40 = vld [vmem:[%s3477_s1 + $0x140] sm:$0xf]  ;;  %v1581_v47 = vld [vmem:[%s3477_s1 + $0x30] sm:$0xf] }
   0xb   :  { %1051 = vmatpush.bf16.msra.mxu3 %v1798_v25  ;;  %v2190_v41 = vld [vmem:[%s3477_s1 + $0x144] sm:$0xf0]  ;;  %v1781_v42 = vld [vmem:[%s3477_s1 + $0x1c0] sm:$0xf]  ;;  %v1654_v45 = vor.u32 %v2174_v39, %v1653_v37  ;;  %v2156_v48 = vld [vmem:[%s3477_s1 + $0x34] sm:$0xf0] }
   0xc   :  { %v2206_v43 = vld [vmem:[%s3477_s1 + $0x1c4] sm:$0xf0]  ;;  %995 = vmatpush.bf16.msra.mxu0 %v1598_v29  ;;  %v1718_v46 = vor.u32 %v2190_v41, %v1717_v40  ;;  %v1645_v49 = vld [vmem:[%s3477_s1 + $0xb0] sm:$0xf]  ;;  %v2172_v51 = vld [vmem:[%s3477_s1 + $0xb4] sm:$0xf0]  ;;  %v1582_v56 = vor.u32 %v2156_v48, %v1581_v47 }
   0xd   :  { %1014 = vmatpush.bf16.msra.mxu1 %v1662_v33  ;;  %v1782_v50 = vor.u32 %v2206_v43, %v1781_v42  ;;  %v1709_v52 = vld [vmem:[%s3477_s1 + $0x130] sm:$0xf]  ;;  %v2188_v53 = vld [vmem:[%s3477_s1 + $0x134] sm:$0xf0]  ;;  %v1646_v57 = vor.u32 %v2172_v51, %v1645_v49  ;;  %v1573_v59 = vld [vmem:[%s3477_s1 + $0x20] sm:$0xf] }
   0xe   :  { %1033 = vmatpush.bf16.msra.mxu2 %v1726_v34  ;;  %v1773_v54 = vld [vmem:[%s3477_s1 + $0x1b0] sm:$0xf]  ;;  %v2204_v55 = vld [vmem:[%s3477_s1 + $0x1b4] sm:$0xf0]  ;;  %v1710_v58 = vor.u32 %v2188_v53, %v1709_v52  ;;  %v2154_v60 = vld [vmem:[%s3477_s1 + $0x24] sm:$0xf0] }
   0xf   :  { %1052 = vmatpush.bf16.msra.mxu3 %v1790_v38  ;;  %v1637_v61 = vld [vmem:[%s3477_s1 + $0xa0] sm:$0xf]  ;;  %v1774_v62 = vor.u32 %v2204_v55, %v1773_v54  ;;  %v2170_v63 = vld [vmem:[%s3477_s1 + $0xa4] sm:$0xf0]  ;;  %v1574_v4 = vor.u32 %v2154_v60, %v1573_v59  ;;  %v1565_v7 = vld [vmem:[%s3477_s1 + $0x10] sm:$0xf] }
  0x10   :  { %996 = vmatpush.bf16.msra.mxu0 %v1590_v44  ;;  %v1701_v0 = vld [vmem:[%s3477_s1 + $0x120] sm:$0xf]  ;;  %v2186_v1 = vld [vmem:[%s3477_s1 + $0x124] sm:$0xf0]  ;;  %v1638_v5 = vor.u32 %v2170_v63, %v1637_v61  ;;  %v2152_v8 = vld [vmem:[%s3477_s1 + $0x14] sm:$0xf0] }
  0x11   :  { %1015 = vmatpush.bf16.msra.mxu1 %v1654_v45  ;;  %v1765_v2 = vld [vmem:[%s3477_s1 + $0x1a0] sm:$0xf]  ;;  %v2202_v3 = vld [vmem:[%s3477_s1 + $0x1a4] sm:$0xf0]  ;;  %v1702_v6 = vor.u32 %v2186_v1, %v1701_v0  ;;  %v1629_v9 = vld [vmem:[%s3477_s1 + $0x90] sm:$0xf]  ;;  %v1566_v17 = vor.u32 %v2152_v8, %v1565_v7 }
  0x12   :  { %1034 = vmatpush.bf16.msra.mxu2 %v1718_v46  ;;  %v1766_v10 = vor.u32 %v2202_v3, %v1765_v2  ;;  %v2168_v11 = vld [vmem:[%s3477_s1 + $0x94] sm:$0xf0]  ;;  %v1693_v12 = vld [vmem:[%s3477_s1 + $0x110] sm:$0xf]  ;;  %v1557_v16 = vld [vmem:[%s3477_s1] sm:$0xf] }
  0x13   :  { %1053 = vmatpush.bf16.msra.mxu3 %v1782_v50  ;;  %v2184_v13 = vld [vmem:[%s3477_s1 + $0x114] sm:$0xf0]  ;;  %v1757_v14 = vld [vmem:[%s3477_s1 + $0x190] sm:$0xf]  ;;  %v2150_v18 = vld [vmem:[%s3477_s1 + $0x4] sm:$0xf0]  ;;  %v1630_v21 = vor.u32 %v2168_v11, %v1629_v9 }
  0x14   :  { %997 = vmatpush.bf16.msra.mxu0 %v1582_v56  ;;  %v2200_v15 = vld [vmem:[%s3477_s1 + $0x194] sm:$0xf0]  ;;  %v1621_v19 = vld [vmem:[%s3477_s1 + $0x80] sm:$0xf]  ;;  %v2166_v20 = vld [vmem:[%s3477_s1 + $0x84] sm:$0xf0]  ;;  %v1694_v22 = vor.u32 %v2184_v13, %v1693_v12  ;;  %v1558_v34 = vor.u32 %v2150_v18, %v1557_v16 }
  0x15   :  { %1016 = vmatpush.bf16.msra.mxu1 %v1646_v57  ;;  %v1685_v23 = vld [vmem:[%s3477_s1 + $0x100] sm:$0xf]  ;;  %v2182_v24 = vld [vmem:[%s3477_s1 + $0x104] sm:$0xf0]  ;;  %v1758_v26 = vor.u32 %v2200_v15, %v1757_v14  ;;  %v2135_v29 = vld [vmem:[%s3478_s0 + $0x20] sm:$0xf0]  ;;  %v1622_v38 = vor.u32 %v2166_v20, %v1621_v19 }
  0x16   :  { %1035 = vmatpush.bf16.msra.mxu2 %v1710_v58  ;;  %v1749_v25 = vld [vmem:[%s3477_s1 + $0x180] sm:$0xf]  ;;  %v2198_v27 = vld [vmem:[%s3477_s1 + $0x184] sm:$0xf0]  ;;  %v2131_v30 = vld [vmem:[%s3478_s0 + $0x4] sm:$0xf]  ;;  %v1686_v39 = vor.u32 %v2182_v24, %v1685_v23 }
  0x17   :  { %1054 = vmatpush.bf16.msra.mxu3 %v1774_v62  ;;  %v1485_v28 = vld [vmem:[%s3478_s0] sm:$0xf]  ;;  %v1487_v31 = vld [vmem:[%s3478_s0 + $0x24] sm:$0xf0]  ;;  %v1997_v32 = vld [vmem:[%s3477_s1 + $0x370] sm:$0xf]  ;;  %v1750_v43 = vor.u32 %v2198_v27, %v1749_v25 }
  0x18   :  { %998 = vmatpush.bf16.msra.mxu0 %v1574_v4  ;;  %v2260_v33 = vld [vmem:[%s3477_s1 + $0x374] sm:$0xf0]  ;;  %v1493_v35 = vld [vmem:[%s3478_s0 + $0x8] sm:$0xf]  ;;  %v1933_v36 = vld [vmem:[%s3477_s1 + $0x2f0] sm:$0xf]  ;;  %v2575_v48 = vor.u32 %v2135_v29, %v1485_v28  ;;  %v2586_v53 = vor.u32 %v2131_v30, %v1487_v31 }
  0x19   :  { %1017 = vmatpush.bf16.msra.mxu1 %v1638_v5  ;;  %v2244_v37 = vld [vmem:[%s3477_s1 + $0x2f4] sm:$0xf0]  ;;  %v2136_v40 = vld [vmem:[%s3478_s0 + $0x28] sm:$0xf0]  ;;  %v1495_v42 = vld [vmem:[%s3478_s0 + $0x2c] sm:$0xf0]  ;;  %v1998_v44 = vor.u32 %v2260_v33, %v1997_v32 }
  0x1a   :  { %1036 = vmatpush.bf16.msra.mxu2 %v1702_v6  ;;  %v2132_v41 = vld [vmem:[%s3478_s0 + $0xc] sm:$0xf]  ;;  %v1869_v45 = vld [vmem:[%s3477_s1 + $0x270] sm:$0xf]  ;;  %v2228_v46 = vld [vmem:[%s3477_s1 + $0x274] sm:$0xf0]  ;;  %v1934_v49 = vor.u32 %v2244_v37, %v1933_v36  ;;  %v2588_v54 = vor.u32 %v2136_v40, %v1493_v35 }
  0x1b   :  { %1055 = vmatpush.bf16.msra.mxu3 %v1766_v10  ;;  %v2061_v47 = vld [vmem:[%s3477_s1 + $0x3f0] sm:$0xf]  ;;  %v2276_v50 = vld [vmem:[%s3477_s1 + $0x3f4] sm:$0xf0]  ;;  %v1989_v51 = vld [vmem:[%s3477_s1 + $0x360] sm:$0xf]  ;;  %v2596_v57 = vor.u32 %v2132_v41, %v1495_v42  ;;  %v1870_v58 = vor.u32 %v2228_v46, %v1869_v45 }
  0x1c   :  { %999 = vmatpush.bf16.msra.mxu0 %v1566_v17  ;;  %v2258_v52 = vld [vmem:[%s3477_s1 + $0x364] sm:$0xf0]  ;;  %v1925_v55 = vld [vmem:[%s3477_s1 + $0x2e0] sm:$0xf]  ;;  %v2062_v59 = vor.u32 %v2276_v50, %v2061_v47  ;;  %v1981_v2 = vld [vmem:[%s3477_s1 + $0x350] sm:$0xf] }
  0x1d   :  { %1018 = vmatpush.bf16.msra.mxu1 %v1630_v21  ;;  %v2242_v56 = vld [vmem:[%s3477_s1 + $0x2e4] sm:$0xf0]  ;;  %v1990_v60 = vor.u32 %v2258_v52, %v1989_v51  ;;  %v1861_v61 = vld [vmem:[%s3477_s1 + $0x260] sm:$0xf]  ;;  %v2256_v3 = vld [vmem:[%s3477_s1 + $0x354] sm:$0xf0] }
  0x1e   :  { %1037 = vmatpush.bf16.msra.mxu2 %v1694_v22  ;;  %v2226_v62 = vld [vmem:[%s3477_s1 + $0x264] sm:$0xf0]  ;;  %v2053_v63 = vld [vmem:[%s3477_s1 + $0x3e0] sm:$0xf]  ;;  %v1926_v0 = vor.u32 %v2242_v56, %v1925_v55  ;;  %v1917_v4 = vld [vmem:[%s3477_s1 + $0x2d0] sm:$0xf]  ;;  %v1982_v8 = vor.u32 %v2256_v3, %v1981_v2 }
  0x1f   :  { %1056 = vmatpush.bf16.msra.mxu3 %v1758_v26  ;;  %v2274_v1 = vld [vmem:[%s3477_s1 + $0x3e4] sm:$0xf0]  ;;  %v2240_v5 = vld [vmem:[%s3477_s1 + $0x2d4] sm:$0xf0]  ;;  %v1862_v6 = vor.u32 %v2226_v62, %v1861_v61  ;;  %v1853_v9 = vld [vmem:[%s3477_s1 + $0x250] sm:$0xf] }
  0x20   :  { %1000 = vmatpush.bf16.msra.mxu0 %v1558_v34  ;;  %v2054_v7 = vor.u32 %v2274_v1, %v2053_v63  ;;  %v2224_v10 = vld [vmem:[%s3477_s1 + $0x254] sm:$0xf0]  ;;  %v2045_v11 = vld [vmem:[%s3477_s1 + $0x3d0] sm:$0xf]  ;;  %v1918_v12 = vor.u32 %v2240_v5, %v1917_v4  ;;  %v1973_v14 = vld [vmem:[%s3477_s1 + $0x340] sm:$0xf] }
  0x21   :  { %1019 = vmatpush.bf16.msra.mxu1 %v1622_v38  ;;  %v2272_v13 = vld [vmem:[%s3477_s1 + $0x3d4] sm:$0xf0]  ;;  %v2254_v15 = vld [vmem:[%s3477_s1 + $0x344] sm:$0xf0]  ;;  %v1909_v16 = vld [vmem:[%s3477_s1 + $0x2c0] sm:$0xf]  ;;  %v1854_v18 = vor.u32 %v2224_v10, %v1853_v9 }
  0x22   :  { %1038 = vmatpush.bf16.msra.mxu2 %v1686_v39  ;;  %v2238_v17 = vld [vmem:[%s3477_s1 + $0x2c4] sm:$0xf0]  ;;  %v1845_v19 = vld [vmem:[%s3477_s1 + $0x240] sm:$0xf]  ;;  %v2046_v22 = vor.u32 %v2272_v13, %v2045_v11  ;;  %v1974_v23 = vor.u32 %v2254_v15, %v1973_v14  ;;  %v2144_v26 = vld [vmem:[%s3478_s0 + $0x68] sm:$0xf0] }
  0x23   :  { %1057 = vmatpush.bf16.msra.mxu3 %v1750_v43  ;;  %1001 = vmatmul.bf16.vlgmr.msra.gmra.mxu0 %v2575_v48  ;;  %v2222_v20 = vld [vmem:[%s3477_s1 + $0x244] sm:$0xf0]  ;;  %v2037_v21 = vld [vmem:[%s3477_s1 + $0x3c0] sm:$0xf]  ;;  %v1910_v27 = vor.u32 %v2238_v17, %v1909_v16  ;;  %v2140_v28 = vld [vmem:[%s3478_s0 + $0x4c] sm:$0xf] }
  0x24   :  { %1020 = vmatmul.bf16.vlgmr.msra.gmra.mxu1 %v2586_v53  ;;  %1069 = vmatpush.bf16.msrb.mxu0 %v1870_v58  ;;  %v2270_v24 = vld [vmem:[%s3477_s1 + $0x3c4] sm:$0xf0]  ;;  %v1523_v29 = vld [vmem:[%s3478_s0 + $0x6c] sm:$0xf0]  ;;  %v2252_v31 = vld [vmem:[%s3477_s1 + $0x334] sm:$0xf0]  ;;  %v1846_v35 = vor.u32 %v2222_v20, %v1845_v19 }
  0x25   :  { %1088 = vmatpush.bf16.msrb.mxu1 %v1934_v49  ;;  %1039 = vmatmul.bf16.vlgmr.msra.gmra.mxu2 %v2588_v54  ;;  %v1521_v25 = vld [vmem:[%s3478_s0 + $0x48] sm:$0xf]  ;;  %v1965_v30 = vld [vmem:[%s3477_s1 + $0x330] sm:$0xf]  ;;  %v2236_v34 = vld [vmem:[%s3477_s1 + $0x2b4] sm:$0xf0]  ;;  %v2038_v39 = vor.u32 %v2270_v24, %v2037_v21  ;;  %v2718_v50 = vor.u32 %v2140_v28, %v1523_v29 }
  0x26   :  { %1107 = vmatpush.bf16.msrb.mxu2 %v1998_v44  ;;  %1058 = vmatmul.bf16.vlgmr.msra.gmra.mxu3 %v2596_v57  ;;  %v1529_v32 = vld [vmem:[%s3478_s0 + $0x50] sm:$0xf]  ;;  %v2145_v36 = vld [vmem:[%s3478_s0 + $0x70] sm:$0xf0]  ;;  %v1531_v38 = vld [vmem:[%s3478_s0 + $0x74] sm:$0xf0]  ;;  %v1966_v40 = vor.u32 %v2252_v31, %v1965_v30  ;;  %v2707_v44 = vor.u32 %v2144_v26, %v1521_v25 }
  0x27   :  { %1126 = vmatpush.bf16.msrb.mxu3 %v2062_v59  ;;  %v1901_v33 = vld [vmem:[%s3477_s1 + $0x2b0] sm:$0xf]  ;;  %v2141_v37 = vld [vmem:[%s3478_s0 + $0x54] sm:$0xf]  ;;  %v2220_v42 = vld [vmem:[%s3477_s1 + $0x234] sm:$0xf0]  ;;  %v2720_v51 = vor.u32 %v2145_v36, %v1529_v32 }
  0x28   :  { %1070 = vmatpush.bf16.msrb.mxu0 %v1862_v6  ;;  %v1837_v41 = vld [vmem:[%s3477_s1 + $0x230] sm:$0xf]  ;;  %v1902_v45 = vor.u32 %v2236_v34, %v1901_v33  ;;  %v2268_v46 = vld [vmem:[%s3477_s1 + $0x3b4] sm:$0xf0]  ;;  %v1957_v47 = vld [vmem:[%s3477_s1 + $0x320] sm:$0xf]  ;;  %v2728_v56 = vor.u32 %v2141_v37, %v1531_v38 }
  0x29   :  { %1089 = vmatpush.bf16.msrb.mxu1 %v1926_v0  ;;  %v2029_v43 = vld [vmem:[%s3477_s1 + $0x3b0] sm:$0xf]  ;;  %v2250_v49 = vld [vmem:[%s3477_s1 + $0x324] sm:$0xf0]  ;;  %v1893_v52 = vld [vmem:[%s3477_s1 + $0x2a0] sm:$0xf]  ;;  %v1838_v58 = vor.u32 %v2220_v42, %v1837_v41 }
  0x2a   :  { %1108 = vmatpush.bf16.msrb.mxu2 %v1990_v60  ;;  %v2234_v55 = vld [vmem:[%s3477_s1 + $0x2a4] sm:$0xf0]  ;;  %v2030_v59 = vor.u32 %v2268_v46, %v2029_v43  ;;  %v1958_v60 = vor.u32 %v2250_v49, %v1957_v47  ;;  %v1829_v61 = vld [vmem:[%s3477_s1 + $0x220] sm:$0xf]  ;;  %v1949_v2 = vld [vmem:[%s3477_s1 + $0x310] sm:$0xf] }
  0x2b   :  { %1127 = vmatpush.bf16.msrb.mxu3 %v2054_v7  ;;  %v2218_v62 = vld [vmem:[%s3477_s1 + $0x224] sm:$0xf0]  ;;  %v2021_v63 = vld [vmem:[%s3477_s1 + $0x3a0] sm:$0xf]  ;;  %v1894_v0 = vor.u32 %v2234_v55, %v1893_v52  ;;  %v2248_v3 = vld [vmem:[%s3477_s1 + $0x314] sm:$0xf0] }
  0x2c   :  { %1071 = vmatpush.bf16.msrb.mxu0 %v1854_v18  ;;  %v2266_v1 = vld [vmem:[%s3477_s1 + $0x3a4] sm:$0xf0]  ;;  %v1885_v4 = vld [vmem:[%s3477_s1 + $0x290] sm:$0xf]  ;;  %v2232_v5 = vld [vmem:[%s3477_s1 + $0x294] sm:$0xf0]  ;;  %v1830_v6 = vor.u32 %v2218_v62, %v1829_v61  ;;  %v1950_v9 = vor.u32 %v2248_v3, %v1949_v2 }
  0x2d   :  { %1090 = vmatpush.bf16.msrb.mxu1 %v1918_v12  ;;  %v1821_v7 = vld [vmem:[%s3477_s1 + $0x210] sm:$0xf]  ;;  %v2216_v10 = vld [vmem:[%s3477_s1 + $0x214] sm:$0xf0]  ;;  %v1886_v13 = vor.u32 %v2232_v5, %v1885_v4  ;;  %v1941_v14 = vld [vmem:[%s3477_s1 + $0x300] sm:$0xf] }
  0x2e   :  { %1109 = vmatpush.bf16.msrb.mxu2 %v1982_v8  ;;  %v2022_v8 = vor.u32 %v2266_v1, %v2021_v63  ;;  %v2013_v11 = vld [vmem:[%s3477_s1 + $0x390] sm:$0xf]  ;;  %v2264_v12 = vld [vmem:[%s3477_s1 + $0x394] sm:$0xf0]  ;;  %v2246_v15 = vld [vmem:[%s3477_s1 + $0x304] sm:$0xf0]  ;;  %v1822_v20 = vor.u32 %v2216_v10, %v1821_v7 }
  0x2f   :  { %1128 = vmatpush.bf16.msrb.mxu3 %v2046_v22  ;;  %v1877_v16 = vld [vmem:[%s3477_s1 + $0x280] sm:$0xf]  ;;  %v2230_v17 = vld [vmem:[%s3477_s1 + $0x284] sm:$0xf0]  ;;  %v2179_v18 = vld [vmem:[%s3477_s1 + $0xf4] sm:$0xf]  ;;  %v2014_v24 = vor.u32 %v2264_v12, %v2013_v11  ;;  %v1942_v25 = vor.u32 %v2246_v15, %v1941_v14 }
  0x30   :  { %1072 = vmatpush.bf16.msrb.mxu0 %v1846_v35  ;;  %v1679_v19 = vld [vmem:[%s3477_s1 + $0xf8] sm:$0xf0]  ;;  %v1813_v21 = vld [vmem:[%s3477_s1 + $0x200] sm:$0xf]  ;;  %v2163_v22 = vld [vmem:[%s3477_s1 + $0x74] sm:$0xf]  ;;  %v1878_v29 = vor.u32 %v2230_v17, %v1877_v16 }
  0x31   :  { %1091 = vmatpush.bf16.msrb.mxu1 %v1910_v27  ;;  %v2214_v26 = vld [vmem:[%s3477_s1 + $0x204] sm:$0xf0]  ;;  %v2005_v27 = vld [vmem:[%s3477_s1 + $0x380] sm:$0xf]  ;;  %v1501_v30 = vld [vmem:[%s3478_s0 + $0x10] sm:$0xf]  ;;  %v1682_v34 = vor.u32 %v2179_v18, %v1679_v19 }
  0x32   :  { %1110 = vmatpush.bf16.msrb.mxu2 %v1974_v23  ;;  %v1615_v23 = vld [vmem:[%s3477_s1 + $0x78] sm:$0xf0]  ;;  %v2262_v28 = vld [vmem:[%s3477_s1 + $0x384] sm:$0xf0]  ;;  %v2137_v31 = vld [vmem:[%s3478_s0 + $0x30] sm:$0xf0]  ;;  %v1814_v42 = vor.u32 %v2214_v26, %v1813_v21 }
  0x33   :  { %1129 = vmatpush.bf16.msrb.mxu3 %v2038_v39  ;;  %1006 = vmatmul.bf16.gmra.mxu0 %v2707_v44  ;;  %v2133_v32 = vld [vmem:[%s3478_s0 + $0x14] sm:$0xf]  ;;  %v1503_v33 = vld [vmem:[%s3478_s0 + $0x34] sm:$0xf0]  ;;  %v2125_v35 = vld [vmem:[%s3477_s1 + $0x470] sm:$0xf]  ;;  %v1618_v38 = vor.u32 %v2163_v22, %v1615_v23  ;;  %v2006_v47 = vor.u32 %v2262_v28, %v2005_v27 }
  0x34   :  { %1025 = vmatmul.bf16.gmra.mxu1 %v2718_v50  ;;  %1073 = vmatpush.bf16.msrb.mxu0 %v1838_v58  ;;  %v2292_v36 = vld [vmem:[%s3477_s1 + $0x474] sm:$0xf0]  ;;  %v2195_v37 = vld [vmem:[%s3477_s1 + $0x174] sm:$0xf]  ;;  %v1743_v39 = vld [vmem:[%s3477_s1 + $0x178] sm:$0xf0]  ;;  %v2865_v1 = vor.u32 %v2133_v32, %v1503_v33 }
  0x35   :  { %1092 = vmatpush.bf16.msrb.mxu1 %v1902_v45  ;;  %1044 = vmatmul.bf16.gmra.mxu2 %v2720_v51  ;;  %v1671_v41 = vld [vmem:[%s3477_s1 + $0xe8] sm:$0xf0]  ;;  %v1509_v43 = vld [vmem:[%s3478_s0 + $0x18] sm:$0xf]  ;;  %v2138_v45 = vld [vmem:[%s3478_s0 + $0x38] sm:$0xf0]  ;;  %v2126_v52 = vor.u32 %v2292_v36, %v2125_v35 }
  0x36   :  { %1111 = vmatpush.bf16.msrb.mxu2 %v1966_v40  ;;  %1063 = vmatmul.bf16.gmra.mxu3 %v2728_v56  ;;  %v2177_v40 = vld [vmem:[%s3477_s1 + $0xe4] sm:$0xf]  ;;  %v2134_v46 = vld [vmem:[%s3478_s0 + $0x1c] sm:$0xf]  ;;  %v1511_v49 = vld [vmem:[%s3478_s0 + $0x3c] sm:$0xf0]  ;;  %v2876_v5 = vor.u32 %v2138_v45, %v1509_v43 }
  0x37   :  { %1130 = vmatpush.bf16.msrb.mxu3 %v2030_v59  ;;  %v2117_v55 = vld [vmem:[%s3477_s1 + $0x460] sm:$0xf]  ;;  %v2290_v58 = vld [vmem:[%s3477_s1 + $0x464] sm:$0xf0]  ;;  %v1746_v59 = vor.u32 %v2195_v37, %v1743_v39  ;;  %v2161_v61 = vld [vmem:[%s3477_s1 + $0x64] sm:$0xf] }
  0x38   :  { %1074 = vmatpush.bf16.msrb.mxu0 %v1830_v6  ;;  %v1607_v62 = vld [vmem:[%s3477_s1 + $0x68] sm:$0xf0]  ;;  %v2193_v63 = vld [vmem:[%s3477_s1 + $0x164] sm:$0xf]  ;;  %v2175_v3 = vld [vmem:[%s3477_s1 + $0xd4] sm:$0xf]  ;;  %v2878_v6 = vor.u32 %v2134_v46, %v1511_v49  ;;  %v2118_v7 = vor.u32 %v2290_v58, %v2117_v55 }
  0x39   :  { %1093 = vmatpush.bf16.msrb.mxu1 %v1894_v0  ;;  %v2863_v0 = vor.u32 %v2137_v31, %v1501_v30  ;;  %v1735_v2 = vld [vmem:[%s3477_s1 + $0x168] sm:$0xf0]  ;;  %v1663_v4 = vld [vmem:[%s3477_s1 + $0xd8] sm:$0xf0]  ;;  %v2288_v10 = vld [vmem:[%s3477_s1 + $0x454] sm:$0xf0] }
  0x3a   :  { %1112 = vmatpush.bf16.msrb.mxu2 %v1958_v60  ;;  %v1674_v60 = vor.u32 %v2177_v40, %v1671_v41  ;;  %v1738_v11 = vor.u32 %v2193_v63, %v1735_v2  ;;  %v1666_v12 = vor.u32 %v2175_v3, %v1663_v4  ;;  %v1599_v14 = vld [vmem:[%s3477_s1 + $0x58] sm:$0xf0]  ;;  %v2191_v15 = vld [vmem:[%s3477_s1 + $0x154] sm:$0xf]  ;;  %v2173_v17 = vld [vmem:[%s3477_s1 + $0xc4] sm:$0xf] }
  0x3b   :  { %1131 = vmatpush.bf16.msrb.mxu3 %v2022_v8  ;;  %v1610_v8 = vor.u32 %v2161_v61, %v1607_v62  ;;  %v1727_v16 = vld [vmem:[%s3477_s1 + $0x158] sm:$0xf0]  ;;  %v1655_v18 = vld [vmem:[%s3477_s1 + $0xc8] sm:$0xf0]  ;;  %v2101_v21 = vld [vmem:[%s3477_s1 + $0x440] sm:$0xf] }
  0x3c   :  { %1075 = vmatpush.bf16.msrb.mxu0 %v1822_v20  ;;  %v2286_v22 = vld [vmem:[%s3477_s1 + $0x444] sm:$0xf0]  ;;  %v1730_v23 = vor.u32 %v2191_v15, %v1727_v16  ;;  %v1591_v26 = vld [vmem:[%s3477_s1 + $0x48] sm:$0xf0]  ;;  %v2189_v27 = vld [vmem:[%s3477_s1 + $0x144] sm:$0xf] }
  0x3d   :  { %1094 = vmatpush.bf16.msrb.mxu1 %v1886_v13  ;;  %v2159_v13 = vld [vmem:[%s3477_s1 + $0x54] sm:$0xf]  ;;  %v1719_v28 = vld [vmem:[%s3477_s1 + $0x148] sm:$0xf0]  ;;  %v1647_v30 = vld [vmem:[%s3477_s1 + $0xb8] sm:$0xf0]  ;;  %v2102_v31 = vor.u32 %v2286_v22, %v2101_v21 }
  0x3e   :  { %1113 = vmatpush.bf16.msrb.mxu2 %v1950_v9  ;;  %v2109_v9 = vld [vmem:[%s3477_s1 + $0x450] sm:$0xf]  ;;  %v1602_v20 = vor.u32 %v2159_v13, %v1599_v14  ;;  %v1722_v35 = vor.u32 %v2189_v27, %v1719_v28  ;;  %v1537_v36 = vld [vmem:[%s3478_s0 + $0x58] sm:$0xf]  ;;  %v2146_v37 = vld [vmem:[%s3478_s0 + $0x78] sm:$0xf0] }
  0x3f   :  { %1132 = vmatpush.bf16.msrb.mxu3 %v2014_v24  ;;  %v2110_v19 = vor.u32 %v2288_v10, %v2109_v9  ;;  %v1658_v24 = vor.u32 %v2173_v17, %v1655_v18  ;;  %v2093_v33 = vld [vmem:[%s3477_s1 + $0x430] sm:$0xf]  ;;  %v1539_v39 = vld [vmem:[%s3478_s0 + $0x7c] sm:$0xf0]  ;;  %v2155_v41 = vld [vmem:[%s3477_s1 + $0x34] sm:$0xf] }
  0x40   :  { %1076 = vmatpush.bf16.msrb.mxu0 %v1814_v42  ;;  %v1583_v42 = vld [vmem:[%s3477_s1 + $0x38] sm:$0xf0]  ;;  %v2187_v43 = vld [vmem:[%s3477_s1 + $0x134] sm:$0xf]  ;;  %v2169_v46 = vld [vmem:[%s3477_s1 + $0xa4] sm:$0xf] }
  0x41   :  { %1095 = vmatpush.bf16.msrb.mxu1 %v1878_v29  ;;  %v2171_v29 = vld [vmem:[%s3477_s1 + $0xb4] sm:$0xf]  ;;  %v1711_v45 = vld [vmem:[%s3477_s1 + $0x138] sm:$0xf0]  ;;  %v1545_v49 = vld [vmem:[%s3478_s0 + $0x60] sm:$0xf] }
  0x42   :  { %1114 = vmatpush.bf16.msrb.mxu2 %v1942_v25  ;;  %v2157_v25 = vld [vmem:[%s3477_s1 + $0x44] sm:$0xf]  ;;  %v1650_v40 = vor.u32 %v2171_v29, %v1647_v30  ;;  %v1547_v58 = vld [vmem:[%s3478_s0 + $0x84] sm:$0xf0]  ;;  %v2085_v61 = vld [vmem:[%s3477_s1 + $0x420] sm:$0xf]  ;;  %v1714_v63 = vor.u32 %v2187_v43, %v1711_v45 }
  0x43   :  { %1133 = vmatpush.bf16.msrb.mxu3 %v2006_v47  ;;  %1077 = vmatmul.bf16.vlgmr.msrb.gmra.mxu0 %v2863_v0  ;;  %v1594_v32 = vor.u32 %v2157_v25, %v1591_v26  ;;  %v1639_v47 = vld [vmem:[%s3477_s1 + $0xa8] sm:$0xf0]  ;;  %v2143_v55 = vld [vmem:[%s3478_s0 + $0x64] sm:$0xf]  ;;  %v2282_v62 = vld [vmem:[%s3477_s1 + $0x424] sm:$0xf0] }
  0x44   :  { %1145 = vmatpush.bf16.msra.mxu0 %v2126_v52  ;;  %1096 = vmatmul.bf16.vlgmr.msrb.gmra.mxu1 %v2865_v1  ;;  %v2147_v52 = vld [vmem:[%s3478_s0 + $0x80] sm:$0xf0]  ;;  %v1642_v2 = vor.u32 %v2169_v46, %v1639_v47  ;;  %v1575_v4 = vld [vmem:[%s3477_s1 + $0x28] sm:$0xf0]  ;;  %v3010_v14 = vor.u32 %v2143_v55, %v1547_v58  ;;  %v2086_v15 = vor.u32 %v2282_v62, %v2085_v61  ;;  %v2077_v17 = vld [vmem:[%s3477_s1 + $0x410] sm:$0xf] }
  0x45   :  { %1164 = vmatpush.bf16.msra.mxu1 %v1618_v38  ;;  %1115 = vmatmul.bf16.vlgmr.msrb.gmra.mxu2 %v2876_v5  ;;  %v2142_v38 = vld [vmem:[%s3478_s0 + $0x5c] sm:$0xf]  ;;  %v2153_v3 = vld [vmem:[%s3477_s1 + $0x24] sm:$0xf]  ;;  %v1703_v10 = vld [vmem:[%s3477_s1 + $0x128] sm:$0xf0]  ;;  %v3008_v13 = vor.u32 %v2147_v52, %v1545_v49 }
  0x46   :  { %1183 = vmatpush.bf16.msra.mxu2 %v1682_v34  ;;  %1134 = vmatmul.bf16.vlgmr.msrb.gmra.mxu3 %v2878_v6  ;;  %v2284_v34 = vld [vmem:[%s3477_s1 + $0x434] sm:$0xf0]  ;;  %v2997_v9 = vor.u32 %v2142_v38, %v1539_v39  ;;  %v1578_v16 = vor.u32 %v2153_v3, %v1575_v4  ;;  %v2151_v21 = vld [vmem:[%s3477_s1 + $0x14] sm:$0xf]  ;;  %v1567_v22 = vld [vmem:[%s3477_s1 + $0x18] sm:$0xf0] }
  0x47   :  { %1202 = vmatpush.bf16.msra.mxu3 %v1746_v59  ;;  %v2094_v59 = vor.u32 %v2284_v34, %v2093_v33  ;;  %v2280_v18 = vld [vmem:[%s3477_s1 + $0x414] sm:$0xf0]  ;;  %v2165_v25 = vld [vmem:[%s3477_s1 + $0x84] sm:$0xf]  ;;  %v1623_v26 = vld [vmem:[%s3477_s1 + $0x88] sm:$0xf0]  ;;  %v1570_v30 = vor.u32 %v2151_v21, %v1567_v22 }
  0x48   :  { %1146 = vmatpush.bf16.msra.mxu0 %v2118_v7  ;;  %v2185_v7 = vld [vmem:[%s3477_s1 + $0x124] sm:$0xf]  ;;  %v2243_v27 = vld [vmem:[%s3477_s1 + $0x2f4] sm:$0xf]  ;;  %v1935_v28 = vld [vmem:[%s3477_s1 + $0x2f8] sm:$0xf0]  ;;  %v2078_v29 = vor.u32 %v2280_v18, %v2077_v17 }
  0x49   :  { %1165 = vmatpush.bf16.msra.mxu1 %v1610_v8  ;;  %v2995_v8 = vor.u32 %v2146_v37, %v1537_v36  ;;  %v2149_v33 = vld [vmem:[%s3477_s1 + $0x4] sm:$0xf]  ;;  %v1559_v36 = vld [vmem:[%s3477_s1 + $0x8] sm:$0xf0]  ;;  %v1938_v39 = vor.u32 %v2243_v27, %v1935_v28  ;;  %v1871_v43 = vld [vmem:[%s3477_s1 + $0x278] sm:$0xf0] }
  0x4a   :  { %1184 = vmatpush.bf16.msra.mxu2 %v1674_v60  ;;  %v1586_v60 = vor.u32 %v2155_v41, %v1583_v42  ;;  %v2181_v37 = vld [vmem:[%s3477_s1 + $0x104] sm:$0xf]  ;;  %v1687_v38 = vld [vmem:[%s3477_s1 + $0x108] sm:$0xf0]  ;;  %v1807_v41 = vld [vmem:[%s3477_s1 + $0x1f8] sm:$0xf0]  ;;  %v1562_v49 = vor.u32 %v2149_v33, %v1559_v36 }
  0x4b   :  { %1203 = vmatpush.bf16.msra.mxu3 %v1738_v11  ;;  %v2167_v11 = vld [vmem:[%s3477_s1 + $0x94] sm:$0xf]  ;;  %v1999_v46 = vld [vmem:[%s3477_s1 + $0x378] sm:$0xf0]  ;;  %v2241_v52 = vld [vmem:[%s3477_s1 + $0x2e4] sm:$0xf]  ;;  %v1690_v58 = vor.u32 %v2181_v37, %v1687_v38 }
  0x4c   :  { %1147 = vmatpush.bf16.msra.mxu0 %v2110_v19  ;;  %v1706_v19 = vor.u32 %v2185_v7, %v1703_v10  ;;  %v2227_v42 = vld [vmem:[%s3477_s1 + $0x274] sm:$0xf]  ;;  %v1927_v55 = vld [vmem:[%s3477_s1 + $0x2e8] sm:$0xf0]  ;;  %v2209_v62 = vld [vmem:[%s3477_s1 + $0x1e4] sm:$0xf] }
  0x4d   :  { %1166 = vmatpush.bf16.msra.mxu1 %v1602_v20  ;;  %v2259_v45 = vld [vmem:[%s3477_s1 + $0x374] sm:$0xf]  ;;  %v2139_v3 = vld [vmem:[%s3478_s0 + $0x40] sm:$0xf0]  ;;  %v1930_v4 = vor.u32 %v2241_v52, %v1927_v55  ;;  %v1863_v10 = vld [vmem:[%s3477_s1 + $0x268] sm:$0xf0] }
  0x4e   :  { %1185 = vmatpush.bf16.msra.mxu2 %v1666_v12  ;;  %v1631_v12 = vld [vmem:[%s3477_s1 + $0x98] sm:$0xf0]  ;;  %v2002_v61 = vor.u32 %v2259_v45, %v1999_v46  ;;  %v2225_v7 = vld [vmem:[%s3477_s1 + $0x264] sm:$0xf]  ;;  %v2255_v27 = vld [vmem:[%s3477_s1 + $0x354] sm:$0xf] }
  0x4f   :  { %1204 = vmatpush.bf16.msra.mxu3 %v1730_v23  ;;  %v1634_v20 = vor.u32 %v2167_v11, %v1631_v12  ;;  %v2183_v23 = vld [vmem:[%s3477_s1 + $0x114] sm:$0xf]  ;;  %v2257_v12 = vld [vmem:[%s3477_s1 + $0x364] sm:$0xf]  ;;  %v1919_v18 = vld [vmem:[%s3477_s1 + $0x2d8] sm:$0xf0]  ;;  %v1866_v21 = vor.u32 %v2225_v7, %v1863_v10 }
  0x50   :  { %1148 = vmatpush.bf16.msra.mxu0 %v2102_v31  ;;  %v2069_v31 = vld [vmem:[%s3477_s1 + $0x400] sm:$0xf]  ;;  %v1983_v28 = vld [vmem:[%s3477_s1 + $0x358] sm:$0xf0]  ;;  %v2235_v38 = vld [vmem:[%s3477_s1 + $0x2b4] sm:$0xf] }
  0x51   :  { %1167 = vmatpush.bf16.msra.mxu1 %v1594_v32  ;;  %v2278_v32 = vld [vmem:[%s3477_s1 + $0x404] sm:$0xf0]  ;;  %v2219_v45 = vld [vmem:[%s3477_s1 + $0x234] sm:$0xf]  ;;  %v1839_v46 = vld [vmem:[%s3477_s1 + $0x238] sm:$0xf0] }
  0x52   :  { %1186 = vmatpush.bf16.msra.mxu2 %v1658_v24  ;;  %v1695_v24 = vld [vmem:[%s3477_s1 + $0x118] sm:$0xf0]  ;;  %v2070_v47 = vor.u32 %v2278_v32, %v2069_v31  ;;  %v2205_v31 = vld [vmem:[%s3477_s1 + $0x1c4] sm:$0xf]  ;;  %v1783_v32 = vld [vmem:[%s3477_s1 + $0x1c8] sm:$0xf0] }
  0x53   :  { %1205 = vmatpush.bf16.msra.mxu3 %v1722_v35  ;;  %1082 = vmatmul.bf16.gmra.mxu0 %v2995_v8  ;;  %v1698_v34 = vor.u32 %v2183_v23, %v1695_v24  ;;  %v1626_v35 = vor.u32 %v2165_v25, %v1623_v26  ;;  %v2223_v23 = vld [vmem:[%s3477_s1 + $0x254] sm:$0xf]  ;;  %v1855_v24 = vld [vmem:[%s3477_s1 + $0x258] sm:$0xf0]  ;;  %v1786_v37 = vor.u32 %v2205_v31, %v1783_v32  ;;  %v1831_v7 = vld [vmem:[%s3477_s1 + $0x228] sm:$0xf0] }
  0x54   :  { %1149 = vmatpush.bf16.msra.mxu0 %v2094_v59  ;;  %1101 = vmatmul.bf16.gmra.mxu1 %v2997_v9  ;;  %v1858_v33 = vor.u32 %v2223_v23, %v1855_v24  ;;  %v2251_v52 = vld [vmem:[%s3477_s1 + $0x334] sm:$0xf]  ;;  %v1967_v55 = vld [vmem:[%s3477_s1 + $0x338] sm:$0xf0]  ;;  %v1879_v31 = vld [vmem:[%s3477_s1 + $0x288] sm:$0xf0] }
  0x55   :  { %1168 = vmatpush.bf16.msra.mxu1 %v1586_v60  ;;  %1120 = vmatmul.bf16.gmra.mxu2 %v3008_v13  ;;  %v1874_v60 = vor.u32 %v2227_v42, %v1871_v43  ;;  %v2215_v24 = vld [vmem:[%s3477_s1 + $0x214] sm:$0xf]  ;;  %v2197_v32 = vld [vmem:[%s3477_s1 + $0x184] sm:$0xf] }
  0x56   :  { %1187 = vmatpush.bf16.msra.mxu2 %v1650_v40  ;;  %1139 = vmatmul.bf16.gmra.mxu3 %v3010_v14  ;;  %v2211_v40 = vld [vmem:[%s3477_s1 + $0x1f4] sm:$0xf] }
  0x57   :  { %1206 = vmatpush.bf16.msra.mxu3 %v1714_v63  ;;  %v1810_v59 = vor.u32 %v2211_v40, %v1807_v41  ;;  %v1799_v63 = vld [vmem:[%s3477_s1 + $0x1e8] sm:$0xf0]  ;;  %v2203_v40 = vld [vmem:[%s3477_s1 + $0x1b4] sm:$0xf]  ;;  %v1775_v41 = vld [vmem:[%s3477_s1 + $0x1b8] sm:$0xf0] }
  0x58   :  { %1150 = vmatpush.bf16.msra.mxu0 %v2086_v15  ;;  %v1802_v11 = vor.u32 %v2209_v62, %v1799_v63  ;;  %v1991_v15 = vld [vmem:[%s3477_s1 + $0x368] sm:$0xf0]  ;;  %v1553_v62 = vld [vmem:[%s3478_s0 + $0x68] sm:$0xf] }
  0x59   :  { %1169 = vmatpush.bf16.msra.mxu1 %v1578_v16  ;;  %v2239_v16 = vld [vmem:[%s3477_s1 + $0x2d4] sm:$0xf]  ;;  %v1994_v22 = vor.u32 %v2257_v12, %v1991_v15  ;;  %v2148_v63 = vld [vmem:[%s3478_s0 + $0x88] sm:$0xf0]  ;;  %v2249_v12 = vld [vmem:[%s3477_s1 + $0x324] sm:$0xf] }
  0x5a   :  { %1188 = vmatpush.bf16.msra.mxu2 %v1642_v2  ;;  %v1517_v2 = vld [vmem:[%s3478_s0 + $0x20] sm:$0xf]  ;;  %v1922_v25 = vor.u32 %v2239_v16, %v1919_v18  ;;  %v1959_v15 = vld [vmem:[%s3477_s1 + $0x328] sm:$0xf0]  ;;  %v2231_v16 = vld [vmem:[%s3477_s1 + $0x294] sm:$0xf]  ;;  %v3223_v18 = vor.u32 %v2148_v63, %v1553_v62 }
  0x5b   :  { %1207 = vmatpush.bf16.msra.mxu3 %v1706_v19  ;;  %v3115_v17 = vor.u32 %v2139_v3, %v1517_v2  ;;  %v2207_v19 = vld [vmem:[%s3477_s1 + $0x1d4] sm:$0xf]  ;;  %v1842_v2 = vor.u32 %v2219_v45, %v1839_v46  ;;  %v1970_v3 = vor.u32 %v2251_v52, %v1967_v55  ;;  %v1962_v23 = vor.u32 %v2249_v12, %v1959_v15  ;;  %v2119_v52 = vld [vmem:[%s3477_s1 + $0x468] sm:$0xf0] }
  0x5c   :  { %1151 = vmatpush.bf16.msra.mxu0 %v2078_v29  ;;  %v2237_v29 = vld [vmem:[%s3477_s1 + $0x2c4] sm:$0xf] }
  0x5d   :  { %1170 = vmatpush.bf16.msra.mxu1 %v1570_v30  ;;  %v1911_v30 = vld [vmem:[%s3477_s1 + $0x2c8] sm:$0xf0] }
  0x5e   :  { %1189 = vmatpush.bf16.msra.mxu2 %v1634_v20  ;;  %v1791_v20 = vld [vmem:[%s3477_s1 + $0x1d8] sm:$0xf0]  ;;  %v1914_v36 = vor.u32 %v2237_v29, %v1911_v30  ;;  %v2229_v30 = vld [vmem:[%s3477_s1 + $0x284] sm:$0xf] }
  0x5f   :  { %1208 = vmatpush.bf16.msra.mxu3 %v1698_v34  ;;  %v1794_v26 = vor.u32 %v2207_v19, %v1791_v20  ;;  %v2221_v34 = vld [vmem:[%s3477_s1 + $0x244] sm:$0xf]  ;;  %v1887_v19 = vld [vmem:[%s3477_s1 + $0x298] sm:$0xf0]  ;;  %v2199_v20 = vld [vmem:[%s3477_s1 + $0x194] sm:$0xf] }
  0x60   :  { %1152 = vmatpush.bf16.msra.mxu0 %v2070_v47  ;;  %v1951_v29 = vld [vmem:[%s3477_s1 + $0x318] sm:$0xf0] }
  0x61   :  { %1171 = vmatpush.bf16.msra.mxu1 %v1562_v49  ;;  %v1778_v49 = vor.u32 %v2203_v40, %v1775_v41  ;;  %v2127_v40 = vld [vmem:[%s3477_s1 + $0x478] sm:$0xf0]  ;;  %v2273_v41 = vld [vmem:[%s3477_s1 + $0x3e4] sm:$0xf] }
  0x62   :  { %1190 = vmatpush.bf16.msra.mxu2 %v1626_v35  ;;  %v1847_v35 = vld [vmem:[%s3477_s1 + $0x248] sm:$0xf0] }
  0x63   :  { %1209 = vmatpush.bf16.msra.mxu3 %v1690_v58  ;;  %1153 = vmatmul.bf16.vlgmr.msra.gmra.mxu0 %v3115_v17  ;;  %v1850_v42 = vor.u32 %v2221_v34, %v1847_v35  ;;  %v2233_v58 = vld [vmem:[%s3477_s1 + $0x2a4] sm:$0xf] }
  0x64   :  { %1221 = vmatpush.bf16.msrb.mxu0 %v1810_v59  ;;  %1172 = vmatmul.bf16.vlgmr.msra.gmra.mxu1 %v2575_v48  ;;  %v1986_v48 = vor.u32 %v2255_v27, %v1983_v28  ;;  %v1895_v59 = vld [vmem:[%s3477_s1 + $0x2a8] sm:$0xf0]  ;;  %v2247_v28 = vld [vmem:[%s3477_s1 + $0x314] sm:$0xf] }
  0x65   :  { %1240 = vmatpush.bf16.msrb.mxu1 %v1874_v60  ;;  %1191 = vmatmul.bf16.vlgmr.msra.gmra.mxu2 %v2586_v53  ;;  %v2253_v53 = vld [vmem:[%s3477_s1 + $0x344] sm:$0xf]  ;;  %v1898_v10 = vor.u32 %v2233_v58, %v1895_v59  ;;  %v1954_v35 = vor.u32 %v2247_v28, %v1951_v29  ;;  %v2271_v58 = vld [vmem:[%s3477_s1 + $0x3d4] sm:$0xf]  ;;  %v2047_v59 = vld [vmem:[%s3477_s1 + $0x3d8] sm:$0xf0] }
  0x66   :  { %1259 = vmatpush.bf16.msrb.mxu2 %v1938_v39  ;;  %1210 = vmatmul.bf16.vlgmr.msra.gmra.mxu3 %v2588_v54  ;;  %v1975_v54 = vld [vmem:[%s3477_s1 + $0x348] sm:$0xf0]  ;;  %v1903_v39 = vld [vmem:[%s3477_s1 + $0x2b8] sm:$0xf0]  ;;  %v2201_v60 = vld [vmem:[%s3477_s1 + $0x1a4] sm:$0xf]  ;;  %v2050_v62 = vor.u32 %v2271_v58, %v2047_v59 }
  0x67   :  { %1278 = vmatpush.bf16.msrb.mxu3 %v2002_v61  ;;  %v1978_v43 = vor.u32 %v2253_v53, %v1975_v54  ;;  %v1906_v47 = vor.u32 %v2235_v38, %v1903_v39  ;;  %v1767_v61 = vld [vmem:[%s3477_s1 + $0x1a8] sm:$0xf0]  ;;  %v2245_v53 = vld [vmem:[%s3477_s1 + $0x304] sm:$0xf]  ;;  %v2291_v39 = vld [vmem:[%s3477_s1 + $0x474] sm:$0xf] }
  0x68   :  { %1222 = vmatpush.bf16.msrb.mxu0 %v1802_v11  ;;  %v1770_v11 = vor.u32 %v2201_v60, %v1767_v61  ;;  %v1943_v54 = vld [vmem:[%s3477_s1 + $0x308] sm:$0xf0]  ;;  %v2130_v46 = vor.u32 %v2291_v39, %v2127_v40  ;;  %v2287_v60 = vld [vmem:[%s3477_s1 + $0x454] sm:$0xf]  ;;  %v2111_v61 = vld [vmem:[%s3477_s1 + $0x458] sm:$0xf0] }
  0x69   :  { %1241 = vmatpush.bf16.msrb.mxu1 %v1866_v21  ;;  %v1759_v21 = vld [vmem:[%s3477_s1 + $0x198] sm:$0xf0]  ;;  %v1946_v45 = vor.u32 %v2245_v53, %v1943_v54  ;;  %v2114_v63 = vor.u32 %v2287_v60, %v2111_v61 }
  0x6a   :  { %1260 = vmatpush.bf16.msrb.mxu2 %v1930_v4  ;;  %v2217_v4 = vld [vmem:[%s3477_s1 + $0x224] sm:$0xf]  ;;  %v1762_v27 = vor.u32 %v2199_v20, %v1759_v21  ;;  %v2087_v21 = vld [vmem:[%s3477_s1 + $0x428] sm:$0xf0] }
  0x6b   :  { %1279 = vmatpush.bf16.msrb.mxu3 %v1994_v22  ;;  %v1834_v22 = vor.u32 %v2217_v4, %v1831_v7  ;;  %v2285_v4 = vld [vmem:[%s3477_s1 + $0x444] sm:$0xf]  ;;  %v2103_v7 = vld [vmem:[%s3477_s1 + $0x448] sm:$0xf0] }
  0x6c   :  { %1223 = vmatpush.bf16.msrb.mxu0 %v1794_v26  ;;  %v1890_v26 = vor.u32 %v2231_v16, %v1887_v19  ;;  %v2265_v16 = vld [vmem:[%s3477_s1 + $0x3a4] sm:$0xf]  ;;  %v2023_v19 = vld [vmem:[%s3477_s1 + $0x3a8] sm:$0xf0] }
  0x6d   :  { %1242 = vmatpush.bf16.msrb.mxu1 %v1858_v33  ;;  %v1751_v33 = vld [vmem:[%s3477_s1 + $0x188] sm:$0xf0]  ;;  %v2281_v20 = vld [vmem:[%s3477_s1 + $0x424] sm:$0xf] }
  0x6e   :  { %1261 = vmatpush.bf16.msrb.mxu2 %v1922_v25  ;;  %v1823_v25 = vld [vmem:[%s3477_s1 + $0x218] sm:$0xf0] }
  0x6f   :  { %1280 = vmatpush.bf16.msrb.mxu3 %v1986_v48  ;;  %v2063_v48 = vld [vmem:[%s3477_s1 + $0x3f8] sm:$0xf0]  ;;  %v1826_v34 = vor.u32 %v2215_v24, %v1823_v25  ;;  %v2263_v24 = vld [vmem:[%s3477_s1 + $0x394] sm:$0xf] }
  0x70   :  { %1224 = vmatpush.bf16.msrb.mxu0 %v1786_v37  ;;  %v1815_v37 = vld [vmem:[%s3477_s1 + $0x208] sm:$0xf0]  ;;  %v2015_v25 = vld [vmem:[%s3477_s1 + $0x398] sm:$0xf0] }
  0x71   :  { %1243 = vmatpush.bf16.msrb.mxu1 %v1850_v42  ;;  %v2055_v42 = vld [vmem:[%s3477_s1 + $0x3e8] sm:$0xf0]  ;;  %v2018_v28 = vor.u32 %v2263_v24, %v2015_v25 }
  0x72   :  { %1262 = vmatpush.bf16.msrb.mxu2 %v1914_v36  ;;  %v2213_v36 = vld [vmem:[%s3477_s1 + $0x204] sm:$0xf] }
  0x73   :  { %1281 = vmatpush.bf16.msrb.mxu3 %v1978_v43  ;;  %1158 = vmatmul.bf16.gmra.mxu0 %v3223_v18  ;;  %v1818_v43 = vor.u32 %v2213_v36, %v1815_v37 }
  0x74   :  { %1225 = vmatpush.bf16.msrb.mxu0 %v1778_v49  ;;  %1177 = vmatmul.bf16.gmra.mxu1 %v2707_v44  ;;  %v2275_v44 = vld [vmem:[%s3477_s1 + $0x3f4] sm:$0xf]  ;;  %v2289_v49 = vld [vmem:[%s3477_s1 + $0x464] sm:$0xf] }
  0x75   :  { %1244 = vmatpush.bf16.msrb.mxu1 %v1842_v2  ;;  %1196 = vmatmul.bf16.gmra.mxu2 %v2718_v50  ;;  %v1882_v50 = vor.u32 %v2229_v30, %v1879_v31  ;;  %v2066_v38 = vor.u32 %v2275_v44, %v2063_v48  ;;  %v2122_v55 = vor.u32 %v2289_v49, %v2119_v52  ;;  %v2269_v2 = vld [vmem:[%s3477_s1 + $0x3c4] sm:$0xf]  ;;  %v2007_v31 = vld [vmem:[%s3477_s1 + $0x388] sm:$0xf0] }
  0x76   :  { %1263 = vmatpush.bf16.msrb.mxu2 %v1906_v47  ;;  %1215 = vmatmul.bf16.gmra.mxu3 %v2720_v51  ;;  %v1754_v51 = vor.u32 %v2197_v32, %v1751_v33  ;;  %v2058_v47 = vor.u32 %v2273_v41, %v2055_v42  ;;  %v2261_v30 = vld [vmem:[%s3477_s1 + $0x384] sm:$0xf]  ;;  %v2071_v33 = vld [vmem:[%s3477_s1 + $0x408] sm:$0xf0] }
  0x77   :  { %1282 = vmatpush.bf16.msrb.mxu3 %v1970_v3  ;;  %v2039_v3 = vld [vmem:[%s3477_s1 + $0x3c8] sm:$0xf0]  ;;  %v2277_v32 = vld [vmem:[%s3477_s1 + $0x404] sm:$0xf]  ;;  %v2010_v44 = vor.u32 %v2261_v30, %v2007_v31 }
  0x78   :  { %1226 = vmatpush.bf16.msrb.mxu0 %v1770_v11  ;;  %v2031_v11 = vld [vmem:[%s3477_s1 + $0x3b8] sm:$0xf0] }
  0x79   :  { %1245 = vmatpush.bf16.msrb.mxu1 %v1834_v22  ;;  %v2026_v22 = vor.u32 %v2265_v16, %v2023_v19 }
  0x7a   :  { %1264 = vmatpush.bf16.msrb.mxu2 %v1898_v10  ;;  %v2042_v10 = vor.u32 %v2269_v2, %v2039_v3 }
  0x7b   :  { %1283 = vmatpush.bf16.msrb.mxu3 %v1962_v23  ;;  %v2090_v23 = vor.u32 %v2281_v20, %v2087_v21 }
  0x7c   :  { %1227 = vmatpush.bf16.msrb.mxu0 %v1762_v27  ;;  %v2079_v27 = vld [vmem:[%s3477_s1 + $0x418] sm:$0xf0] }
  0x7d   :  { %1246 = vmatpush.bf16.msrb.mxu1 %v1826_v34 }
  0x7e   :  { %1265 = vmatpush.bf16.msrb.mxu2 %v1890_v26  ;;  %v2279_v26 = vld [vmem:[%s3477_s1 + $0x414] sm:$0xf] }
  0x7f   :  { %1284 = vmatpush.bf16.msrb.mxu3 %v1954_v35  ;;  %v2082_v29 = vor.u32 %v2279_v26, %v2079_v27 }
  0x80   :  { %1228 = vmatpush.bf16.msrb.mxu0 %v1754_v51 }
  0x81   :  { %1247 = vmatpush.bf16.msrb.mxu1 %v1818_v43 }
  0x82   :  { %1266 = vmatpush.bf16.msrb.mxu2 %v1882_v50 }
  0x83   :  { %1285 = vmatpush.bf16.msrb.mxu3 %v1946_v45  ;;  %1229 = vmatmul.bf16.vlgmr.msrb.gmra.mxu0 %v2596_v57  ;;  %v2106_v57 = vor.u32 %v2285_v4, %v2103_v7 }
  0x84   :  { %1297 = vmatpush.bf16.msra.mxu0 %v2066_v38  ;;  %1248 = vmatmul.bf16.vlgmr.msrb.gmra.mxu1 %v2863_v0  ;;  %v2267_v0 = vld [vmem:[%s3477_s1 + $0x3b4] sm:$0xf] }
  0x85   :  { %1316 = vmatpush.bf16.msra.mxu1 %v2130_v46  ;;  %1267 = vmatmul.bf16.vlgmr.msrb.gmra.mxu2 %v2865_v1  ;;  %v2283_v1 = vld [vmem:[%s3477_s1 + $0x434] sm:$0xf]  ;;  %v2034_v12 = vor.u32 %v2267_v0, %v2031_v11 }
  0x86   :  { %2293 = vmatpush.bf16.msra.mxu2 %v2066_v38  ;;  %1286 = vmatmul.bf16.vlgmr.msrb.gmra.mxu3 %v2876_v5  ;;  %v2095_v5 = vld [vmem:[%s3477_s1 + $0x438] sm:$0xf0] }
  0x87   :  { %2301 = vmatpush.bf16.msra.mxu3 %v2130_v46  ;;  %v2098_v15 = vor.u32 %v2283_v1, %v2095_v5 }
  0x88   :  { %1298 = vmatpush.bf16.msra.mxu0 %v2058_v47 }
  0x89   :  { %1317 = vmatpush.bf16.msra.mxu1 %v2122_v55 }
  0x8a   :  { %2294 = vmatpush.bf16.msra.mxu2 %v2058_v47 }
  0x8b   :  { %2302 = vmatpush.bf16.msra.mxu3 %v2122_v55 }
  0x8c   :  { %1299 = vmatpush.bf16.msra.mxu0 %v2050_v62 }
  0x8d   :  { %1318 = vmatpush.bf16.msra.mxu1 %v2114_v63 }
  0x8e   :  { %2295 = vmatpush.bf16.msra.mxu2 %v2050_v62 }
  0x8f   :  { %2303 = vmatpush.bf16.msra.mxu3 %v2114_v63 }
  0x90   :  { %1300 = vmatpush.bf16.msra.mxu0 %v2042_v10 }
  0x91   :  { %1319 = vmatpush.bf16.msra.mxu1 %v2106_v57 }
  0x92   :  { %2296 = vmatpush.bf16.msra.mxu2 %v2042_v10 }
  0x93   :  { %2304 = vmatpush.bf16.msra.mxu3 %v2106_v57  ;;  %1234 = vmatmul.bf16.gmra.mxu0 %v2728_v56  ;;  %v2074_v56 = vor.u32 %v2277_v32, %v2071_v33 }
  0x94   :  { %1301 = vmatpush.bf16.msra.mxu0 %v2034_v12  ;;  %1253 = vmatmul.bf16.gmra.mxu1 %v2995_v8 }
  0x95   :  { %1320 = vmatpush.bf16.msra.mxu1 %v2098_v15  ;;  %1272 = vmatmul.bf16.gmra.mxu2 %v2997_v9 }
  0x96   :  { %2297 = vmatpush.bf16.msra.mxu2 %v2034_v12  ;;  %1291 = vmatmul.bf16.gmra.mxu3 %v3008_v13 }
  0x97   :  { %2305 = vmatpush.bf16.msra.mxu3 %v2098_v15 }
  0x98   :  { %1302 = vmatpush.bf16.msra.mxu0 %v2026_v22 }
  0x99   :  { %1321 = vmatpush.bf16.msra.mxu1 %v2090_v23 }
  0x9a   :  { %2298 = vmatpush.bf16.msra.mxu2 %v2026_v22 }
  0x9b   :  { %2306 = vmatpush.bf16.msra.mxu3 %v2090_v23 }
  0x9c   :  { %1303 = vmatpush.bf16.msra.mxu0 %v2018_v28 }
  0x9d   :  { %1322 = vmatpush.bf16.msra.mxu1 %v2082_v29 }
  0x9e   :  { %2299 = vmatpush.bf16.msra.mxu2 %v2018_v28 }
  0x9f   :  { %2307 = vmatpush.bf16.msra.mxu3 %v2082_v29 }
  0xa0   :  { %1304 = vmatpush.bf16.msra.mxu0 %v2010_v44  ;;  %v1002_v8 = vpop.f32.mrf.mxu0 }
  0xa1   :  { %1323 = vmatpush.bf16.msra.mxu1 %v2074_v56  ;;  %v1021_v48 = vpop.f32.mrf.mxu1 }
  0xa2   :  { %2300 = vmatpush.bf16.msra.mxu2 %v2010_v44  ;;  %v1022_v34 = vadd.f32 %v1021_v48, %v1002_v8 }
  0xa3   :  { %2308 = vmatpush.bf16.msra.mxu3 %v2074_v56  ;;  %1305 = vmatmul.bf16.vlgmr.msra.gmra.mxu0 %v2878_v6 }
  0xa4   :  { %1324 = vmatmul.bf16.vlgmr.msra.gmra.mxu1 %v3115_v17 }
  0xa5   :  { %1310 = vmatmul.bf16.vlgmr.msra.gmra.mxu2 %v3010_v14 }
  0xa6   :  { %1329 = vmatmul.bf16.vlgmr.msra.gmra.mxu3 %v3223_v18 }
  0xa8   :  { %v1040_v9 = vpop.f32.mrf.mxu2  ;;  %v1004_v36 = vpop.f32.mrf.mxu0 }
  0xa9   :  { %v1041_v13 = vadd.f32 %v1040_v9, %v1022_v34  ;;  %v1059_v35 = vpop.f32.mrf.mxu3  ;;  %v1023_v50 = vpop.f32.mrf.mxu1 }
  0xaa   :  { %v1024_v63 = vadd.f32 %v1023_v50, %v1004_v36 }
  0xab   :  { %v1060_v51 = vadd.f32 %v1059_v35, %v1041_v13 }
  0xb0   :  { %v1042_v37 = vpop.f32.mrf.mxu2  ;;  %v1007_v54 = vpop.f32.mrf.mxu0 }
  0xb1   :  { %v1061_v53 = vpop.f32.mrf.mxu3  ;;  %v1026_v38 = vpop.f32.mrf.mxu1  ;;  %v1043_v2 = vadd.f32 %v1042_v37, %v1024_v63 }
  0xb2   :  { %v1027_v3 = vadd.f32 %v1026_v38, %v1007_v54 }
  0xb3   :  { %v1062_v11 = vadd.f32 %v1061_v53, %v1043_v2 }
  0xb8   :  { %v1045_v39 = vpop.f32.mrf.mxu2  ;;  %v1009_v41 = vpop.f32.mrf.mxu0 }
  0xb9   :  { %v1064_v40 = vpop.f32.mrf.mxu3  ;;  %v1028_v6 = vpop.f32.mrf.mxu1  ;;  %v1046_v0 = vadd.f32 %v1045_v39, %v1027_v3 }
  0xba   :  { %v1029_v5 = vadd.f32 %v1028_v6, %v1009_v41 }
  0xbb   :  { %v1065_v1 = vadd.f32 %v1064_v40, %v1046_v0 }
  0xc0   :  { %v1047_v42 = vpop.f32.mrf.mxu2  ;;  %v1078_v43 = vpop.f32.mrf.mxu0 }
  0xc1   :  { %v1066_v17 = vpop.f32.mrf.mxu3  ;;  %v1097_v14 = vpop.f32.mrf.mxu1  ;;  %v1048_v15 = vadd.f32 %v1047_v42, %v1029_v5  ;;  %v1079_v16 = vadd.f32 %v1078_v43, %v1060_v51 }
  0xc3   :  { %v1067_v25 = vadd.f32 %v1066_v17, %v1048_v15  ;;  %v1098_v26 = vadd.f32 %v1097_v14, %v1079_v16 }
  0xc8   :  { %v1116_v45 = vpop.f32.mrf.mxu2  ;;  %v1080_v46 = vpop.f32.mrf.mxu0 }
  0xc9   :  { %v1135_v18 = vpop.f32.mrf.mxu3  ;;  %v1099_v47 = vpop.f32.mrf.mxu1  ;;  %v1081_v12 = vadd.f32 %v1080_v46, %v1062_v11  ;;  %v1117_v29 = vadd.f32 %v1116_v45, %v1098_v26 }
  0xcb   :  { %v1100_v24 = vadd.f32 %v1099_v47, %v1081_v12  ;;  %v1136_v48 = vadd.f32 %v1135_v18, %v1117_v29 }
  0xd0   :  { %v1118_v49 = vpop.f32.mrf.mxu2  ;;  %v1083_v55 = vpop.f32.mrf.mxu0 }
  0xd1   :  { %v1137_v52 = vpop.f32.mrf.mxu3  ;;  %v1102_v58 = vpop.f32.mrf.mxu1  ;;  %v1084_v19 = vadd.f32 %v1083_v55, %v1065_v1  ;;  %v1119_v27 = vadd.f32 %v1118_v49, %v1100_v24 }
  0xd3   :  { %v1103_v28 = vadd.f32 %v1102_v58, %v1084_v19  ;;  %v1138_v32 = vadd.f32 %v1137_v52, %v1119_v27 }
  0xd8   :  { %v1121_v59 = vpop.f32.mrf.mxu2  ;;  %v1085_v61 = vpop.f32.mrf.mxu0 }
  0xd9   :  { %v1140_v60 = vpop.f32.mrf.mxu3  ;;  %v1104_v62 = vpop.f32.mrf.mxu1  ;;  %v1122_v30 = vadd.f32 %v1121_v59, %v1103_v28  ;;  %v1086_v31 = vadd.f32 %v1085_v61, %v1067_v25 }
  0xdb   :  { %v1141_v34 = vadd.f32 %v1140_v60, %v1122_v30  ;;  %v1105_v9 = vadd.f32 %v1104_v62, %v1086_v31 }
  0xe0   :  { %v1123_v4 = vpop.f32.mrf.mxu2  ;;  %v1154_v10 = vpop.f32.mrf.mxu0 }
  0xe1   :  { %v1142_v7 = vpop.f32.mrf.mxu3  ;;  %v3382_v57 = vpop.f32.mrf.mxu1  ;;  %v1124_v35 = vadd.f32 %v1123_v4, %v1105_v9  ;;  %v3394_v36 = vadd.f32 %v1154_v10, %v1136_v48 }
  0xe3   :  { %v1143_v37 = vadd.f32 %v1142_v7, %v1124_v35  ;;  %v1355_v53 = vmul.f32 %v3394_v36, %v3394_v36 }
  0xe8   :  { %v3384_v20 = vpop.f32.mrf.mxu2  ;;  %v1156_v22 = vpop.f32.mrf.mxu0 }
  0xe9   :  { %v3386_v21 = vpop.f32.mrf.mxu3  ;;  %v3388_v23 = vpop.f32.mrf.mxu1  ;;  %v3392_v13 = vadd.f32 %v1156_v22, %v1138_v32  ;;  %v1193_v29 = vadd.f32 %v3384_v20, %v3382_v57 }
  0xeb   :  { %v1357_v51 = vmul.f32 %v3392_v13, %v3392_v13  ;;  %v1335_v54 = vadd.f32 %v3392_v13, %v3394_v36  ;;  %v1212_v31 = vadd.f32 %v3386_v21, %v1193_v29  ;;  %v3426_v21 = vld [vmem:[%s3479_s2] sm:$0x3] }
  0xed   :  { %v1363_v42 = vadd.f32 %v1357_v51, %v1355_v53 }
  0xf0   :  { %v1194_v33 = vpop.f32.mrf.mxu2  ;;  %v1159_v56 = vpop.f32.mrf.mxu0 }
  0xf1   :  { %v3390_v44 = vpop.f32.mrf.mxu3  ;;  %v1178_v8 = vpop.f32.mrf.mxu1  ;;  %v3396_v50 = vadd.f32 %v1159_v56, %v1141_v34  ;;  %v1195_v32 = vadd.f32 %v1194_v33, %v3388_v23  ;;  %v3431_v23 = vld [vmem:[%s3480_s3] sm:$0x3] }
  0xf3   :  { %v1359_v38 = vmul.f32 %v3396_v50, %v3396_v50  ;;  %v1336_v17 = vadd.f32 %v1335_v54, %v3396_v50  ;;  %v1214_v54 = vadd.f32 %v3390_v44, %v1195_v32 }
  0xf5   :  { %v1364_v14 = vadd.f32 %v1363_v42, %v1359_v38 }
  0xf8   :  { %v1197_v39 = vpop.f32.mrf.mxu2  ;;  %v1161_v41 = vpop.f32.mrf.mxu0 }
  0xf9   :  { %v1216_v40 = vpop.f32.mrf.mxu3  ;;  %v1180_v6 = vpop.f32.mrf.mxu1  ;;  %v3407_v43 = vadd.f32 %v1161_v41, %v1143_v37  ;;  %v1198_v9 = vadd.f32 %v1197_v39, %v1178_v8 }
  0xfb   :  { %v1337_v45 = vadd.f32 %v1336_v17, %v3407_v43  ;;  %v1361_v18 = vmul.f32 %v3407_v43, %v3407_v43  ;;  %v1217_v41 = vadd.f32 %v1216_v40, %v1198_v9 }
  0xfd   :  { %v1338_v46 = vrot.slane %v1337_v45, 4  ;;  %v1365_v47 = vadd.f32 %v1364_v14, %v1361_v18  ;;  %v1443_v18 = vperm.slane %v3431_v23, 0 }
  0xff   :  { %v1339_v49 = vadd.f32 %v1338_v46, %v1337_v45  ;;  %v1366_v52 = vrot.slane %v1365_v47, 4  ;;  %v1429_v45 = vperm.slane %v3426_v21, 0 }
 0x100   :  { %v1199_v55 = vpop.f32.mrf.mxu2  ;;  %v1230_v59 = vpop.f32.mrf.mxu0 }
 0x101   :  { %v1218_v58 = vpop.f32.mrf.mxu3  ;;  %v1249_v60 = vpop.f32.mrf.mxu1  ;;  %v1340_v61 = vrot.slane %v1339_v49, 2  ;;  %v1367_v62 = vadd.f32 %v1366_v52, %v1365_v47  ;;  %v1231_v56 = vadd.f32 %v1230_v59, %v1212_v31  ;;  %v1200_v57 = vadd.f32 %v1199_v55, %v1180_v6 }
 0x103   :  { %v1341_v63 = vadd.f32 %v1340_v61, %v1339_v49  ;;  %v1368_v2 = vrot.slane %v1367_v62, 2  ;;  %v1250_v38 = vadd.f32 %v1249_v60, %v1231_v56  ;;  %v1219_v40 = vadd.f32 %v1218_v58, %v1200_v57 }
 0x105   :  { %v1342_v3 = vrot.slane %v1341_v63, 1  ;;  %v1369_v4 = vadd.f32 %v1368_v2, %v1367_v62 }
 0x107   :  { %v1343_v7 = vadd.f32 %v1342_v3, %v1341_v63  ;;  %v1370_v10 = vrot.slane %v1369_v4, 1 }
 0x108   :  { %v1268_v0 = vpop.f32.mrf.mxu2  ;;  %v1232_v1 = vpop.f32.mrf.mxu0 }
 0x109   :  { %v1287_v11 = vpop.f32.mrf.mxu3  ;;  %v1251_v5 = vpop.f32.mrf.mxu1  ;;  %v3412_v12 = vmul.f32 0.03125, %v1343_v7  ;;  %v1371_v15 = vadd.f32 %v1370_v10, %v1369_v4  ;;  %v1269_v20 = vadd.f32 %v1268_v0, %v1250_v38  ;;  %v1233_v17 = vadd.f32 %v1232_v1, %v1214_v54 }
 0x10b   :  { %v1381_v16 = vmul.f32 0.03125, %v1371_v15  ;;  %v1383_v19 = vmul.f32 %v3412_v12, %v3412_v12  ;;  %v1288_v46 = vadd.f32 %v1287_v11, %v1269_v20  ;;  %v1252_v47 = vadd.f32 %v1251_v5, %v1233_v17 }
 0x10c   :  { %v1389_v60 = vsub.f32 %v3394_v36, %v3412_v12  ;;  %v1391_v61 = vsub.f32 %v3392_v13, %v3412_v12  ;;  %v1393_v58 = vsub.f32 %v3396_v50, %v3412_v12  ;;  %v1395_v62 = vsub.f32 %v3407_v43, %v3412_v12 }
 0x10d   :  { %v1385_v22 = vsub.f32 %v1381_v16, %v1383_v19 }
 0x10f   :  { %v1387_v24 = vmax.f32 %v1385_v22, 0.0 }
 0x110   :  { %v1270_v25 = vpop.f32.mrf.mxu2  ;;  %v1235_v27 = vpop.f32.mrf.mxu0 }
 0x111   :  { %v3416_v26 = vpop.f32.mrf.mxu3  ;;  %v1254_v28 = vpop.f32.mrf.mxu1  ;;  %v1397_v30 = vadd.f32 1e-05, %v1387_v24  ;;  %v1236_v33 = vadd.f32 %v1235_v27, %v1217_v41  ;;  %v1271_v2 = vadd.f32 %v1270_v25, %v1252_v47 }
 0x113   :  { %2309 = vrsqrt.f32 %v1397_v30  ;;  %vm1405_vm1 = vweird.f32 %v1397_v30  ;;  %v1255_v55 = vadd.f32 %v1254_v28, %v1236_v33  ;;  %v1290_v19 = vadd.f32 %v3416_v26, %v1271_v2 }
 0x118   :  { %v1273_v48 = vpop.f32.mrf.mxu2  ;;  %v1237_v35 = vpop.f32.mrf.mxu0 }
 0x119   :  { %v1292_v34 = vpop.f32.mrf.mxu3  ;;  %v1256_v51 = vpop.f32.mrf.mxu1  ;;  %v1238_v59 = vadd.f32 %v1237_v35, %v1219_v40  ;;  %v1274_v3 = vadd.f32 %v1273_v48, %v1255_v55 }
 0x11a   :  { %v2310_v37 = vpop.eup %2309 }
 0x11b   :  { %v1400_v53 = vmul.f32 %v2310_v37, %v1397_v30  ;;  %vm1406_vm0 = vweird.f32 %v2310_v37  ;;  %v1257_v36 = vadd.f32 %v1256_v51, %v1238_v59  ;;  %v1293_v43 = vadd.f32 %v1292_v34, %v1274_v3 }
 0x11c   :  { %vm1407_vm2 = vmor %vm1405_vm1, %vm1406_vm0 }
 0x11d   :  { %v1401_v42 = vmul.f32 %v2310_v37, %v1400_v53 }
 0x11f   :  { %v1402_v14 = vmul.f32 0.5, %v1401_v42 }
 0x120   :  { %v1275_v8 = vpop.f32.mrf.mxu2  ;;  %v1306_v6 = vpop.f32.mrf.mxu0 }
 0x121   :  { %v1294_v44 = vpop.f32.mrf.mxu3  ;;  %v1403_v39 = vsub.f32 1.5, %v1402_v14  ;;  %v1325_v49 = vpop.f32.mrf.mxu1  ;;  %v1307_v4 = vadd.f32 %v1306_v6, %v1288_v46  ;;  %v1276_v12 = vadd.f32 %v1275_v8, %v1257_v36 }
 0x123   :  { %v1404_v52 = vmul.f32 %v2310_v37, %v1403_v39  ;;  %v3445_v22 = vadd.f32 %v1325_v49, %v1307_v4  ;;  %v1295_v51 = vadd.f32 %v1294_v44, %v1276_v12 }
 0x125   :  { %v1408_v63 = vsel %vm1407_vm2, %v2310_v37, %v1404_v52  ;;  %v1356_v54 = vmul.f32 %v3445_v22, %v3445_v22 }
 0x126   :  { %v1419_v7 = vmul.f32 %v1408_v63, %v1389_v60  ;;  %v1421_v10 = vmul.f32 %v1408_v63, %v1391_v61  ;;  %v1423_v0 = vmul.f32 %v1408_v63, %v1393_v58  ;;  %v1425_v11 = vmul.f32 %v1408_v63, %v1395_v62 }
 0x128   :  { %v1433_v1 = vmul.f32 %v1429_v45, %v1419_v7  ;;  %v1435_v5 = vmul.f32 %v1429_v45, %v1421_v10  ;;  %v1437_v13 = vmul.f32 %v1429_v45, %v1423_v0  ;;  %v1439_v15 = vmul.f32 %v1429_v45, %v1425_v11  ;;  %v1311_v16 = vpop.f32.mrf.mxu2  ;;  %v1308_v24 = vpop.f32.mrf.mxu0 }
 0x129   :  { %v1330_v50 = vpop.f32.mrf.mxu3  ;;  %v1312_v30 = vadd.f32 %v1311_v16, %v1293_v43  ;;  %v1309_v31 = vadd.f32 %v1308_v24, %v1290_v19  ;;  %v1327_v35 = vpop.f32.mrf.mxu1 }
 0x12a   :  { %v1447_v25 = vadd.f32 %v1443_v18, %v1433_v1  ;;  %v1449_v27 = vadd.f32 %v1443_v18, %v1435_v5  ;;  %v1451_v28 = vadd.f32 %v1443_v18, %v1437_v13  ;;  %v1453_v29 = vadd.f32 %v1443_v18, %v1439_v15 }
 0x12b   :  { %v1328_v37 = vadd.f32 %v1327_v35, %v1309_v31  ;;  %v1331_v41 = vadd.f32 %v1330_v50, %v1312_v30  ;;  %v1430_v50 = vperm.slane %v3426_v21, 1 }
 0x12c   :  { %v1455_v32 = vmax.f32 %v1447_v25, 0.0  ;;  %v1457_v56 = vmax.f32 %v1449_v27, 0.0  ;;  %v1459_v48 = vmax.f32 %v1451_v28, 0.0  ;;  %v1461_v9 = vmax.f32 %v1453_v29, 0.0 }
 0x12d   :  { %v1344_v42 = vadd.f32 %v1328_v37, %v3445_v22  ;;  %v1358_v57 = vmul.f32 %v1328_v37, %v1328_v37  ;;  %v1360_v8 = vmul.f32 %v1331_v41, %v1331_v41  ;;  %v1444_v27 = vperm.slane %v3431_v23, 1 }
 0x12e   :  { %v1463_v53 = vmin.f32 %v1455_v32, 6.0  ;;  %v1465_v26 = vmin.f32 %v1457_v56, 6.0  ;;  %v1467_v34 = vmin.f32 %v1459_v48, 6.0  ;;  %v1469_v38 = vmin.f32 %v1461_v9, 6.0 }
 0x12f   :  { %v1372_v17 = vadd.f32 %v1358_v57, %v1356_v54  ;;  %v1345_v39 = vadd.f32 %v1344_v42, %v1331_v41 }
 0x130   :  { %1471 = vst [vmem:[%s3481_s4] sm:$0xff] %v1463_v53  ;;  %v1313_v20 = vpop.f32.mrf.mxu2 }
 0x131   :  { %1473 = vst [vmem:[%s3481_s4 + $0x10] sm:$0xff] %v1465_v26  ;;  %v1314_v14 = vadd.f32 %v1313_v20, %v1295_v51  ;;  %v1332_v33 = vpop.f32.mrf.mxu3  ;;  %v1373_v45 = vadd.f32 %v1372_v17, %v1360_v8 }
 0x132   :  { %1475 = vst [vmem:[%s3481_s4 + $0x20] sm:$0xff] %v1467_v34 }
 0x133   :  { %1477 = vst [vmem:[%s3481_s4 + $0x30] sm:$0xff] %v1469_v38  ;;  %v1333_v44 = vadd.f32 %v1332_v33, %v1314_v14 }
 0x135   :  { %v1346_v40 = vadd.f32 %v1345_v39, %v1333_v44  ;;  %v1362_v6 = vmul.f32 %v1333_v44, %v1333_v44 }
 0x137   :  { %v1347_v18 = vrot.slane %v1346_v40, 4  ;;  %v1374_v46 = vadd.f32 %v1373_v45, %v1362_v6 }
 0x139   :  { %v1348_v47 = vadd.f32 %v1347_v18, %v1346_v40  ;;  %v1375_v49 = vrot.slane %v1374_v46, 4 }
 0x13b   :  { %v1349_v52 = vrot.slane %v1348_v47, 2  ;;  %v1376_v55 = vadd.f32 %v1375_v49, %v1374_v46 }
 0x13d   :  { %v1350_v59 = vadd.f32 %v1349_v52, %v1348_v47  ;;  %v1377_v60 = vrot.slane %v1376_v55, 2 }
 0x13f   :  { %v1351_v61 = vrot.slane %v1350_v59, 1  ;;  %v1378_v58 = vadd.f32 %v1377_v60, %v1376_v55 }
 0x141   :  { %v1352_v62 = vadd.f32 %v1351_v61, %v1350_v59  ;;  %v1379_v63 = vrot.slane %v1378_v58, 1 }
 0x143   :  { %v1354_v2 = vmul.f32 0.03125, %v1352_v62  ;;  %v1380_v3 = vadd.f32 %v1379_v63, %v1378_v58 }
 0x145   :  { %v1382_v4 = vmul.f32 0.03125, %v1380_v3  ;;  %v1384_v7 = vmul.f32 %v1354_v2, %v1354_v2  ;;  %v1390_v19 = vsub.f32 %v3445_v22, %v1354_v2  ;;  %v1392_v43 = vsub.f32 %v1328_v37, %v1354_v2 }
 0x146   :  { %v1394_v12 = vsub.f32 %v1331_v41, %v1354_v2  ;;  %v1396_v24 = vsub.f32 %v1333_v44, %v1354_v2 }
 0x147   :  { %v1386_v10 = vsub.f32 %v1382_v4, %v1384_v7 }
 0x149   :  { %v1388_v0 = vmax.f32 %v1386_v10, 0.0 }
 0x14b   :  { %v1398_v11 = vadd.f32 1e-05, %v1388_v0 }
 0x14d   :  { %2311 = vrsqrt.f32 %v1398_v11  ;;  %vm1415_vm4 = vweird.f32 %v1398_v11 }
 0x153   :  { %v2312_v36 = vpop.eup %2311 }
 0x154   :  { %v1410_v1 = vmul.f32 %v2312_v36, %v1398_v11  ;;  %vm1416_vm3 = vweird.f32 %v2312_v36 }
 0x155   :  { %vm1417_vm5 = vmor %vm1415_vm4, %vm1416_vm3 }
 0x156   :  { %v1411_v5 = vmul.f32 %v2312_v36, %v1410_v1 }
 0x158   :  { %v1412_v13 = vmul.f32 0.5, %v1411_v5 }
 0x15a   :  { %v1413_v15 = vsub.f32 1.5, %v1412_v13 }
 0x15c   :  { %v1414_v16 = vmul.f32 %v2312_v36, %v1413_v15 }
 0x15e   :  { %v1418_v25 = vsel %vm1417_vm5, %v2312_v36, %v1414_v16 }
 0x15f   :  { %v1420_v28 = vmul.f32 %v1418_v25, %v1390_v19  ;;  %v1422_v29 = vmul.f32 %v1418_v25, %v1392_v43  ;;  %v1424_v30 = vmul.f32 %v1418_v25, %v1394_v12  ;;  %v1426_v31 = vmul.f32 %v1418_v25, %v1396_v24 }
 0x161   :  { %v1434_v32 = vmul.f32 %v1430_v50, %v1420_v28  ;;  %v1436_v56 = vmul.f32 %v1430_v50, %v1422_v29  ;;  %v1438_v48 = vmul.f32 %v1430_v50, %v1424_v30  ;;  %v1440_v9 = vmul.f32 %v1430_v50, %v1426_v31 }
 0x163   :  { %v1448_v35 = vadd.f32 %v1444_v27, %v1434_v32  ;;  %v1450_v51 = vadd.f32 %v1444_v27, %v1436_v56  ;;  %v1452_v21 = vadd.f32 %v1444_v27, %v1438_v48  ;;  %v1454_v53 = vadd.f32 %v1444_v27, %v1440_v9 }
 0x165   :  { %v1456_v22 = vmax.f32 %v1448_v35, 0.0  ;;  %v1458_v37 = vmax.f32 %v1450_v51, 0.0  ;;  %v1460_v26 = vmax.f32 %v1452_v21, 0.0  ;;  %v1462_v34 = vmax.f32 %v1454_v53, 0.0 }
 0x167   :  { %v1464_v54 = vmin.f32 %v1456_v22, 6.0  ;;  %v1466_v38 = vmin.f32 %v1458_v37, 6.0  ;;  %v1468_v41 = vmin.f32 %v1460_v26, 6.0  ;;  %v1470_v23 = vmin.f32 %v1462_v34, 6.0 }
 0x169   :  { %1472 = vst [vmem:[%s3481_s4 + $0x8] sm:$0xff] %v1464_v54 }
 0x16a   :  { %1474 = vst [vmem:[%s3481_s4 + $0x18] sm:$0xff] %v1466_v38 }
 0x16b   :  { %1476 = vst [vmem:[%s3481_s4 + $0x28] sm:$0xff] %v1468_v41 }
 0x16c   :  { %1478 = vst [vmem:[%s3481_s4 + $0x38] sm:$0xff] %v1470_v23 }

// kernel: _discriminator_forward.8
= control target key start
LH: loop header
LB: loop body
LE: loop exit
PB: predicated region body
PF: predicated region fallthrough
CT: control target
= control target key end

     0   :  { %s19901_s1 = inlined_call_operand.vmem [shape: bf16[4096,512], index: 1, kind: input, shape index: {}]   ;;  %s19902_s0 = inlined_call_operand.vmem [shape: bf16[8,4096], index: 0, kind: input, shape index: {}]   ;;  %s19903_s2 = inlined_call_operand.vmem [shape: f32[1,512], index: 2, kind: input, shape index: {}]   ;;  %s19904_s3 = inlined_call_operand.vmem [shape: f32[1,512], index: 3, kind: input, shape index: {}]   ;;  %s19905_s4 = inlined_call_operand.vmem [shape: f32[8,512], index: 4, kind: output, shape index: {}]  }
   0x1   :  { %v8235_v0 = vld [vmem:[%s19901_s1 + $0xe0] sm:$0xf]  ;;  %v12247_v1 = vld [vmem:[%s19901_s1 + $0xec] sm:$0xf0] }
   0x2   :  { %v8363_v2 = vld [vmem:[%s19901_s1 + $0x1e0] sm:$0xf]  ;;  %v8236_v3 = vor.u32 %v12247_v1, %v8235_v0  ;;  %v12279_v4 = vld [vmem:[%s19901_s1 + $0x1ec] sm:$0xf0] }
   0x3   :  { %v8491_v5 = vld [vmem:[%s19901_s1 + $0x2e0] sm:$0xf]  ;;  %v12311_v6 = vld [vmem:[%s19901_s1 + $0x2ec] sm:$0xf0]  ;;  %v8364_v7 = vor.u32 %v12279_v4, %v8363_v2 }
   0x4   :  { %v8492_v8 = vor.u32 %v12311_v6, %v8491_v5  ;;  %v8619_v9 = vld [vmem:[%s19901_s1 + $0x3e0] sm:$0xf]  ;;  %v12343_v10 = vld [vmem:[%s19901_s1 + $0x3ec] sm:$0xf0]  ;;  %6289 = vmatpush.bf16.msra.mxu0 %v8236_v3 }
   0x5   :  { %v8219_v11 = vld [vmem:[%s19901_s1 + $0xc0] sm:$0xf]  ;;  %v8620_v12 = vor.u32 %v12343_v10, %v8619_v9  ;;  %v12243_v13 = vld [vmem:[%s19901_s1 + $0xcc] sm:$0xf0]  ;;  %6302 = vmatpush.bf16.msra.mxu1 %v8364_v7 }
   0x6   :  { %v8347_v14 = vld [vmem:[%s19901_s1 + $0x1c0] sm:$0xf]  ;;  %v12275_v15 = vld [vmem:[%s19901_s1 + $0x1cc] sm:$0xf0]  ;;  %6315 = vmatpush.bf16.msra.mxu2 %v8492_v8  ;;  %v8220_v16 = vor.u32 %v12243_v13, %v8219_v11 }
   0x7   :  { %v8348_v17 = vor.u32 %v12275_v15, %v8347_v14  ;;  %v8475_v18 = vld [vmem:[%s19901_s1 + $0x2c0] sm:$0xf]  ;;  %v12307_v19 = vld [vmem:[%s19901_s1 + $0x2cc] sm:$0xf0]  ;;  %6328 = vmatpush.bf16.msra.mxu3 %v8620_v12 }
   0x8   :  { %v8603_v20 = vld [vmem:[%s19901_s1 + $0x3c0] sm:$0xf]  ;;  %v8476_v21 = vor.u32 %v12307_v19, %v8475_v18  ;;  %v12339_v22 = vld [vmem:[%s19901_s1 + $0x3cc] sm:$0xf0]  ;;  %6290 = vmatpush.bf16.msra.mxu0 %v8220_v16 }
   0x9   :  { %v8203_v23 = vld [vmem:[%s19901_s1 + $0xa0] sm:$0xf]  ;;  %v12239_v24 = vld [vmem:[%s19901_s1 + $0xac] sm:$0xf0]  ;;  %v8604_v25 = vor.u32 %v12339_v22, %v8603_v20  ;;  %6303 = vmatpush.bf16.msra.mxu1 %v8348_v17 }
   0xa   :  { %v8331_v26 = vld [vmem:[%s19901_s1 + $0x1a0] sm:$0xf]  ;;  %v12271_v27 = vld [vmem:[%s19901_s1 + $0x1ac] sm:$0xf0]  ;;  %v8204_v29 = vor.u32 %v12239_v24, %v8203_v23  ;;  %6316 = vmatpush.bf16.msra.mxu2 %v8476_v21 }
   0xb   :  { %v8459_v28 = vld [vmem:[%s19901_s1 + $0x2a0] sm:$0xf]  ;;  %v12303_v30 = vld [vmem:[%s19901_s1 + $0x2ac] sm:$0xf0]  ;;  %v8332_v33 = vor.u32 %v12271_v27, %v8331_v26  ;;  %6329 = vmatpush.bf16.msra.mxu3 %v8604_v25 }
   0xc   :  { %v8587_v31 = vld [vmem:[%s19901_s1 + $0x3a0] sm:$0xf]  ;;  %v12335_v32 = vld [vmem:[%s19901_s1 + $0x3ac] sm:$0xf0]  ;;  %v8460_v34 = vor.u32 %v12303_v30, %v8459_v28  ;;  %6291 = vmatpush.bf16.msra.mxu0 %v8204_v29 }
   0xd   :  { %v8187_v35 = vld [vmem:[%s19901_s1 + $0x80] sm:$0xf]  ;;  %v12235_v36 = vld [vmem:[%s19901_s1 + $0x8c] sm:$0xf0]  ;;  %v8588_v38 = vor.u32 %v12335_v32, %v8587_v31  ;;  %6304 = vmatpush.bf16.msra.mxu1 %v8332_v33 }
   0xe   :  { %v8315_v37 = vld [vmem:[%s19901_s1 + $0x180] sm:$0xf]  ;;  %v12267_v39 = vld [vmem:[%s19901_s1 + $0x18c] sm:$0xf0]  ;;  %v8188_v44 = vor.u32 %v12235_v36, %v8187_v35  ;;  %6317 = vmatpush.bf16.msra.mxu2 %v8460_v34 }
   0xf   :  { %v8443_v40 = vld [vmem:[%s19901_s1 + $0x280] sm:$0xf]  ;;  %v12299_v41 = vld [vmem:[%s19901_s1 + $0x28c] sm:$0xf0]  ;;  %v8316_v45 = vor.u32 %v12267_v39, %v8315_v37  ;;  %6330 = vmatpush.bf16.msra.mxu3 %v8588_v38 }
  0x10   :  { %v8571_v42 = vld [vmem:[%s19901_s1 + $0x380] sm:$0xf]  ;;  %v12331_v43 = vld [vmem:[%s19901_s1 + $0x38c] sm:$0xf0]  ;;  %v8444_v46 = vor.u32 %v12299_v41, %v8443_v40  ;;  %6292 = vmatpush.bf16.msra.mxu0 %v8188_v44 }
  0x11   :  { %v8171_v47 = vld [vmem:[%s19901_s1 + $0x60] sm:$0xf]  ;;  %v12231_v48 = vld [vmem:[%s19901_s1 + $0x6c] sm:$0xf0]  ;;  %v8572_v50 = vor.u32 %v12331_v43, %v8571_v42  ;;  %6305 = vmatpush.bf16.msra.mxu1 %v8316_v45 }
  0x12   :  { %v8299_v49 = vld [vmem:[%s19901_s1 + $0x160] sm:$0xf]  ;;  %v12263_v51 = vld [vmem:[%s19901_s1 + $0x16c] sm:$0xf0]  ;;  %v8172_v56 = vor.u32 %v12231_v48, %v8171_v47  ;;  %6318 = vmatpush.bf16.msra.mxu2 %v8444_v46 }
  0x13   :  { %v8427_v52 = vld [vmem:[%s19901_s1 + $0x260] sm:$0xf]  ;;  %v12295_v53 = vld [vmem:[%s19901_s1 + $0x26c] sm:$0xf0]  ;;  %v8300_v57 = vor.u32 %v12263_v51, %v8299_v49  ;;  %6331 = vmatpush.bf16.msra.mxu3 %v8572_v50 }
  0x14   :  { %v8555_v54 = vld [vmem:[%s19901_s1 + $0x360] sm:$0xf]  ;;  %v12327_v55 = vld [vmem:[%s19901_s1 + $0x36c] sm:$0xf0]  ;;  %v8428_v58 = vor.u32 %v12295_v53, %v8427_v52  ;;  %6293 = vmatpush.bf16.msra.mxu0 %v8172_v56 }
  0x15   :  { %v8155_v59 = vld [vmem:[%s19901_s1 + $0x40] sm:$0xf]  ;;  %v12227_v60 = vld [vmem:[%s19901_s1 + $0x4c] sm:$0xf0]  ;;  %v8556_v62 = vor.u32 %v12327_v55, %v8555_v54  ;;  %6306 = vmatpush.bf16.msra.mxu1 %v8300_v57 }
  0x16   :  { %v8283_v61 = vld [vmem:[%s19901_s1 + $0x140] sm:$0xf]  ;;  %v12259_v63 = vld [vmem:[%s19901_s1 + $0x14c] sm:$0xf0]  ;;  %v8156_v4 = vor.u32 %v12227_v60, %v8155_v59  ;;  %6319 = vmatpush.bf16.msra.mxu2 %v8428_v58  ;;  %v18_v58 = vld [vmem:[%s19902_s0 + $0x8] sm:$0xff] }
  0x17   :  { %v8411_v0 = vld [vmem:[%s19901_s1 + $0x240] sm:$0xf]  ;;  %v12291_v1 = vld [vmem:[%s19901_s1 + $0x24c] sm:$0xf0]  ;;  %v8284_v5 = vor.u32 %v12259_v63, %v8283_v61  ;;  %6332 = vmatpush.bf16.msra.mxu3 %v8556_v62  ;;  %v1075_v63 = vunpack.c.l.b16 %v18_v58 }
  0x18   :  { %v8539_v2 = vld [vmem:[%s19901_s1 + $0x340] sm:$0xf]  ;;  %v12323_v3 = vld [vmem:[%s19901_s1 + $0x34c] sm:$0xf0]  ;;  %v8412_v6 = vor.u32 %v12291_v1, %v8411_v0  ;;  %6294 = vmatpush.bf16.msra.mxu0 %v8156_v4  ;;  %v1076_v0 = vunpack.c.h.b16 %v18_v58 }
  0x19   :  { %v8139_v7 = vld [vmem:[%s19901_s1 + $0x20] sm:$0xf]  ;;  %v12223_v8 = vld [vmem:[%s19901_s1 + $0x2c] sm:$0xf0]  ;;  %v8540_v10 = vor.u32 %v12323_v3, %v8539_v2  ;;  %6307 = vmatpush.bf16.msra.mxu1 %v8284_v5  ;;  %v13545_v4 = vpack.c.b16 %v1075_v63, %v1075_v63 }
  0x1a   :  { %v8267_v9 = vld [vmem:[%s19901_s1 + $0x120] sm:$0xf]  ;;  %v12255_v11 = vld [vmem:[%s19901_s1 + $0x12c] sm:$0xf0]  ;;  %v8140_v16 = vor.u32 %v12223_v8, %v8139_v7  ;;  %6320 = vmatpush.bf16.msra.mxu2 %v8412_v6  ;;  %v13550_v6 = vpack.c.b16 %v1076_v0, %v1076_v0 }
  0x1b   :  { %v8395_v12 = vld [vmem:[%s19901_s1 + $0x220] sm:$0xf]  ;;  %v12287_v13 = vld [vmem:[%s19901_s1 + $0x22c] sm:$0xf0]  ;;  %v8268_v19 = vor.u32 %v12255_v11, %v8267_v9  ;;  %6333 = vmatpush.bf16.msra.mxu3 %v8540_v10 }
  0x1c   :  { %v8523_v14 = vld [vmem:[%s19901_s1 + $0x320] sm:$0xf]  ;;  %v12319_v15 = vld [vmem:[%s19901_s1 + $0x32c] sm:$0xf0]  ;;  %v8396_v20 = vor.u32 %v12287_v13, %v8395_v12  ;;  %6295 = vmatpush.bf16.msra.mxu0 %v8140_v16 }
  0x1d   :  { %v8123_v17 = vld [vmem:[%s19901_s1] sm:$0xf]  ;;  %v12219_v18 = vld [vmem:[%s19901_s1 + $0xc] sm:$0xf0]  ;;  %v8524_v24 = vor.u32 %v12319_v15, %v8523_v14  ;;  %6308 = vmatpush.bf16.msra.mxu1 %v8268_v19 }
  0x1e   :  { %v8251_v21 = vld [vmem:[%s19901_s1 + $0x100] sm:$0xf]  ;;  %v12251_v22 = vld [vmem:[%s19901_s1 + $0x10c] sm:$0xf0]  ;;  %v8124_v31 = vor.u32 %v12219_v18, %v8123_v17  ;;  %6321 = vmatpush.bf16.msra.mxu2 %v8396_v20 }
  0x1f   :  { %v8379_v23 = vld [vmem:[%s19901_s1 + $0x200] sm:$0xf]  ;;  %v12283_v25 = vld [vmem:[%s19901_s1 + $0x20c] sm:$0xf0]  ;;  %v8252_v35 = vor.u32 %v12251_v22, %v8251_v21  ;;  %6334 = vmatpush.bf16.msra.mxu3 %v8524_v24 }
  0x20   :  { %v8507_v26 = vld [vmem:[%s19901_s1 + $0x300] sm:$0xf]  ;;  %v12315_v27 = vld [vmem:[%s19901_s1 + $0x30c] sm:$0xf0]  ;;  %v8380_v36 = vor.u32 %v12283_v25, %v8379_v23  ;;  %6296 = vmatpush.bf16.msra.mxu0 %v8124_v31 }
  0x21   :  { %v8747_v28 = vld [vmem:[%s19901_s1 + $0x4e0] sm:$0xf]  ;;  %v12375_v29 = vld [vmem:[%s19901_s1 + $0x4ec] sm:$0xf0]  ;;  %v8508_v39 = vor.u32 %v12315_v27, %v8507_v26  ;;  %6309 = vmatpush.bf16.msra.mxu1 %v8252_v35 }
  0x22   :  { %v8875_v30 = vld [vmem:[%s19901_s1 + $0x5e0] sm:$0xf]  ;;  %v12407_v32 = vld [vmem:[%s19901_s1 + $0x5ec] sm:$0xf0]  ;;  %v8748_v40 = vor.u32 %v12375_v29, %v8747_v28  ;;  %6322 = vmatpush.bf16.msra.mxu2 %v8380_v36 }
  0x23   :  { %v9003_v33 = vld [vmem:[%s19901_s1 + $0x6e0] sm:$0xf]  ;;  %v12439_v34 = vld [vmem:[%s19901_s1 + $0x6ec] sm:$0xf0]  ;;  %v8876_v41 = vor.u32 %v12407_v32, %v8875_v30  ;;  %6335 = vmatpush.bf16.msra.mxu3 %v8508_v39 }
  0x24   :  { %v9131_v37 = vld [vmem:[%s19901_s1 + $0x7e0] sm:$0xf]  ;;  %v12471_v38 = vld [vmem:[%s19901_s1 + $0x7ec] sm:$0xf0]  ;;  %v9004_v42 = vor.u32 %v12439_v34, %v9003_v33  ;;  %6341 = vmatpush.bf16.msrb.mxu0 %v8748_v40 }
  0x25   :  { %v8731_v43 = vld [vmem:[%s19901_s1 + $0x4c0] sm:$0xf]  ;;  %v12371_v44 = vld [vmem:[%s19901_s1 + $0x4cc] sm:$0xf0]  ;;  %v9132_v46 = vor.u32 %v12471_v38, %v9131_v37  ;;  %6354 = vmatpush.bf16.msrb.mxu1 %v8876_v41  ;;  %6323 = vmatmul.bf16.vlgmr.msra.gmra.mxu2 %v13545_v4 }
  0x26   :  { %v8859_v45 = vld [vmem:[%s19901_s1 + $0x5c0] sm:$0xf]  ;;  %v12403_v47 = vld [vmem:[%s19901_s1 + $0x5cc] sm:$0xf0]  ;;  %v8732_v52 = vor.u32 %v12371_v44, %v8731_v43  ;;  %6367 = vmatpush.bf16.msrb.mxu2 %v9004_v42  ;;  %6336 = vmatmul.bf16.vlgmr.msra.gmra.mxu3 %v13550_v6 }
  0x27   :  { %v8987_v48 = vld [vmem:[%s19901_s1 + $0x6c0] sm:$0xf]  ;;  %v12435_v49 = vld [vmem:[%s19901_s1 + $0x6cc] sm:$0xf0]  ;;  %v8860_v54 = vor.u32 %v12403_v47, %v8859_v45  ;;  %6380 = vmatpush.bf16.msrb.mxu3 %v9132_v46 }
  0x28   :  { %v9115_v50 = vld [vmem:[%s19901_s1 + $0x7c0] sm:$0xf]  ;;  %v12467_v51 = vld [vmem:[%s19901_s1 + $0x7cc] sm:$0xf0]  ;;  %v8988_v55 = vor.u32 %v12435_v49, %v8987_v48  ;;  %6342 = vmatpush.bf16.msrb.mxu0 %v8732_v52 }
  0x29   :  { %v8715_v53 = vld [vmem:[%s19901_s1 + $0x4a0] sm:$0xf]  ;;  %v12367_v56 = vld [vmem:[%s19901_s1 + $0x4ac] sm:$0xf0]  ;;  %v9116_v59 = vor.u32 %v12467_v51, %v9115_v50  ;;  %6355 = vmatpush.bf16.msrb.mxu1 %v8860_v54 }
  0x2a   :  { %v8843_v57 = vld [vmem:[%s19901_s1 + $0x5a0] sm:$0xf]  ;;  %v12399_v60 = vld [vmem:[%s19901_s1 + $0x5ac] sm:$0xf0]  ;;  %v8716_v3 = vor.u32 %v12367_v56, %v8715_v53  ;;  %6368 = vmatpush.bf16.msrb.mxu2 %v8988_v55 }
  0x2b   :  { %v8971_v61 = vld [vmem:[%s19901_s1 + $0x6a0] sm:$0xf]  ;;  %v12431_v62 = vld [vmem:[%s19901_s1 + $0x6ac] sm:$0xf0]  ;;  %v8844_v7 = vor.u32 %v12399_v60, %v8843_v57  ;;  %6381 = vmatpush.bf16.msrb.mxu3 %v9116_v59 }
  0x2c   :  { %v9099_v1 = vld [vmem:[%s19901_s1 + $0x7a0] sm:$0xf]  ;;  %v12463_v2 = vld [vmem:[%s19901_s1 + $0x7ac] sm:$0xf0]  ;;  %v8972_v8 = vor.u32 %v12431_v62, %v8971_v61  ;;  %6343 = vmatpush.bf16.msrb.mxu0 %v8716_v3  ;;  %v20_v3 = vld [vmem:[%s19902_s0 + $0x18] sm:$0xff] }
  0x2d   :  { %v17_v5 = vld [vmem:[%s19902_s0] sm:$0xff]  ;;  %v12363_v10 = vld [vmem:[%s19901_s1 + $0x48c] sm:$0xf0]  ;;  %v9100_v14 = vor.u32 %v12463_v2, %v9099_v1  ;;  %6356 = vmatpush.bf16.msrb.mxu1 %v8844_v7 }
  0x2e   :  { %v8699_v9 = vld [vmem:[%s19901_s1 + $0x480] sm:$0xf]  ;;  %v1073_v12 = vunpack.c.l.b16 %v17_v5  ;;  %v1074_v13 = vunpack.c.h.b16 %v17_v5  ;;  %v12395_v15 = vld [vmem:[%s19901_s1 + $0x58c] sm:$0xf0]  ;;  %6369 = vmatpush.bf16.msrb.mxu2 %v8972_v8 }
  0x2f   :  { %v8827_v11 = vld [vmem:[%s19901_s1 + $0x580] sm:$0xf]  ;;  %v12427_v17 = vld [vmem:[%s19901_s1 + $0x68c] sm:$0xf0]  ;;  %v8700_v22 = vor.u32 %v12363_v10, %v8699_v9  ;;  %6382 = vmatpush.bf16.msrb.mxu3 %v9100_v14 }
  0x30   :  { %v8955_v16 = vld [vmem:[%s19901_s1 + $0x680] sm:$0xf]  ;;  %v12459_v19 = vld [vmem:[%s19901_s1 + $0x78c] sm:$0xf0]  ;;  %v13577_v20 = vpack.c.b16 %v1073_v12, %v1073_v12  ;;  %v13580_v21 = vpack.c.b16 %v1074_v13, %v1074_v13  ;;  %v8828_v23 = vor.u32 %v12395_v15, %v8827_v11 }
  0x31   :  { %v9083_v18 = vld [vmem:[%s19901_s1 + $0x780] sm:$0xf]  ;;  %v8956_v24 = vor.u32 %v12427_v17, %v8955_v16  ;;  %v12359_v26 = vld [vmem:[%s19901_s1 + $0x46c] sm:$0xf0]  ;;  %6344 = vmatpush.bf16.msrb.mxu0 %v8700_v22  ;;  %v1079_v17 = vunpack.c.l.b16 %v20_v3 }
  0x32   :  { %v8683_v25 = vld [vmem:[%s19901_s1 + $0x460] sm:$0xf]  ;;  %v9084_v28 = vor.u32 %v12459_v19, %v9083_v18  ;;  %v12391_v29 = vld [vmem:[%s19901_s1 + $0x56c] sm:$0xf0]  ;;  %6297 = vmatmul.bf16.vlgmr.msra.gmra.mxu0 %v13577_v20  ;;  %6310 = vmatmul.bf16.vlgmr.msra.gmra.mxu1 %v13580_v21 }
  0x33   :  { %v8811_v27 = vld [vmem:[%s19901_s1 + $0x560] sm:$0xf]  ;;  %v12423_v31 = vld [vmem:[%s19901_s1 + $0x66c] sm:$0xf0]  ;;  %v8684_v34 = vor.u32 %v12359_v26, %v8683_v25  ;;  %6357 = vmatpush.bf16.msrb.mxu1 %v8828_v23  ;;  %6370 = vmatpush.bf16.msrb.mxu2 %v8956_v24  ;;  %v1080_v25 = vunpack.c.h.b16 %v20_v3 }
  0x34   :  { %v8939_v30 = vld [vmem:[%s19901_s1 + $0x660] sm:$0xf]  ;;  %v12455_v33 = vld [vmem:[%s19901_s1 + $0x76c] sm:$0xf0]  ;;  %v8812_v35 = vor.u32 %v12391_v29, %v8811_v27  ;;  %6383 = vmatpush.bf16.msrb.mxu3 %v9084_v28 }
  0x35   :  { %v9067_v32 = vld [vmem:[%s19901_s1 + $0x760] sm:$0xf]  ;;  %v8940_v36 = vor.u32 %v12423_v31, %v8939_v30  ;;  %v12355_v38 = vld [vmem:[%s19901_s1 + $0x44c] sm:$0xf0]  ;;  %6345 = vmatpush.bf16.msrb.mxu0 %v8684_v34 }
  0x36   :  { %v8667_v37 = vld [vmem:[%s19901_s1 + $0x440] sm:$0xf]  ;;  %v9068_v40 = vor.u32 %v12455_v33, %v9067_v32  ;;  %v12387_v41 = vld [vmem:[%s19901_s1 + $0x54c] sm:$0xf0] }
  0x37   :  { %v8795_v39 = vld [vmem:[%s19901_s1 + $0x540] sm:$0xf]  ;;  %v12419_v43 = vld [vmem:[%s19901_s1 + $0x64c] sm:$0xf0]  ;;  %v8668_v46 = vor.u32 %v12355_v38, %v8667_v37  ;;  %6358 = vmatpush.bf16.msrb.mxu1 %v8812_v35  ;;  %6371 = vmatpush.bf16.msrb.mxu2 %v8940_v36  ;;  %v13728_v38 = vpack.c.b16 %v1079_v17, %v1079_v17 }
  0x38   :  { %v8923_v42 = vld [vmem:[%s19901_s1 + $0x640] sm:$0xf]  ;;  %v12451_v45 = vld [vmem:[%s19901_s1 + $0x74c] sm:$0xf0]  ;;  %v8796_v47 = vor.u32 %v12387_v41, %v8795_v39  ;;  %6384 = vmatpush.bf16.msrb.mxu3 %v9068_v40 }
  0x39   :  { %v9051_v44 = vld [vmem:[%s19901_s1 + $0x740] sm:$0xf]  ;;  %v8924_v48 = vor.u32 %v12419_v43, %v8923_v42  ;;  %v12351_v50 = vld [vmem:[%s19901_s1 + $0x42c] sm:$0xf0]  ;;  %6346 = vmatpush.bf16.msrb.mxu0 %v8668_v46  ;;  %v13738_v42 = vpack.c.b16 %v1080_v25, %v1080_v25 }
  0x3a   :  { %v8651_v49 = vld [vmem:[%s19901_s1 + $0x420] sm:$0xf]  ;;  %v9052_v52 = vor.u32 %v12451_v45, %v9051_v44  ;;  %v12383_v53 = vld [vmem:[%s19901_s1 + $0x52c] sm:$0xf0] }
  0x3b   :  { %v8779_v51 = vld [vmem:[%s19901_s1 + $0x520] sm:$0xf]  ;;  %v12415_v55 = vld [vmem:[%s19901_s1 + $0x62c] sm:$0xf0]  ;;  %v8652_v59 = vor.u32 %v12351_v50, %v8651_v49  ;;  %6359 = vmatpush.bf16.msrb.mxu1 %v8796_v47  ;;  %6372 = vmatpush.bf16.msrb.mxu2 %v8924_v48 }
  0x3c   :  { %v8907_v54 = vld [vmem:[%s19901_s1 + $0x620] sm:$0xf]  ;;  %v12447_v57 = vld [vmem:[%s19901_s1 + $0x72c] sm:$0xf0]  ;;  %v8780_v63 = vor.u32 %v12383_v53, %v8779_v51  ;;  %6385 = vmatpush.bf16.msrb.mxu3 %v9052_v52 }
  0x3d   :  { %v9035_v56 = vld [vmem:[%s19901_s1 + $0x720] sm:$0xf]  ;;  %v12347_v60 = vld [vmem:[%s19901_s1 + $0x40c] sm:$0xf0]  ;;  %v8908_v0 = vor.u32 %v12415_v55, %v8907_v54  ;;  %6347 = vmatpush.bf16.msrb.mxu0 %v8652_v59 }
  0x3e   :  { %v8635_v58 = vld [vmem:[%s19901_s1 + $0x400] sm:$0xf]  ;;  %v12379_v62 = vld [vmem:[%s19901_s1 + $0x50c] sm:$0xf0]  ;;  %v9036_v5 = vor.u32 %v12447_v57, %v9035_v56 }
  0x3f   :  { %v8763_v61 = vld [vmem:[%s19901_s1 + $0x500] sm:$0xf]  ;;  %v12411_v2 = vld [vmem:[%s19901_s1 + $0x60c] sm:$0xf0]  ;;  %v8636_v13 = vor.u32 %v12347_v60, %v8635_v58  ;;  %6360 = vmatpush.bf16.msrb.mxu1 %v8780_v63  ;;  %6373 = vmatpush.bf16.msrb.mxu2 %v8908_v0 }
  0x40   :  { %v8891_v1 = vld [vmem:[%s19901_s1 + $0x600] sm:$0xf]  ;;  %v12443_v8 = vld [vmem:[%s19901_s1 + $0x70c] sm:$0xf0]  ;;  %v8764_v18 = vor.u32 %v12379_v62, %v8763_v61  ;;  %6386 = vmatpush.bf16.msrb.mxu3 %v9036_v5 }
  0x41   :  { %v9019_v7 = vld [vmem:[%s19901_s1 + $0x700] sm:$0xf]  ;;  %v19_v9 = vld [vmem:[%s19902_s0 + $0x10] sm:$0xff]  ;;  %v8892_v19 = vor.u32 %v12411_v2, %v8891_v1  ;;  %6348 = vmatpush.bf16.msrb.mxu0 %v8636_v13 }
  0x42   :  { %v9259_v10 = vld [vmem:[%s19901_s1 + $0x8e0] sm:$0xf]  ;;  %v12503_v11 = vld [vmem:[%s19901_s1 + $0x8ec] sm:$0xf0]  ;;  %v1077_v24 = vunpack.c.l.b16 %v19_v9  ;;  %v9020_v26 = vor.u32 %v12443_v8, %v9019_v7  ;;  %v1078_v28 = vunpack.c.h.b16 %v19_v9 }
  0x43   :  { %v9387_v12 = vld [vmem:[%s19901_s1 + $0x9e0] sm:$0xf]  ;;  %v12535_v14 = vld [vmem:[%s19901_s1 + $0x9ec] sm:$0xf0]  ;;  %v9260_v27 = vor.u32 %v12503_v11, %v9259_v10  ;;  %6361 = vmatpush.bf16.msrb.mxu1 %v8764_v18  ;;  %6374 = vmatpush.bf16.msrb.mxu2 %v8892_v19 }
  0x44   :  { %v9515_v15 = vld [vmem:[%s19901_s1 + $0xae0] sm:$0xf]  ;;  %v12567_v16 = vld [vmem:[%s19901_s1 + $0xaec] sm:$0xf0]  ;;  %v9388_v29 = vor.u32 %v12535_v14, %v9387_v12  ;;  %v13736_v41 = vpack.c.b16 %v1077_v24, %v1077_v24  ;;  %6387 = vmatpush.bf16.msrb.mxu3 %v9020_v26  ;;  %v13740_v44 = vpack.c.b16 %v1078_v28, %v1078_v28 }
  0x45   :  { %v9643_v22 = vld [vmem:[%s19901_s1 + $0xbe0] sm:$0xf]  ;;  %v12599_v23 = vld [vmem:[%s19901_s1 + $0xbec] sm:$0xf0]  ;;  %v9516_v30 = vor.u32 %v12567_v16, %v9515_v15  ;;  %6393 = vmatpush.bf16.msra.mxu0 %v9260_v27 }
  0x46   :  { %v9243_v31 = vld [vmem:[%s19901_s1 + $0x8c0] sm:$0xf]  ;;  %v12499_v32 = vld [vmem:[%s19901_s1 + $0x8cc] sm:$0xf0]  ;;  %v9644_v34 = vor.u32 %v12599_v23, %v9643_v22  ;;  %6375 = vmatmul.bf16.vlgmr.msrb.gmra.mxu2 %v13728_v38  ;;  %6349 = vmatmul.bf16.vlgmr.msrb.gmra.mxu0 %v13736_v41 }
  0x47   :  { %v9371_v33 = vld [vmem:[%s19901_s1 + $0x9c0] sm:$0xf]  ;;  %v12531_v35 = vld [vmem:[%s19901_s1 + $0x9cc] sm:$0xf0]  ;;  %v9244_v43 = vor.u32 %v12499_v32, %v9243_v31  ;;  %6406 = vmatpush.bf16.msra.mxu1 %v9388_v29  ;;  %6419 = vmatpush.bf16.msra.mxu2 %v9516_v30 }
  0x48   :  { %v9499_v36 = vld [vmem:[%s19901_s1 + $0xac0] sm:$0xf]  ;;  %v12563_v37 = vld [vmem:[%s19901_s1 + $0xacc] sm:$0xf0]  ;;  %v9372_v45 = vor.u32 %v12531_v35, %v9371_v33  ;;  %6432 = vmatpush.bf16.msra.mxu3 %v9644_v34  ;;  %6362 = vmatmul.bf16.vlgmr.msrb.gmra.mxu1 %v13740_v44 }
  0x49   :  { %v9627_v39 = vld [vmem:[%s19901_s1 + $0xbc0] sm:$0xf]  ;;  %v12595_v40 = vld [vmem:[%s19901_s1 + $0xbcc] sm:$0xf0]  ;;  %v9500_v46 = vor.u32 %v12563_v37, %v9499_v36  ;;  %6388 = vmatmul.bf16.vlgmr.msrb.gmra.mxu3 %v13738_v42  ;;  %6394 = vmatpush.bf16.msra.mxu0 %v9244_v43 }
  0x4a   :  { %v9227_v47 = vld [vmem:[%s19901_s1 + $0x8a0] sm:$0xf]  ;;  %v12495_v48 = vld [vmem:[%s19901_s1 + $0x8ac] sm:$0xf0]  ;;  %v9628_v50 = vor.u32 %v12595_v40, %v9627_v39 }
  0x4b   :  { %v9355_v49 = vld [vmem:[%s19901_s1 + $0x9a0] sm:$0xf]  ;;  %v12527_v51 = vld [vmem:[%s19901_s1 + $0x9ac] sm:$0xf0]  ;;  %v9228_v56 = vor.u32 %v12495_v48, %v9227_v47  ;;  %6407 = vmatpush.bf16.msra.mxu1 %v9372_v45  ;;  %6420 = vmatpush.bf16.msra.mxu2 %v9500_v46 }
  0x4c   :  { %v9483_v52 = vld [vmem:[%s19901_s1 + $0xaa0] sm:$0xf]  ;;  %v12559_v53 = vld [vmem:[%s19901_s1 + $0xaac] sm:$0xf0]  ;;  %v9356_v57 = vor.u32 %v12527_v51, %v9355_v49  ;;  %6433 = vmatpush.bf16.msra.mxu3 %v9628_v50 }
  0x4d   :  { %v9611_v54 = vld [vmem:[%s19901_s1 + $0xba0] sm:$0xf]  ;;  %v12591_v55 = vld [vmem:[%s19901_s1 + $0xbac] sm:$0xf0]  ;;  %v9484_v58 = vor.u32 %v12559_v53, %v9483_v52  ;;  %6395 = vmatpush.bf16.msra.mxu0 %v9228_v56 }
  0x4e   :  { %v9211_v59 = vld [vmem:[%s19901_s1 + $0x880] sm:$0xf]  ;;  %v12491_v60 = vld [vmem:[%s19901_s1 + $0x88c] sm:$0xf0]  ;;  %v9612_v62 = vor.u32 %v12591_v55, %v9611_v54 }
  0x4f   :  { %v9339_v61 = vld [vmem:[%s19901_s1 + $0x980] sm:$0xf]  ;;  %v12523_v63 = vld [vmem:[%s19901_s1 + $0x98c] sm:$0xf0]  ;;  %v9212_v5 = vor.u32 %v12491_v60, %v9211_v59  ;;  %6408 = vmatpush.bf16.msra.mxu1 %v9356_v57  ;;  %6421 = vmatpush.bf16.msra.mxu2 %v9484_v58 }
  0x50   :  { %v9467_v0 = vld [vmem:[%s19901_s1 + $0xa80] sm:$0xf]  ;;  %v12555_v1 = vld [vmem:[%s19901_s1 + $0xa8c] sm:$0xf0]  ;;  %v9340_v7 = vor.u32 %v12523_v63, %v9339_v61  ;;  %6434 = vmatpush.bf16.msra.mxu3 %v9612_v62  ;;  %v22_v61 = vld [vmem:[%s19902_s0 + $0x28] sm:$0xff] }
  0x51   :  { %v9595_v2 = vld [vmem:[%s19901_s1 + $0xb80] sm:$0xf]  ;;  %v12587_v3 = vld [vmem:[%s19901_s1 + $0xb8c] sm:$0xf0]  ;;  %v9468_v8 = vor.u32 %v12555_v1, %v9467_v0  ;;  %6396 = vmatpush.bf16.msra.mxu0 %v9212_v5 }
  0x52   :  { %v9195_v9 = vld [vmem:[%s19901_s1 + $0x860] sm:$0xf]  ;;  %v12487_v10 = vld [vmem:[%s19901_s1 + $0x86c] sm:$0xf0]  ;;  %v9596_v12 = vor.u32 %v12587_v3, %v9595_v2 }
  0x53   :  { %v9323_v11 = vld [vmem:[%s19901_s1 + $0x960] sm:$0xf]  ;;  %v12519_v13 = vld [vmem:[%s19901_s1 + $0x96c] sm:$0xf0]  ;;  %v9196_v18 = vor.u32 %v12487_v10, %v9195_v9  ;;  %6409 = vmatpush.bf16.msra.mxu1 %v9340_v7  ;;  %6422 = vmatpush.bf16.msra.mxu2 %v9468_v8 }
  0x54   :  { %v9451_v14 = vld [vmem:[%s19901_s1 + $0xa60] sm:$0xf]  ;;  %v12551_v15 = vld [vmem:[%s19901_s1 + $0xa6c] sm:$0xf0]  ;;  %v9324_v19 = vor.u32 %v12519_v13, %v9323_v11  ;;  %6435 = vmatpush.bf16.msra.mxu3 %v9596_v12  ;;  %v1083_v12 = vunpack.c.l.b16 %v22_v61 }
  0x55   :  { %v9579_v16 = vld [vmem:[%s19901_s1 + $0xb60] sm:$0xf]  ;;  %v12583_v17 = vld [vmem:[%s19901_s1 + $0xb6c] sm:$0xf0]  ;;  %v9452_v22 = vor.u32 %v12551_v15, %v9451_v14  ;;  %6397 = vmatpush.bf16.msra.mxu0 %v9196_v18 }
  0x56   :  { %v9179_v23 = vld [vmem:[%s19901_s1 + $0x840] sm:$0xf]  ;;  %v12483_v24 = vld [vmem:[%s19901_s1 + $0x84c] sm:$0xf0]  ;;  %v9580_v26 = vor.u32 %v12583_v17, %v9579_v16  ;;  %v1084_v16 = vunpack.c.h.b16 %v22_v61 }
  0x57   :  { %v9307_v25 = vld [vmem:[%s19901_s1 + $0x940] sm:$0xf]  ;;  %v12515_v27 = vld [vmem:[%s19901_s1 + $0x94c] sm:$0xf0]  ;;  %v9180_v32 = vor.u32 %v12483_v24, %v9179_v23  ;;  %6410 = vmatpush.bf16.msra.mxu1 %v9324_v19  ;;  %6423 = vmatpush.bf16.msra.mxu2 %v9452_v22 }
  0x58   :  { %v9435_v28 = vld [vmem:[%s19901_s1 + $0xa40] sm:$0xf]  ;;  %v12547_v29 = vld [vmem:[%s19901_s1 + $0xa4c] sm:$0xf0]  ;;  %v9308_v33 = vor.u32 %v12515_v27, %v9307_v25  ;;  %6436 = vmatpush.bf16.msra.mxu3 %v9580_v26 }
  0x59   :  { %v9563_v30 = vld [vmem:[%s19901_s1 + $0xb40] sm:$0xf]  ;;  %v12579_v31 = vld [vmem:[%s19901_s1 + $0xb4c] sm:$0xf0]  ;;  %v9436_v34 = vor.u32 %v12547_v29, %v9435_v28  ;;  %6398 = vmatpush.bf16.msra.mxu0 %v9180_v32  ;;  %v13940_v29 = vpack.c.b16 %v1083_v12, %v1083_v12 }
  0x5a   :  { %v9163_v35 = vld [vmem:[%s19901_s1 + $0x820] sm:$0xf]  ;;  %v12479_v36 = vld [vmem:[%s19901_s1 + $0x82c] sm:$0xf0]  ;;  %v9564_v39 = vor.u32 %v12579_v31, %v9563_v30 }
  0x5b   :  { %v9291_v37 = vld [vmem:[%s19901_s1 + $0x920] sm:$0xf]  ;;  %v12511_v40 = vld [vmem:[%s19901_s1 + $0x92c] sm:$0xf0]  ;;  %v9164_v49 = vor.u32 %v12479_v36, %v9163_v35  ;;  %6411 = vmatpush.bf16.msra.mxu1 %v9308_v33  ;;  %6424 = vmatpush.bf16.msra.mxu2 %v9436_v34  ;;  %v13950_v33 = vpack.c.b16 %v1084_v16, %v1084_v16 }
  0x5c   :  { %v9419_v43 = vld [vmem:[%s19901_s1 + $0xa20] sm:$0xf]  ;;  %v12543_v45 = vld [vmem:[%s19901_s1 + $0xa2c] sm:$0xf0]  ;;  %v9292_v53 = vor.u32 %v12511_v40, %v9291_v37  ;;  %6437 = vmatpush.bf16.msra.mxu3 %v9564_v39 }
  0x5d   :  { %v9547_v46 = vld [vmem:[%s19901_s1 + $0xb20] sm:$0xf]  ;;  %v12575_v47 = vld [vmem:[%s19901_s1 + $0xb2c] sm:$0xf0]  ;;  %v9420_v54 = vor.u32 %v12543_v45, %v9419_v43  ;;  %6399 = vmatpush.bf16.msra.mxu0 %v9164_v49 }
  0x5e   :  { %v9147_v48 = vld [vmem:[%s19901_s1 + $0x800] sm:$0xf]  ;;  %v12475_v50 = vld [vmem:[%s19901_s1 + $0x80c] sm:$0xf0]  ;;  %v9548_v58 = vor.u32 %v12575_v47, %v9547_v46 }
  0x5f   :  { %v9275_v51 = vld [vmem:[%s19901_s1 + $0x900] sm:$0xf]  ;;  %v12507_v52 = vld [vmem:[%s19901_s1 + $0x90c] sm:$0xf0]  ;;  %v9148_v1 = vor.u32 %v12475_v50, %v9147_v48  ;;  %6412 = vmatpush.bf16.msra.mxu1 %v9292_v53  ;;  %6425 = vmatpush.bf16.msra.mxu2 %v9420_v54 }
  0x60   :  { %v9403_v55 = vld [vmem:[%s19901_s1 + $0xa00] sm:$0xf]  ;;  %v12539_v56 = vld [vmem:[%s19901_s1 + $0xa0c] sm:$0xf0]  ;;  %v9276_v8 = vor.u32 %v12507_v52, %v9275_v51  ;;  %6438 = vmatpush.bf16.msra.mxu3 %v9548_v58 }
  0x61   :  { %v21_v57 = vld [vmem:[%s19902_s0 + $0x20] sm:$0xff]  ;;  %v12571_v60 = vld [vmem:[%s19901_s1 + $0xb0c] sm:$0xf0]  ;;  %v9404_v9 = vor.u32 %v12539_v56, %v9403_v55  ;;  %6400 = vmatpush.bf16.msra.mxu0 %v9148_v1 }
  0x62   :  { %v9531_v59 = vld [vmem:[%s19901_s1 + $0xb00] sm:$0xf]  ;;  %v12631_v63 = vld [vmem:[%s19901_s1 + $0xcec] sm:$0xf0]  ;;  %v1081_v7 = vunpack.c.l.b16 %v21_v57  ;;  %v1082_v13 = vunpack.c.h.b16 %v21_v57 }
  0x63   :  { %v9771_v62 = vld [vmem:[%s19901_s1 + $0xce0] sm:$0xf]  ;;  %v12663_v2 = vld [vmem:[%s19901_s1 + $0xdec] sm:$0xf0]  ;;  %v9532_v14 = vor.u32 %v12571_v60, %v9531_v59  ;;  %6413 = vmatpush.bf16.msra.mxu1 %v9276_v8  ;;  %6426 = vmatpush.bf16.msra.mxu2 %v9404_v9 }
  0x64   :  { %v9899_v0 = vld [vmem:[%s19901_s1 + $0xde0] sm:$0xf]  ;;  %v12695_v5 = vld [vmem:[%s19901_s1 + $0xeec] sm:$0xf0]  ;;  %v9772_v15 = vor.u32 %v12631_v63, %v9771_v62  ;;  %v13929_v25 = vpack.c.b16 %v1081_v7, %v1081_v7  ;;  %v13942_v30 = vpack.c.b16 %v1082_v13, %v1082_v13 }
  0x65   :  { %v10027_v3 = vld [vmem:[%s19901_s1 + $0xee0] sm:$0xf]  ;;  %v12727_v11 = vld [vmem:[%s19901_s1 + $0xfec] sm:$0xf0]  ;;  %v9900_v17 = vor.u32 %v12663_v2, %v9899_v0  ;;  %6439 = vmatpush.bf16.msra.mxu3 %v9532_v14 }
  0x66   :  { %v10155_v10 = vld [vmem:[%s19901_s1 + $0xfe0] sm:$0xf]  ;;  %v10028_v18 = vor.u32 %v12695_v5, %v10027_v3  ;;  %v12627_v22 = vld [vmem:[%s19901_s1 + $0xccc] sm:$0xf0]  ;;  %6445 = vmatpush.bf16.msrb.mxu0 %v9772_v15  ;;  %6427 = vmatmul.bf16.vlgmr.msra.gmra.mxu2 %v13940_v29 }
  0x67   :  { %v9755_v19 = vld [vmem:[%s19901_s1 + $0xcc0] sm:$0xf]  ;;  %v10156_v24 = vor.u32 %v12727_v11, %v10155_v10  ;;  %v12659_v26 = vld [vmem:[%s19901_s1 + $0xdcc] sm:$0xf0]  ;;  %6458 = vmatpush.bf16.msrb.mxu1 %v9900_v17  ;;  %6401 = vmatmul.bf16.vlgmr.msra.gmra.mxu0 %v13929_v25 }
  0x68   :  { %v9883_v23 = vld [vmem:[%s19901_s1 + $0xdc0] sm:$0xf]  ;;  %v12691_v28 = vld [vmem:[%s19901_s1 + $0xecc] sm:$0xf0]  ;;  %v9756_v34 = vor.u32 %v12627_v22, %v9755_v19  ;;  %6471 = vmatpush.bf16.msrb.mxu2 %v10028_v18  ;;  %6414 = vmatmul.bf16.vlgmr.msra.gmra.mxu1 %v13942_v30 }
  0x69   :  { %v10011_v27 = vld [vmem:[%s19901_s1 + $0xec0] sm:$0xf]  ;;  %v12723_v32 = vld [vmem:[%s19901_s1 + $0xfcc] sm:$0xf0]  ;;  %v9884_v35 = vor.u32 %v12659_v26, %v9883_v23  ;;  %6484 = vmatpush.bf16.msrb.mxu3 %v10156_v24 }
  0x6a   :  { %v10139_v31 = vld [vmem:[%s19901_s1 + $0xfc0] sm:$0xf]  ;;  %v10012_v36 = vor.u32 %v12691_v28, %v10011_v27  ;;  %v12623_v39 = vld [vmem:[%s19901_s1 + $0xcac] sm:$0xf0]  ;;  %6440 = vmatmul.bf16.vlgmr.msra.gmra.mxu3 %v13950_v33  ;;  %6446 = vmatpush.bf16.msrb.mxu0 %v9756_v34 }
  0x6b   :  { %v9739_v37 = vld [vmem:[%s19901_s1 + $0xca0] sm:$0xf]  ;;  %v10140_v43 = vor.u32 %v12723_v32, %v10139_v31  ;;  %v12655_v45 = vld [vmem:[%s19901_s1 + $0xdac] sm:$0xf0]  ;;  %6459 = vmatpush.bf16.msrb.mxu1 %v9884_v35 }
  0x6c   :  { %v9867_v40 = vld [vmem:[%s19901_s1 + $0xda0] sm:$0xf]  ;;  %v12687_v47 = vld [vmem:[%s19901_s1 + $0xeac] sm:$0xf0]  ;;  %v9740_v50 = vor.u32 %v12623_v39, %v9739_v37  ;;  %6472 = vmatpush.bf16.msrb.mxu2 %v10012_v36 }
  0x6d   :  { %v9995_v46 = vld [vmem:[%s19901_s1 + $0xea0] sm:$0xf]  ;;  %v12719_v49 = vld [vmem:[%s19901_s1 + $0xfac] sm:$0xf0]  ;;  %v9868_v51 = vor.u32 %v12655_v45, %v9867_v40  ;;  %6485 = vmatpush.bf16.msrb.mxu3 %v10140_v43 }
  0x6e   :  { %v10123_v48 = vld [vmem:[%s19901_s1 + $0xfa0] sm:$0xf]  ;;  %v9996_v52 = vor.u32 %v12687_v47, %v9995_v46  ;;  %v12619_v54 = vld [vmem:[%s19901_s1 + $0xc8c] sm:$0xf0]  ;;  %6447 = vmatpush.bf16.msrb.mxu0 %v9740_v50 }
  0x6f   :  { %v9723_v53 = vld [vmem:[%s19901_s1 + $0xc80] sm:$0xf]  ;;  %v10124_v56 = vor.u32 %v12719_v49, %v10123_v48  ;;  %v12651_v57 = vld [vmem:[%s19901_s1 + $0xd8c] sm:$0xf0]  ;;  %6460 = vmatpush.bf16.msrb.mxu1 %v9868_v51 }
  0x70   :  { %v9851_v55 = vld [vmem:[%s19901_s1 + $0xd80] sm:$0xf]  ;;  %v12683_v59 = vld [vmem:[%s19901_s1 + $0xe8c] sm:$0xf0]  ;;  %v9724_v62 = vor.u32 %v12619_v54, %v9723_v53  ;;  %6473 = vmatpush.bf16.msrb.mxu2 %v9996_v52 }
  0x71   :  { %v9979_v58 = vld [vmem:[%s19901_s1 + $0xe80] sm:$0xf]  ;;  %v12715_v61 = vld [vmem:[%s19901_s1 + $0xf8c] sm:$0xf0]  ;;  %v9852_v63 = vor.u32 %v12651_v57, %v9851_v55  ;;  %6486 = vmatpush.bf16.msrb.mxu3 %v10124_v56 }
  0x72   :  { %v10107_v60 = vld [vmem:[%s19901_s1 + $0xf80] sm:$0xf]  ;;  %v9980_v0 = vor.u32 %v12683_v59, %v9979_v58  ;;  %v12615_v2 = vld [vmem:[%s19901_s1 + $0xc6c] sm:$0xf0]  ;;  %6448 = vmatpush.bf16.msrb.mxu0 %v9724_v62  ;;  %v24_v59 = vld [vmem:[%s19902_s0 + $0x38] sm:$0xff] }
  0x73   :  { %v9707_v1 = vld [vmem:[%s19901_s1 + $0xc60] sm:$0xf]  ;;  %v10108_v5 = vor.u32 %v12715_v61, %v10107_v60  ;;  %v12647_v7 = vld [vmem:[%s19901_s1 + $0xd6c] sm:$0xf0]  ;;  %6461 = vmatpush.bf16.msrb.mxu1 %v9852_v63 }
  0x74   :  { %v9835_v3 = vld [vmem:[%s19901_s1 + $0xd60] sm:$0xf]  ;;  %v12679_v9 = vld [vmem:[%s19901_s1 + $0xe6c] sm:$0xf0]  ;;  %v9708_v12 = vor.u32 %v12615_v2, %v9707_v1  ;;  %6474 = vmatpush.bf16.msrb.mxu2 %v9980_v0 }
  0x75   :  { %v9963_v8 = vld [vmem:[%s19901_s1 + $0xe60] sm:$0xf]  ;;  %v12711_v11 = vld [vmem:[%s19901_s1 + $0xf6c] sm:$0xf0]  ;;  %v9836_v13 = vor.u32 %v12647_v7, %v9835_v3  ;;  %6487 = vmatpush.bf16.msrb.mxu3 %v10108_v5 }
  0x76   :  { %v10091_v10 = vld [vmem:[%s19901_s1 + $0xf60] sm:$0xf]  ;;  %v9964_v14 = vor.u32 %v12679_v9, %v9963_v8  ;;  %v12611_v16 = vld [vmem:[%s19901_s1 + $0xc4c] sm:$0xf0]  ;;  %6449 = vmatpush.bf16.msrb.mxu0 %v9708_v12 }
  0x77   :  { %v9691_v15 = vld [vmem:[%s19901_s1 + $0xc40] sm:$0xf]  ;;  %v10092_v18 = vor.u32 %v12711_v11, %v10091_v10  ;;  %v12643_v19 = vld [vmem:[%s19901_s1 + $0xd4c] sm:$0xf0]  ;;  %6462 = vmatpush.bf16.msrb.mxu1 %v9836_v13  ;;  %v1087_v10 = vunpack.c.l.b16 %v24_v59 }
  0x78   :  { %v9819_v17 = vld [vmem:[%s19901_s1 + $0xd40] sm:$0xf]  ;;  %v12675_v23 = vld [vmem:[%s19901_s1 + $0xe4c] sm:$0xf0]  ;;  %v9692_v27 = vor.u32 %v12611_v16, %v9691_v15  ;;  %6475 = vmatpush.bf16.msrb.mxu2 %v9964_v14  ;;  %v1088_v14 = vunpack.c.h.b16 %v24_v59 }
  0x79   :  { %v9947_v22 = vld [vmem:[%s19901_s1 + $0xe40] sm:$0xf]  ;;  %v12707_v26 = vld [vmem:[%s19901_s1 + $0xf4c] sm:$0xf0]  ;;  %v9820_v28 = vor.u32 %v12643_v19, %v9819_v17  ;;  %6488 = vmatpush.bf16.msrb.mxu3 %v10092_v18 }
  0x7a   :  { %v10075_v24 = vld [vmem:[%s19901_s1 + $0xf40] sm:$0xf]  ;;  %v9948_v31 = vor.u32 %v12675_v23, %v9947_v22  ;;  %v12607_v34 = vld [vmem:[%s19901_s1 + $0xc2c] sm:$0xf0]  ;;  %6450 = vmatpush.bf16.msrb.mxu0 %v9692_v27 }
  0x7b   :  { %v9675_v32 = vld [vmem:[%s19901_s1 + $0xc20] sm:$0xf]  ;;  %v10076_v36 = vor.u32 %v12707_v26, %v10075_v24  ;;  %v12639_v37 = vld [vmem:[%s19901_s1 + $0xd2c] sm:$0xf0]  ;;  %6463 = vmatpush.bf16.msrb.mxu1 %v9820_v28  ;;  %v14150_v28 = vpack.c.b16 %v1087_v10, %v1087_v10 }
  0x7c   :  { %v9803_v35 = vld [vmem:[%s19901_s1 + $0xd20] sm:$0xf]  ;;  %v12671_v40 = vld [vmem:[%s19901_s1 + $0xe2c] sm:$0xf0]  ;;  %v9676_v47 = vor.u32 %v12607_v34, %v9675_v32  ;;  %6476 = vmatpush.bf16.msrb.mxu2 %v9948_v31 }
  0x7d   :  { %v9931_v39 = vld [vmem:[%s19901_s1 + $0xe20] sm:$0xf]  ;;  %v12703_v45 = vld [vmem:[%s19901_s1 + $0xf2c] sm:$0xf0]  ;;  %v9804_v51 = vor.u32 %v12639_v37, %v9803_v35  ;;  %6489 = vmatpush.bf16.msrb.mxu3 %v10076_v36  ;;  %v14160_v35 = vpack.c.b16 %v1088_v14, %v1088_v14 }
  0x7e   :  { %v10059_v43 = vld [vmem:[%s19901_s1 + $0xf20] sm:$0xf]  ;;  %v12603_v48 = vld [vmem:[%s19901_s1 + $0xc0c] sm:$0xf0]  ;;  %v9932_v52 = vor.u32 %v12671_v40, %v9931_v39  ;;  %6451 = vmatpush.bf16.msrb.mxu0 %v9676_v47 }
  0x7f   :  { %v9659_v46 = vld [vmem:[%s19901_s1 + $0xc00] sm:$0xf]  ;;  %v12635_v50 = vld [vmem:[%s19901_s1 + $0xd0c] sm:$0xf0]  ;;  %v10060_v56 = vor.u32 %v12703_v45, %v10059_v43  ;;  %6464 = vmatpush.bf16.msrb.mxu1 %v9804_v51 }
  0x80   :  { %v9787_v49 = vld [vmem:[%s19901_s1 + $0xd00] sm:$0xf]  ;;  %v12667_v54 = vld [vmem:[%s19901_s1 + $0xe0c] sm:$0xf0]  ;;  %v9660_v63 = vor.u32 %v12603_v48, %v9659_v46  ;;  %6477 = vmatpush.bf16.msrb.mxu2 %v9932_v52 }
  0x81   :  { %v9915_v53 = vld [vmem:[%s19901_s1 + $0xe00] sm:$0xf]  ;;  %v23_v55 = vld [vmem:[%s19902_s0 + $0x30] sm:$0xff]  ;;  %v9788_v5 = vor.u32 %v12635_v50, %v9787_v49  ;;  %6490 = vmatpush.bf16.msrb.mxu3 %v10060_v56 }
  0x82   :  { %v10043_v57 = vld [vmem:[%s19901_s1 + $0xf00] sm:$0xf]  ;;  %v12699_v58 = vld [vmem:[%s19901_s1 + $0xf0c] sm:$0xf0]  ;;  %v1085_v3 = vunpack.c.l.b16 %v23_v55  ;;  %v9916_v7 = vor.u32 %v12667_v54, %v9915_v53  ;;  %v1086_v11 = vunpack.c.h.b16 %v23_v55  ;;  %6452 = vmatpush.bf16.msrb.mxu0 %v9660_v63 }
  0x83   :  { %v10283_v60 = vld [vmem:[%s19901_s1 + $0x10e0] sm:$0xf]  ;;  %v12759_v61 = vld [vmem:[%s19901_s1 + $0x10ec] sm:$0xf0]  ;;  %v10044_v12 = vor.u32 %v12699_v58, %v10043_v57  ;;  %6465 = vmatpush.bf16.msrb.mxu1 %v9788_v5 }
  0x84   :  { %v10411_v62 = vld [vmem:[%s19901_s1 + $0x11e0] sm:$0xf]  ;;  %v12791_v0 = vld [vmem:[%s19901_s1 + $0x11ec] sm:$0xf0]  ;;  %v10284_v13 = vor.u32 %v12759_v61, %v10283_v60  ;;  %v14139_v23 = vpack.c.b16 %v1085_v3, %v1085_v3  ;;  %6478 = vmatpush.bf16.msrb.mxu2 %v9916_v7  ;;  %v14152_v31 = vpack.c.b16 %v1086_v11, %v1086_v11 }
  0x85   :  { %v10539_v1 = vld [vmem:[%s19901_s1 + $0x12e0] sm:$0xf]  ;;  %v12823_v2 = vld [vmem:[%s19901_s1 + $0x12ec] sm:$0xf0]  ;;  %v10412_v15 = vor.u32 %v12791_v0, %v10411_v62  ;;  %6491 = vmatpush.bf16.msrb.mxu3 %v10044_v12 }
  0x86   :  { %v10667_v8 = vld [vmem:[%s19901_s1 + $0x13e0] sm:$0xf]  ;;  %v12855_v9 = vld [vmem:[%s19901_s1 + $0x13ec] sm:$0xf0]  ;;  %v10540_v16 = vor.u32 %v12823_v2, %v10539_v1  ;;  %6497 = vmatpush.bf16.msra.mxu0 %v10284_v13  ;;  %6466 = vmatmul.bf16.vlgmr.msrb.gmra.mxu1 %v14152_v31 }
  0x87   :  { %v10267_v17 = vld [vmem:[%s19901_s1 + $0x10c0] sm:$0xf]  ;;  %v12755_v18 = vld [vmem:[%s19901_s1 + $0x10cc] sm:$0xf0]  ;;  %v10668_v22 = vor.u32 %v12855_v9, %v10667_v8  ;;  %6510 = vmatpush.bf16.msra.mxu1 %v10412_v15  ;;  %6453 = vmatmul.bf16.vlgmr.msrb.gmra.mxu0 %v14139_v23 }
  0x88   :  { %v10395_v19 = vld [vmem:[%s19901_s1 + $0x11c0] sm:$0xf]  ;;  %v12787_v24 = vld [vmem:[%s19901_s1 + $0x11cc] sm:$0xf0]  ;;  %v10268_v36 = vor.u32 %v12755_v18, %v10267_v17  ;;  %6523 = vmatpush.bf16.msra.mxu2 %v10540_v16  ;;  %6492 = vmatmul.bf16.vlgmr.msrb.gmra.mxu3 %v14160_v35 }
  0x89   :  { %v10523_v26 = vld [vmem:[%s19901_s1 + $0x12c0] sm:$0xf]  ;;  %v12819_v27 = vld [vmem:[%s19901_s1 + $0x12cc] sm:$0xf0]  ;;  %v10396_v37 = vor.u32 %v12787_v24, %v10395_v19  ;;  %6536 = vmatpush.bf16.msra.mxu3 %v10668_v22  ;;  %6479 = vmatmul.bf16.vlgmr.msrb.gmra.mxu2 %v14150_v28 }
  0x8a   :  { %v10651_v32 = vld [vmem:[%s19901_s1 + $0x13c0] sm:$0xf]  ;;  %v12851_v34 = vld [vmem:[%s19901_s1 + $0x13cc] sm:$0xf0]  ;;  %v10524_v39 = vor.u32 %v12819_v27, %v10523_v26  ;;  %6498 = vmatpush.bf16.msra.mxu0 %v10268_v36 }
  0x8b   :  { %v10251_v40 = vld [vmem:[%s19901_s1 + $0x10a0] sm:$0xf]  ;;  %v12751_v43 = vld [vmem:[%s19901_s1 + $0x10ac] sm:$0xf0]  ;;  %v10652_v46 = vor.u32 %v12851_v34, %v10651_v32  ;;  %6511 = vmatpush.bf16.msra.mxu1 %v10396_v37 }
  0x8c   :  { %v10379_v45 = vld [vmem:[%s19901_s1 + $0x11a0] sm:$0xf]  ;;  %v12783_v47 = vld [vmem:[%s19901_s1 + $0x11ac] sm:$0xf0]  ;;  %v10252_v52 = vor.u32 %v12751_v43, %v10251_v40  ;;  %6524 = vmatpush.bf16.msra.mxu2 %v10524_v39 }
  0x8d   :  { %v10507_v48 = vld [vmem:[%s19901_s1 + $0x12a0] sm:$0xf]  ;;  %v12815_v49 = vld [vmem:[%s19901_s1 + $0x12ac] sm:$0xf0]  ;;  %v10380_v53 = vor.u32 %v12783_v47, %v10379_v45  ;;  %6537 = vmatpush.bf16.msra.mxu3 %v10652_v46 }
  0x8e   :  { %v10635_v50 = vld [vmem:[%s19901_s1 + $0x13a0] sm:$0xf]  ;;  %v12847_v51 = vld [vmem:[%s19901_s1 + $0x13ac] sm:$0xf0]  ;;  %v10508_v54 = vor.u32 %v12815_v49, %v10507_v48  ;;  %6499 = vmatpush.bf16.msra.mxu0 %v10252_v52 }
  0x8f   :  { %v10235_v55 = vld [vmem:[%s19901_s1 + $0x1080] sm:$0xf]  ;;  %v12747_v56 = vld [vmem:[%s19901_s1 + $0x108c] sm:$0xf0]  ;;  %v10636_v58 = vor.u32 %v12847_v51, %v10635_v50  ;;  %6512 = vmatpush.bf16.msra.mxu1 %v10380_v53 }
  0x90   :  { %v10363_v57 = vld [vmem:[%s19901_s1 + $0x1180] sm:$0xf]  ;;  %v12779_v59 = vld [vmem:[%s19901_s1 + $0x118c] sm:$0xf0]  ;;  %v10236_v0 = vor.u32 %v12747_v56, %v10235_v55  ;;  %6525 = vmatpush.bf16.msra.mxu2 %v10508_v54 }
  0x91   :  { %v10491_v60 = vld [vmem:[%s19901_s1 + $0x1280] sm:$0xf]  ;;  %v12811_v61 = vld [vmem:[%s19901_s1 + $0x128c] sm:$0xf0]  ;;  %v10364_v1 = vor.u32 %v12779_v59, %v10363_v57  ;;  %6538 = vmatpush.bf16.msra.mxu3 %v10636_v58 }
  0x92   :  { %v10619_v62 = vld [vmem:[%s19901_s1 + $0x1380] sm:$0xf]  ;;  %v12843_v63 = vld [vmem:[%s19901_s1 + $0x138c] sm:$0xf0]  ;;  %v10492_v2 = vor.u32 %v12811_v61, %v10491_v60  ;;  %6500 = vmatpush.bf16.msra.mxu0 %v10236_v0 }
  0x93   :  { %v10219_v3 = vld [vmem:[%s19901_s1 + $0x1060] sm:$0xf]  ;;  %v12743_v5 = vld [vmem:[%s19901_s1 + $0x106c] sm:$0xf0]  ;;  %v10620_v8 = vor.u32 %v12843_v63, %v10619_v62  ;;  %6513 = vmatpush.bf16.msra.mxu1 %v10364_v1  ;;  %v26_v1 = vld [vmem:[%s19902_s0 + $0x48] sm:$0xff] }
  0x94   :  { %v10347_v7 = vld [vmem:[%s19901_s1 + $0x1160] sm:$0xf]  ;;  %v12775_v9 = vld [vmem:[%s19901_s1 + $0x116c] sm:$0xf0]  ;;  %v10220_v14 = vor.u32 %v12743_v5, %v10219_v3  ;;  %6526 = vmatpush.bf16.msra.mxu2 %v10492_v2 }
  0x95   :  { %v10475_v10 = vld [vmem:[%s19901_s1 + $0x1260] sm:$0xf]  ;;  %v12807_v11 = vld [vmem:[%s19901_s1 + $0x126c] sm:$0xf0]  ;;  %v10348_v15 = vor.u32 %v12775_v9, %v10347_v7  ;;  %6539 = vmatpush.bf16.msra.mxu3 %v10620_v8 }
  0x96   :  { %v10603_v12 = vld [vmem:[%s19901_s1 + $0x1360] sm:$0xf]  ;;  %v12839_v13 = vld [vmem:[%s19901_s1 + $0x136c] sm:$0xf0]  ;;  %v10476_v16 = vor.u32 %v12807_v11, %v10475_v10  ;;  %6501 = vmatpush.bf16.msra.mxu0 %v10220_v14 }
  0x97   :  { %v10203_v17 = vld [vmem:[%s19901_s1 + $0x1040] sm:$0xf]  ;;  %v12739_v18 = vld [vmem:[%s19901_s1 + $0x104c] sm:$0xf0]  ;;  %v10604_v22 = vor.u32 %v12839_v13, %v10603_v12  ;;  %6514 = vmatpush.bf16.msra.mxu1 %v10348_v15 }
  0x98   :  { %v10331_v19 = vld [vmem:[%s19901_s1 + $0x1140] sm:$0xf]  ;;  %v12771_v24 = vld [vmem:[%s19901_s1 + $0x114c] sm:$0xf0]  ;;  %v10204_v36 = vor.u32 %v12739_v18, %v10203_v17  ;;  %6527 = vmatpush.bf16.msra.mxu2 %v10476_v16  ;;  %v1091_v16 = vunpack.c.l.b16 %v26_v1 }
  0x99   :  { %v10459_v26 = vld [vmem:[%s19901_s1 + $0x1240] sm:$0xf]  ;;  %v12803_v27 = vld [vmem:[%s19901_s1 + $0x124c] sm:$0xf0]  ;;  %v10332_v37 = vor.u32 %v12771_v24, %v10331_v19  ;;  %6540 = vmatpush.bf16.msra.mxu3 %v10604_v22  ;;  %v1092_v22 = vunpack.c.h.b16 %v26_v1 }
  0x9a   :  { %v10587_v32 = vld [vmem:[%s19901_s1 + $0x1340] sm:$0xf]  ;;  %v12835_v34 = vld [vmem:[%s19901_s1 + $0x134c] sm:$0xf0]  ;;  %v10460_v39 = vor.u32 %v12803_v27, %v10459_v26  ;;  %6502 = vmatpush.bf16.msra.mxu0 %v10204_v36 }
  0x9b   :  { %v10187_v40 = vld [vmem:[%s19901_s1 + $0x1020] sm:$0xf]  ;;  %v12735_v43 = vld [vmem:[%s19901_s1 + $0x102c] sm:$0xf0]  ;;  %v10588_v46 = vor.u32 %v12835_v34, %v10587_v32  ;;  %6515 = vmatpush.bf16.msra.mxu1 %v10332_v37 }
  0x9c   :  { %v10315_v45 = vld [vmem:[%s19901_s1 + $0x1120] sm:$0xf]  ;;  %v12767_v47 = vld [vmem:[%s19901_s1 + $0x112c] sm:$0xf0]  ;;  %v10188_v53 = vor.u32 %v12735_v43, %v10187_v40  ;;  %6528 = vmatpush.bf16.msra.mxu2 %v10460_v39 }
  0x9d   :  { %v10443_v48 = vld [vmem:[%s19901_s1 + $0x1220] sm:$0xf]  ;;  %v12799_v49 = vld [vmem:[%s19901_s1 + $0x122c] sm:$0xf0]  ;;  %v10316_v57 = vor.u32 %v12767_v47, %v10315_v45  ;;  %6541 = vmatpush.bf16.msra.mxu3 %v10588_v46  ;;  %v14360_v45 = vpack.c.b16 %v1091_v16, %v1091_v16 }
  0x9e   :  { %v10571_v50 = vld [vmem:[%s19901_s1 + $0x1320] sm:$0xf]  ;;  %v12831_v51 = vld [vmem:[%s19901_s1 + $0x132c] sm:$0xf0]  ;;  %v10444_v58 = vor.u32 %v12799_v49, %v10443_v48  ;;  %6503 = vmatpush.bf16.msra.mxu0 %v10188_v53  ;;  %v14370_v49 = vpack.c.b16 %v1092_v22, %v1092_v22 }
  0x9f   :  { %v10171_v52 = vld [vmem:[%s19901_s1 + $0x1000] sm:$0xf]  ;;  %v12731_v54 = vld [vmem:[%s19901_s1 + $0x100c] sm:$0xf0]  ;;  %v10572_v62 = vor.u32 %v12831_v51, %v10571_v50  ;;  %6516 = vmatpush.bf16.msra.mxu1 %v10316_v57 }
  0xa0   :  { %v10299_v55 = vld [vmem:[%s19901_s1 + $0x1100] sm:$0xf]  ;;  %v12763_v56 = vld [vmem:[%s19901_s1 + $0x110c] sm:$0xf0]  ;;  %v10172_v7 = vor.u32 %v12731_v54, %v10171_v52  ;;  %6529 = vmatpush.bf16.msra.mxu2 %v10444_v58 }
  0xa1   :  { %v10427_v59 = vld [vmem:[%s19901_s1 + $0x1200] sm:$0xf]  ;;  %v12795_v60 = vld [vmem:[%s19901_s1 + $0x120c] sm:$0xf0]  ;;  %v10300_v12 = vor.u32 %v12763_v56, %v10299_v55  ;;  %6542 = vmatpush.bf16.msra.mxu3 %v10572_v62 }
  0xa2   :  { %v25_v61 = vld [vmem:[%s19902_s0 + $0x40] sm:$0xff]  ;;  %v12827_v0 = vld [vmem:[%s19901_s1 + $0x130c] sm:$0xf0]  ;;  %v10428_v13 = vor.u32 %v12795_v60, %v10427_v59  ;;  %6504 = vmatpush.bf16.msra.mxu0 %v10172_v7 }
  0xa3   :  { %v10555_v63 = vld [vmem:[%s19901_s1 + $0x1300] sm:$0xf]  ;;  %v12887_v3 = vld [vmem:[%s19901_s1 + $0x14ec] sm:$0xf0]  ;;  %v1089_v11 = vunpack.c.l.b16 %v25_v61  ;;  %v1090_v17 = vunpack.c.h.b16 %v25_v61  ;;  %6517 = vmatpush.bf16.msra.mxu1 %v10300_v12 }
  0xa4   :  { %v10795_v2 = vld [vmem:[%s19901_s1 + $0x14e0] sm:$0xf]  ;;  %v12919_v8 = vld [vmem:[%s19901_s1 + $0x15ec] sm:$0xf0]  ;;  %v10556_v18 = vor.u32 %v12827_v0, %v10555_v63  ;;  %6530 = vmatpush.bf16.msra.mxu2 %v10428_v13 }
  0xa5   :  { %v10923_v5 = vld [vmem:[%s19901_s1 + $0x15e0] sm:$0xf]  ;;  %v12951_v10 = vld [vmem:[%s19901_s1 + $0x16ec] sm:$0xf0]  ;;  %v10796_v19 = vor.u32 %v12887_v3, %v10795_v2  ;;  %v14349_v37 = vpack.c.b16 %v1089_v11, %v1089_v11  ;;  %v14362_v46 = vpack.c.b16 %v1090_v17, %v1090_v17 }
  0xa6   :  { %v11051_v9 = vld [vmem:[%s19901_s1 + $0x16e0] sm:$0xf]  ;;  %v12983_v15 = vld [vmem:[%s19901_s1 + $0x17ec] sm:$0xf0]  ;;  %v10924_v24 = vor.u32 %v12919_v8, %v10923_v5  ;;  %6543 = vmatpush.bf16.msra.mxu3 %v10556_v18 }
  0xa7   :  { %v11179_v14 = vld [vmem:[%s19901_s1 + $0x17e0] sm:$0xf]  ;;  %v11052_v26 = vor.u32 %v12951_v10, %v11051_v9  ;;  %v12883_v32 = vld [vmem:[%s19901_s1 + $0x14cc] sm:$0xf0]  ;;  %6549 = vmatpush.bf16.msrb.mxu0 %v10796_v19  ;;  %6531 = vmatmul.bf16.vlgmr.msra.gmra.mxu2 %v14360_v45 }
  0xa8   :  { %v10779_v27 = vld [vmem:[%s19901_s1 + $0x14c0] sm:$0xf]  ;;  %v11180_v36 = vor.u32 %v12983_v15, %v11179_v14  ;;  %v12915_v39 = vld [vmem:[%s19901_s1 + $0x15cc] sm:$0xf0]  ;;  %6562 = vmatpush.bf16.msrb.mxu1 %v10924_v24  ;;  %6505 = vmatmul.bf16.vlgmr.msra.gmra.mxu0 %v14349_v37 }
  0xa9   :  { %v10907_v34 = vld [vmem:[%s19901_s1 + $0x15c0] sm:$0xf]  ;;  %v12947_v43 = vld [vmem:[%s19901_s1 + $0x16cc] sm:$0xf0]  ;;  %v10780_v50 = vor.u32 %v12883_v32, %v10779_v27  ;;  %6575 = vmatpush.bf16.msrb.mxu2 %v11052_v26  ;;  %6518 = vmatmul.bf16.vlgmr.msra.gmra.mxu1 %v14362_v46 }
  0xaa   :  { %v11035_v40 = vld [vmem:[%s19901_s1 + $0x16c0] sm:$0xf]  ;;  %v12979_v48 = vld [vmem:[%s19901_s1 + $0x17cc] sm:$0xf0]  ;;  %v10908_v51 = vor.u32 %v12915_v39, %v10907_v34  ;;  %6588 = vmatpush.bf16.msrb.mxu3 %v11180_v36 }
  0xab   :  { %v11163_v47 = vld [vmem:[%s19901_s1 + $0x17c0] sm:$0xf]  ;;  %v11036_v52 = vor.u32 %v12947_v43, %v11035_v40  ;;  %v12879_v54 = vld [vmem:[%s19901_s1 + $0x14ac] sm:$0xf0]  ;;  %6544 = vmatmul.bf16.vlgmr.msra.gmra.mxu3 %v14370_v49  ;;  %6550 = vmatpush.bf16.msrb.mxu0 %v10780_v50 }
  0xac   :  { %v10763_v53 = vld [vmem:[%s19901_s1 + $0x14a0] sm:$0xf]  ;;  %v11164_v56 = vor.u32 %v12979_v48, %v11163_v47  ;;  %v12911_v57 = vld [vmem:[%s19901_s1 + $0x15ac] sm:$0xf0]  ;;  %6563 = vmatpush.bf16.msrb.mxu1 %v10908_v51 }
  0xad   :  { %v10891_v55 = vld [vmem:[%s19901_s1 + $0x15a0] sm:$0xf]  ;;  %v12943_v59 = vld [vmem:[%s19901_s1 + $0x16ac] sm:$0xf0]  ;;  %v10764_v62 = vor.u32 %v12879_v54, %v10763_v53  ;;  %6576 = vmatpush.bf16.msrb.mxu2 %v11036_v52 }
  0xae   :  { %v11019_v58 = vld [vmem:[%s19901_s1 + $0x16a0] sm:$0xf]  ;;  %v12975_v61 = vld [vmem:[%s19901_s1 + $0x17ac] sm:$0xf0]  ;;  %v10892_v63 = vor.u32 %v12911_v57, %v10891_v55  ;;  %6589 = vmatpush.bf16.msrb.mxu3 %v11164_v56 }
  0xaf   :  { %v11147_v60 = vld [vmem:[%s19901_s1 + $0x17a0] sm:$0xf]  ;;  %v11020_v0 = vor.u32 %v12943_v59, %v11019_v58  ;;  %v12875_v2 = vld [vmem:[%s19901_s1 + $0x148c] sm:$0xf0]  ;;  %6551 = vmatpush.bf16.msrb.mxu0 %v10764_v62  ;;  %v6298_v54 = vpop.f32.mrf.mxu0  ;;  %v6311_v56 = vpop.f32.mrf.mxu1 }
  0xb0   :  { %v10747_v1 = vld [vmem:[%s19901_s1 + $0x1480] sm:$0xf]  ;;  %v11148_v5 = vor.u32 %v12975_v61, %v11147_v60  ;;  %v12907_v7 = vld [vmem:[%s19901_s1 + $0x158c] sm:$0xf0]  ;;  %6564 = vmatpush.bf16.msrb.mxu1 %v10892_v63  ;;  %v6312_v62 = vadd.f32 %v6311_v56, %v6298_v54  ;;  %v6324_v63 = vpop.f32.mrf.mxu2 }
  0xb1   :  { %v10875_v3 = vld [vmem:[%s19901_s1 + $0x1580] sm:$0xf]  ;;  %v12939_v9 = vld [vmem:[%s19901_s1 + $0x168c] sm:$0xf0]  ;;  %v10748_v12 = vor.u32 %v12875_v2, %v10747_v1  ;;  %6577 = vmatpush.bf16.msrb.mxu2 %v11020_v0 }
  0xb2   :  { %v11003_v8 = vld [vmem:[%s19901_s1 + $0x1680] sm:$0xf]  ;;  %v12971_v11 = vld [vmem:[%s19901_s1 + $0x178c] sm:$0xf0]  ;;  %v10876_v13 = vor.u32 %v12907_v7, %v10875_v3  ;;  %6590 = vmatpush.bf16.msrb.mxu3 %v11148_v5  ;;  %v6337_v5 = vpop.f32.mrf.mxu3 }
  0xb3   :  { %v11131_v10 = vld [vmem:[%s19901_s1 + $0x1780] sm:$0xf]  ;;  %v11004_v14 = vor.u32 %v12939_v9, %v11003_v8  ;;  %v12871_v16 = vld [vmem:[%s19901_s1 + $0x146c] sm:$0xf0]  ;;  %6552 = vmatpush.bf16.msrb.mxu0 %v10748_v12 }
  0xb4   :  { %v10731_v15 = vld [vmem:[%s19901_s1 + $0x1460] sm:$0xf]  ;;  %v11132_v18 = vor.u32 %v12971_v11, %v11131_v10  ;;  %v12903_v19 = vld [vmem:[%s19901_s1 + $0x156c] sm:$0xf0]  ;;  %6565 = vmatpush.bf16.msrb.mxu1 %v10876_v13  ;;  %v6325_v10 = vadd.f32 %v6324_v63, %v6312_v62 }
  0xb5   :  { %v10859_v17 = vld [vmem:[%s19901_s1 + $0x1560] sm:$0xf]  ;;  %v12935_v24 = vld [vmem:[%s19901_s1 + $0x166c] sm:$0xf0]  ;;  %v10732_v32 = vor.u32 %v12871_v16, %v10731_v15  ;;  %6578 = vmatpush.bf16.msrb.mxu2 %v11004_v14 }
  0xb6   :  { %v10987_v22 = vld [vmem:[%s19901_s1 + $0x1660] sm:$0xf]  ;;  %v12967_v27 = vld [vmem:[%s19901_s1 + $0x176c] sm:$0xf0]  ;;  %v10860_v34 = vor.u32 %v12903_v19, %v10859_v17  ;;  %6591 = vmatpush.bf16.msrb.mxu3 %v11132_v18 }
  0xb7   :  { %v11115_v26 = vld [vmem:[%s19901_s1 + $0x1760] sm:$0xf]  ;;  %v10988_v36 = vor.u32 %v12935_v24, %v10987_v22  ;;  %v12867_v40 = vld [vmem:[%s19901_s1 + $0x144c] sm:$0xf0]  ;;  %6553 = vmatpush.bf16.msrb.mxu0 %v10732_v32  ;;  %v14517_v22 = vadd.f32 %v6337_v5, %v6325_v10  ;;  %v28_v32 = vld [vmem:[%s19902_s0 + $0x58] sm:$0xff] }
  0xb8   :  { %v10715_v39 = vld [vmem:[%s19901_s1 + $0x1440] sm:$0xf]  ;;  %v11116_v47 = vor.u32 %v12967_v27, %v11115_v26  ;;  %v12899_v48 = vld [vmem:[%s19901_s1 + $0x154c] sm:$0xf0]  ;;  %6566 = vmatpush.bf16.msrb.mxu1 %v10860_v34  ;;  %v1096_v62 = vunpack.c.h.b16 %v28_v32 }
  0xb9   :  { %v10843_v43 = vld [vmem:[%s19901_s1 + $0x1540] sm:$0xf]  ;;  %v12931_v51 = vld [vmem:[%s19901_s1 + $0x164c] sm:$0xf0]  ;;  %v10716_v55 = vor.u32 %v12867_v40, %v10715_v39  ;;  %6579 = vmatpush.bf16.msrb.mxu2 %v10988_v36  ;;  %v6300_v40 = vpop.f32.mrf.mxu0 }
  0xba   :  { %v10971_v50 = vld [vmem:[%s19901_s1 + $0x1640] sm:$0xf]  ;;  %v12963_v53 = vld [vmem:[%s19901_s1 + $0x174c] sm:$0xf0]  ;;  %v10844_v57 = vor.u32 %v12899_v48, %v10843_v43  ;;  %6592 = vmatpush.bf16.msrb.mxu3 %v11116_v47  ;;  %v6339_v63 = vpop.f32.mrf.mxu3 }
  0xbb   :  { %v11099_v52 = vld [vmem:[%s19901_s1 + $0x1740] sm:$0xf]  ;;  %v10972_v58 = vor.u32 %v12931_v51, %v10971_v50  ;;  %v12863_v60 = vld [vmem:[%s19901_s1 + $0x142c] sm:$0xf0]  ;;  %6554 = vmatpush.bf16.msrb.mxu0 %v10716_v55 }
  0xbc   :  { %v10699_v59 = vld [vmem:[%s19901_s1 + $0x1420] sm:$0xf]  ;;  %v11100_v0 = vor.u32 %v12963_v53, %v11099_v52  ;;  %v12895_v1 = vld [vmem:[%s19901_s1 + $0x152c] sm:$0xf0]  ;;  %6567 = vmatpush.bf16.msrb.mxu1 %v10844_v57  ;;  %v6313_v52 = vpop.f32.mrf.mxu1  ;;  %v1095_v57 = vunpack.c.l.b16 %v28_v32 }
  0xbd   :  { %v10827_v61 = vld [vmem:[%s19901_s1 + $0x1520] sm:$0xf]  ;;  %v12927_v3 = vld [vmem:[%s19901_s1 + $0x162c] sm:$0xf0]  ;;  %v10700_v11 = vor.u32 %v12863_v60, %v10699_v59  ;;  %6580 = vmatpush.bf16.msrb.mxu2 %v10972_v58  ;;  %v6326_v59 = vpop.f32.mrf.mxu2 }
  0xbe   :  { %v10955_v2 = vld [vmem:[%s19901_s1 + $0x1620] sm:$0xf]  ;;  %v12959_v8 = vld [vmem:[%s19901_s1 + $0x172c] sm:$0xf0]  ;;  %v10828_v15 = vor.u32 %v12895_v1, %v10827_v61  ;;  %6593 = vmatpush.bf16.msrb.mxu3 %v11100_v0 }
  0xbf   :  { %v11083_v7 = vld [vmem:[%s19901_s1 + $0x1720] sm:$0xf]  ;;  %v12859_v12 = vld [vmem:[%s19901_s1 + $0x140c] sm:$0xf0]  ;;  %v10956_v16 = vor.u32 %v12927_v3, %v10955_v2  ;;  %6555 = vmatpush.bf16.msrb.mxu0 %v10700_v11 }
  0xc0   :  { %v10683_v9 = vld [vmem:[%s19901_s1 + $0x1400] sm:$0xf]  ;;  %v12891_v14 = vld [vmem:[%s19901_s1 + $0x150c] sm:$0xf0]  ;;  %v11084_v24 = vor.u32 %v12959_v8, %v11083_v7  ;;  %6568 = vmatpush.bf16.msrb.mxu1 %v10828_v15 }
  0xc1   :  { %v10811_v13 = vld [vmem:[%s19901_s1 + $0x1500] sm:$0xf]  ;;  %v12923_v18 = vld [vmem:[%s19901_s1 + $0x160c] sm:$0xf0]  ;;  %v10684_v43 = vor.u32 %v12859_v12, %v10683_v9  ;;  %6581 = vmatpush.bf16.msrb.mxu2 %v10956_v16  ;;  %v14572_v12 = vpack.c.b16 %v1095_v57, %v1095_v57  ;;  %v14582_v16 = vpack.c.b16 %v1096_v62, %v1096_v62 }
  0xc2   :  { %v10939_v17 = vld [vmem:[%s19901_s1 + $0x1600] sm:$0xf]  ;;  %v27_v19 = vld [vmem:[%s19902_s0 + $0x50] sm:$0xff]  ;;  %v10812_v53 = vor.u32 %v12891_v14, %v10811_v13  ;;  %6594 = vmatpush.bf16.msrb.mxu3 %v11084_v24 }
  0xc3   :  { %v11067_v26 = vld [vmem:[%s19901_s1 + $0x1700] sm:$0xf]  ;;  %v12955_v27 = vld [vmem:[%s19901_s1 + $0x170c] sm:$0xf0]  ;;  %v1093_v51 = vunpack.c.l.b16 %v27_v19  ;;  %v10940_v54 = vor.u32 %v12923_v18, %v10939_v17  ;;  %v1094_v58 = vunpack.c.h.b16 %v27_v19  ;;  %6556 = vmatpush.bf16.msrb.mxu0 %v10684_v43 }
  0xc4   :  { %v11307_v34 = vld [vmem:[%s19901_s1 + $0x18e0] sm:$0xf]  ;;  %v13015_v36 = vld [vmem:[%s19901_s1 + $0x18ec] sm:$0xf0]  ;;  %v11068_v60 = vor.u32 %v12955_v27, %v11067_v26  ;;  %6569 = vmatpush.bf16.msrb.mxu1 %v10812_v53 }
  0xc5   :  { %v11435_v39 = vld [vmem:[%s19901_s1 + $0x19e0] sm:$0xf]  ;;  %v13047_v47 = vld [vmem:[%s19901_s1 + $0x19ec] sm:$0xf0]  ;;  %v11308_v61 = vor.u32 %v13015_v36, %v11307_v34  ;;  %v14561_v8 = vpack.c.b16 %v1093_v51, %v1093_v51  ;;  %6582 = vmatpush.bf16.msrb.mxu2 %v10940_v54  ;;  %v14574_v13 = vpack.c.b16 %v1094_v58, %v1094_v58 }
  0xc6   :  { %v11563_v48 = vld [vmem:[%s19901_s1 + $0x1ae0] sm:$0xf]  ;;  %v13079_v50 = vld [vmem:[%s19901_s1 + $0x1aec] sm:$0xf0]  ;;  %v11436_v0 = vor.u32 %v13047_v47, %v11435_v39  ;;  %6595 = vmatpush.bf16.msrb.mxu3 %v11068_v60 }
  0xc7   :  { %v11691_v55 = vld [vmem:[%s19901_s1 + $0x1be0] sm:$0xf]  ;;  %v13111_v56 = vld [vmem:[%s19901_s1 + $0x1bec] sm:$0xf0]  ;;  %v11564_v1 = vor.u32 %v13079_v50, %v11563_v48  ;;  %6601 = vmatpush.bf16.msra.mxu0 %v11308_v61  ;;  %6570 = vmatmul.bf16.vlgmr.msrb.gmra.mxu1 %v14574_v13  ;;  %v6350_v61 = vpop.f32.mrf.mxu0 }
  0xc8   :  { %v11291_v2 = vld [vmem:[%s19901_s1 + $0x18c0] sm:$0xf]  ;;  %v13011_v3 = vld [vmem:[%s19901_s1 + $0x18cc] sm:$0xf0]  ;;  %v11692_v7 = vor.u32 %v13111_v56, %v11691_v55  ;;  %6614 = vmatpush.bf16.msra.mxu1 %v11436_v0  ;;  %6557 = vmatmul.bf16.vlgmr.msrb.gmra.mxu0 %v14561_v8 }
  0xc9   :  { %v11419_v5 = vld [vmem:[%s19901_s1 + $0x19c0] sm:$0xf]  ;;  %v13043_v9 = vld [vmem:[%s19901_s1 + $0x19cc] sm:$0xf0]  ;;  %v11292_v17 = vor.u32 %v13011_v3, %v11291_v2  ;;  %6627 = vmatpush.bf16.msra.mxu2 %v11564_v1  ;;  %6596 = vmatmul.bf16.vlgmr.msrb.gmra.mxu3 %v14582_v16  ;;  %v6351_v3 = vadd.f32 %v6350_v61, %v14517_v22 }
  0xca   :  { %v11547_v10 = vld [vmem:[%s19901_s1 + $0x1ac0] sm:$0xf]  ;;  %v13075_v11 = vld [vmem:[%s19901_s1 + $0x1acc] sm:$0xf0]  ;;  %v11420_v18 = vor.u32 %v13043_v9, %v11419_v5  ;;  %6640 = vmatpush.bf16.msra.mxu3 %v11692_v7  ;;  %6583 = vmatmul.bf16.vlgmr.msrb.gmra.mxu2 %v14572_v12  ;;  %v6363_v5 = vpop.f32.mrf.mxu1 }
  0xcb   :  { %v11675_v14 = vld [vmem:[%s19901_s1 + $0x1bc0] sm:$0xf]  ;;  %v13107_v15 = vld [vmem:[%s19901_s1 + $0x1bcc] sm:$0xf0]  ;;  %v11548_v19 = vor.u32 %v13075_v11, %v11547_v10  ;;  %6602 = vmatpush.bf16.msra.mxu0 %v11292_v17 }
  0xcc   :  { %v11275_v24 = vld [vmem:[%s19901_s1 + $0x18a0] sm:$0xf]  ;;  %v13007_v26 = vld [vmem:[%s19901_s1 + $0x18ac] sm:$0xf0]  ;;  %v11676_v32 = vor.u32 %v13107_v15, %v11675_v14  ;;  %6615 = vmatpush.bf16.msra.mxu1 %v11420_v18  ;;  %v6364_v15 = vadd.f32 %v6363_v5, %v6351_v3 }
  0xcd   :  { %v11403_v27 = vld [vmem:[%s19901_s1 + $0x19a0] sm:$0xf]  ;;  %v13039_v34 = vld [vmem:[%s19901_s1 + $0x19ac] sm:$0xf0]  ;;  %v11276_v47 = vor.u32 %v13007_v26, %v11275_v24  ;;  %6628 = vmatpush.bf16.msra.mxu2 %v11548_v19 }
  0xce   :  { %v11531_v36 = vld [vmem:[%s19901_s1 + $0x1aa0] sm:$0xf]  ;;  %v13071_v39 = vld [vmem:[%s19901_s1 + $0x1aac] sm:$0xf0]  ;;  %v11404_v48 = vor.u32 %v13039_v34, %v11403_v27  ;;  %6641 = vmatpush.bf16.msra.mxu3 %v11676_v32  ;;  %v6376_v32 = vpop.f32.mrf.mxu2 }
  0xcf   :  { %v11659_v40 = vld [vmem:[%s19901_s1 + $0x1ba0] sm:$0xf]  ;;  %v13103_v43 = vld [vmem:[%s19901_s1 + $0x1bac] sm:$0xf0]  ;;  %v11532_v50 = vor.u32 %v13071_v39, %v11531_v36  ;;  %6603 = vmatpush.bf16.msra.mxu0 %v11276_v47  ;;  %v6389_v47 = vpop.f32.mrf.mxu3 }
  0xd0   :  { %v11259_v51 = vld [vmem:[%s19901_s1 + $0x1880] sm:$0xf]  ;;  %v13003_v52 = vld [vmem:[%s19901_s1 + $0x188c] sm:$0xf0]  ;;  %v11660_v54 = vor.u32 %v13103_v43, %v11659_v40  ;;  %6616 = vmatpush.bf16.msra.mxu1 %v11404_v48  ;;  %v6377_v43 = vadd.f32 %v6376_v32, %v6364_v15 }
  0xd1   :  { %v11387_v53 = vld [vmem:[%s19901_s1 + $0x1980] sm:$0xf]  ;;  %v13035_v55 = vld [vmem:[%s19901_s1 + $0x198c] sm:$0xf0]  ;;  %v11260_v60 = vor.u32 %v13003_v52, %v11259_v51  ;;  %6629 = vmatpush.bf16.msra.mxu2 %v11532_v50 }
  0xd2   :  { %v11515_v56 = vld [vmem:[%s19901_s1 + $0x1a80] sm:$0xf]  ;;  %v13067_v57 = vld [vmem:[%s19901_s1 + $0x1a8c] sm:$0xf0]  ;;  %v11388_v62 = vor.u32 %v13035_v55, %v11387_v53  ;;  %6642 = vmatpush.bf16.msra.mxu3 %v11660_v54  ;;  %v14685_v52 = vadd.f32 %v6389_v47, %v6377_v43  ;;  %v6352_v53 = vpop.f32.mrf.mxu0 }
  0xd3   :  { %v11643_v58 = vld [vmem:[%s19901_s1 + $0x1b80] sm:$0xf]  ;;  %v13099_v59 = vld [vmem:[%s19901_s1 + $0x1b8c] sm:$0xf0]  ;;  %v11516_v63 = vor.u32 %v13067_v57, %v11515_v56  ;;  %6604 = vmatpush.bf16.msra.mxu0 %v11260_v60 }
  0xd4   :  { %v11243_v0 = vld [vmem:[%s19901_s1 + $0x1860] sm:$0xf]  ;;  %v12999_v1 = vld [vmem:[%s19901_s1 + $0x186c] sm:$0xf0]  ;;  %v11644_v7 = vor.u32 %v13099_v59, %v11643_v58  ;;  %6617 = vmatpush.bf16.msra.mxu1 %v11388_v62  ;;  %v6365_v59 = vpop.f32.mrf.mxu1 }
  0xd5   :  { %v11371_v2 = vld [vmem:[%s19901_s1 + $0x1960] sm:$0xf]  ;;  %v13031_v9 = vld [vmem:[%s19901_s1 + $0x196c] sm:$0xf0]  ;;  %v11244_v17 = vor.u32 %v12999_v1, %v11243_v0  ;;  %6630 = vmatpush.bf16.msra.mxu2 %v11516_v63 }
  0xd6   :  { %v11499_v10 = vld [vmem:[%s19901_s1 + $0x1a60] sm:$0xf]  ;;  %v13063_v11 = vld [vmem:[%s19901_s1 + $0x1a6c] sm:$0xf0]  ;;  %v11372_v18 = vor.u32 %v13031_v9, %v11371_v2  ;;  %6643 = vmatpush.bf16.msra.mxu3 %v11644_v7 }
  0xd7   :  { %v11627_v14 = vld [vmem:[%s19901_s1 + $0x1b60] sm:$0xf]  ;;  %v13095_v22 = vld [vmem:[%s19901_s1 + $0x1b6c] sm:$0xf0]  ;;  %v11500_v19 = vor.u32 %v13063_v11, %v11499_v10  ;;  %6605 = vmatpush.bf16.msra.mxu0 %v11244_v17  ;;  %v6378_v17 = vpop.f32.mrf.mxu2 }
  0xd8   :  { %v11227_v24 = vld [vmem:[%s19901_s1 + $0x1840] sm:$0xf]  ;;  %v12995_v26 = vld [vmem:[%s19901_s1 + $0x184c] sm:$0xf0]  ;;  %v11628_v34 = vor.u32 %v13095_v22, %v11627_v14  ;;  %6618 = vmatpush.bf16.msra.mxu1 %v11372_v18 }
  0xd9   :  { %v11355_v27 = vld [vmem:[%s19901_s1 + $0x1940] sm:$0xf]  ;;  %v13027_v36 = vld [vmem:[%s19901_s1 + $0x194c] sm:$0xf0]  ;;  %v11228_v51 = vor.u32 %v12995_v26, %v11227_v24  ;;  %6631 = vmatpush.bf16.msra.mxu2 %v11500_v19  ;;  %v30_v26 = vld [vmem:[%s19902_s0 + $0x68] sm:$0xff] }
  0xda   :  { %v11483_v39 = vld [vmem:[%s19901_s1 + $0x1a40] sm:$0xf]  ;;  %v13059_v40 = vld [vmem:[%s19901_s1 + $0x1a4c] sm:$0xf0]  ;;  %v11356_v54 = vor.u32 %v13027_v36, %v11355_v27  ;;  %6644 = vmatpush.bf16.msra.mxu3 %v11628_v34  ;;  %v6391_v27 = vpop.f32.mrf.mxu3  ;;  %v1100_v59 = vunpack.c.h.b16 %v30_v26 }
  0xdb   :  { %v11611_v48 = vld [vmem:[%s19901_s1 + $0x1b40] sm:$0xf]  ;;  %v13091_v50 = vld [vmem:[%s19901_s1 + $0x1b4c] sm:$0xf0]  ;;  %v11484_v55 = vor.u32 %v13059_v40, %v11483_v39  ;;  %6606 = vmatpush.bf16.msra.mxu0 %v11228_v51 }
  0xdc   :  { %v11211_v56 = vld [vmem:[%s19901_s1 + $0x1820] sm:$0xf]  ;;  %v12991_v57 = vld [vmem:[%s19901_s1 + $0x182c] sm:$0xf0]  ;;  %v11612_v60 = vor.u32 %v13091_v50, %v11611_v48  ;;  %6619 = vmatpush.bf16.msra.mxu1 %v11356_v54 }
  0xdd   :  { %v11339_v58 = vld [vmem:[%s19901_s1 + $0x1920] sm:$0xf]  ;;  %v13023_v61 = vld [vmem:[%s19901_s1 + $0x192c] sm:$0xf0]  ;;  %v11212_v3 = vor.u32 %v12991_v57, %v11211_v56  ;;  %6632 = vmatpush.bf16.msra.mxu2 %v11484_v55  ;;  %v1099_v55 = vunpack.c.l.b16 %v30_v26 }
  0xde   :  { %v11467_v62 = vld [vmem:[%s19901_s1 + $0x1a20] sm:$0xf]  ;;  %v13055_v63 = vld [vmem:[%s19901_s1 + $0x1a2c] sm:$0xf0]  ;;  %v11340_v10 = vor.u32 %v13023_v61, %v11339_v58  ;;  %6645 = vmatpush.bf16.msra.mxu3 %v11612_v60 }
  0xdf   :  { %v11595_v0 = vld [vmem:[%s19901_s1 + $0x1b20] sm:$0xf]  ;;  %v13087_v1 = vld [vmem:[%s19901_s1 + $0x1b2c] sm:$0xf0]  ;;  %v11468_v11 = vor.u32 %v13055_v63, %v11467_v62  ;;  %6607 = vmatpush.bf16.msra.mxu0 %v11212_v3 }
  0xe0   :  { %v11195_v2 = vld [vmem:[%s19901_s1 + $0x1800] sm:$0xf]  ;;  %v12987_v5 = vld [vmem:[%s19901_s1 + $0x180c] sm:$0xf0]  ;;  %v11596_v18 = vor.u32 %v13087_v1, %v11595_v0  ;;  %6620 = vmatpush.bf16.msra.mxu1 %v11340_v10 }
  0xe1   :  { %v11323_v7 = vld [vmem:[%s19901_s1 + $0x1900] sm:$0xf]  ;;  %v13019_v9 = vld [vmem:[%s19901_s1 + $0x190c] sm:$0xf0]  ;;  %v11196_v39 = vor.u32 %v12987_v5, %v11195_v2  ;;  %6633 = vmatpush.bf16.msra.mxu2 %v11468_v11 }
  0xe2   :  { %v11451_v14 = vld [vmem:[%s19901_s1 + $0x1a00] sm:$0xf]  ;;  %v13051_v22 = vld [vmem:[%s19901_s1 + $0x1a0c] sm:$0xf0]  ;;  %v11324_v50 = vor.u32 %v13019_v9, %v11323_v7  ;;  %6646 = vmatpush.bf16.msra.mxu3 %v11596_v18  ;;  %v14785_v9 = vpack.c.b16 %v1099_v55, %v1099_v55 }
  0xe3   :  { %v29_v15 = vld [vmem:[%s19902_s0 + $0x60] sm:$0xff]  ;;  %v13083_v24 = vld [vmem:[%s19901_s1 + $0x1b0c] sm:$0xf0]  ;;  %v11452_v51 = vor.u32 %v13051_v22, %v11451_v14  ;;  %6608 = vmatpush.bf16.msra.mxu0 %v11196_v39  ;;  %v14795_v22 = vpack.c.b16 %v1100_v59, %v1100_v59 }
  0xe4   :  { %v11579_v19 = vld [vmem:[%s19901_s1 + $0x1b00] sm:$0xf]  ;;  %v13143_v34 = vld [vmem:[%s19901_s1 + $0x1cec] sm:$0xf0]  ;;  %v1097_v48 = vunpack.c.l.b16 %v29_v15  ;;  %v1098_v56 = vunpack.c.h.b16 %v29_v15  ;;  %6621 = vmatpush.bf16.msra.mxu1 %v11324_v50 }
  0xe5   :  { %v11819_v32 = vld [vmem:[%s19901_s1 + $0x1ce0] sm:$0xf]  ;;  %v13175_v40 = vld [vmem:[%s19901_s1 + $0x1dec] sm:$0xf0]  ;;  %v11580_v57 = vor.u32 %v13083_v24, %v11579_v19  ;;  %6634 = vmatpush.bf16.msra.mxu2 %v11452_v51 }
  0xe6   :  { %v11947_v36 = vld [vmem:[%s19901_s1 + $0x1de0] sm:$0xf]  ;;  %v13207_v47 = vld [vmem:[%s19901_s1 + $0x1eec] sm:$0xf0]  ;;  %v11820_v58 = vor.u32 %v13143_v34, %v11819_v32  ;;  %v14774_v2 = vpack.c.b16 %v1097_v48, %v1097_v48  ;;  %v14787_v10 = vpack.c.b16 %v1098_v56, %v1098_v56 }
  0xe7   :  { %v12075_v43 = vld [vmem:[%s19901_s1 + $0x1ee0] sm:$0xf]  ;;  %v13239_v54 = vld [vmem:[%s19901_s1 + $0x1fec] sm:$0xf0]  ;;  %v11948_v60 = vor.u32 %v13175_v40, %v11947_v36  ;;  %6647 = vmatpush.bf16.msra.mxu3 %v11580_v57 }
  0xe8   :  { %v12203_v53 = vld [vmem:[%s19901_s1 + $0x1fe0] sm:$0xf]  ;;  %v12076_v61 = vor.u32 %v13207_v47, %v12075_v43  ;;  %v13139_v63 = vld [vmem:[%s19901_s1 + $0x1ccc] sm:$0xf0]  ;;  %6653 = vmatpush.bf16.msrb.mxu0 %v11820_v58  ;;  %6635 = vmatmul.bf16.vlgmr.msra.gmra.mxu2 %v14785_v9  ;;  %v6402_v58 = vpop.f32.mrf.mxu0 }
  0xe9   :  { %v11803_v62 = vld [vmem:[%s19901_s1 + $0x1cc0] sm:$0xf]  ;;  %v12204_v1 = vor.u32 %v13239_v54, %v12203_v53  ;;  %v13171_v3 = vld [vmem:[%s19901_s1 + $0x1dcc] sm:$0xf0]  ;;  %6666 = vmatpush.bf16.msrb.mxu1 %v11948_v60  ;;  %6609 = vmatmul.bf16.vlgmr.msra.gmra.mxu0 %v14774_v2 }
  0xea   :  { %v11931_v0 = vld [vmem:[%s19901_s1 + $0x1dc0] sm:$0xf]  ;;  %v13203_v7 = vld [vmem:[%s19901_s1 + $0x1ecc] sm:$0xf0]  ;;  %v11804_v15 = vor.u32 %v13139_v63, %v11803_v62  ;;  %6679 = vmatpush.bf16.msrb.mxu2 %v12076_v61  ;;  %6622 = vmatmul.bf16.vlgmr.msra.gmra.mxu1 %v14787_v10  ;;  %v6403_v61 = vadd.f32 %v6402_v58, %v14685_v52  ;;  %v6415_v63 = vpop.f32.mrf.mxu1 }
  0xeb   :  { %v12059_v5 = vld [vmem:[%s19901_s1 + $0x1ec0] sm:$0xf]  ;;  %v13235_v14 = vld [vmem:[%s19901_s1 + $0x1fcc] sm:$0xf0]  ;;  %v11932_v17 = vor.u32 %v13171_v3, %v11931_v0  ;;  %6692 = vmatpush.bf16.msrb.mxu3 %v12204_v1 }
  0xec   :  { %v12187_v11 = vld [vmem:[%s19901_s1 + $0x1fc0] sm:$0xf]  ;;  %v12060_v18 = vor.u32 %v13203_v7, %v12059_v5  ;;  %v13135_v24 = vld [vmem:[%s19901_s1 + $0x1cac] sm:$0xf0]  ;;  %6648 = vmatmul.bf16.vlgmr.msra.gmra.mxu3 %v14795_v22  ;;  %6654 = vmatpush.bf16.msrb.mxu0 %v11804_v15 }
  0xed   :  { %v11787_v19 = vld [vmem:[%s19901_s1 + $0x1ca0] sm:$0xf]  ;;  %v12188_v27 = vor.u32 %v13235_v14, %v12187_v11  ;;  %v13167_v32 = vld [vmem:[%s19901_s1 + $0x1dac] sm:$0xf0]  ;;  %6667 = vmatpush.bf16.msrb.mxu1 %v11932_v17  ;;  %v6416_v11 = vadd.f32 %v6415_v63, %v6403_v61 }
  0xee   :  { %v11915_v26 = vld [vmem:[%s19901_s1 + $0x1da0] sm:$0xf]  ;;  %v13199_v36 = vld [vmem:[%s19901_s1 + $0x1eac] sm:$0xf0]  ;;  %v11788_v43 = vor.u32 %v13135_v24, %v11787_v19  ;;  %6680 = vmatpush.bf16.msrb.mxu2 %v12060_v18 }
  0xef   :  { %v12043_v34 = vld [vmem:[%s19901_s1 + $0x1ea0] sm:$0xf]  ;;  %v13231_v40 = vld [vmem:[%s19901_s1 + $0x1fac] sm:$0xf0]  ;;  %v11916_v47 = vor.u32 %v13167_v32, %v11915_v26  ;;  %6693 = vmatpush.bf16.msrb.mxu3 %v12188_v27 }
  0xf0   :  { %v12171_v39 = vld [vmem:[%s19901_s1 + $0x1fa0] sm:$0xf]  ;;  %v12044_v48 = vor.u32 %v13199_v36, %v12043_v34  ;;  %v13131_v51 = vld [vmem:[%s19901_s1 + $0x1c8c] sm:$0xf0]  ;;  %6655 = vmatpush.bf16.msrb.mxu0 %v11788_v43 }
  0xf1   :  { %v11771_v50 = vld [vmem:[%s19901_s1 + $0x1c80] sm:$0xf]  ;;  %v12172_v54 = vor.u32 %v13231_v40, %v12171_v39  ;;  %v13163_v55 = vld [vmem:[%s19901_s1 + $0x1d8c] sm:$0xf0]  ;;  %6668 = vmatpush.bf16.msrb.mxu1 %v11916_v47  ;;  %v6428_v40 = vpop.f32.mrf.mxu2 }
  0xf2   :  { %v11899_v53 = vld [vmem:[%s19901_s1 + $0x1d80] sm:$0xf]  ;;  %v13195_v57 = vld [vmem:[%s19901_s1 + $0x1e8c] sm:$0xf0]  ;;  %v11772_v62 = vor.u32 %v13131_v51, %v11771_v50  ;;  %6681 = vmatpush.bf16.msrb.mxu2 %v12044_v48  ;;  %v6429_v50 = vadd.f32 %v6428_v40, %v6416_v11  ;;  %v6441_v51 = vpop.f32.mrf.mxu3  ;;  %v32_v40 = vld [vmem:[%s19902_s0 + $0x78] sm:$0xff] }
  0xf3   :  { %v12027_v56 = vld [vmem:[%s19901_s1 + $0x1e80] sm:$0xf]  ;;  %v13227_v60 = vld [vmem:[%s19901_s1 + $0x1f8c] sm:$0xf0]  ;;  %v11900_v0 = vor.u32 %v13163_v55, %v11899_v53  ;;  %6694 = vmatpush.bf16.msrb.mxu3 %v12172_v54  ;;  %v6404_v55 = vpop.f32.mrf.mxu0 }
  0xf4   :  { %v12155_v59 = vld [vmem:[%s19901_s1 + $0x1f80] sm:$0xf]  ;;  %v12028_v1 = vor.u32 %v13195_v57, %v12027_v56  ;;  %v13127_v5 = vld [vmem:[%s19901_s1 + $0x1c6c] sm:$0xf0]  ;;  %6656 = vmatpush.bf16.msrb.mxu0 %v11772_v62  ;;  %v6417_v57 = vpop.f32.mrf.mxu1  ;;  %v14898_v58 = vadd.f32 %v6441_v51, %v6429_v50  ;;  %v12277_v50 = vld [vmem:[%s19901_s1 + $0x1e4] sm:$0xf] }
  0xf5   :  { %v11755_v3 = vld [vmem:[%s19901_s1 + $0x1c60] sm:$0xf]  ;;  %v12156_v52 = vor.u32 %v13227_v60, %v12155_v59  ;;  %v13159_v14 = vld [vmem:[%s19901_s1 + $0x1d6c] sm:$0xf0]  ;;  %6669 = vmatpush.bf16.msrb.mxu1 %v11900_v0  ;;  %v12309_v55 = vld [vmem:[%s19901_s1 + $0x2e4] sm:$0xf] }
  0xf6   :  { %v11883_v7 = vld [vmem:[%s19901_s1 + $0x1d60] sm:$0xf]  ;;  %v13191_v17 = vld [vmem:[%s19901_s1 + $0x1e6c] sm:$0xf0]  ;;  %v11756_v24 = vor.u32 %v13127_v5, %v11755_v3  ;;  %6682 = vmatpush.bf16.msrb.mxu2 %v12028_v1 }
  0xf7   :  { %v12011_v15 = vld [vmem:[%s19901_s1 + $0x1e60] sm:$0xf]  ;;  %v13223_v19 = vld [vmem:[%s19901_s1 + $0x1f6c] sm:$0xf0]  ;;  %v11884_v26 = vor.u32 %v13159_v14, %v11883_v7  ;;  %6695 = vmatpush.bf16.msrb.mxu3 %v12156_v52 }
  0xf8   :  { %v12139_v18 = vld [vmem:[%s19901_s1 + $0x1f60] sm:$0xf]  ;;  %v12012_v27 = vor.u32 %v13191_v17, %v12011_v15  ;;  %v13123_v34 = vld [vmem:[%s19901_s1 + $0x1c4c] sm:$0xf0]  ;;  %6657 = vmatpush.bf16.msrb.mxu0 %v11756_v24 }
  0xf9   :  { %v11739_v32 = vld [vmem:[%s19901_s1 + $0x1c40] sm:$0xf]  ;;  %v12140_v39 = vor.u32 %v13223_v19, %v12139_v18  ;;  %v13155_v43 = vld [vmem:[%s19901_s1 + $0x1d4c] sm:$0xf0]  ;;  %6670 = vmatpush.bf16.msrb.mxu1 %v11884_v26 }
  0xfa   :  { %v11867_v36 = vld [vmem:[%s19901_s1 + $0x1d40] sm:$0xf]  ;;  %v13187_v48 = vld [vmem:[%s19901_s1 + $0x1e4c] sm:$0xf0]  ;;  %v11740_v56 = vor.u32 %v13123_v34, %v11739_v32  ;;  %6683 = vmatpush.bf16.msrb.mxu2 %v12012_v27  ;;  %v6443_v51 = vpop.f32.mrf.mxu3 }
  0xfb   :  { %v11995_v47 = vld [vmem:[%s19901_s1 + $0x1e40] sm:$0xf]  ;;  %v13219_v54 = vld [vmem:[%s19901_s1 + $0x1f4c] sm:$0xf0]  ;;  %v11868_v59 = vor.u32 %v13155_v43, %v11867_v36  ;;  %6696 = vmatpush.bf16.msrb.mxu3 %v12140_v39  ;;  %v6430_v43 = vpop.f32.mrf.mxu2  ;;  %v12269_v51 = vld [vmem:[%s19901_s1 + $0x1a4] sm:$0xf] }
  0xfc   :  { %v12123_v53 = vld [vmem:[%s19901_s1 + $0x1f40] sm:$0xf]  ;;  %v11996_v60 = vor.u32 %v13187_v48, %v11995_v47  ;;  %v13119_v62 = vld [vmem:[%s19901_s1 + $0x1c2c] sm:$0xf0]  ;;  %6658 = vmatpush.bf16.msrb.mxu0 %v11740_v56  ;;  %v12245_v47 = vld [vmem:[%s19901_s1 + $0xe4] sm:$0xf] }
  0xfd   :  { %v11723_v61 = vld [vmem:[%s19901_s1 + $0x1c20] sm:$0xf]  ;;  %v12124_v0 = vor.u32 %v13219_v54, %v12123_v53  ;;  %v13151_v1 = vld [vmem:[%s19901_s1 + $0x1d2c] sm:$0xf0]  ;;  %6671 = vmatpush.bf16.msrb.mxu1 %v11868_v59  ;;  %v8237_v48 = vld [vmem:[%s19901_s1 + $0xf0] sm:$0xf0] }
  0xfe   :  { %v11851_v63 = vld [vmem:[%s19901_s1 + $0x1d20] sm:$0xf]  ;;  %v13183_v5 = vld [vmem:[%s19901_s1 + $0x1e2c] sm:$0xf0]  ;;  %v11724_v14 = vor.u32 %v13119_v62, %v11723_v61  ;;  %6684 = vmatpush.bf16.msrb.mxu2 %v11996_v60  ;;  %v8365_v54 = vld [vmem:[%s19901_s1 + $0x1f0] sm:$0xf0] }
  0xff   :  { %v11979_v3 = vld [vmem:[%s19901_s1 + $0x1e20] sm:$0xf]  ;;  %v13215_v52 = vld [vmem:[%s19901_s1 + $0x1f2c] sm:$0xf0]  ;;  %v11852_v19 = vor.u32 %v13151_v1, %v11851_v63  ;;  %6697 = vmatpush.bf16.msrb.mxu3 %v12124_v0  ;;  %v8493_v56 = vld [vmem:[%s19901_s1 + $0x2f0] sm:$0xf0]  ;;  %v1103_v63 = vunpack.c.l.b16 %v32_v40 }
 0x100   :  { %v12107_v7 = vld [vmem:[%s19901_s1 + $0x1f20] sm:$0xf]  ;;  %v13115_v15 = vld [vmem:[%s19901_s1 + $0x1c0c] sm:$0xf0]  ;;  %v11980_v24 = vor.u32 %v13183_v5, %v11979_v3  ;;  %6659 = vmatpush.bf16.msrb.mxu0 %v11724_v14  ;;  %v12341_v61 = vld [vmem:[%s19901_s1 + $0x3e4] sm:$0xf]  ;;  %v8240_v3 = vor.u32 %v12245_v47, %v8237_v48  ;;  %v1104_v5 = vunpack.c.h.b16 %v32_v40 }
 0x101   :  { %v11707_v11 = vld [vmem:[%s19901_s1 + $0x1c00] sm:$0xf]  ;;  %v13147_v18 = vld [vmem:[%s19901_s1 + $0x1d0c] sm:$0xf0]  ;;  %v12108_v34 = vor.u32 %v13215_v52, %v12107_v7  ;;  %6672 = vmatpush.bf16.msrb.mxu1 %v11852_v19  ;;  %v8621_v62 = vld [vmem:[%s19901_s1 + $0x3f0] sm:$0xf0]  ;;  %v8368_v7 = vor.u32 %v12277_v50, %v8365_v54  ;;  %v8496_v52 = vor.u32 %v12309_v55, %v8493_v56 }
 0x102   :  { %v11835_v17 = vld [vmem:[%s19901_s1 + $0x1d00] sm:$0xf]  ;;  %v13179_v27 = vld [vmem:[%s19901_s1 + $0x1e0c] sm:$0xf0]  ;;  %v11708_v53 = vor.u32 %v13115_v15, %v11707_v11  ;;  %6685 = vmatpush.bf16.msrb.mxu2 %v11980_v24  ;;  %v12241_v11 = vld [vmem:[%s19901_s1 + $0xc4] sm:$0xf] }
 0x103   :  { %v11963_v26 = vld [vmem:[%s19901_s1 + $0x1e00] sm:$0xf]  ;;  %v31_v32 = vld [vmem:[%s19902_s0 + $0x70] sm:$0xff]  ;;  %v11836_v59 = vor.u32 %v13147_v18, %v11835_v17  ;;  %6698 = vmatpush.bf16.msrb.mxu3 %v12108_v34  ;;  %v12273_v15 = vld [vmem:[%s19901_s1 + $0x1c4] sm:$0xf]  ;;  %v8624_v17 = vor.u32 %v12341_v61, %v8621_v62 }
 0x104   :  { %v12091_v36 = vld [vmem:[%s19901_s1 + $0x1f00] sm:$0xf]  ;;  %v13211_v39 = vld [vmem:[%s19901_s1 + $0x1f0c] sm:$0xf0]  ;;  %v1101_v57 = vunpack.c.l.b16 %v31_v32  ;;  %v11964_v60 = vor.u32 %v13179_v27, %v11963_v26  ;;  %v1102_v0 = vunpack.c.h.b16 %v31_v32  ;;  %v8221_v14 = vld [vmem:[%s19901_s1 + $0xd0] sm:$0xf0]  ;;  %6660 = vmatpush.bf16.msrb.mxu0 %v11708_v53  ;;  %v14998_v27 = vpack.c.b16 %v1103_v63, %v1103_v63 }
 0x105   :  { %v12092_v1 = vor.u32 %v13211_v39, %v12091_v36  ;;  %v8349_v19 = vld [vmem:[%s19901_s1 + $0x1d0] sm:$0xf0]  ;;  %v12305_v24 = vld [vmem:[%s19901_s1 + $0x2c4] sm:$0xf]  ;;  %6673 = vmatpush.bf16.msrb.mxu1 %v11836_v59  ;;  %v15008_v39 = vpack.c.b16 %v1104_v5, %v1104_v5  ;;  %v8224_v40 = vor.u32 %v12241_v11, %v8221_v14  ;;  %v6454_v11 = vpop.f32.mrf.mxu0 }
 0x106   :  { %v14987_v18 = vpack.c.b16 %v1101_v57, %v1101_v57  ;;  %v8477_v26 = vld [vmem:[%s19901_s1 + $0x2d0] sm:$0xf0]  ;;  %6686 = vmatpush.bf16.msrb.mxu2 %v11964_v60  ;;  %v15000_v32 = vpack.c.b16 %v1102_v0, %v1102_v0  ;;  %v12337_v34 = vld [vmem:[%s19901_s1 + $0x3c4] sm:$0xf]  ;;  %v8352_v43 = vor.u32 %v12273_v15, %v8349_v19 }
 0x107   :  { %v8605_v36 = vld [vmem:[%s19901_s1 + $0x3d0] sm:$0xf0]  ;;  %6699 = vmatpush.bf16.msrb.mxu3 %v12092_v1  ;;  %v8480_v47 = vor.u32 %v12305_v24, %v8477_v26  ;;  %v12237_v48 = vld [vmem:[%s19901_s1 + $0xa4] sm:$0xf]  ;;  %v6467_v24 = vpop.f32.mrf.mxu1 }
 0x108   :  { %6705 = vmatpush.bf16.msra.mxu0 %v8240_v3  ;;  %v8205_v50 = vld [vmem:[%s19901_s1 + $0xb0] sm:$0xf0]  ;;  %v8608_v53 = vor.u32 %v12337_v34, %v8605_v36  ;;  %v12301_v55 = vld [vmem:[%s19901_s1 + $0x2a4] sm:$0xf]  ;;  %6674 = vmatmul.bf16.vlgmr.msrb.gmra.mxu1 %v15000_v32 }
 0x109   :  { %6718 = vmatpush.bf16.msra.mxu1 %v8368_v7  ;;  %6661 = vmatmul.bf16.vlgmr.msrb.gmra.mxu0 %v14987_v18  ;;  %v8333_v54 = vld [vmem:[%s19901_s1 + $0x1b0] sm:$0xf0]  ;;  %v12333_v57 = vld [vmem:[%s19901_s1 + $0x3a4] sm:$0xf]  ;;  %v8208_v60 = vor.u32 %v12237_v48, %v8205_v50 }
 0x10a   :  { %6731 = vmatpush.bf16.msra.mxu2 %v8496_v52  ;;  %v8461_v56 = vld [vmem:[%s19901_s1 + $0x2b0] sm:$0xf0]  ;;  %6700 = vmatmul.bf16.vlgmr.msrb.gmra.mxu3 %v15008_v39  ;;  %v8336_v61 = vor.u32 %v12269_v51, %v8333_v54  ;;  %v12233_v63 = vld [vmem:[%s19901_s1 + $0x84] sm:$0xf] }
 0x10b   :  { %6744 = vmatpush.bf16.msra.mxu3 %v8624_v17  ;;  %6687 = vmatmul.bf16.vlgmr.msrb.gmra.mxu2 %v14998_v27  ;;  %v8589_v59 = vld [vmem:[%s19901_s1 + $0x3b0] sm:$0xf0]  ;;  %v8464_v62 = vor.u32 %v12301_v55, %v8461_v56  ;;  %v12265_v1 = vld [vmem:[%s19901_s1 + $0x184] sm:$0xf]  ;;  %v6455_v17 = vadd.f32 %v6454_v11, %v14898_v58 }
 0x10c   :  { %6706 = vmatpush.bf16.msra.mxu0 %v8224_v40  ;;  %v8189_v0 = vld [vmem:[%s19901_s1 + $0x90] sm:$0xf0]  ;;  %v8592_v3 = vor.u32 %v12333_v57, %v8589_v59  ;;  %v12297_v7 = vld [vmem:[%s19901_s1 + $0x284] sm:$0xf] }
 0x10d   :  { %6719 = vmatpush.bf16.msra.mxu1 %v8352_v43  ;;  %v8317_v5 = vld [vmem:[%s19901_s1 + $0x190] sm:$0xf0]  ;;  %v12329_v14 = vld [vmem:[%s19901_s1 + $0x384] sm:$0xf]  ;;  %v8192_v19 = vor.u32 %v12233_v63, %v8189_v0  ;;  %v6480_v63 = vpop.f32.mrf.mxu2 }
 0x10e   :  { %6732 = vmatpush.bf16.msra.mxu2 %v8480_v47  ;;  %v8445_v52 = vld [vmem:[%s19901_s1 + $0x290] sm:$0xf0]  ;;  %v8320_v26 = vor.u32 %v12265_v1, %v8317_v5  ;;  %v12229_v36 = vld [vmem:[%s19901_s1 + $0x64] sm:$0xf]  ;;  %v6468_v47 = vadd.f32 %v6467_v24, %v6455_v17 }
 0x10f   :  { %6745 = vmatpush.bf16.msra.mxu3 %v8608_v53  ;;  %v8573_v15 = vld [vmem:[%s19901_s1 + $0x390] sm:$0xf0]  ;;  %v8448_v34 = vor.u32 %v12297_v7, %v8445_v52  ;;  %v12261_v43 = vld [vmem:[%s19901_s1 + $0x164] sm:$0xf]  ;;  %v6493_v7 = vpop.f32.mrf.mxu3  ;;  %v6469_v17 = vpop.f32.mrf.mxu1 }
 0x110   :  { %6707 = vmatpush.bf16.msra.mxu0 %v8208_v60  ;;  %v8173_v40 = vld [vmem:[%s19901_s1 + $0x70] sm:$0xf0]  ;;  %v8576_v58 = vor.u32 %v12329_v14, %v8573_v15  ;;  %v12293_v50 = vld [vmem:[%s19901_s1 + $0x264] sm:$0xf]  ;;  %v6481_v5 = vadd.f32 %v6480_v63, %v6468_v47  ;;  %v6456_v14 = vpop.f32.mrf.mxu0 }
 0x111   :  { %6720 = vmatpush.bf16.msra.mxu1 %v8336_v61  ;;  %v8301_v48 = vld [vmem:[%s19901_s1 + $0x170] sm:$0xf0]  ;;  %v12325_v53 = vld [vmem:[%s19901_s1 + $0x364] sm:$0xf]  ;;  %v8176_v55 = vor.u32 %v12229_v36, %v8173_v40 }
 0x112   :  { %6733 = vmatpush.bf16.msra.mxu2 %v8464_v62  ;;  %v8429_v51 = vld [vmem:[%s19901_s1 + $0x270] sm:$0xf0]  ;;  %v8304_v56 = vor.u32 %v12261_v43, %v8301_v48  ;;  %v12225_v59 = vld [vmem:[%s19901_s1 + $0x44] sm:$0xf] }
 0x113   :  { %6746 = vmatpush.bf16.msra.mxu3 %v8592_v3  ;;  %v8557_v54 = vld [vmem:[%s19901_s1 + $0x370] sm:$0xf0]  ;;  %v8432_v57 = vor.u32 %v12293_v50, %v8429_v51  ;;  %v12257_v61 = vld [vmem:[%s19901_s1 + $0x144] sm:$0xf] }
 0x114   :  { %6708 = vmatpush.bf16.msra.mxu0 %v8192_v19  ;;  %v8157_v60 = vld [vmem:[%s19901_s1 + $0x50] sm:$0xf0]  ;;  %v8560_v62 = vor.u32 %v12325_v53, %v8557_v54  ;;  %v12289_v1 = vld [vmem:[%s19901_s1 + $0x244] sm:$0xf]  ;;  %v15111_v19 = vadd.f32 %v6493_v7, %v6481_v5 }
 0x115   :  { %6721 = vmatpush.bf16.msra.mxu1 %v8320_v26  ;;  %v8285_v0 = vld [vmem:[%s19901_s1 + $0x150] sm:$0xf0]  ;;  %v12321_v52 = vld [vmem:[%s19901_s1 + $0x344] sm:$0xf]  ;;  %v8160_v15 = vor.u32 %v12225_v59, %v8157_v60 }
 0x116   :  { %6734 = vmatpush.bf16.msra.mxu2 %v8448_v34  ;;  %v8413_v3 = vld [vmem:[%s19901_s1 + $0x250] sm:$0xf0]  ;;  %v8288_v24 = vor.u32 %v12257_v61, %v8285_v0  ;;  %v12221_v34 = vld [vmem:[%s19901_s1 + $0x24] sm:$0xf] }
 0x117   :  { %6747 = vmatpush.bf16.msra.mxu3 %v8576_v58  ;;  %v8541_v11 = vld [vmem:[%s19901_s1 + $0x350] sm:$0xf0]  ;;  %v8416_v26 = vor.u32 %v12289_v1, %v8413_v3  ;;  %v12253_v40 = vld [vmem:[%s19901_s1 + $0x124] sm:$0xf]  ;;  %v6482_v3 = vpop.f32.mrf.mxu2 }
 0x118   :  { %6709 = vmatpush.bf16.msra.mxu0 %v8176_v55  ;;  %v8141_v36 = vld [vmem:[%s19901_s1 + $0x30] sm:$0xf0]  ;;  %v8544_v43 = vor.u32 %v12321_v52, %v8541_v11  ;;  %v12285_v47 = vld [vmem:[%s19901_s1 + $0x224] sm:$0xf]  ;;  %v6495_v11 = vpop.f32.mrf.mxu3 }
 0x119   :  { %6722 = vmatpush.bf16.msra.mxu1 %v8304_v56  ;;  %v8269_v58 = vld [vmem:[%s19901_s1 + $0x130] sm:$0xf0]  ;;  %v12317_v50 = vld [vmem:[%s19901_s1 + $0x324] sm:$0xf]  ;;  %v8144_v53 = vor.u32 %v12221_v34, %v8141_v36 }
 0x11a   :  { %6735 = vmatpush.bf16.msra.mxu2 %v8432_v57  ;;  %v8397_v48 = vld [vmem:[%s19901_s1 + $0x230] sm:$0xf0]  ;;  %v12217_v54 = vld [vmem:[%s19901_s1 + $0x4] sm:$0xf]  ;;  %v8272_v56 = vor.u32 %v12253_v40, %v8269_v58 }
 0x11b   :  { %6748 = vmatpush.bf16.msra.mxu3 %v8560_v62  ;;  %v8525_v51 = vld [vmem:[%s19901_s1 + $0x330] sm:$0xf0]  ;;  %v8400_v57 = vor.u32 %v12285_v47, %v8397_v48  ;;  %v12249_v59 = vld [vmem:[%s19901_s1 + $0x104] sm:$0xf] }
 0x11c   :  { %6710 = vmatpush.bf16.msra.mxu0 %v8160_v15  ;;  %v8125_v55 = vld [vmem:[%s19901_s1 + $0x10] sm:$0xf0]  ;;  %v12281_v61 = vld [vmem:[%s19901_s1 + $0x204] sm:$0xf]  ;;  %v8528_v62 = vor.u32 %v12317_v50, %v8525_v51 }
 0x11d   :  { %6723 = vmatpush.bf16.msra.mxu1 %v8288_v24  ;;  %v8253_v60 = vld [vmem:[%s19901_s1 + $0x110] sm:$0xf0]  ;;  %v12313_v0 = vld [vmem:[%s19901_s1 + $0x304] sm:$0xf]  ;;  %v8128_v14 = vor.u32 %v12217_v54, %v8125_v55 }
 0x11e   :  { %6736 = vmatpush.bf16.msra.mxu2 %v8416_v26  ;;  %v8381_v63 = vld [vmem:[%s19901_s1 + $0x210] sm:$0xf0]  ;;  %v12373_v5 = vld [vmem:[%s19901_s1 + $0x4e4] sm:$0xf]  ;;  %v8256_v26 = vor.u32 %v12249_v59, %v8253_v60 }
 0x11f   :  { %6749 = vmatpush.bf16.msra.mxu3 %v8544_v43  ;;  %v8509_v1 = vld [vmem:[%s19901_s1 + $0x310] sm:$0xf0]  ;;  %v12405_v52 = vld [vmem:[%s19901_s1 + $0x5e4] sm:$0xf]  ;;  %v8384_v34 = vor.u32 %v12281_v61, %v8381_v63 }
 0x120   :  { %v8749_v7 = vld [vmem:[%s19901_s1 + $0x4f0] sm:$0xf0]  ;;  %6711 = vmatpush.bf16.msra.mxu0 %v8144_v53  ;;  %v12437_v17 = vld [vmem:[%s19901_s1 + $0x6e4] sm:$0xf]  ;;  %v8512_v43 = vor.u32 %v12313_v0, %v8509_v1 }
 0x121   :  { %v8877_v15 = vld [vmem:[%s19901_s1 + $0x5f0] sm:$0xf0]  ;;  %6724 = vmatpush.bf16.msra.mxu1 %v8272_v56  ;;  %v12469_v36 = vld [vmem:[%s19901_s1 + $0x7e4] sm:$0xf]  ;;  %v8752_v58 = vor.u32 %v12373_v5, %v8749_v7 }
 0x122   :  { %v9005_v24 = vld [vmem:[%s19901_s1 + $0x6f0] sm:$0xf0]  ;;  %6737 = vmatpush.bf16.msra.mxu2 %v8400_v57  ;;  %v8880_v47 = vor.u32 %v12405_v52, %v8877_v15  ;;  %v12369_v50 = vld [vmem:[%s19901_s1 + $0x4c4] sm:$0xf] }
 0x123   :  { %v9133_v40 = vld [vmem:[%s19901_s1 + $0x7f0] sm:$0xf0]  ;;  %6750 = vmatpush.bf16.msra.mxu3 %v8528_v62  ;;  %v9008_v48 = vor.u32 %v12437_v17, %v9005_v24  ;;  %v12401_v53 = vld [vmem:[%s19901_s1 + $0x5c4] sm:$0xf] }
 0x124   :  { %v8733_v51 = vld [vmem:[%s19901_s1 + $0x4d0] sm:$0xf0]  ;;  %6712 = vmatpush.bf16.msra.mxu0 %v8128_v14  ;;  %v9136_v54 = vor.u32 %v12469_v36, %v9133_v40  ;;  %v12433_v56 = vld [vmem:[%s19901_s1 + $0x6c4] sm:$0xf] }
 0x125   :  { %v8861_v55 = vld [vmem:[%s19901_s1 + $0x5d0] sm:$0xf0]  ;;  %6725 = vmatpush.bf16.msra.mxu1 %v8256_v26  ;;  %v12465_v59 = vld [vmem:[%s19901_s1 + $0x7c4] sm:$0xf]  ;;  %v8736_v61 = vor.u32 %v12369_v50, %v8733_v51  ;;  %v6506_v50 = vpop.f32.mrf.mxu0 }
 0x126   :  { %v8989_v57 = vld [vmem:[%s19901_s1 + $0x6d0] sm:$0xf0]  ;;  %6738 = vmatpush.bf16.msra.mxu2 %v8384_v34  ;;  %v8864_v62 = vor.u32 %v12401_v53, %v8861_v55  ;;  %v12365_v0 = vld [vmem:[%s19901_s1 + $0x4a4] sm:$0xf] }
 0x127   :  { %v9117_v60 = vld [vmem:[%s19901_s1 + $0x7d0] sm:$0xf0]  ;;  %6751 = vmatpush.bf16.msra.mxu3 %v8512_v43  ;;  %v8992_v63 = vor.u32 %v12433_v56, %v8989_v57  ;;  %v12397_v3 = vld [vmem:[%s19901_s1 + $0x5a4] sm:$0xf]  ;;  %6713 = vmatmul.bf16.vlgmr.msra.gmra.mxu0 %v13577_v20  ;;  %v6519_v56 = vpop.f32.mrf.mxu1 }
 0x128   :  { %6757 = vmatpush.bf16.msrb.mxu0 %v8752_v58  ;;  %v8717_v1 = vld [vmem:[%s19901_s1 + $0x4b0] sm:$0xf0]  ;;  %v9120_v5 = vor.u32 %v12465_v59, %v9117_v60  ;;  %v12429_v52 = vld [vmem:[%s19901_s1 + $0x6a4] sm:$0xf]  ;;  %6726 = vmatmul.bf16.vlgmr.msra.gmra.mxu1 %v13580_v21 }
 0x129   :  { %6770 = vmatpush.bf16.msrb.mxu1 %v8880_v47  ;;  %v8845_v7 = vld [vmem:[%s19901_s1 + $0x5b0] sm:$0xf0]  ;;  %6739 = vmatmul.bf16.vlgmr.msra.gmra.mxu2 %v13545_v4  ;;  %v12461_v14 = vld [vmem:[%s19901_s1 + $0x7a4] sm:$0xf]  ;;  %v8720_v17 = vor.u32 %v12365_v0, %v8717_v1 }
 0x12a   :  { %6783 = vmatpush.bf16.msrb.mxu2 %v9008_v48  ;;  %v8973_v11 = vld [vmem:[%s19901_s1 + $0x6b0] sm:$0xf0]  ;;  %6752 = vmatmul.bf16.vlgmr.msra.gmra.mxu3 %v13550_v6  ;;  %v8848_v24 = vor.u32 %v12397_v3, %v8845_v7  ;;  %v12361_v34 = vld [vmem:[%s19901_s1 + $0x484] sm:$0xf] }
 0x12b   :  { %6796 = vmatpush.bf16.msrb.mxu3 %v9136_v54  ;;  %v9101_v15 = vld [vmem:[%s19901_s1 + $0x7b0] sm:$0xf0]  ;;  %v8976_v26 = vor.u32 %v12429_v52, %v8973_v11  ;;  %v12393_v40 = vld [vmem:[%s19901_s1 + $0x584] sm:$0xf]  ;;  %v6507_v54 = vadd.f32 %v6506_v50, %v15111_v19 }
 0x12c   :  { %6758 = vmatpush.bf16.msrb.mxu0 %v8736_v61  ;;  %v8701_v36 = vld [vmem:[%s19901_s1 + $0x490] sm:$0xf0]  ;;  %v9104_v43 = vor.u32 %v12461_v14, %v9101_v15  ;;  %v12425_v47 = vld [vmem:[%s19901_s1 + $0x684] sm:$0xf] }
 0x12d   :  { %6771 = vmatpush.bf16.msrb.mxu1 %v8864_v62  ;;  %v8829_v58 = vld [vmem:[%s19901_s1 + $0x590] sm:$0xf0]  ;;  %v12457_v51 = vld [vmem:[%s19901_s1 + $0x784] sm:$0xf]  ;;  %v8704_v55 = vor.u32 %v12361_v34, %v8701_v36  ;;  %v6532_v34 = vpop.f32.mrf.mxu2 }
 0x12e   :  { %6784 = vmatpush.bf16.msrb.mxu2 %v8992_v63  ;;  %v8957_v48 = vld [vmem:[%s19901_s1 + $0x690] sm:$0xf0]  ;;  %v8832_v57 = vor.u32 %v12393_v40, %v8829_v58  ;;  %v12357_v60 = vld [vmem:[%s19901_s1 + $0x464] sm:$0xf]  ;;  %v6520_v63 = vadd.f32 %v6519_v56, %v6507_v54 }
 0x12f   :  { %6797 = vmatpush.bf16.msrb.mxu3 %v9120_v5  ;;  %v9085_v53 = vld [vmem:[%s19901_s1 + $0x790] sm:$0xf0]  ;;  %v8960_v59 = vor.u32 %v12425_v47, %v8957_v48  ;;  %v12389_v62 = vld [vmem:[%s19901_s1 + $0x564] sm:$0xf]  ;;  %v6545_v47 = vpop.f32.mrf.mxu3  ;;  %v6521_v54 = vpop.f32.mrf.mxu1 }
 0x130   :  { %6759 = vmatpush.bf16.msrb.mxu0 %v8720_v17  ;;  %v8685_v61 = vld [vmem:[%s19901_s1 + $0x470] sm:$0xf0]  ;;  %v9088_v19 = vor.u32 %v12457_v51, %v9085_v53  ;;  %v12421_v1 = vld [vmem:[%s19901_s1 + $0x664] sm:$0xf]  ;;  %v6533_v58 = vadd.f32 %v6532_v34, %v6520_v63  ;;  %v6508_v51 = vpop.f32.mrf.mxu0 }
 0x131   :  { %6772 = vmatpush.bf16.msrb.mxu1 %v8848_v24  ;;  %v8813_v0 = vld [vmem:[%s19901_s1 + $0x570] sm:$0xf0]  ;;  %v12453_v5 = vld [vmem:[%s19901_s1 + $0x764] sm:$0xf]  ;;  %v8688_v52 = vor.u32 %v12357_v60, %v8685_v61 }
 0x132   :  { %6785 = vmatpush.bf16.msrb.mxu2 %v8976_v26  ;;  %v8941_v3 = vld [vmem:[%s19901_s1 + $0x670] sm:$0xf0]  ;;  %v8816_v11 = vor.u32 %v12389_v62, %v8813_v0  ;;  %v12353_v15 = vld [vmem:[%s19901_s1 + $0x444] sm:$0xf] }
 0x133   :  { %6798 = vmatpush.bf16.msrb.mxu3 %v9104_v43  ;;  %v9069_v7 = vld [vmem:[%s19901_s1 + $0x770] sm:$0xf0]  ;;  %v8944_v14 = vor.u32 %v12421_v1, %v8941_v3  ;;  %v12385_v24 = vld [vmem:[%s19901_s1 + $0x544] sm:$0xf] }
 0x134   :  { %6760 = vmatpush.bf16.msrb.mxu0 %v8704_v55  ;;  %v8669_v17 = vld [vmem:[%s19901_s1 + $0x450] sm:$0xf0]  ;;  %v9072_v26 = vor.u32 %v12453_v5, %v9069_v7  ;;  %v12417_v40 = vld [vmem:[%s19901_s1 + $0x644] sm:$0xf]  ;;  %v15310_v55 = vadd.f32 %v6545_v47, %v6533_v58 }
 0x135   :  { %6773 = vmatpush.bf16.msrb.mxu1 %v8832_v57  ;;  %v8797_v36 = vld [vmem:[%s19901_s1 + $0x550] sm:$0xf0]  ;;  %v12449_v48 = vld [vmem:[%s19901_s1 + $0x744] sm:$0xf]  ;;  %v8672_v53 = vor.u32 %v12353_v15, %v8669_v17 }
 0x136   :  { %6786 = vmatpush.bf16.msrb.mxu2 %v8960_v59  ;;  %v8925_v43 = vld [vmem:[%s19901_s1 + $0x650] sm:$0xf0]  ;;  %v8800_v56 = vor.u32 %v12385_v24, %v8797_v36  ;;  %v12349_v59 = vld [vmem:[%s19901_s1 + $0x424] sm:$0xf] }
 0x137   :  { %6799 = vmatpush.bf16.msrb.mxu3 %v9088_v19  ;;  %v9053_v50 = vld [vmem:[%s19901_s1 + $0x750] sm:$0xf0]  ;;  %v8928_v57 = vor.u32 %v12417_v40, %v8925_v43  ;;  %v12381_v61 = vld [vmem:[%s19901_s1 + $0x524] sm:$0xf]  ;;  %v6534_v43 = vpop.f32.mrf.mxu2 }
 0x138   :  { %6761 = vmatpush.bf16.msrb.mxu0 %v8688_v52  ;;  %v8653_v60 = vld [vmem:[%s19901_s1 + $0x430] sm:$0xf0]  ;;  %v9056_v62 = vor.u32 %v12449_v48, %v9053_v50  ;;  %v12413_v63 = vld [vmem:[%s19901_s1 + $0x624] sm:$0xf]  ;;  %v6547_v50 = vpop.f32.mrf.mxu3 }
 0x139   :  { %6774 = vmatpush.bf16.msrb.mxu1 %v8816_v11  ;;  %v8781_v19 = vld [vmem:[%s19901_s1 + $0x530] sm:$0xf0]  ;;  %v12445_v1 = vld [vmem:[%s19901_s1 + $0x724] sm:$0xf]  ;;  %v8656_v5 = vor.u32 %v12349_v59, %v8653_v60 }
 0x13a   :  { %6787 = vmatpush.bf16.msrb.mxu2 %v8944_v14  ;;  %v8909_v0 = vld [vmem:[%s19901_s1 + $0x630] sm:$0xf0]  ;;  %v12345_v7 = vld [vmem:[%s19901_s1 + $0x404] sm:$0xf]  ;;  %v8784_v11 = vor.u32 %v12381_v61, %v8781_v19 }
 0x13b   :  { %6800 = vmatpush.bf16.msrb.mxu3 %v9072_v26  ;;  %v9037_v3 = vld [vmem:[%s19901_s1 + $0x730] sm:$0xf0]  ;;  %v8912_v14 = vor.u32 %v12413_v63, %v8909_v0  ;;  %v12377_v15 = vld [vmem:[%s19901_s1 + $0x504] sm:$0xf] }
 0x13c   :  { %6762 = vmatpush.bf16.msrb.mxu0 %v8672_v53  ;;  %v8637_v52 = vld [vmem:[%s19901_s1 + $0x410] sm:$0xf0]  ;;  %v12409_v24 = vld [vmem:[%s19901_s1 + $0x604] sm:$0xf]  ;;  %v9040_v26 = vor.u32 %v12445_v1, %v9037_v3 }
 0x13d   :  { %6775 = vmatpush.bf16.msrb.mxu1 %v8800_v56  ;;  %v8765_v17 = vld [vmem:[%s19901_s1 + $0x510] sm:$0xf0]  ;;  %v12441_v36 = vld [vmem:[%s19901_s1 + $0x704] sm:$0xf]  ;;  %v8640_v51 = vor.u32 %v12345_v7, %v8637_v52 }
 0x13e   :  { %6788 = vmatpush.bf16.msrb.mxu2 %v8928_v57  ;;  %v8893_v34 = vld [vmem:[%s19901_s1 + $0x610] sm:$0xf0]  ;;  %v12501_v58 = vld [vmem:[%s19901_s1 + $0x8e4] sm:$0xf]  ;;  %v8768_v57 = vor.u32 %v12377_v15, %v8765_v17 }
 0x13f   :  { %6801 = vmatpush.bf16.msrb.mxu3 %v9056_v62  ;;  %v9021_v40 = vld [vmem:[%s19901_s1 + $0x710] sm:$0xf0]  ;;  %v12533_v48 = vld [vmem:[%s19901_s1 + $0x9e4] sm:$0xf]  ;;  %v8896_v59 = vor.u32 %v12409_v24, %v8893_v34 }
 0x140   :  { %v9261_v47 = vld [vmem:[%s19901_s1 + $0x8f0] sm:$0xf0]  ;;  %6763 = vmatpush.bf16.msrb.mxu0 %v8656_v5  ;;  %v12565_v54 = vld [vmem:[%s19901_s1 + $0xae4] sm:$0xf]  ;;  %v9024_v62 = vor.u32 %v12441_v36, %v9021_v40 }
 0x141   :  { %v9389_v53 = vld [vmem:[%s19901_s1 + $0x9f0] sm:$0xf0]  ;;  %6776 = vmatpush.bf16.msrb.mxu1 %v8784_v11  ;;  %v12597_v60 = vld [vmem:[%s19901_s1 + $0xbe4] sm:$0xf]  ;;  %v9264_v19 = vor.u32 %v12501_v58, %v9261_v47 }
 0x142   :  { %v9517_v56 = vld [vmem:[%s19901_s1 + $0xaf0] sm:$0xf0]  ;;  %6789 = vmatpush.bf16.msrb.mxu2 %v8912_v14  ;;  %v9392_v63 = vor.u32 %v12533_v48, %v9389_v53  ;;  %v12497_v1 = vld [vmem:[%s19901_s1 + $0x8c4] sm:$0xf] }
 0x143   :  { %v9645_v61 = vld [vmem:[%s19901_s1 + $0xbf0] sm:$0xf0]  ;;  %6802 = vmatpush.bf16.msrb.mxu3 %v9040_v26  ;;  %v9520_v0 = vor.u32 %v12565_v54, %v9517_v56  ;;  %v12529_v5 = vld [vmem:[%s19901_s1 + $0x9c4] sm:$0xf] }
 0x144   :  { %v9245_v3 = vld [vmem:[%s19901_s1 + $0x8d0] sm:$0xf0]  ;;  %6764 = vmatpush.bf16.msrb.mxu0 %v8640_v51  ;;  %v9648_v7 = vor.u32 %v12597_v60, %v9645_v61  ;;  %v12561_v11 = vld [vmem:[%s19901_s1 + $0xac4] sm:$0xf] }
 0x145   :  { %v9373_v52 = vld [vmem:[%s19901_s1 + $0x9d0] sm:$0xf0]  ;;  %6777 = vmatpush.bf16.msrb.mxu1 %v8768_v57  ;;  %v12593_v15 = vld [vmem:[%s19901_s1 + $0xbc4] sm:$0xf]  ;;  %v9248_v24 = vor.u32 %v12497_v1, %v9245_v3  ;;  %v15454_v1 = vpop.f32.mrf.mxu0 }
 0x146   :  { %v9501_v14 = vld [vmem:[%s19901_s1 + $0xad0] sm:$0xf0]  ;;  %6790 = vmatpush.bf16.msrb.mxu2 %v8896_v59  ;;  %v9376_v26 = vor.u32 %v12529_v5, %v9373_v52  ;;  %v12493_v36 = vld [vmem:[%s19901_s1 + $0x8a4] sm:$0xf]  ;;  %v15462_v52 = vpop.f32.mrf.mxu1 }
 0x147   :  { %v9629_v17 = vld [vmem:[%s19901_s1 + $0xbd0] sm:$0xf0]  ;;  %6803 = vmatpush.bf16.msrb.mxu3 %v9024_v62  ;;  %v9504_v34 = vor.u32 %v12561_v11, %v9501_v14  ;;  %v12525_v43 = vld [vmem:[%s19901_s1 + $0x9a4] sm:$0xf]  ;;  %6765 = vmatmul.bf16.vlgmr.msrb.gmra.mxu0 %v13736_v41 }
 0x148   :  { %6809 = vmatpush.bf16.msra.mxu0 %v9264_v19  ;;  %v9229_v40 = vld [vmem:[%s19901_s1 + $0x8b0] sm:$0xf0]  ;;  %v9632_v58 = vor.u32 %v12593_v15, %v9629_v17  ;;  %v12557_v48 = vld [vmem:[%s19901_s1 + $0xaa4] sm:$0xf]  ;;  %6778 = vmatmul.bf16.vlgmr.msrb.gmra.mxu1 %v13740_v44 }
 0x149   :  { %6822 = vmatpush.bf16.msra.mxu1 %v9392_v63  ;;  %6791 = vmatmul.bf16.vlgmr.msrb.gmra.mxu2 %v13728_v38  ;;  %v9357_v47 = vld [vmem:[%s19901_s1 + $0x9b0] sm:$0xf0]  ;;  %v12589_v51 = vld [vmem:[%s19901_s1 + $0xba4] sm:$0xf]  ;;  %v9232_v54 = vor.u32 %v12493_v36, %v9229_v40 }
 0x14a   :  { %6835 = vmatpush.bf16.msra.mxu2 %v9520_v0  ;;  %v9485_v50 = vld [vmem:[%s19901_s1 + $0xab0] sm:$0xf0]  ;;  %6804 = vmatmul.bf16.vlgmr.msrb.gmra.mxu3 %v13738_v42  ;;  %v9360_v56 = vor.u32 %v12525_v43, %v9357_v47  ;;  %v12489_v59 = vld [vmem:[%s19901_s1 + $0x884] sm:$0xf] }
 0x14b   :  { %6848 = vmatpush.bf16.msra.mxu3 %v9648_v7  ;;  %v9613_v53 = vld [vmem:[%s19901_s1 + $0xbb0] sm:$0xf0]  ;;  %v9488_v57 = vor.u32 %v12557_v48, %v9485_v50  ;;  %v12521_v61 = vld [vmem:[%s19901_s1 + $0x984] sm:$0xf] }
 0x14c   :  { %6810 = vmatpush.bf16.msra.mxu0 %v9248_v24  ;;  %v9213_v60 = vld [vmem:[%s19901_s1 + $0x890] sm:$0xf0]  ;;  %v9616_v62 = vor.u32 %v12589_v51, %v9613_v53  ;;  %v12553_v63 = vld [vmem:[%s19901_s1 + $0xa84] sm:$0xf] }
 0x14d   :  { %6823 = vmatpush.bf16.msra.mxu1 %v9376_v26  ;;  %v9341_v19 = vld [vmem:[%s19901_s1 + $0x990] sm:$0xf0]  ;;  %v12585_v3 = vld [vmem:[%s19901_s1 + $0xb84] sm:$0xf]  ;;  %v9216_v7 = vor.u32 %v12489_v59, %v9213_v60 }
 0x14e   :  { %6836 = vmatpush.bf16.msra.mxu2 %v9504_v34  ;;  %v9469_v0 = vld [vmem:[%s19901_s1 + $0xa90] sm:$0xf0]  ;;  %v9344_v11 = vor.u32 %v12521_v61, %v9341_v19  ;;  %v12485_v15 = vld [vmem:[%s19901_s1 + $0x864] sm:$0xf] }
 0x14f   :  { %6849 = vmatpush.bf16.msra.mxu3 %v9632_v58  ;;  %v9597_v5 = vld [vmem:[%s19901_s1 + $0xb90] sm:$0xf0]  ;;  %v9472_v14 = vor.u32 %v12553_v63, %v9469_v0  ;;  %v12517_v24 = vld [vmem:[%s19901_s1 + $0x964] sm:$0xf]  ;;  %v6560_v0 = vpop.f32.mrf.mxu0 }
 0x150   :  { %6811 = vmatpush.bf16.msra.mxu0 %v9232_v54  ;;  %v9197_v17 = vld [vmem:[%s19901_s1 + $0x870] sm:$0xf0]  ;;  %v9600_v26 = vor.u32 %v12585_v3, %v9597_v5  ;;  %v12549_v36 = vld [vmem:[%s19901_s1 + $0xa64] sm:$0xf]  ;;  %v6573_v5 = vpop.f32.mrf.mxu1 }
 0x151   :  { %6824 = vmatpush.bf16.msra.mxu1 %v9360_v56  ;;  %v9325_v34 = vld [vmem:[%s19901_s1 + $0x970] sm:$0xf0]  ;;  %v12581_v43 = vld [vmem:[%s19901_s1 + $0xb64] sm:$0xf]  ;;  %v9200_v47 = vor.u32 %v12485_v15, %v9197_v17 }
 0x152   :  { %6837 = vmatpush.bf16.msra.mxu2 %v9488_v57  ;;  %v9453_v40 = vld [vmem:[%s19901_s1 + $0xa70] sm:$0xf0]  ;;  %v9328_v48 = vor.u32 %v12517_v24, %v9325_v34  ;;  %v12481_v51 = vld [vmem:[%s19901_s1 + $0x844] sm:$0xf]  ;;  %v15497_v57 = vpop.f32.mrf.mxu2 }
 0x153   :  { %6850 = vmatpush.bf16.msra.mxu3 %v9616_v62  ;;  %v9581_v58 = vld [vmem:[%s19901_s1 + $0xb70] sm:$0xf0]  ;;  %v9456_v50 = vor.u32 %v12549_v36, %v9453_v40  ;;  %v12513_v54 = vld [vmem:[%s19901_s1 + $0x944] sm:$0xf]  ;;  %v15508_v62 = vpop.f32.mrf.mxu3 }
 0x154   :  { %6812 = vmatpush.bf16.msra.mxu0 %v9216_v7  ;;  %v9181_v53 = vld [vmem:[%s19901_s1 + $0x850] sm:$0xf0]  ;;  %v9584_v56 = vor.u32 %v12581_v43, %v9581_v58  ;;  %v12545_v60 = vld [vmem:[%s19901_s1 + $0xa44] sm:$0xf] }
 0x155   :  { %6825 = vmatpush.bf16.msra.mxu1 %v9344_v11  ;;  %v9309_v59 = vld [vmem:[%s19901_s1 + $0x950] sm:$0xf0]  ;;  %v12577_v19 = vld [vmem:[%s19901_s1 + $0xb44] sm:$0xf]  ;;  %v9184_v3 = vor.u32 %v12481_v51, %v9181_v53 }
 0x156   :  { %6838 = vmatpush.bf16.msra.mxu2 %v9472_v14  ;;  %v9437_v61 = vld [vmem:[%s19901_s1 + $0xa50] sm:$0xf0]  ;;  %v9312_v7 = vor.u32 %v12513_v54, %v9309_v59  ;;  %v12477_v14 = vld [vmem:[%s19901_s1 + $0x824] sm:$0xf] }
 0x157   :  { %6851 = vmatpush.bf16.msra.mxu3 %v9600_v26  ;;  %v9565_v63 = vld [vmem:[%s19901_s1 + $0xb50] sm:$0xf0]  ;;  %v9440_v11 = vor.u32 %v12545_v60, %v9437_v61  ;;  %v12509_v17 = vld [vmem:[%s19901_s1 + $0x924] sm:$0xf] }
 0x158   :  { %6813 = vmatpush.bf16.msra.mxu0 %v9200_v47  ;;  %v9165_v15 = vld [vmem:[%s19901_s1 + $0x830] sm:$0xf0]  ;;  %v9568_v24 = vor.u32 %v12577_v19, %v9565_v63  ;;  %v12541_v34 = vld [vmem:[%s19901_s1 + $0xa24] sm:$0xf] }
 0x159   :  { %6826 = vmatpush.bf16.msra.mxu1 %v9328_v48  ;;  %v9293_v26 = vld [vmem:[%s19901_s1 + $0x930] sm:$0xf0]  ;;  %v12573_v40 = vld [vmem:[%s19901_s1 + $0xb24] sm:$0xf]  ;;  %v9168_v58 = vor.u32 %v12477_v14, %v9165_v15 }
 0x15a   :  { %6839 = vmatpush.bf16.msra.mxu2 %v9456_v50  ;;  %v9421_v36 = vld [vmem:[%s19901_s1 + $0xa30] sm:$0xf0]  ;;  %v12473_v47 = vld [vmem:[%s19901_s1 + $0x804] sm:$0xf]  ;;  %v9296_v50 = vor.u32 %v12509_v17, %v9293_v26  ;;  %v6586_v63 = vpop.f32.mrf.mxu2 }
 0x15b   :  { %6852 = vmatpush.bf16.msra.mxu3 %v9584_v56  ;;  %v9549_v43 = vld [vmem:[%s19901_s1 + $0xb30] sm:$0xf0]  ;;  %v9424_v51 = vor.u32 %v12541_v34, %v9421_v36  ;;  %v12505_v53 = vld [vmem:[%s19901_s1 + $0x904] sm:$0xf] }
 0x15c   :  { %6814 = vmatpush.bf16.msra.mxu0 %v9184_v3  ;;  %v9149_v48 = vld [vmem:[%s19901_s1 + $0x810] sm:$0xf0]  ;;  %v12537_v56 = vld [vmem:[%s19901_s1 + $0xa04] sm:$0xf]  ;;  %v9552_v59 = vor.u32 %v12573_v40, %v9549_v43 }
 0x15d   :  { %6827 = vmatpush.bf16.msra.mxu1 %v9312_v7  ;;  %v9277_v54 = vld [vmem:[%s19901_s1 + $0x910] sm:$0xf0]  ;;  %v12569_v61 = vld [vmem:[%s19901_s1 + $0xb04] sm:$0xf]  ;;  %v6599_v7 = vpop.f32.mrf.mxu3 }
 0x15e   :  { %6840 = vmatpush.bf16.msra.mxu2 %v9440_v11  ;;  %v9405_v60 = vld [vmem:[%s19901_s1 + $0xa10] sm:$0xf0]  ;;  %v12629_v0 = vld [vmem:[%s19901_s1 + $0xce4] sm:$0xf]  ;;  %v9152_v11 = vor.u32 %v12473_v47, %v9149_v48 }
 0x15f   :  { %6853 = vmatpush.bf16.msra.mxu3 %v9568_v24  ;;  %v9533_v19 = vld [vmem:[%s19901_s1 + $0xb10] sm:$0xf0]  ;;  %v12661_v5 = vld [vmem:[%s19901_s1 + $0xde4] sm:$0xf]  ;;  %v9280_v24 = vor.u32 %v12505_v53, %v9277_v54  ;;  %v9408_v26 = vor.u32 %v12537_v56, %v9405_v60 }
 0x160   :  { %v9773_v3 = vld [vmem:[%s19901_s1 + $0xcf0] sm:$0xf0]  ;;  %6815 = vmatpush.bf16.msra.mxu0 %v9168_v58  ;;  %v12693_v15 = vld [vmem:[%s19901_s1 + $0xee4] sm:$0xf]  ;;  %v9536_v40 = vor.u32 %v12569_v61, %v9533_v19 }
 0x161   :  { %v9901_v14 = vld [vmem:[%s19901_s1 + $0xdf0] sm:$0xf0]  ;;  %6828 = vmatpush.bf16.msra.mxu1 %v9296_v50  ;;  %v12725_v34 = vld [vmem:[%s19901_s1 + $0xfe4] sm:$0xf]  ;;  %v9776_v43 = vor.u32 %v12629_v0, %v9773_v3 }
 0x162   :  { %v10029_v17 = vld [vmem:[%s19901_s1 + $0xef0] sm:$0xf0]  ;;  %6841 = vmatpush.bf16.msra.mxu2 %v9424_v51  ;;  %v9904_v58 = vor.u32 %v12661_v5, %v9901_v14  ;;  %v12625_v48 = vld [vmem:[%s19901_s1 + $0xcc4] sm:$0xf] }
 0x163   :  { %v10157_v36 = vld [vmem:[%s19901_s1 + $0xff0] sm:$0xf0]  ;;  %6854 = vmatpush.bf16.msra.mxu3 %v9552_v59  ;;  %v10032_v47 = vor.u32 %v12693_v15, %v10029_v17  ;;  %v12657_v51 = vld [vmem:[%s19901_s1 + $0xdc4] sm:$0xf] }
 0x164   :  { %v9757_v50 = vld [vmem:[%s19901_s1 + $0xcd0] sm:$0xf0]  ;;  %6816 = vmatpush.bf16.msra.mxu0 %v9152_v11  ;;  %v10160_v53 = vor.u32 %v12725_v34, %v10157_v36  ;;  %v12689_v56 = vld [vmem:[%s19901_s1 + $0xec4] sm:$0xf] }
 0x165   :  { %v9885_v54 = vld [vmem:[%s19901_s1 + $0xdd0] sm:$0xf0]  ;;  %6829 = vmatpush.bf16.msra.mxu1 %v9280_v24  ;;  %v12721_v60 = vld [vmem:[%s19901_s1 + $0xfc4] sm:$0xf]  ;;  %v9760_v19 = vor.u32 %v12625_v48, %v9757_v50 }
 0x166   :  { %v10013_v59 = vld [vmem:[%s19901_s1 + $0xed0] sm:$0xf0]  ;;  %6842 = vmatpush.bf16.msra.mxu2 %v9408_v26  ;;  %v9888_v63 = vor.u32 %v12657_v51, %v9885_v54  ;;  %v12621_v3 = vld [vmem:[%s19901_s1 + $0xca4] sm:$0xf]  ;;  %v15658_v54 = vpop.f32.mrf.mxu0 }
 0x167   :  { %v10141_v61 = vld [vmem:[%s19901_s1 + $0xfd0] sm:$0xf0]  ;;  %6855 = vmatpush.bf16.msra.mxu3 %v9536_v40  ;;  %v10016_v0 = vor.u32 %v12689_v56, %v10013_v59  ;;  %v12653_v7 = vld [vmem:[%s19901_s1 + $0xda4] sm:$0xf]  ;;  %6817 = vmatmul.bf16.vlgmr.msra.gmra.mxu0 %v13929_v25 }
 0x168   :  { %6861 = vmatpush.bf16.msrb.mxu0 %v9776_v43  ;;  %v9741_v5 = vld [vmem:[%s19901_s1 + $0xcb0] sm:$0xf0]  ;;  %v10144_v11 = vor.u32 %v12721_v60, %v10141_v61  ;;  %v12685_v15 = vld [vmem:[%s19901_s1 + $0xea4] sm:$0xf]  ;;  %6830 = vmatmul.bf16.vlgmr.msra.gmra.mxu1 %v13942_v30  ;;  %v15666_v61 = vpop.f32.mrf.mxu1 }
 0x169   :  { %6874 = vmatpush.bf16.msrb.mxu1 %v9904_v58  ;;  %v9869_v14 = vld [vmem:[%s19901_s1 + $0xdb0] sm:$0xf0]  ;;  %6843 = vmatmul.bf16.vlgmr.msra.gmra.mxu2 %v13940_v29  ;;  %v12717_v24 = vld [vmem:[%s19901_s1 + $0xfa4] sm:$0xf]  ;;  %v9744_v34 = vor.u32 %v12621_v3, %v9741_v5 }
 0x16a   :  { %6887 = vmatpush.bf16.msrb.mxu2 %v10032_v47  ;;  %v9997_v17 = vld [vmem:[%s19901_s1 + $0xeb0] sm:$0xf0]  ;;  %6856 = vmatmul.bf16.vlgmr.msra.gmra.mxu3 %v13950_v33  ;;  %v9872_v36 = vor.u32 %v12653_v7, %v9869_v14  ;;  %v12617_v43 = vld [vmem:[%s19901_s1 + $0xc84] sm:$0xf] }
 0x16b   :  { %6900 = vmatpush.bf16.msrb.mxu3 %v10160_v53  ;;  %v10125_v26 = vld [vmem:[%s19901_s1 + $0xfb0] sm:$0xf0]  ;;  %v10000_v40 = vor.u32 %v12685_v15, %v9997_v17  ;;  %v12649_v47 = vld [vmem:[%s19901_s1 + $0xd84] sm:$0xf] }
 0x16c   :  { %6862 = vmatpush.bf16.msrb.mxu0 %v9760_v19  ;;  %v9725_v58 = vld [vmem:[%s19901_s1 + $0xc90] sm:$0xf0]  ;;  %v10128_v48 = vor.u32 %v12717_v24, %v10125_v26  ;;  %v12681_v51 = vld [vmem:[%s19901_s1 + $0xe84] sm:$0xf] }
 0x16d   :  { %6875 = vmatpush.bf16.msrb.mxu1 %v9888_v63  ;;  %v9853_v50 = vld [vmem:[%s19901_s1 + $0xd90] sm:$0xf0]  ;;  %v12713_v56 = vld [vmem:[%s19901_s1 + $0xf84] sm:$0xf]  ;;  %v9728_v60 = vor.u32 %v12617_v43, %v9725_v58 }
 0x16e   :  { %6888 = vmatpush.bf16.msrb.mxu2 %v10016_v0  ;;  %v9981_v53 = vld [vmem:[%s19901_s1 + $0xe90] sm:$0xf0]  ;;  %v9856_v19 = vor.u32 %v12649_v47, %v9853_v50  ;;  %v12613_v0 = vld [vmem:[%s19901_s1 + $0xc64] sm:$0xf] }
 0x16f   :  { %6901 = vmatpush.bf16.msrb.mxu3 %v10144_v11  ;;  %v10109_v59 = vld [vmem:[%s19901_s1 + $0xf90] sm:$0xf0]  ;;  %v9984_v63 = vor.u32 %v12681_v51, %v9981_v53  ;;  %v12645_v5 = vld [vmem:[%s19901_s1 + $0xd64] sm:$0xf] }
 0x170   :  { %6863 = vmatpush.bf16.msrb.mxu0 %v9744_v34  ;;  %v9709_v3 = vld [vmem:[%s19901_s1 + $0xc70] sm:$0xf0]  ;;  %v10112_v7 = vor.u32 %v12713_v56, %v10109_v59  ;;  %v12677_v14 = vld [vmem:[%s19901_s1 + $0xe64] sm:$0xf]  ;;  %v6559_v56 = vadd.f32 %v15454_v1, %v15310_v55  ;;  %v15714_v59 = vpop.f32.mrf.mxu3 }
 0x171   :  { %6876 = vmatpush.bf16.msrb.mxu1 %v9872_v36  ;;  %v9837_v11 = vld [vmem:[%s19901_s1 + $0xd70] sm:$0xf0]  ;;  %v12709_v17 = vld [vmem:[%s19901_s1 + $0xf64] sm:$0xf]  ;;  %v9712_v26 = vor.u32 %v12613_v0, %v9709_v3  ;;  %v6625_v3 = vpop.f32.mrf.mxu1 }
 0x172   :  { %6889 = vmatpush.bf16.msrb.mxu2 %v10000_v40  ;;  %v9965_v15 = vld [vmem:[%s19901_s1 + $0xe70] sm:$0xf0]  ;;  %v9840_v34 = vor.u32 %v12645_v5, %v9837_v11  ;;  %v12609_v40 = vld [vmem:[%s19901_s1 + $0xc44] sm:$0xf] }
 0x173   :  { %6902 = vmatpush.bf16.msrb.mxu3 %v10128_v48  ;;  %v10093_v24 = vld [vmem:[%s19901_s1 + $0xf70] sm:$0xf0]  ;;  %v9968_v36 = vor.u32 %v12677_v14, %v9965_v15  ;;  %v12641_v58 = vld [vmem:[%s19901_s1 + $0xd44] sm:$0xf]  ;;  %v15701_v48 = vpop.f32.mrf.mxu2 }
 0x174   :  { %6864 = vmatpush.bf16.msrb.mxu0 %v9728_v60  ;;  %v9693_v43 = vld [vmem:[%s19901_s1 + $0xc50] sm:$0xf0]  ;;  %v10096_v47 = vor.u32 %v12709_v17, %v10093_v24  ;;  %v12673_v51 = vld [vmem:[%s19901_s1 + $0xe44] sm:$0xf] }
 0x175   :  { %6877 = vmatpush.bf16.msrb.mxu1 %v9856_v19  ;;  %v9821_v50 = vld [vmem:[%s19901_s1 + $0xd50] sm:$0xf0]  ;;  %v12705_v60 = vld [vmem:[%s19901_s1 + $0xf44] sm:$0xf]  ;;  %v9696_v0 = vor.u32 %v12609_v40, %v9693_v43 }
 0x176   :  { %6890 = vmatpush.bf16.msrb.mxu2 %v9984_v63  ;;  %v9949_v53 = vld [vmem:[%s19901_s1 + $0xe50] sm:$0xf0]  ;;  %v6612_v63 = vpop.f32.mrf.mxu0  ;;  %v9824_v5 = vor.u32 %v12641_v58, %v9821_v50  ;;  %v12605_v55 = vld [vmem:[%s19901_s1 + $0xc24] sm:$0xf] }
 0x177   :  { %6903 = vmatpush.bf16.msrb.mxu3 %v10112_v7  ;;  %v10077_v19 = vld [vmem:[%s19901_s1 + $0xf50] sm:$0xf0]  ;;  %v9952_v7 = vor.u32 %v12673_v51, %v9949_v53  ;;  %v12637_v11 = vld [vmem:[%s19901_s1 + $0xd24] sm:$0xf] }
 0x178   :  { %6865 = vmatpush.bf16.msrb.mxu0 %v9712_v26  ;;  %v9677_v1 = vld [vmem:[%s19901_s1 + $0xc30] sm:$0xf0]  ;;  %v10080_v14 = vor.u32 %v12705_v60, %v10077_v19  ;;  %v12669_v17 = vld [vmem:[%s19901_s1 + $0xe24] sm:$0xf]  ;;  %v6572_v26 = vadd.f32 %v15462_v52, %v6559_v56 }
 0x179   :  { %6878 = vmatpush.bf16.msrb.mxu1 %v9840_v34  ;;  %v9805_v15 = vld [vmem:[%s19901_s1 + $0xd30] sm:$0xf0]  ;;  %v12701_v34 = vld [vmem:[%s19901_s1 + $0xf24] sm:$0xf]  ;;  %v9680_v40 = vor.u32 %v12605_v55, %v9677_v1  ;;  %v6651_v55 = vpop.f32.mrf.mxu3 }
 0x17a   :  { %6891 = vmatpush.bf16.msrb.mxu2 %v9968_v36  ;;  %v9933_v24 = vld [vmem:[%s19901_s1 + $0xe30] sm:$0xf0]  ;;  %v12601_v43 = vld [vmem:[%s19901_s1 + $0xc04] sm:$0xf]  ;;  %v6585_v52 = vadd.f32 %v15497_v57, %v6572_v26 }
 0x17b   :  { %6904 = vmatpush.bf16.msrb.mxu3 %v10096_v47  ;;  %v10061_v36 = vld [vmem:[%s19901_s1 + $0xf30] sm:$0xf0]  ;;  %v9808_v47 = vor.u32 %v12637_v11, %v9805_v15  ;;  %v9936_v50 = vor.u32 %v12669_v17, %v9933_v24  ;;  %v12633_v51 = vld [vmem:[%s19901_s1 + $0xd04] sm:$0xf] }
 0x17c   :  { %6866 = vmatpush.bf16.msrb.mxu0 %v9696_v0  ;;  %v9661_v58 = vld [vmem:[%s19901_s1 + $0xc10] sm:$0xf0]  ;;  %v12665_v56 = vld [vmem:[%s19901_s1 + $0xe04] sm:$0xf]  ;;  %v10064_v60 = vor.u32 %v12701_v34, %v10061_v36  ;;  %v6638_v0 = vpop.f32.mrf.mxu2  ;;  %v6598_v17 = vadd.f32 %v15508_v62, %v6585_v52 }
 0x17d   :  { %6879 = vmatpush.bf16.msrb.mxu1 %v9824_v5  ;;  %v9789_v53 = vld [vmem:[%s19901_s1 + $0xd10] sm:$0xf0]  ;;  %v12697_v19 = vld [vmem:[%s19901_s1 + $0xf04] sm:$0xf]  ;;  %v9664_v1 = vor.u32 %v12601_v43, %v9661_v58 }
 0x17e   :  { %6892 = vmatpush.bf16.msrb.mxu2 %v9952_v7  ;;  %v9917_v57 = vld [vmem:[%s19901_s1 + $0xe10] sm:$0xf0]  ;;  %v12757_v3 = vld [vmem:[%s19901_s1 + $0x10e4] sm:$0xf]  ;;  %v9792_v24 = vor.u32 %v12633_v51, %v9789_v53  ;;  %v6611_v58 = vadd.f32 %v15658_v54, %v6598_v17 }
 0x17f   :  { %6905 = vmatpush.bf16.msrb.mxu3 %v10080_v14  ;;  %v10045_v63 = vld [vmem:[%s19901_s1 + $0xf10] sm:$0xf0]  ;;  %v12789_v7 = vld [vmem:[%s19901_s1 + $0x11e4] sm:$0xf]  ;;  %v9920_v26 = vor.u32 %v12665_v56, %v9917_v57 }
 0x180   :  { %v10285_v5 = vld [vmem:[%s19901_s1 + $0x10f0] sm:$0xf0]  ;;  %6867 = vmatpush.bf16.msrb.mxu0 %v9680_v40  ;;  %v12821_v14 = vld [vmem:[%s19901_s1 + $0x12e4] sm:$0xf]  ;;  %v10048_v40 = vor.u32 %v12697_v19, %v10045_v63  ;;  %v6624_v19 = vadd.f32 %v15666_v61, %v6611_v58 }
 0x181   :  { %v10413_v11 = vld [vmem:[%s19901_s1 + $0x11f0] sm:$0xf0]  ;;  %6880 = vmatpush.bf16.msrb.mxu1 %v9808_v47  ;;  %v12853_v34 = vld [vmem:[%s19901_s1 + $0x13e4] sm:$0xf]  ;;  %v10288_v43 = vor.u32 %v12757_v3, %v10285_v5 }
 0x182   :  { %v10541_v15 = vld [vmem:[%s19901_s1 + $0x12f0] sm:$0xf0]  ;;  %6893 = vmatpush.bf16.msrb.mxu2 %v9936_v50  ;;  %v10416_v0 = vor.u32 %v12789_v7, %v10413_v11  ;;  %v12753_v62 = vld [vmem:[%s19901_s1 + $0x10c4] sm:$0xf]  ;;  %v6637_v17 = vadd.f32 %v15701_v48, %v6624_v19 }
 0x183   :  { %v10669_v36 = vld [vmem:[%s19901_s1 + $0x13f0] sm:$0xf0]  ;;  %6906 = vmatpush.bf16.msrb.mxu3 %v10064_v60  ;;  %v10544_v55 = vor.u32 %v12821_v14, %v10541_v15  ;;  %v12785_v47 = vld [vmem:[%s19901_s1 + $0x11c4] sm:$0xf] }
 0x184   :  { %v10269_v52 = vld [vmem:[%s19901_s1 + $0x10d0] sm:$0xf0]  ;;  %6868 = vmatpush.bf16.msrb.mxu0 %v9664_v1  ;;  %v10672_v50 = vor.u32 %v12853_v34, %v10669_v36  ;;  %v12817_v51 = vld [vmem:[%s19901_s1 + $0x12c4] sm:$0xf] }
 0x185   :  { %v10397_v54 = vld [vmem:[%s19901_s1 + $0x11d0] sm:$0xf0]  ;;  %6881 = vmatpush.bf16.msrb.mxu1 %v9792_v24  ;;  %v12849_v56 = vld [vmem:[%s19901_s1 + $0x13c4] sm:$0xf]  ;;  %v10272_v57 = vor.u32 %v12753_v62, %v10269_v52 }
 0x186   :  { %v10525_v53 = vld [vmem:[%s19901_s1 + $0x12d0] sm:$0xf0]  ;;  %6894 = vmatpush.bf16.msrb.mxu2 %v9920_v26  ;;  %v10400_v63 = vor.u32 %v12785_v47, %v10397_v54  ;;  %v12749_v5 = vld [vmem:[%s19901_s1 + $0x10a4] sm:$0xf]  ;;  %v6650_v47 = vadd.f32 %v15714_v59, %v6637_v17 }
 0x187   :  { %v10653_v60 = vld [vmem:[%s19901_s1 + $0x13d0] sm:$0xf0]  ;;  %6907 = vmatpush.bf16.msrb.mxu3 %v10048_v40  ;;  %v10528_v3 = vor.u32 %v12817_v51, %v10525_v53  ;;  %v12781_v1 = vld [vmem:[%s19901_s1 + $0x11a4] sm:$0xf]  ;;  %6869 = vmatmul.bf16.vlgmr.msrb.gmra.mxu0 %v14139_v23 }
 0x188   :  { %6913 = vmatpush.bf16.msra.mxu0 %v10288_v43  ;;  %v10253_v7 = vld [vmem:[%s19901_s1 + $0x10b0] sm:$0xf0]  ;;  %v10656_v61 = vor.u32 %v12849_v56, %v10653_v60  ;;  %v12813_v14 = vld [vmem:[%s19901_s1 + $0x12a4] sm:$0xf]  ;;  %6882 = vmatmul.bf16.vlgmr.msrb.gmra.mxu1 %v14152_v31  ;;  %v6675_v56 = vpop.f32.mrf.mxu1 }
 0x189   :  { %6926 = vmatpush.bf16.msra.mxu1 %v10416_v0  ;;  %v10381_v11 = vld [vmem:[%s19901_s1 + $0x11b0] sm:$0xf0]  ;;  %6895 = vmatmul.bf16.vlgmr.msrb.gmra.mxu2 %v14150_v28  ;;  %v12845_v24 = vld [vmem:[%s19901_s1 + $0x13a4] sm:$0xf]  ;;  %v10256_v34 = vor.u32 %v12749_v5, %v10253_v7 }
 0x18a   :  { %6939 = vmatpush.bf16.msra.mxu2 %v10544_v55  ;;  %v10509_v15 = vld [vmem:[%s19901_s1 + $0x12b0] sm:$0xf0]  ;;  %6908 = vmatmul.bf16.vlgmr.msrb.gmra.mxu3 %v14160_v35  ;;  %v10384_v36 = vor.u32 %v12781_v1, %v10381_v11  ;;  %v12745_v40 = vld [vmem:[%s19901_s1 + $0x1084] sm:$0xf] }
 0x18b   :  { %6952 = vmatpush.bf16.msra.mxu3 %v10672_v50  ;;  %v10637_v26 = vld [vmem:[%s19901_s1 + $0x13b0] sm:$0xf0]  ;;  %v10512_v48 = vor.u32 %v12813_v14, %v10509_v15  ;;  %v12777_v58 = vld [vmem:[%s19901_s1 + $0x1184] sm:$0xf]  ;;  %v6662_v50 = vpop.f32.mrf.mxu0 }
 0x18c   :  { %6914 = vmatpush.bf16.msra.mxu0 %v10272_v57  ;;  %v10237_v43 = vld [vmem:[%s19901_s1 + $0x1090] sm:$0xf0]  ;;  %v10640_v0 = vor.u32 %v12845_v24, %v10637_v26  ;;  %v12809_v62 = vld [vmem:[%s19901_s1 + $0x1284] sm:$0xf]  ;;  %v6663_v60 = vadd.f32 %v6662_v50, %v6650_v47 }
 0x18d   :  { %6927 = vmatpush.bf16.msra.mxu1 %v10400_v63  ;;  %v10365_v55 = vld [vmem:[%s19901_s1 + $0x1190] sm:$0xf0]  ;;  %v12841_v54 = vld [vmem:[%s19901_s1 + $0x1384] sm:$0xf]  ;;  %v10240_v53 = vor.u32 %v12745_v40, %v10237_v43 }
 0x18e   :  { %6940 = vmatpush.bf16.msra.mxu2 %v10528_v3  ;;  %v10493_v52 = vld [vmem:[%s19901_s1 + $0x1290] sm:$0xf0]  ;;  %v10368_v57 = vor.u32 %v12777_v58, %v10365_v55  ;;  %v12741_v59 = vld [vmem:[%s19901_s1 + $0x1064] sm:$0xf]  ;;  %v6676_v17 = vadd.f32 %v6675_v56, %v6663_v60  ;;  %v6688_v43 = vpop.f32.mrf.mxu2 }
 0x18f   :  { %6953 = vmatpush.bf16.msra.mxu3 %v10656_v61  ;;  %v10621_v51 = vld [vmem:[%s19901_s1 + $0x1390] sm:$0xf0]  ;;  %v10496_v19 = vor.u32 %v12809_v62, %v10493_v52  ;;  %v12773_v3 = vld [vmem:[%s19901_s1 + $0x1164] sm:$0xf]  ;;  %v6701_v52 = vpop.f32.mrf.mxu3 }
 0x190   :  { %6915 = vmatpush.bf16.msra.mxu0 %v10256_v34  ;;  %v10221_v63 = vld [vmem:[%s19901_s1 + $0x1070] sm:$0xf0]  ;;  %v10624_v5 = vor.u32 %v12841_v54, %v10621_v51  ;;  %v12805_v1 = vld [vmem:[%s19901_s1 + $0x1264] sm:$0xf]  ;;  %v6689_v62 = vadd.f32 %v6688_v43, %v6676_v17  ;;  %v6677_v56 = vpop.f32.mrf.mxu1 }
 0x191   :  { %6928 = vmatpush.bf16.msra.mxu1 %v10384_v36  ;;  %v10349_v7 = vld [vmem:[%s19901_s1 + $0x1170] sm:$0xf0]  ;;  %v12837_v11 = vld [vmem:[%s19901_s1 + $0x1364] sm:$0xf]  ;;  %v10224_v15 = vor.u32 %v12741_v59, %v10221_v63 }
 0x192   :  { %6941 = vmatpush.bf16.msra.mxu2 %v10512_v48  ;;  %v10477_v61 = vld [vmem:[%s19901_s1 + $0x1270] sm:$0xf0]  ;;  %v10352_v24 = vor.u32 %v12773_v3, %v10349_v7  ;;  %v12737_v34 = vld [vmem:[%s19901_s1 + $0x1044] sm:$0xf]  ;;  %v15928_v60 = vadd.f32 %v6701_v52, %v6689_v62 }
 0x193   :  { %6954 = vmatpush.bf16.msra.mxu3 %v10640_v0  ;;  %v10605_v14 = vld [vmem:[%s19901_s1 + $0x1370] sm:$0xf0]  ;;  %v10480_v26 = vor.u32 %v12805_v1, %v10477_v61  ;;  %v12769_v48 = vld [vmem:[%s19901_s1 + $0x1144] sm:$0xf]  ;;  %v6664_v54 = vpop.f32.mrf.mxu0 }
 0x194   :  { %6916 = vmatpush.bf16.msra.mxu0 %v10240_v53  ;;  %v10205_v36 = vld [vmem:[%s19901_s1 + $0x1050] sm:$0xf0]  ;;  %v10608_v40 = vor.u32 %v12837_v11, %v10605_v14  ;;  %v12801_v0 = vld [vmem:[%s19901_s1 + $0x1244] sm:$0xf]  ;;  %v7953_v11 = vrot.slane %v15928_v60, 4  ;;  %v7981_v14 = vmul.f32 %v15928_v60, %v15928_v60 }
 0x195   :  { %6929 = vmatpush.bf16.msra.mxu1 %v10368_v57  ;;  %v10333_v58 = vld [vmem:[%s19901_s1 + $0x1150] sm:$0xf0]  ;;  %v12833_v47 = vld [vmem:[%s19901_s1 + $0x1344] sm:$0xf]  ;;  %v10208_v51 = vor.u32 %v12737_v34, %v10205_v36 }
 0x196   :  { %6942 = vmatpush.bf16.msra.mxu2 %v10496_v19  ;;  %v10461_v55 = vld [vmem:[%s19901_s1 + $0x1250] sm:$0xf0]  ;;  %v12733_v53 = vld [vmem:[%s19901_s1 + $0x1024] sm:$0xf]  ;;  %v10336_v57 = vor.u32 %v12769_v48, %v10333_v58  ;;  %v7954_v48 = vadd.f32 %v7953_v11, %v15928_v60  ;;  %v6690_v54 = vpop.f32.mrf.mxu2 }
 0x197   :  { %6955 = vmatpush.bf16.msra.mxu3 %v10624_v5  ;;  %v10589_v50 = vld [vmem:[%s19901_s1 + $0x1350] sm:$0xf0]  ;;  %v10464_v19 = vor.u32 %v12801_v0, %v10461_v55  ;;  %v12765_v63 = vld [vmem:[%s19901_s1 + $0x1124] sm:$0xf] }
 0x198   :  { %6917 = vmatpush.bf16.msra.mxu0 %v10224_v15  ;;  %v10189_v59 = vld [vmem:[%s19901_s1 + $0x1030] sm:$0xf0]  ;;  %v10592_v5 = vor.u32 %v12833_v47, %v10589_v50  ;;  %v12797_v7 = vld [vmem:[%s19901_s1 + $0x1224] sm:$0xf] }
 0x199   :  { %6930 = vmatpush.bf16.msra.mxu1 %v10352_v24  ;;  %v10317_v3 = vld [vmem:[%s19901_s1 + $0x1130] sm:$0xf0]  ;;  %v12829_v61 = vld [vmem:[%s19901_s1 + $0x1324] sm:$0xf]  ;;  %v10192_v24 = vor.u32 %v12733_v53, %v10189_v59 }
 0x19a   :  { %6943 = vmatpush.bf16.msra.mxu2 %v10480_v26  ;;  %v10445_v1 = vld [vmem:[%s19901_s1 + $0x1230] sm:$0xf0]  ;;  %v12729_v17 = vld [vmem:[%s19901_s1 + $0x1004] sm:$0xf]  ;;  %v10320_v43 = vor.u32 %v12765_v63, %v10317_v3 }
 0x19b   :  { %6956 = vmatpush.bf16.msra.mxu3 %v10608_v40  ;;  %v10573_v15 = vld [vmem:[%s19901_s1 + $0x1330] sm:$0xf0]  ;;  %v12761_v34 = vld [vmem:[%s19901_s1 + $0x1104] sm:$0xf]  ;;  %v7985_v40 = vrot.slane %v7981_v14, 4  ;;  %v10448_v58 = vor.u32 %v12797_v7, %v10445_v1 }
 0x19c   :  { %6918 = vmatpush.bf16.msra.mxu0 %v10208_v51  ;;  %v10173_v26 = vld [vmem:[%s19901_s1 + $0x1010] sm:$0xf0]  ;;  %v12793_v0 = vld [vmem:[%s19901_s1 + $0x1204] sm:$0xf]  ;;  %v10576_v62 = vor.u32 %v12829_v61, %v10573_v15  ;;  %v7955_v51 = vrot.slane %v7954_v48, 2 }
 0x19d   :  { %v10301_v36 = vld [vmem:[%s19901_s1 + $0x1110] sm:$0xf0]  ;;  %6931 = vmatpush.bf16.msra.mxu1 %v10336_v57  ;;  %v12825_v52 = vld [vmem:[%s19901_s1 + $0x1304] sm:$0xf]  ;;  %v7986_v53 = vadd.f32 %v7985_v40, %v7981_v14  ;;  %v10176_v59 = vor.u32 %v12729_v17, %v10173_v26 }
 0x19e   :  { %6944 = vmatpush.bf16.msra.mxu2 %v10464_v19  ;;  %v10429_v55 = vld [vmem:[%s19901_s1 + $0x1210] sm:$0xf0]  ;;  %v12885_v50 = vld [vmem:[%s19901_s1 + $0x14e4] sm:$0xf]  ;;  %v6703_v19 = vpop.f32.mrf.mxu3  ;;  %v7956_v7 = vadd.f32 %v7955_v51, %v7954_v48  ;;  %v10304_v61 = vor.u32 %v12761_v34, %v10301_v36 }
 0x19f   :  { %6957 = vmatpush.bf16.msra.mxu3 %v10592_v5  ;;  %v10557_v47 = vld [vmem:[%s19901_s1 + $0x1310] sm:$0xf0]  ;;  %v12917_v57 = vld [vmem:[%s19901_s1 + $0x15e4] sm:$0xf]  ;;  %v7987_v1 = vrot.slane %v7986_v53, 2  ;;  %v10432_v11 = vor.u32 %v12793_v0, %v10429_v55 }
 0x1a0   :  { %v10797_v56 = vld [vmem:[%s19901_s1 + $0x14f0] sm:$0xf0]  ;;  %6919 = vmatpush.bf16.msra.mxu0 %v10192_v24  ;;  %v12949_v3 = vld [vmem:[%s19901_s1 + $0x16e4] sm:$0xf]  ;;  %v10560_v17 = vor.u32 %v12825_v52, %v10557_v47  ;;  %v7957_v48 = vrot.slane %v7956_v7, 1 }
 0x1a1   :  { %v10925_v63 = vld [vmem:[%s19901_s1 + $0x15f0] sm:$0xf0]  ;;  %6932 = vmatpush.bf16.msra.mxu1 %v10320_v43  ;;  %v12981_v14 = vld [vmem:[%s19901_s1 + $0x17e4] sm:$0xf]  ;;  %v10800_v24 = vor.u32 %v12885_v50, %v10797_v56  ;;  %v7988_v40 = vadd.f32 %v7987_v1, %v7986_v53 }
 0x1a2   :  { %v11053_v5 = vld [vmem:[%s19901_s1 + $0x16f0] sm:$0xf0]  ;;  %6945 = vmatpush.bf16.msra.mxu2 %v10448_v58  ;;  %v12881_v26 = vld [vmem:[%s19901_s1 + $0x14c4] sm:$0xf]  ;;  %v10928_v43 = vor.u32 %v12917_v57, %v10925_v63  ;;  %v7958_v47 = vadd.f32 %v7957_v48, %v7956_v7 }
 0x1a3   :  { %v11181_v15 = vld [vmem:[%s19901_s1 + $0x17f0] sm:$0xf0]  ;;  %6958 = vmatpush.bf16.msra.mxu3 %v10576_v62  ;;  %v11056_v34 = vor.u32 %v12949_v3, %v11053_v5  ;;  %v12913_v58 = vld [vmem:[%s19901_s1 + $0x15c4] sm:$0xf]  ;;  %v7989_v50 = vrot.slane %v7988_v40, 1 }
 0x1a4   :  { %v10781_v36 = vld [vmem:[%s19901_s1 + $0x14d0] sm:$0xf0]  ;;  %6920 = vmatpush.bf16.msra.mxu0 %v10176_v59  ;;  %v11184_v0 = vor.u32 %v12981_v14, %v11181_v15  ;;  %v12945_v62 = vld [vmem:[%s19901_s1 + $0x16c4] sm:$0xf]  ;;  %v16030_v57 = vmul.f32 0.125, %v7958_v47 }
 0x1a5   :  { %v10909_v55 = vld [vmem:[%s19901_s1 + $0x15d0] sm:$0xf0]  ;;  %6933 = vmatpush.bf16.msra.mxu1 %v10304_v61  ;;  %v12977_v54 = vld [vmem:[%s19901_s1 + $0x17c4] sm:$0xf]  ;;  %v10784_v53 = vor.u32 %v12881_v26, %v10781_v36  ;;  %v7990_v19 = vadd.f32 %v7989_v50, %v7988_v40 }
 0x1a6   :  { %v11037_v52 = vld [vmem:[%s19901_s1 + $0x16d0] sm:$0xf0]  ;;  %6946 = vmatpush.bf16.msra.mxu2 %v10432_v11  ;;  %v12877_v56 = vld [vmem:[%s19901_s1 + $0x14a4] sm:$0xf]  ;;  %v10912_v59 = vor.u32 %v12913_v58, %v10909_v55  ;;  %v8013_v15 = vmul.f32 %v16030_v57, %v16030_v57 }
 0x1a7   :  { %v11165_v51 = vld [vmem:[%s19901_s1 + $0x17d0] sm:$0xf0]  ;;  %6959 = vmatpush.bf16.msra.mxu3 %v10560_v17  ;;  %v11040_v63 = vor.u32 %v12945_v62, %v11037_v52  ;;  %v12909_v5 = vld [vmem:[%s19901_s1 + $0x15a4] sm:$0xf]  ;;  %6921 = vmatmul.bf16.vlgmr.msra.gmra.mxu0 %v14349_v37  ;;  %v8009_v14 = vmul.f32 0.125, %v7990_v19 }
 0x1a8   :  { %6965 = vmatpush.bf16.msrb.mxu0 %v10800_v24  ;;  %v10765_v3 = vld [vmem:[%s19901_s1 + $0x14b0] sm:$0xf0]  ;;  %v11168_v7 = vor.u32 %v12977_v54, %v11165_v51  ;;  %v12941_v61 = vld [vmem:[%s19901_s1 + $0x16a4] sm:$0xf]  ;;  %6934 = vmatmul.bf16.vlgmr.msra.gmra.mxu1 %v14362_v46 }
 0x1a9   :  { %6978 = vmatpush.bf16.msrb.mxu1 %v10928_v43  ;;  %v10893_v1 = vld [vmem:[%s19901_s1 + $0x15b0] sm:$0xf0]  ;;  %6947 = vmatmul.bf16.vlgmr.msra.gmra.mxu2 %v14360_v45  ;;  %v12973_v17 = vld [vmem:[%s19901_s1 + $0x17a4] sm:$0xf]  ;;  %v10768_v26 = vor.u32 %v12877_v56, %v10765_v3  ;;  %v8017_v48 = vsub.f32 %v8009_v14, %v8013_v15  ;;  %v6714_v56 = vpop.f32.mrf.mxu0 }
 0x1aa   :  { %6991 = vmatpush.bf16.msrb.mxu2 %v11056_v34  ;;  %v11021_v11 = vld [vmem:[%s19901_s1 + $0x16b0] sm:$0xf0]  ;;  %6960 = vmatmul.bf16.vlgmr.msra.gmra.mxu3 %v14370_v49  ;;  %v10896_v40 = vor.u32 %v12909_v5, %v10893_v1  ;;  %v12873_v34 = vld [vmem:[%s19901_s1 + $0x1484] sm:$0xf] }
 0x1ab   :  { %7004 = vmatpush.bf16.msrb.mxu3 %v11184_v0  ;;  %v11149_v24 = vld [vmem:[%s19901_s1 + $0x17b0] sm:$0xf0]  ;;  %v11024_v43 = vor.u32 %v12941_v61, %v11021_v11  ;;  %v12905_v58 = vld [vmem:[%s19901_s1 + $0x1584] sm:$0xf]  ;;  %v8021_v47 = vmax.f32 %v8017_v48, 0.0 }
 0x1ac   :  { %6966 = vmatpush.bf16.msrb.mxu0 %v10784_v53  ;;  %v10749_v36 = vld [vmem:[%s19901_s1 + $0x1490] sm:$0xf0]  ;;  %v11152_v0 = vor.u32 %v12973_v17, %v11149_v24  ;;  %v12937_v62 = vld [vmem:[%s19901_s1 + $0x1684] sm:$0xf] }
 0x1ad   :  { %6979 = vmatpush.bf16.msrb.mxu1 %v10912_v59  ;;  %v10877_v55 = vld [vmem:[%s19901_s1 + $0x1590] sm:$0xf0]  ;;  %v12969_v50 = vld [vmem:[%s19901_s1 + $0x1784] sm:$0xf]  ;;  %v10752_v51 = vor.u32 %v12873_v34, %v10749_v36  ;;  %v16086_v19 = vadd.f32 1e-05, %v8021_v47 }
 0x1ae   :  { %6992 = vmatpush.bf16.msrb.mxu2 %v11040_v63  ;;  %v11005_v52 = vld [vmem:[%s19901_s1 + $0x1690] sm:$0xf0]  ;;  %v12869_v53 = vld [vmem:[%s19901_s1 + $0x1464] sm:$0xf]  ;;  %v10880_v59 = vor.u32 %v12905_v58, %v10877_v55  ;;  %v6740_v58 = vpop.f32.mrf.mxu2 }
 0x1af   :  { %7005 = vmatpush.bf16.msrb.mxu3 %v11168_v7  ;;  %v11133_v54 = vld [vmem:[%s19901_s1 + $0x1790] sm:$0xf0]  ;;  %v11008_v63 = vor.u32 %v12937_v62, %v11005_v52  ;;  %v12901_v5 = vld [vmem:[%s19901_s1 + $0x1564] sm:$0xf]  ;;  %v6727_v7 = vpop.f32.mrf.mxu1  ;;  %13241 = vrsqrt.f32 %v16086_v19  ;;  %vm8039_vm1 = vweird.f32 %v16086_v19 }
 0x1b0   :  { %6967 = vmatpush.bf16.msrb.mxu0 %v10768_v26  ;;  %v10733_v3 = vld [vmem:[%s19901_s1 + $0x1470] sm:$0xf0]  ;;  %v11136_v1 = vor.u32 %v12969_v50, %v11133_v54  ;;  %v12933_v11 = vld [vmem:[%s19901_s1 + $0x1664] sm:$0xf]  ;;  %v6728_v15 = vadd.f32 %v6727_v7, %v6714_v56  ;;  %v6753_v50 = vpop.f32.mrf.mxu3 }
 0x1b1   :  { %6980 = vmatpush.bf16.msrb.mxu1 %v10896_v40  ;;  %v10861_v61 = vld [vmem:[%s19901_s1 + $0x1570] sm:$0xf0]  ;;  %v12965_v17 = vld [vmem:[%s19901_s1 + $0x1764] sm:$0xf]  ;;  %v10736_v26 = vor.u32 %v12869_v53, %v10733_v3 }
 0x1b2   :  { %6993 = vmatpush.bf16.msrb.mxu2 %v11024_v43  ;;  %v10989_v14 = vld [vmem:[%s19901_s1 + $0x1670] sm:$0xf0]  ;;  %v10864_v48 = vor.u32 %v12901_v5, %v10861_v61  ;;  %v12865_v43 = vld [vmem:[%s19901_s1 + $0x1444] sm:$0xf]  ;;  %v6741_v47 = vadd.f32 %v6740_v58, %v6728_v15 }
 0x1b3   :  { %7006 = vmatpush.bf16.msrb.mxu3 %v11152_v0  ;;  %v11117_v24 = vld [vmem:[%s19901_s1 + $0x1770] sm:$0xf0]  ;;  %v10992_v40 = vor.u32 %v12933_v11, %v10989_v14  ;;  %v12897_v36 = vld [vmem:[%s19901_s1 + $0x1544] sm:$0xf] }
 0x1b4   :  { %6968 = vmatpush.bf16.msrb.mxu0 %v10752_v51  ;;  %v10717_v34 = vld [vmem:[%s19901_s1 + $0x1450] sm:$0xf0]  ;;  %v11120_v0 = vor.u32 %v12965_v17, %v11117_v24  ;;  %v12929_v62 = vld [vmem:[%s19901_s1 + $0x1644] sm:$0xf]  ;;  %v16134_v56 = vadd.f32 %v6753_v50, %v6741_v47 }
 0x1b5   :  { %6981 = vmatpush.bf16.msrb.mxu1 %v10880_v59  ;;  %v10845_v55 = vld [vmem:[%s19901_s1 + $0x1550] sm:$0xf0]  ;;  %v12961_v54 = vld [vmem:[%s19901_s1 + $0x1744] sm:$0xf]  ;;  %v10720_v53 = vor.u32 %v12865_v43, %v10717_v34  ;;  %v6716_v59 = vpop.f32.mrf.mxu0 }
 0x1b6   :  { %6994 = vmatpush.bf16.msrb.mxu2 %v11008_v63  ;;  %v10973_v52 = vld [vmem:[%s19901_s1 + $0x1650] sm:$0xf0]  ;;  %v16136_v63 = vpop.eup %13241  ;;  %v10848_v3 = vor.u32 %v12897_v36, %v10845_v55  ;;  %v12861_v7 = vld [vmem:[%s19901_s1 + $0x1424] sm:$0xf]  ;;  %v8077_v59 = vld [vmem:[%s19903_s2] sm:$0xf] }
 0x1b7   :  { %7007 = vmatpush.bf16.msrb.mxu3 %v11136_v1  ;;  %v11101_v51 = vld [vmem:[%s19901_s1 + $0x1750] sm:$0xf0]  ;;  %v10976_v5 = vor.u32 %v12929_v62, %v10973_v52  ;;  %v12893_v61 = vld [vmem:[%s19901_s1 + $0x1524] sm:$0xf]  ;;  %v6729_v11 = vpop.f32.mrf.mxu1  ;;  %v8034_v14 = vmul.f32 %v16136_v63, %v16086_v19  ;;  %vm8040_vm0 = vweird.f32 %v16136_v63 }
 0x1b8   :  { %6969 = vmatpush.bf16.msrb.mxu0 %v10736_v26  ;;  %v10701_v1 = vld [vmem:[%s19901_s1 + $0x1430] sm:$0xf0]  ;;  %v11104_v15 = vor.u32 %v12961_v54, %v11101_v51  ;;  %v12925_v24 = vld [vmem:[%s19901_s1 + $0x1624] sm:$0xf]  ;;  %v6742_v51 = vpop.f32.mrf.mxu2  ;;  %vm8041_vm2 = vmor %vm8039_vm1, %vm8040_vm0 }
 0x1b9   :  { %6982 = vmatpush.bf16.msrb.mxu1 %v10864_v48  ;;  %v10829_v17 = vld [vmem:[%s19901_s1 + $0x1530] sm:$0xf0]  ;;  %v12957_v48 = vld [vmem:[%s19901_s1 + $0x1724] sm:$0xf]  ;;  %v8035_v34 = vmul.f32 %v16136_v63, %v8034_v14  ;;  %v10704_v36 = vor.u32 %v12861_v7, %v10701_v1  ;;  %v6755_v1 = vpop.f32.mrf.mxu3 }
 0x1ba   :  { %6995 = vmatpush.bf16.msrb.mxu2 %v10992_v40  ;;  %v10957_v26 = vld [vmem:[%s19901_s1 + $0x1630] sm:$0xf0]  ;;  %v12857_v43 = vld [vmem:[%s19901_s1 + $0x1404] sm:$0xf]  ;;  %v10832_v62 = vor.u32 %v12893_v61, %v10829_v17 }
 0x1bb   :  { %7008 = vmatpush.bf16.msrb.mxu3 %v11120_v0  ;;  %v11085_v40 = vld [vmem:[%s19901_s1 + $0x1730] sm:$0xf0]  ;;  %v12889_v0 = vld [vmem:[%s19901_s1 + $0x1504] sm:$0xf]  ;;  %v10960_v52 = vor.u32 %v12925_v24, %v10957_v26 }
 0x1bc   :  { %6970 = vmatpush.bf16.msrb.mxu0 %v10720_v53  ;;  %v10685_v58 = vld [vmem:[%s19901_s1 + $0x1410] sm:$0xf0]  ;;  %v12921_v47 = vld [vmem:[%s19901_s1 + $0x1604] sm:$0xf]  ;;  %v8036_v53 = vmul.f32 0.5, %v8035_v34 }
 0x1bd   :  { %v10813_v55 = vld [vmem:[%s19901_s1 + $0x1510] sm:$0xf0]  ;;  %6983 = vmatpush.bf16.msrb.mxu1 %v10848_v3  ;;  %v12953_v54 = vld [vmem:[%s19901_s1 + $0x1704] sm:$0xf]  ;;  %v11088_v3 = vor.u32 %v12957_v48, %v11085_v40  ;;  %v10688_v17 = vor.u32 %v12857_v43, %v10685_v58  ;;  %v8091_v58 = vld [vmem:[%s19904_s3] sm:$0xf] }
 0x1be   :  { %6996 = vmatpush.bf16.msrb.mxu2 %v10976_v5  ;;  %v10941_v50 = vld [vmem:[%s19901_s1 + $0x1610] sm:$0xf0]  ;;  %v13013_v7 = vld [vmem:[%s19901_s1 + $0x18e4] sm:$0xf]  ;;  %v10816_v48 = vor.u32 %v12889_v0, %v10813_v55 }
 0x1bf   :  { %7009 = vmatpush.bf16.msrb.mxu3 %v11104_v15  ;;  %v11069_v5 = vld [vmem:[%s19901_s1 + $0x1710] sm:$0xf0]  ;;  %v13045_v11 = vld [vmem:[%s19901_s1 + $0x19e4] sm:$0xf]  ;;  %v8037_v15 = vsub.f32 1.5, %v8036_v53  ;;  %v10944_v40 = vor.u32 %v12921_v47, %v10941_v50  ;;  %v8079_v47 = vperm.slane %v8077_v59, 0 }
 0x1c0   :  { %v11309_v61 = vld [vmem:[%s19901_s1 + $0x18f0] sm:$0xf0]  ;;  %6971 = vmatpush.bf16.msrb.mxu0 %v10704_v36  ;;  %v13077_v24 = vld [vmem:[%s19901_s1 + $0x1ae4] sm:$0xf] }
 0x1c1   :  { %v11437_v14 = vld [vmem:[%s19901_s1 + $0x19f0] sm:$0xf0]  ;;  %6984 = vmatpush.bf16.msrb.mxu1 %v10832_v62  ;;  %v13109_v34 = vld [vmem:[%s19901_s1 + $0x1be4] sm:$0xf]  ;;  %v8038_v36 = vmul.f32 %v16136_v63, %v8037_v15  ;;  %v11072_v62 = vor.u32 %v12953_v54, %v11069_v5  ;;  %v11312_v0 = vor.u32 %v13013_v7, %v11309_v61  ;;  %v8093_v7 = vperm.slane %v8091_v58, 0 }
 0x1c2   :  { %v11565_v26 = vld [vmem:[%s19901_s1 + $0x1af0] sm:$0xf0]  ;;  %6997 = vmatpush.bf16.msrb.mxu2 %v10960_v52  ;;  %v13009_v55 = vld [vmem:[%s19901_s1 + $0x18c4] sm:$0xf]  ;;  %v8025_v52 = vsub.f32 %v15928_v60, %v16030_v57  ;;  %v11440_v50 = vor.u32 %v13045_v11, %v11437_v14 }
 0x1c3   :  { %v11693_v43 = vld [vmem:[%s19901_s1 + $0x1bf0] sm:$0xf0]  ;;  %7010 = vmatpush.bf16.msrb.mxu3 %v11088_v3  ;;  %v11568_v19 = vor.u32 %v13077_v24, %v11565_v26  ;;  %v13041_v54 = vld [vmem:[%s19901_s1 + $0x19c4] sm:$0xf]  ;;  %v8042_v53 = vsel %vm8041_vm2, %v16136_v63, %v8038_v36 }
 0x1c4   :  { %v11293_v51 = vld [vmem:[%s19901_s1 + $0x18d0] sm:$0xf0]  ;;  %6972 = vmatpush.bf16.msrb.mxu0 %v10688_v17  ;;  %v11696_v3 = vor.u32 %v13109_v34, %v11693_v43  ;;  %v13073_v57 = vld [vmem:[%s19901_s1 + $0x1ac4] sm:$0xf]  ;;  %v8073_v5 = vmul.f32 %v8042_v53, %v8025_v52 }
 0x1c5   :  { %v11421_v60 = vld [vmem:[%s19901_s1 + $0x19d0] sm:$0xf0]  ;;  %6985 = vmatpush.bf16.msrb.mxu1 %v10816_v48  ;;  %v13105_v63 = vld [vmem:[%s19901_s1 + $0x1bc4] sm:$0xf]  ;;  %v11296_v61 = vor.u32 %v13009_v55, %v11293_v51 }
 0x1c6   :  { %v11549_v59 = vld [vmem:[%s19901_s1 + $0x1ad0] sm:$0xf0]  ;;  %6998 = vmatpush.bf16.msrb.mxu2 %v10944_v40  ;;  %v8087_v11 = vmul.f32 %v8079_v47, %v8073_v5  ;;  %v11424_v14 = vor.u32 %v13041_v54, %v11421_v60  ;;  %v13005_v17 = vld [vmem:[%s19901_s1 + $0x18a4] sm:$0xf] }
 0x1c7   :  { %v11677_v1 = vld [vmem:[%s19901_s1 + $0x1bd0] sm:$0xf0]  ;;  %7011 = vmatpush.bf16.msrb.mxu3 %v11072_v62  ;;  %v11552_v15 = vor.u32 %v13073_v57, %v11549_v59  ;;  %v13037_v26 = vld [vmem:[%s19901_s1 + $0x19a4] sm:$0xf]  ;;  %6973 = vmatmul.bf16.vlgmr.msrb.gmra.mxu0 %v14561_v8 }
 0x1c8   :  { %7017 = vmatpush.bf16.msra.mxu0 %v11312_v0  ;;  %v11277_v24 = vld [vmem:[%s19901_s1 + $0x18b0] sm:$0xf0]  ;;  %v11680_v48 = vor.u32 %v13105_v63, %v11677_v1  ;;  %v13069_v34 = vld [vmem:[%s19901_s1 + $0x1aa4] sm:$0xf]  ;;  %v8101_v36 = vadd.f32 %v8093_v7, %v8087_v11  ;;  %6986 = vmatmul.bf16.vlgmr.msrb.gmra.mxu1 %v14574_v13  ;;  %v6766_v63 = vpop.f32.mrf.mxu0 }
 0x1c9   :  { %7030 = vmatpush.bf16.msra.mxu1 %v11440_v50  ;;  %v11405_v40 = vld [vmem:[%s19901_s1 + $0x19b0] sm:$0xf0]  ;;  %6999 = vmatmul.bf16.vlgmr.msrb.gmra.mxu2 %v14572_v12  ;;  %v13101_v58 = vld [vmem:[%s19901_s1 + $0x1ba4] sm:$0xf]  ;;  %v11280_v0 = vor.u32 %v13005_v17, %v11277_v24  ;;  %v6767_v17 = vadd.f32 %v6766_v63, %v16134_v56  ;;  %v6779_v24 = vpop.f32.mrf.mxu1 }
 0x1ca   :  { %7043 = vmatpush.bf16.msra.mxu2 %v11568_v19  ;;  %v11533_v43 = vld [vmem:[%s19901_s1 + $0x1ab0] sm:$0xf0]  ;;  %7012 = vmatmul.bf16.vlgmr.msrb.gmra.mxu3 %v14582_v16  ;;  %v13001_v55 = vld [vmem:[%s19901_s1 + $0x1884] sm:$0xf]  ;;  %v8105_v52 = vmax.f32 %v8101_v36, 0.0  ;;  %v11408_v47 = vor.u32 %v13037_v26, %v11405_v40 }
 0x1cb   :  { %7056 = vmatpush.bf16.msra.mxu3 %v11696_v3  ;;  %v11661_v62 = vld [vmem:[%s19901_s1 + $0x1bb0] sm:$0xf0]  ;;  %v11536_v50 = vor.u32 %v13069_v34, %v11533_v43  ;;  %v13033_v51 = vld [vmem:[%s19901_s1 + $0x1984] sm:$0xf]  ;;  %v6780_v36 = vadd.f32 %v6779_v24, %v6767_v17 }
 0x1cc   :  { %7018 = vmatpush.bf16.msra.mxu0 %v11296_v61  ;;  %v11261_v19 = vld [vmem:[%s19901_s1 + $0x1890] sm:$0xf0]  ;;  %v11664_v54 = vor.u32 %v13101_v58, %v11661_v62  ;;  %v13065_v3 = vld [vmem:[%s19901_s1 + $0x1a84] sm:$0xf]  ;;  %v8109_v57 = vmin.f32 %v8105_v52, 6.0 }
 0x1cd   :  { %7031 = vmatpush.bf16.msra.mxu1 %v11424_v14  ;;  %v11389_v53 = vld [vmem:[%s19901_s1 + $0x1990] sm:$0xf0]  ;;  %v13097_v59 = vld [vmem:[%s19901_s1 + $0x1b84] sm:$0xf]  ;;  %v11264_v7 = vor.u32 %v13001_v55, %v11261_v19 }
 0x1ce   :  { %7044 = vmatpush.bf16.msra.mxu2 %v11552_v15  ;;  %v11517_v60 = vld [vmem:[%s19901_s1 + $0x1a90] sm:$0xf0]  ;;  %8113 = vst [vmem:[%s19905_s4] sm:$0xff] %v8109_v57  ;;  %v11392_v1 = vor.u32 %v13033_v51, %v11389_v53  ;;  %v12997_v11 = vld [vmem:[%s19901_s1 + $0x1864] sm:$0xf] }
 0x1cf   :  { %7057 = vmatpush.bf16.msra.mxu3 %v11680_v48  ;;  %v11645_v5 = vld [vmem:[%s19901_s1 + $0x1b90] sm:$0xf0]  ;;  %v11520_v61 = vor.u32 %v13065_v3, %v11517_v60  ;;  %v13029_v15 = vld [vmem:[%s19901_s1 + $0x1964] sm:$0xf]  ;;  %v6805_v60 = vpop.f32.mrf.mxu3 }
 0x1d0   :  { %7019 = vmatpush.bf16.msra.mxu0 %v11280_v0  ;;  %v11245_v14 = vld [vmem:[%s19901_s1 + $0x1870] sm:$0xf0]  ;;  %v11648_v26 = vor.u32 %v13097_v59, %v11645_v5  ;;  %v13061_v40 = vld [vmem:[%s19901_s1 + $0x1a64] sm:$0xf]  ;;  %v6768_v63 = vpop.f32.mrf.mxu0 }
 0x1d1   :  { %7032 = vmatpush.bf16.msra.mxu1 %v11408_v47  ;;  %v11373_v48 = vld [vmem:[%s19901_s1 + $0x1970] sm:$0xf0]  ;;  %v13093_v43 = vld [vmem:[%s19901_s1 + $0x1b64] sm:$0xf]  ;;  %v11248_v58 = vor.u32 %v12997_v11, %v11245_v14  ;;  %v6781_v17 = vpop.f32.mrf.mxu1 }
 0x1d2   :  { %7045 = vmatpush.bf16.msra.mxu2 %v11536_v50  ;;  %v11501_v34 = vld [vmem:[%s19901_s1 + $0x1a70] sm:$0xf0]  ;;  %v11376_v62 = vor.u32 %v13029_v15, %v11373_v48  ;;  %v12993_v55 = vld [vmem:[%s19901_s1 + $0x1844] sm:$0xf]  ;;  %v6792_v50 = vpop.f32.mrf.mxu2 }
 0x1d3   :  { %7058 = vmatpush.bf16.msra.mxu3 %v11664_v54  ;;  %v11629_v56 = vld [vmem:[%s19901_s1 + $0x1b70] sm:$0xf0]  ;;  %v11504_v0 = vor.u32 %v13061_v40, %v11501_v34  ;;  %v13025_v47 = vld [vmem:[%s19901_s1 + $0x1944] sm:$0xf]  ;;  %v6793_v3 = vadd.f32 %v6792_v50, %v6780_v36 }
 0x1d4   :  { %7020 = vmatpush.bf16.msra.mxu0 %v11264_v7  ;;  %v11229_v52 = vld [vmem:[%s19901_s1 + $0x1850] sm:$0xf0]  ;;  %v11632_v19 = vor.u32 %v13093_v43, %v11629_v56  ;;  %v13057_v54 = vld [vmem:[%s19901_s1 + $0x1a44] sm:$0xf] }
 0x1d5   :  { %7033 = vmatpush.bf16.msra.mxu1 %v11392_v1  ;;  %v11357_v51 = vld [vmem:[%s19901_s1 + $0x1950] sm:$0xf0]  ;;  %v13089_v57 = vld [vmem:[%s19901_s1 + $0x1b44] sm:$0xf]  ;;  %v11232_v5 = vor.u32 %v12993_v55, %v11229_v52  ;;  %v16355_v7 = vadd.f32 %v6805_v60, %v6793_v3 }
 0x1d6   :  { %7046 = vmatpush.bf16.msra.mxu2 %v11520_v61  ;;  %v11485_v53 = vld [vmem:[%s19901_s1 + $0x1a50] sm:$0xf0]  ;;  %v11360_v1 = vor.u32 %v13025_v47, %v11357_v51  ;;  %v12989_v11 = vld [vmem:[%s19901_s1 + $0x1824] sm:$0xf] }
 0x1d7   :  { %7059 = vmatpush.bf16.msra.mxu3 %v11648_v26  ;;  %v11613_v59 = vld [vmem:[%s19901_s1 + $0x1b50] sm:$0xf0]  ;;  %v11488_v61 = vor.u32 %v13057_v54, %v11485_v53  ;;  %v13021_v15 = vld [vmem:[%s19901_s1 + $0x1924] sm:$0xf]  ;;  %v6807_v3 = vpop.f32.mrf.mxu3 }
 0x1d8   :  { %7021 = vmatpush.bf16.msra.mxu0 %v11248_v58  ;;  %v11213_v14 = vld [vmem:[%s19901_s1 + $0x1830] sm:$0xf0]  ;;  %v11616_v24 = vor.u32 %v13089_v57, %v11613_v59  ;;  %v13053_v48 = vld [vmem:[%s19901_s1 + $0x1a24] sm:$0xf] }
 0x1d9   :  { %7034 = vmatpush.bf16.msra.mxu1 %v11376_v62  ;;  %v11341_v26 = vld [vmem:[%s19901_s1 + $0x1930] sm:$0xf0]  ;;  %v13085_v34 = vld [vmem:[%s19901_s1 + $0x1b24] sm:$0xf]  ;;  %v11216_v56 = vor.u32 %v12989_v11, %v11213_v14 }
 0x1da   :  { %7047 = vmatpush.bf16.msra.mxu2 %v11504_v0  ;;  %v11469_v40 = vld [vmem:[%s19901_s1 + $0x1a30] sm:$0xf0]  ;;  %v12985_v36 = vld [vmem:[%s19901_s1 + $0x1804] sm:$0xf]  ;;  %v11344_v62 = vor.u32 %v13021_v15, %v11341_v26  ;;  %v6794_v50 = vpop.f32.mrf.mxu2 }
 0x1db   :  { %7060 = vmatpush.bf16.msra.mxu3 %v11632_v19  ;;  %v11597_v43 = vld [vmem:[%s19901_s1 + $0x1b30] sm:$0xf0]  ;;  %v11472_v0 = vor.u32 %v13053_v48, %v11469_v40  ;;  %v13017_v55 = vld [vmem:[%s19901_s1 + $0x1904] sm:$0xf] }
 0x1dc   :  { %7022 = vmatpush.bf16.msra.mxu0 %v11232_v5  ;;  %v11197_v58 = vld [vmem:[%s19901_s1 + $0x1810] sm:$0xf0]  ;;  %v13049_v47 = vld [vmem:[%s19901_s1 + $0x1a04] sm:$0xf]  ;;  %v11600_v19 = vor.u32 %v13085_v34, %v11597_v43 }
 0x1dd   :  { %7035 = vmatpush.bf16.msra.mxu1 %v11360_v1  ;;  %v11325_v52 = vld [vmem:[%s19901_s1 + $0x1910] sm:$0xf0]  ;;  %v13081_v54 = vld [vmem:[%s19901_s1 + $0x1b04] sm:$0xf]  ;;  %v11200_v5 = vor.u32 %v12985_v36, %v11197_v58 }
 0x1de   :  { %7048 = vmatpush.bf16.msra.mxu2 %v11488_v61  ;;  %v11453_v51 = vld [vmem:[%s19901_s1 + $0x1a10] sm:$0xf0]  ;;  %v13141_v60 = vld [vmem:[%s19901_s1 + $0x1ce4] sm:$0xf]  ;;  %v11328_v11 = vor.u32 %v13017_v55, %v11325_v52 }
 0x1df   :  { %7061 = vmatpush.bf16.msra.mxu3 %v11616_v24  ;;  %v11581_v53 = vld [vmem:[%s19901_s1 + $0x1b10] sm:$0xf0]  ;;  %v13173_v59 = vld [vmem:[%s19901_s1 + $0x1de4] sm:$0xf]  ;;  %v11456_v14 = vor.u32 %v13049_v47, %v11453_v51 }
 0x1e0   :  { %v11821_v57 = vld [vmem:[%s19901_s1 + $0x1cf0] sm:$0xf0]  ;;  %7023 = vmatpush.bf16.msra.mxu0 %v11216_v56  ;;  %v13205_v1 = vld [vmem:[%s19901_s1 + $0x1ee4] sm:$0xf]  ;;  %v11584_v24 = vor.u32 %v13081_v54, %v11581_v53 }
 0x1e1   :  { %v11949_v63 = vld [vmem:[%s19901_s1 + $0x1df0] sm:$0xf0]  ;;  %7036 = vmatpush.bf16.msra.mxu1 %v11344_v62  ;;  %v13237_v15 = vld [vmem:[%s19901_s1 + $0x1fe4] sm:$0xf]  ;;  %v11824_v26 = vor.u32 %v13141_v60, %v11821_v57 }
 0x1e2   :  { %v12077_v61 = vld [vmem:[%s19901_s1 + $0x1ef0] sm:$0xf0]  ;;  %7049 = vmatpush.bf16.msra.mxu2 %v11472_v0  ;;  %v11952_v48 = vor.u32 %v13173_v59, %v11949_v63  ;;  %v13137_v34 = vld [vmem:[%s19901_s1 + $0x1cc4] sm:$0xf] }
 0x1e3   :  { %v12205_v17 = vld [vmem:[%s19901_s1 + $0x1ff0] sm:$0xf0]  ;;  %7062 = vmatpush.bf16.msra.mxu3 %v11600_v19  ;;  %v12080_v40 = vor.u32 %v13205_v1, %v12077_v61  ;;  %v13169_v56 = vld [vmem:[%s19901_s1 + $0x1dc4] sm:$0xf] }
 0x1e4   :  { %v11805_v43 = vld [vmem:[%s19901_s1 + $0x1cd0] sm:$0xf0]  ;;  %7024 = vmatpush.bf16.msra.mxu0 %v11200_v5  ;;  %v12208_v36 = vor.u32 %v13237_v15, %v12205_v17  ;;  %v13201_v62 = vld [vmem:[%s19901_s1 + $0x1ec4] sm:$0xf] }
 0x1e5   :  { %v11933_v58 = vld [vmem:[%s19901_s1 + $0x1dd0] sm:$0xf0]  ;;  %7037 = vmatpush.bf16.msra.mxu1 %v11328_v11  ;;  %v13233_v55 = vld [vmem:[%s19901_s1 + $0x1fc4] sm:$0xf]  ;;  %v11808_v47 = vor.u32 %v13137_v34, %v11805_v43  ;;  %v6818_v34 = vpop.f32.mrf.mxu0 }
 0x1e6   :  { %v12061_v0 = vld [vmem:[%s19901_s1 + $0x1ed0] sm:$0xf0]  ;;  %7050 = vmatpush.bf16.msra.mxu2 %v11456_v14  ;;  %v11936_v50 = vor.u32 %v13169_v56, %v11933_v58  ;;  %v13133_v51 = vld [vmem:[%s19901_s1 + $0x1ca4] sm:$0xf] }
 0x1e7   :  { %v12189_v52 = vld [vmem:[%s19901_s1 + $0x1fd0] sm:$0xf0]  ;;  %7063 = vmatpush.bf16.msra.mxu3 %v11584_v24  ;;  %v12064_v19 = vor.u32 %v13201_v62, %v12061_v0  ;;  %v13165_v53 = vld [vmem:[%s19901_s1 + $0x1da4] sm:$0xf]  ;;  %7025 = vmatmul.bf16.vlgmr.msra.gmra.mxu0 %v14774_v2  ;;  %v6831_v62 = vpop.f32.mrf.mxu1 }
 0x1e8   :  { %7069 = vmatpush.bf16.msrb.mxu0 %v11824_v26  ;;  %v11789_v54 = vld [vmem:[%s19901_s1 + $0x1cb0] sm:$0xf0]  ;;  %v12192_v3 = vor.u32 %v13233_v55, %v12189_v52  ;;  %v13197_v57 = vld [vmem:[%s19901_s1 + $0x1ea4] sm:$0xf]  ;;  %7038 = vmatmul.bf16.vlgmr.msra.gmra.mxu1 %v14787_v10 }
 0x1e9   :  { %7082 = vmatpush.bf16.msrb.mxu1 %v11952_v48  ;;  %v11917_v60 = vld [vmem:[%s19901_s1 + $0x1db0] sm:$0xf0]  ;;  %7051 = vmatmul.bf16.vlgmr.msra.gmra.mxu2 %v14785_v9  ;;  %v13229_v5 = vld [vmem:[%s19901_s1 + $0x1fa4] sm:$0xf]  ;;  %v11792_v1 = vor.u32 %v13133_v51, %v11789_v54 }
 0x1ea   :  { %7095 = vmatpush.bf16.msrb.mxu2 %v12080_v40  ;;  %v12045_v59 = vld [vmem:[%s19901_s1 + $0x1eb0] sm:$0xf0]  ;;  %7064 = vmatmul.bf16.vlgmr.msra.gmra.mxu3 %v14795_v22  ;;  %v11920_v61 = vor.u32 %v13165_v53, %v11917_v60  ;;  %v13129_v14 = vld [vmem:[%s19901_s1 + $0x1c84] sm:$0xf] }
 0x1eb   :  { %7108 = vmatpush.bf16.msrb.mxu3 %v12208_v36  ;;  %v12173_v63 = vld [vmem:[%s19901_s1 + $0x1fb0] sm:$0xf0]  ;;  %v12048_v11 = vor.u32 %v13197_v57, %v12045_v59  ;;  %v13161_v17 = vld [vmem:[%s19901_s1 + $0x1d84] sm:$0xf]  ;;  %v6819_v36 = vadd.f32 %v6818_v34, %v16355_v7 }
 0x1ec   :  { %7070 = vmatpush.bf16.msrb.mxu0 %v11808_v47  ;;  %v11773_v15 = vld [vmem:[%s19901_s1 + $0x1c90] sm:$0xf0]  ;;  %v12176_v24 = vor.u32 %v13229_v5, %v12173_v63  ;;  %v13193_v48 = vld [vmem:[%s19901_s1 + $0x1e84] sm:$0xf] }
 0x1ed   :  { %7083 = vmatpush.bf16.msrb.mxu1 %v11936_v50  ;;  %v11901_v26 = vld [vmem:[%s19901_s1 + $0x1d90] sm:$0xf0]  ;;  %v13225_v43 = vld [vmem:[%s19901_s1 + $0x1f84] sm:$0xf]  ;;  %v11776_v58 = vor.u32 %v13129_v14, %v11773_v15  ;;  %v6844_v14 = vpop.f32.mrf.mxu2 }
 0x1ee   :  { %7096 = vmatpush.bf16.msrb.mxu2 %v12064_v19  ;;  %v12029_v40 = vld [vmem:[%s19901_s1 + $0x1e90] sm:$0xf0]  ;;  %v11904_v0 = vor.u32 %v13161_v17, %v11901_v26  ;;  %v13125_v52 = vld [vmem:[%s19901_s1 + $0x1c64] sm:$0xf]  ;;  %v6832_v19 = vadd.f32 %v6831_v62, %v6819_v36 }
 0x1ef   :  { %7109 = vmatpush.bf16.msrb.mxu3 %v12192_v3  ;;  %v12157_v56 = vld [vmem:[%s19901_s1 + $0x1f90] sm:$0xf0]  ;;  %v12032_v55 = vor.u32 %v13193_v48, %v12029_v40  ;;  %v13157_v50 = vld [vmem:[%s19901_s1 + $0x1d64] sm:$0xf]  ;;  %v6857_v48 = vpop.f32.mrf.mxu3  ;;  %v6833_v36 = vpop.f32.mrf.mxu1 }
 0x1f0   :  { %7071 = vmatpush.bf16.msrb.mxu0 %v11792_v1  ;;  %v11757_v47 = vld [vmem:[%s19901_s1 + $0x1c70] sm:$0xf0]  ;;  %v12160_v7 = vor.u32 %v13225_v43, %v12157_v56  ;;  %v13189_v54 = vld [vmem:[%s19901_s1 + $0x1e64] sm:$0xf]  ;;  %v6845_v26 = vadd.f32 %v6844_v14, %v6832_v19  ;;  %v6820_v43 = vpop.f32.mrf.mxu0  ;;  %v8499_v36 = vld [vmem:[%s19901_s1 + $0x2e8] sm:$0xf] }
 0x1f1   :  { %7084 = vmatpush.bf16.msrb.mxu1 %v11920_v61  ;;  %v11885_v51 = vld [vmem:[%s19901_s1 + $0x1d70] sm:$0xf0]  ;;  %v13221_v3 = vld [vmem:[%s19901_s1 + $0x1f64] sm:$0xf]  ;;  %v11760_v57 = vor.u32 %v13125_v52, %v11757_v47 }
 0x1f2   :  { %7097 = vmatpush.bf16.msrb.mxu2 %v12048_v11  ;;  %v12013_v53 = vld [vmem:[%s19901_s1 + $0x1e70] sm:$0xf0]  ;;  %v11888_v59 = vor.u32 %v13157_v50, %v11885_v51  ;;  %v13121_v63 = vld [vmem:[%s19901_s1 + $0x1c44] sm:$0xf] }
 0x1f3   :  { %7110 = vmatpush.bf16.msrb.mxu3 %v12176_v24  ;;  %v12141_v60 = vld [vmem:[%s19901_s1 + $0x1f70] sm:$0xf0]  ;;  %v12016_v5 = vor.u32 %v13189_v54, %v12013_v53  ;;  %v13153_v61 = vld [vmem:[%s19901_s1 + $0x1d44] sm:$0xf] }
 0x1f4   :  { %7072 = vmatpush.bf16.msrb.mxu0 %v11776_v58  ;;  %v11741_v1 = vld [vmem:[%s19901_s1 + $0x1c50] sm:$0xf0]  ;;  %v12144_v11 = vor.u32 %v13221_v3, %v12141_v60  ;;  %v13185_v17 = vld [vmem:[%s19901_s1 + $0x1e44] sm:$0xf]  ;;  %v16554_v58 = vadd.f32 %v6857_v48, %v6845_v26  ;;  %v8243_v26 = vld [vmem:[%s19901_s1 + $0xe8] sm:$0xf] }
 0x1f5   :  { %7085 = vmatpush.bf16.msrb.mxu1 %v11904_v0  ;;  %v11869_v15 = vld [vmem:[%s19901_s1 + $0x1d50] sm:$0xf0]  ;;  %v13217_v40 = vld [vmem:[%s19901_s1 + $0x1f44] sm:$0xf]  ;;  %v11744_v56 = vor.u32 %v13121_v63, %v11741_v1  ;;  %v12248_v48 = vld [vmem:[%s19901_s1 + $0xf4] sm:$0xf0] }
 0x1f6   :  { %7098 = vmatpush.bf16.msrb.mxu2 %v12032_v55  ;;  %v11997_v24 = vld [vmem:[%s19901_s1 + $0x1e50] sm:$0xf0]  ;;  %v11872_v62 = vor.u32 %v13153_v61, %v11869_v15  ;;  %v13117_v55 = vld [vmem:[%s19901_s1 + $0x1c24] sm:$0xf] }
 0x1f7   :  { %7111 = vmatpush.bf16.msrb.mxu3 %v12160_v7  ;;  %v12125_v34 = vld [vmem:[%s19901_s1 + $0x1f50] sm:$0xf0]  ;;  %v12000_v0 = vor.u32 %v13185_v17, %v11997_v24  ;;  %v13149_v47 = vld [vmem:[%s19901_s1 + $0x1d24] sm:$0xf]  ;;  %v6846_v24 = vpop.f32.mrf.mxu2 }
 0x1f8   :  { %7073 = vmatpush.bf16.msrb.mxu0 %v11760_v57  ;;  %v11725_v52 = vld [vmem:[%s19901_s1 + $0x1c30] sm:$0xf0]  ;;  %v12128_v50 = vor.u32 %v13217_v40, %v12125_v34  ;;  %v13181_v19 = vld [vmem:[%s19901_s1 + $0x1e24] sm:$0xf]  ;;  %v8371_v40 = vld [vmem:[%s19901_s1 + $0x1e8] sm:$0xf]  ;;  %v6859_v34 = vpop.f32.mrf.mxu3 }
 0x1f9   :  { %7086 = vmatpush.bf16.msrb.mxu1 %v11888_v59  ;;  %v11853_v7 = vld [vmem:[%s19901_s1 + $0x1d30] sm:$0xf0]  ;;  %v13213_v54 = vld [vmem:[%s19901_s1 + $0x1f24] sm:$0xf]  ;;  %v11728_v3 = vor.u32 %v13117_v55, %v11725_v52  ;;  %v8627_v52 = vld [vmem:[%s19901_s1 + $0x3e8] sm:$0xf] }
 0x1fa   :  { %7099 = vmatpush.bf16.msrb.mxu2 %v12016_v5  ;;  %v11981_v51 = vld [vmem:[%s19901_s1 + $0x1e30] sm:$0xf0]  ;;  %v13113_v60 = vld [vmem:[%s19901_s1 + $0x1c04] sm:$0xf]  ;;  %v11856_v59 = vor.u32 %v13149_v47, %v11853_v7  ;;  %v12344_v47 = vld [vmem:[%s19901_s1 + $0x3f4] sm:$0xf0]  ;;  %v8244_v7 = vor.u32 %v12248_v48, %v8243_v26 }
 0x1fb   :  { %7112 = vmatpush.bf16.msrb.mxu3 %v12144_v11  ;;  %v12109_v53 = vld [vmem:[%s19901_s1 + $0x1f30] sm:$0xf0]  ;;  %v11984_v5 = vor.u32 %v13181_v19, %v11981_v51  ;;  %v13145_v63 = vld [vmem:[%s19901_s1 + $0x1d04] sm:$0xf]  ;;  %v8339_v24 = vld [vmem:[%s19901_s1 + $0x1a8] sm:$0xf] }
 0x1fc   :  { %7074 = vmatpush.bf16.msrb.mxu0 %v11744_v56  ;;  %v11709_v57 = vld [vmem:[%s19901_s1 + $0x1c10] sm:$0xf0]  ;;  %v13177_v61 = vld [vmem:[%s19901_s1 + $0x1e04] sm:$0xf]  ;;  %v12112_v11 = vor.u32 %v13213_v54, %v12109_v53  ;;  %v12280_v56 = vld [vmem:[%s19901_s1 + $0x1f4] sm:$0xf0] }
 0x1fd   :  { %7087 = vmatpush.bf16.msrb.mxu1 %v11872_v62  ;;  %v11837_v1 = vld [vmem:[%s19901_s1 + $0x1d10] sm:$0xf0]  ;;  %v13209_v15 = vld [vmem:[%s19901_s1 + $0x1f04] sm:$0xf]  ;;  %v11712_v43 = vor.u32 %v13113_v60, %v11709_v57  ;;  %v12312_v62 = vld [vmem:[%s19901_s1 + $0x2f4] sm:$0xf0]  ;;  %v8372_v19 = vor.u32 %v12280_v56, %v8371_v40  ;;  %v8628_v60 = vor.u32 %v12344_v47, %v8627_v52 }
 0x1fe   :  { %7100 = vmatpush.bf16.msrb.mxu2 %v12000_v0  ;;  %v11965_v14 = vld [vmem:[%s19901_s1 + $0x1e10] sm:$0xf0]  ;;  %v11840_v0 = vor.u32 %v13145_v63, %v11837_v1  ;;  %v8500_v51 = vor.u32 %v12312_v62, %v8499_v36  ;;  %v8227_v54 = vld [vmem:[%s19901_s1 + $0xc8] sm:$0xf]  ;;  %v12244_v53 = vld [vmem:[%s19901_s1 + $0xd4] sm:$0xf0] }
 0x1ff   :  { %7113 = vmatpush.bf16.msrb.mxu3 %v12128_v50  ;;  %v12093_v17 = vld [vmem:[%s19901_s1 + $0x1f10] sm:$0xf0]  ;;  %v11968_v55 = vor.u32 %v13177_v61, %v11965_v14  ;;  %v12276_v57 = vld [vmem:[%s19901_s1 + $0x1d4] sm:$0xf0]  ;;  %v8611_v63 = vld [vmem:[%s19901_s1 + $0x3c8] sm:$0xf]  ;;  %v8228_v61 = vor.u32 %v12244_v53, %v8227_v54 }
 0x200   :  { %7075 = vmatpush.bf16.msrb.mxu0 %v11728_v3  ;;  %v12096_v50 = vor.u32 %v13209_v15, %v12093_v17  ;;  %v8355_v3 = vld [vmem:[%s19901_s1 + $0x1c8] sm:$0xf]  ;;  %v12340_v1 = vld [vmem:[%s19901_s1 + $0x3d4] sm:$0xf0] }
 0x201   :  { %7088 = vmatpush.bf16.msrb.mxu1 %v11856_v59  ;;  %v8483_v59 = vld [vmem:[%s19901_s1 + $0x2c8] sm:$0xf]  ;;  %v12240_v17 = vld [vmem:[%s19901_s1 + $0xb4] sm:$0xf0]  ;;  %v8612_v26 = vor.u32 %v12340_v1, %v8611_v63 }
 0x202   :  { %7101 = vmatpush.bf16.msrb.mxu2 %v11984_v5  ;;  %v12308_v5 = vld [vmem:[%s19901_s1 + $0x2d4] sm:$0xf0]  ;;  %v8211_v15 = vld [vmem:[%s19901_s1 + $0xa8] sm:$0xf] }
 0x203   :  { %7114 = vmatpush.bf16.msrb.mxu3 %v12112_v11  ;;  %v8356_v11 = vor.u32 %v12276_v57, %v8355_v3  ;;  %v8484_v14 = vor.u32 %v12308_v5, %v8483_v59  ;;  %v12272_v48 = vld [vmem:[%s19901_s1 + $0x1b4] sm:$0xf0]  ;;  %v8467_v40 = vld [vmem:[%s19901_s1 + $0x2a8] sm:$0xf]  ;;  %v8212_v36 = vor.u32 %v12240_v17, %v8211_v15 }
 0x204   :  { %7076 = vmatpush.bf16.msrb.mxu0 %v11712_v43  ;;  %v12304_v34 = vld [vmem:[%s19901_s1 + $0x2b4] sm:$0xf0]  ;;  %v8595_v43 = vld [vmem:[%s19901_s1 + $0x3a8] sm:$0xf]  ;;  %v8340_v62 = vor.u32 %v12272_v48, %v8339_v24  ;;  %v6870_v54 = vpop.f32.mrf.mxu0 }
 0x205   :  { %7089 = vmatpush.bf16.msrb.mxu1 %v11840_v0  ;;  %v12336_v56 = vld [vmem:[%s19901_s1 + $0x3b4] sm:$0xf0]  ;;  %v8468_v0 = vor.u32 %v12304_v34, %v8467_v40  ;;  %v8323_v47 = vld [vmem:[%s19901_s1 + $0x188] sm:$0xf]  ;;  %v6883_v59 = vpop.f32.mrf.mxu1 }
 0x206   :  { %7102 = vmatpush.bf16.msrb.mxu2 %v11968_v55  ;;  %v8195_v55 = vld [vmem:[%s19901_s1 + $0x88] sm:$0xf]  ;;  %v12236_v52 = vld [vmem:[%s19901_s1 + $0x94] sm:$0xf0] }
 0x207   :  { %7115 = vmatpush.bf16.msrb.mxu3 %v12096_v50  ;;  %7077 = vmatmul.bf16.vlgmr.msrb.gmra.mxu0 %v14987_v18  ;;  %v8596_v50 = vor.u32 %v12336_v56, %v8595_v43  ;;  %v8579_v53 = vld [vmem:[%s19901_s1 + $0x388] sm:$0xf]  ;;  %v12332_v3 = vld [vmem:[%s19901_s1 + $0x394] sm:$0xf0]  ;;  %v8196_v57 = vor.u32 %v12236_v52, %v8195_v55 }
 0x208   :  { %7121 = vmatpush.bf16.msra.mxu0 %v8244_v7  ;;  %7090 = vmatmul.bf16.vlgmr.msrb.gmra.mxu1 %v15000_v32  ;;  %v12268_v7 = vld [vmem:[%s19901_s1 + $0x194] sm:$0xf0]  ;;  %v8179_v1 = vld [vmem:[%s19901_s1 + $0x68] sm:$0xf] }
 0x209   :  { %7134 = vmatpush.bf16.msra.mxu1 %v8372_v19  ;;  %7103 = vmatmul.bf16.vlgmr.msrb.gmra.mxu2 %v14998_v27  ;;  %v8451_v19 = vld [vmem:[%s19901_s1 + $0x288] sm:$0xf]  ;;  %v8324_v5 = vor.u32 %v12268_v7, %v8323_v47  ;;  %v12264_v15 = vld [vmem:[%s19901_s1 + $0x174] sm:$0xf0] }
 0x20a   :  { %7147 = vmatpush.bf16.msra.mxu2 %v8500_v51  ;;  %7116 = vmatmul.bf16.vlgmr.msrb.gmra.mxu3 %v15008_v39  ;;  %v12300_v51 = vld [vmem:[%s19901_s1 + $0x294] sm:$0xf0]  ;;  %v8435_v17 = vld [vmem:[%s19901_s1 + $0x268] sm:$0xf] }
 0x20b   :  { %7160 = vmatpush.bf16.msra.mxu3 %v8628_v60  ;;  %v6871_v60 = vadd.f32 %v6870_v54, %v16554_v58  ;;  %v8452_v63 = vor.u32 %v12300_v51, %v8451_v19  ;;  %v8580_v58 = vor.u32 %v12332_v3, %v8579_v53  ;;  %v12296_v24 = vld [vmem:[%s19901_s1 + $0x274] sm:$0xf0]  ;;  %v8163_v56 = vld [vmem:[%s19901_s1 + $0x48] sm:$0xf] }
 0x20c   :  { %7122 = vmatpush.bf16.msra.mxu0 %v8228_v61  ;;  %v12232_v61 = vld [vmem:[%s19901_s1 + $0x74] sm:$0xf0]  ;;  %v8436_v43 = vor.u32 %v12296_v24, %v8435_v17  ;;  %v6896_v55 = vpop.f32.mrf.mxu2  ;;  %v8419_v47 = vld [vmem:[%s19901_s1 + $0x248] sm:$0xf]  ;;  %v6872_v53 = vpop.f32.mrf.mxu0 }
 0x20d   :  { %7135 = vmatpush.bf16.msra.mxu1 %v8356_v11  ;;  %v8307_v11 = vld [vmem:[%s19901_s1 + $0x168] sm:$0xf]  ;;  %v12328_v48 = vld [vmem:[%s19901_s1 + $0x374] sm:$0xf0]  ;;  %v8180_v40 = vor.u32 %v12232_v61, %v8179_v1  ;;  %v6909_v19 = vpop.f32.mrf.mxu3 }
 0x20e   :  { %7148 = vmatpush.bf16.msra.mxu2 %v8484_v14  ;;  %v6884_v14 = vadd.f32 %v6883_v59, %v6871_v60  ;;  %v8308_v34 = vor.u32 %v12264_v15, %v8307_v11  ;;  %v12260_v52 = vld [vmem:[%s19901_s1 + $0x154] sm:$0xf0]  ;;  %v8547_v51 = vld [vmem:[%s19901_s1 + $0x348] sm:$0xf]  ;;  %v6885_v60 = vpop.f32.mrf.mxu1 }
 0x20f   :  { %7161 = vmatpush.bf16.msra.mxu3 %v8612_v26  ;;  %v8563_v26 = vld [vmem:[%s19901_s1 + $0x368] sm:$0xf]  ;;  %v12324_v54 = vld [vmem:[%s19901_s1 + $0x354] sm:$0xf0] }
 0x210   :  { %7123 = vmatpush.bf16.msra.mxu0 %v8212_v36  ;;  %v12228_v36 = vld [vmem:[%s19901_s1 + $0x54] sm:$0xf0]  ;;  %v6897_v7 = vadd.f32 %v6896_v55, %v6884_v14  ;;  %v8275_v61 = vld [vmem:[%s19901_s1 + $0x128] sm:$0xf]  ;;  %v8548_v11 = vor.u32 %v12324_v54, %v8547_v51 }
 0x211   :  { %7136 = vmatpush.bf16.msra.mxu1 %v8340_v62  ;;  %v8291_v62 = vld [vmem:[%s19901_s1 + $0x148] sm:$0xf]  ;;  %v8164_v3 = vor.u32 %v12228_v36, %v8163_v56  ;;  %v12224_v1 = vld [vmem:[%s19901_s1 + $0x34] sm:$0xf0] }
 0x212   :  { %7149 = vmatpush.bf16.msra.mxu2 %v8468_v0  ;;  %v8564_v0 = vor.u32 %v12328_v48, %v8563_v26  ;;  %v8292_v59 = vor.u32 %v12260_v52, %v8291_v62  ;;  %v8403_v14 = vld [vmem:[%s19901_s1 + $0x228] sm:$0xf]  ;;  %v12288_v15 = vld [vmem:[%s19901_s1 + $0x234] sm:$0xf0] }
 0x213   :  { %7162 = vmatpush.bf16.msra.mxu3 %v8596_v50  ;;  %v12292_v50 = vld [vmem:[%s19901_s1 + $0x254] sm:$0xf0]  ;;  %v8531_v17 = vld [vmem:[%s19901_s1 + $0x328] sm:$0xf] }
 0x214   :  { %7124 = vmatpush.bf16.msra.mxu0 %v8196_v57  ;;  %v16753_v57 = vadd.f32 %v6909_v19, %v6897_v7  ;;  %v12320_v24 = vld [vmem:[%s19901_s1 + $0x334] sm:$0xf0]  ;;  %v8131_v48 = vld [vmem:[%s19901_s1 + $0x8] sm:$0xf] }
 0x215   :  { %7137 = vmatpush.bf16.msra.mxu1 %v8324_v5  ;;  %v8420_v5 = vor.u32 %v12292_v50, %v8419_v47  ;;  %v8259_v56 = vld [vmem:[%s19901_s1 + $0x108] sm:$0xf]  ;;  %v12252_v36 = vld [vmem:[%s19901_s1 + $0x114] sm:$0xf0]  ;;  %v6898_v50 = vpop.f32.mrf.mxu2  ;;  %v6911_v54 = vpop.f32.mrf.mxu3 }
 0x216   :  { %7150 = vmatpush.bf16.msra.mxu2 %v8452_v63  ;;  %v8147_v63 = vld [vmem:[%s19901_s1 + $0x28] sm:$0xf]  ;;  %v12284_v55 = vld [vmem:[%s19901_s1 + $0x214] sm:$0xf0] }
 0x217   :  { %7163 = vmatpush.bf16.msra.mxu3 %v8580_v58  ;;  %v12256_v58 = vld [vmem:[%s19901_s1 + $0x134] sm:$0xf0]  ;;  %v8148_v26 = vor.u32 %v12224_v1, %v8147_v63  ;;  %v8387_v62 = vld [vmem:[%s19901_s1 + $0x208] sm:$0xf] }
 0x218   :  { %7125 = vmatpush.bf16.msra.mxu0 %v8180_v40  ;;  %v12220_v40 = vld [vmem:[%s19901_s1 + $0x14] sm:$0xf0]  ;;  %v8515_v52 = vld [vmem:[%s19901_s1 + $0x308] sm:$0xf]  ;;  %v8388_v63 = vor.u32 %v12284_v55, %v8387_v62 }
 0x219   :  { %7138 = vmatpush.bf16.msra.mxu1 %v8308_v34  ;;  %v8276_v34 = vor.u32 %v12256_v58, %v8275_v61  ;;  %v12316_v47 = vld [vmem:[%s19901_s1 + $0x314] sm:$0xf0]  ;;  %v8755_v7 = vld [vmem:[%s19901_s1 + $0x4e8] sm:$0xf]  ;;  %v8132_v53 = vor.u32 %v12220_v40, %v8131_v48 }
 0x21a   :  { %7151 = vmatpush.bf16.msra.mxu2 %v8436_v43  ;;  %v8404_v43 = vor.u32 %v12288_v15, %v8403_v14  ;;  %v12376_v19 = vld [vmem:[%s19901_s1 + $0x4f4] sm:$0xf0]  ;;  %v8883_v51 = vld [vmem:[%s19901_s1 + $0x5e8] sm:$0xf] }
 0x21b   :  { %7164 = vmatpush.bf16.msra.mxu3 %v8564_v0  ;;  %v8532_v0 = vor.u32 %v12320_v24, %v8531_v17  ;;  %v9011_v60 = vld [vmem:[%s19901_s1 + $0x6e8] sm:$0xf]  ;;  %v12472_v61 = vld [vmem:[%s19901_s1 + $0x7f4] sm:$0xf0]  ;;  %v8756_v58 = vor.u32 %v12376_v19, %v8755_v7 }
 0x21c   :  { %7126 = vmatpush.bf16.msra.mxu0 %v8164_v3  ;;  %v12408_v3 = vld [vmem:[%s19901_s1 + $0x5f4] sm:$0xf0]  ;;  %v9139_v1 = vld [vmem:[%s19901_s1 + $0x7e8] sm:$0xf] }
 0x21d   :  { %7139 = vmatpush.bf16.msra.mxu1 %v8292_v59  ;;  %v12440_v59 = vld [vmem:[%s19901_s1 + $0x6f4] sm:$0xf0]  ;;  %v8884_v14 = vor.u32 %v12408_v3, %v8883_v51  ;;  %v8739_v17 = vld [vmem:[%s19901_s1 + $0x4c8] sm:$0xf]  ;;  %v9140_v48 = vor.u32 %v12472_v61, %v9139_v1 }
 0x21e   :  { %7152 = vmatpush.bf16.msra.mxu2 %v8420_v5  ;;  %v8260_v5 = vor.u32 %v12252_v36, %v8259_v56  ;;  %v9012_v15 = vor.u32 %v12440_v59, %v9011_v60  ;;  %v12372_v24 = vld [vmem:[%s19901_s1 + $0x4d4] sm:$0xf0]  ;;  %v9123_v56 = vld [vmem:[%s19901_s1 + $0x7c8] sm:$0xf] }
 0x21f   :  { %7165 = vmatpush.bf16.msra.mxu3 %v8548_v11  ;;  %v8516_v11 = vor.u32 %v12316_v47, %v8515_v52  ;;  %v12404_v40 = vld [vmem:[%s19901_s1 + $0x5d4] sm:$0xf0]  ;;  %v8740_v62 = vor.u32 %v12372_v24, %v8739_v17  ;;  %v8723_v52 = vld [vmem:[%s19901_s1 + $0x4a8] sm:$0xf] }
 0x220   :  { %7127 = vmatpush.bf16.msra.mxu0 %v8148_v26  ;;  %v8867_v26 = vld [vmem:[%s19901_s1 + $0x5c8] sm:$0xf]  ;;  %v12468_v36 = vld [vmem:[%s19901_s1 + $0x7d4] sm:$0xf0] }
 0x221   :  { %7140 = vmatpush.bf16.msra.mxu1 %v8276_v34  ;;  %v8995_v34 = vld [vmem:[%s19901_s1 + $0x6c8] sm:$0xf]  ;;  %v12368_v47 = vld [vmem:[%s19901_s1 + $0x4b4] sm:$0xf0]  ;;  %v9124_v7 = vor.u32 %v12468_v36, %v9123_v56 }
 0x222   :  { %7153 = vmatpush.bf16.msra.mxu2 %v8404_v43  ;;  %v12436_v43 = vld [vmem:[%s19901_s1 + $0x6d4] sm:$0xf0]  ;;  %v8851_v50 = vld [vmem:[%s19901_s1 + $0x5a8] sm:$0xf]  ;;  %v8724_v60 = vor.u32 %v12368_v47, %v8723_v52 }
 0x223   :  { %7166 = vmatpush.bf16.msra.mxu3 %v8532_v0  ;;  %v8868_v0 = vor.u32 %v12404_v40, %v8867_v26  ;;  %v8996_v55 = vor.u32 %v12436_v43, %v8995_v34  ;;  %v12400_v19 = vld [vmem:[%s19901_s1 + $0x5b4] sm:$0xf0]  ;;  %v8979_v51 = vld [vmem:[%s19901_s1 + $0x6a8] sm:$0xf] }
 0x224   :  { %7128 = vmatpush.bf16.msra.mxu0 %v8132_v53  ;;  %v12432_v54 = vld [vmem:[%s19901_s1 + $0x6b4] sm:$0xf0]  ;;  %v9107_v53 = vld [vmem:[%s19901_s1 + $0x7a8] sm:$0xf]  ;;  %v8852_v59 = vor.u32 %v12400_v19, %v8851_v50  ;;  %v6922_v17 = vpop.f32.mrf.mxu0 }
 0x225   :  { %7141 = vmatpush.bf16.msra.mxu1 %v8260_v5  ;;  %v12464_v3 = vld [vmem:[%s19901_s1 + $0x7b4] sm:$0xf0]  ;;  %v8980_v5 = vor.u32 %v12432_v54, %v8979_v51  ;;  %v8835_v61 = vld [vmem:[%s19901_s1 + $0x588] sm:$0xf]  ;;  %v6935_v34 = vpop.f32.mrf.mxu1 }
 0x226   :  { %7154 = vmatpush.bf16.msra.mxu2 %v8388_v63  ;;  %v8707_v63 = vld [vmem:[%s19901_s1 + $0x488] sm:$0xf]  ;;  %v12364_v1 = vld [vmem:[%s19901_s1 + $0x494] sm:$0xf0] }
 0x227   :  { %7167 = vmatpush.bf16.msra.mxu3 %v8516_v11  ;;  %7129 = vmatmul.bf16.vlgmr.msra.gmra.mxu0 %v13577_v20  ;;  %v9108_v11 = vor.u32 %v12464_v3, %v9107_v53  ;;  %v9091_v24 = vld [vmem:[%s19901_s1 + $0x788] sm:$0xf]  ;;  %v12460_v26 = vld [vmem:[%s19901_s1 + $0x794] sm:$0xf0]  ;;  %v8708_v40 = vor.u32 %v12364_v1, %v8707_v63 }
 0x228   :  { %7173 = vmatpush.bf16.msrb.mxu0 %v8756_v58  ;;  %7142 = vmatmul.bf16.vlgmr.msra.gmra.mxu1 %v13580_v21  ;;  %v12396_v58 = vld [vmem:[%s19901_s1 + $0x594] sm:$0xf0]  ;;  %v8691_v36 = vld [vmem:[%s19901_s1 + $0x468] sm:$0xf] }
 0x229   :  { %7186 = vmatpush.bf16.msrb.mxu1 %v8884_v14  ;;  %7155 = vmatmul.bf16.vlgmr.msra.gmra.mxu2 %v13545_v4  ;;  %v8963_v14 = vld [vmem:[%s19901_s1 + $0x688] sm:$0xf]  ;;  %v8836_v43 = vor.u32 %v12396_v58, %v8835_v61  ;;  %v12392_v52 = vld [vmem:[%s19901_s1 + $0x574] sm:$0xf0] }
 0x22a   :  { %7199 = vmatpush.bf16.msrb.mxu2 %v9012_v15  ;;  %7168 = vmatmul.bf16.vlgmr.msra.gmra.mxu3 %v13550_v6  ;;  %v12428_v15 = vld [vmem:[%s19901_s1 + $0x694] sm:$0xf0]  ;;  %v8947_v47 = vld [vmem:[%s19901_s1 + $0x668] sm:$0xf] }
 0x22b   :  { %7212 = vmatpush.bf16.msrb.mxu3 %v9140_v48  ;;  %v6923_v48 = vadd.f32 %v6922_v17, %v16753_v57  ;;  %v8964_v56 = vor.u32 %v12428_v15, %v8963_v14  ;;  %v9092_v57 = vor.u32 %v12460_v26, %v9091_v24  ;;  %v12424_v50 = vld [vmem:[%s19901_s1 + $0x674] sm:$0xf0]  ;;  %v8675_v3 = vld [vmem:[%s19901_s1 + $0x448] sm:$0xf] }
 0x22c   :  { %7174 = vmatpush.bf16.msrb.mxu0 %v8740_v62  ;;  %v12360_v62 = vld [vmem:[%s19901_s1 + $0x474] sm:$0xf0]  ;;  %v8948_v53 = vor.u32 %v12424_v50, %v8947_v47  ;;  %v6948_v63 = vpop.f32.mrf.mxu2  ;;  %v8931_v61 = vld [vmem:[%s19901_s1 + $0x648] sm:$0xf]  ;;  %v6924_v24 = vpop.f32.mrf.mxu0 }
 0x22d   :  { %7187 = vmatpush.bf16.msrb.mxu1 %v8868_v0  ;;  %v8819_v0 = vld [vmem:[%s19901_s1 + $0x568] sm:$0xf]  ;;  %v12456_v19 = vld [vmem:[%s19901_s1 + $0x774] sm:$0xf0]  ;;  %v8692_v51 = vor.u32 %v12360_v62, %v8691_v36  ;;  %v6961_v14 = vpop.f32.mrf.mxu3 }
 0x22e   :  { %7200 = vmatpush.bf16.msrb.mxu2 %v8996_v55  ;;  %v6936_v55 = vadd.f32 %v6935_v34, %v6923_v48  ;;  %v8820_v54 = vor.u32 %v12392_v52, %v8819_v0  ;;  %v12388_v1 = vld [vmem:[%s19901_s1 + $0x554] sm:$0xf0]  ;;  %v9059_v15 = vld [vmem:[%s19901_s1 + $0x748] sm:$0xf]  ;;  %v6937_v48 = vpop.f32.mrf.mxu1 }
 0x22f   :  { %7213 = vmatpush.bf16.msrb.mxu3 %v9124_v7  ;;  %v9075_v7 = vld [vmem:[%s19901_s1 + $0x768] sm:$0xf]  ;;  %v12452_v17 = vld [vmem:[%s19901_s1 + $0x754] sm:$0xf0] }
 0x230   :  { %7175 = vmatpush.bf16.msrb.mxu0 %v8724_v60  ;;  %v12356_v60 = vld [vmem:[%s19901_s1 + $0x454] sm:$0xf0]  ;;  %v6949_v58 = vadd.f32 %v6948_v63, %v6936_v55  ;;  %v8787_v62 = vld [vmem:[%s19901_s1 + $0x528] sm:$0xf]  ;;  %v9060_v0 = vor.u32 %v12452_v17, %v9059_v15 }
 0x231   :  { %7188 = vmatpush.bf16.msrb.mxu1 %v8852_v59  ;;  %v8803_v59 = vld [vmem:[%s19901_s1 + $0x548] sm:$0xf]  ;;  %v8676_v26 = vor.u32 %v12356_v60, %v8675_v3  ;;  %v12352_v36 = vld [vmem:[%s19901_s1 + $0x434] sm:$0xf0] }
 0x232   :  { %7201 = vmatpush.bf16.msrb.mxu2 %v8980_v5  ;;  %v9076_v5 = vor.u32 %v12456_v19, %v9075_v7  ;;  %v8804_v34 = vor.u32 %v12388_v1, %v8803_v59  ;;  %v8915_v55 = vld [vmem:[%s19901_s1 + $0x628] sm:$0xf]  ;;  %v12416_v52 = vld [vmem:[%s19901_s1 + $0x634] sm:$0xf0] }
 0x233   :  { %7214 = vmatpush.bf16.msrb.mxu3 %v9108_v11  ;;  %v12420_v11 = vld [vmem:[%s19901_s1 + $0x654] sm:$0xf0]  ;;  %v9043_v47 = vld [vmem:[%s19901_s1 + $0x728] sm:$0xf] }
 0x234   :  { %7176 = vmatpush.bf16.msrb.mxu0 %v8708_v40  ;;  %v16952_v40 = vadd.f32 %v6961_v14, %v6949_v58  ;;  %v12448_v50 = vld [vmem:[%s19901_s1 + $0x734] sm:$0xf0]  ;;  %v8643_v19 = vld [vmem:[%s19901_s1 + $0x408] sm:$0xf] }
 0x235   :  { %7189 = vmatpush.bf16.msrb.mxu1 %v8836_v43  ;;  %v8932_v43 = vor.u32 %v12420_v11, %v8931_v61  ;;  %v8771_v3 = vld [vmem:[%s19901_s1 + $0x508] sm:$0xf]  ;;  %v12380_v60 = vld [vmem:[%s19901_s1 + $0x514] sm:$0xf0]  ;;  %v6950_v11 = vpop.f32.mrf.mxu2  ;;  %v6963_v17 = vpop.f32.mrf.mxu3 }
 0x236   :  { %7202 = vmatpush.bf16.msrb.mxu2 %v8964_v56  ;;  %v8659_v56 = vld [vmem:[%s19901_s1 + $0x428] sm:$0xf]  ;;  %v12412_v63 = vld [vmem:[%s19901_s1 + $0x614] sm:$0xf0] }
 0x237   :  { %7215 = vmatpush.bf16.msrb.mxu3 %v9092_v57  ;;  %v12384_v57 = vld [vmem:[%s19901_s1 + $0x534] sm:$0xf0]  ;;  %v8660_v7 = vor.u32 %v12352_v36, %v8659_v56  ;;  %v8899_v59 = vld [vmem:[%s19901_s1 + $0x608] sm:$0xf] }
 0x238   :  { %7177 = vmatpush.bf16.msrb.mxu0 %v8692_v51  ;;  %v12348_v51 = vld [vmem:[%s19901_s1 + $0x414] sm:$0xf0]  ;;  %v9027_v1 = vld [vmem:[%s19901_s1 + $0x708] sm:$0xf]  ;;  %v8900_v56 = vor.u32 %v12412_v63, %v8899_v59 }
 0x239   :  { %7190 = vmatpush.bf16.msrb.mxu1 %v8820_v54  ;;  %v8788_v54 = vor.u32 %v12384_v57, %v8787_v62  ;;  %v12444_v61 = vld [vmem:[%s19901_s1 + $0x714] sm:$0xf0]  ;;  %v9267_v58 = vld [vmem:[%s19901_s1 + $0x8e8] sm:$0xf]  ;;  %v8644_v24 = vor.u32 %v12348_v51, %v8643_v19 }
 0x23a   :  { %7203 = vmatpush.bf16.msrb.mxu2 %v8948_v53  ;;  %v8916_v53 = vor.u32 %v12416_v52, %v8915_v55  ;;  %v12504_v14 = vld [vmem:[%s19901_s1 + $0x8f4] sm:$0xf0]  ;;  %v9395_v15 = vld [vmem:[%s19901_s1 + $0x9e8] sm:$0xf] }
 0x23b   :  { %7216 = vmatpush.bf16.msrb.mxu3 %v9076_v5  ;;  %v9044_v5 = vor.u32 %v12448_v50, %v9043_v47  ;;  %v9523_v48 = vld [vmem:[%s19901_s1 + $0xae8] sm:$0xf]  ;;  %v12600_v62 = vld [vmem:[%s19901_s1 + $0xbf4] sm:$0xf0]  ;;  %v9268_v57 = vor.u32 %v12504_v14, %v9267_v58 }
 0x23c   :  { %7178 = vmatpush.bf16.msrb.mxu0 %v8676_v26  ;;  %v12536_v26 = vld [vmem:[%s19901_s1 + $0x9f4] sm:$0xf0]  ;;  %v9651_v36 = vld [vmem:[%s19901_s1 + $0xbe8] sm:$0xf] }
 0x23d   :  { %7191 = vmatpush.bf16.msrb.mxu1 %v8804_v34  ;;  %v12568_v34 = vld [vmem:[%s19901_s1 + $0xaf4] sm:$0xf0]  ;;  %v9396_v55 = vor.u32 %v12536_v26, %v9395_v15  ;;  %v9251_v47 = vld [vmem:[%s19901_s1 + $0x8c8] sm:$0xf]  ;;  %v9652_v19 = vor.u32 %v12600_v62, %v9651_v36 }
 0x23e   :  { %7204 = vmatpush.bf16.msrb.mxu2 %v8932_v43  ;;  %v8772_v43 = vor.u32 %v12380_v60, %v8771_v3  ;;  %v9524_v52 = vor.u32 %v12568_v34, %v9523_v48  ;;  %v12500_v50 = vld [vmem:[%s19901_s1 + $0x8d4] sm:$0xf0]  ;;  %v9635_v3 = vld [vmem:[%s19901_s1 + $0xbc8] sm:$0xf] }
 0x23f   :  { %7217 = vmatpush.bf16.msrb.mxu3 %v9060_v0  ;;  %v9028_v0 = vor.u32 %v12444_v61, %v9027_v1  ;;  %v12532_v51 = vld [vmem:[%s19901_s1 + $0x9d4] sm:$0xf0]  ;;  %v9252_v59 = vor.u32 %v12500_v50, %v9251_v47  ;;  %v9235_v1 = vld [vmem:[%s19901_s1 + $0x8a8] sm:$0xf] }
 0x240   :  { %7179 = vmatpush.bf16.msrb.mxu0 %v8660_v7  ;;  %v9379_v7 = vld [vmem:[%s19901_s1 + $0x9c8] sm:$0xf]  ;;  %v12596_v60 = vld [vmem:[%s19901_s1 + $0xbd4] sm:$0xf0] }
 0x241   :  { %7192 = vmatpush.bf16.msrb.mxu1 %v8788_v54  ;;  %v9507_v54 = vld [vmem:[%s19901_s1 + $0xac8] sm:$0xf]  ;;  %v12496_v61 = vld [vmem:[%s19901_s1 + $0x8b4] sm:$0xf0]  ;;  %v9636_v58 = vor.u32 %v12596_v60, %v9635_v3 }
 0x242   :  { %7205 = vmatpush.bf16.msrb.mxu2 %v8916_v53  ;;  %v12564_v53 = vld [vmem:[%s19901_s1 + $0xad4] sm:$0xf0]  ;;  %v9363_v11 = vld [vmem:[%s19901_s1 + $0x9a8] sm:$0xf]  ;;  %v9236_v48 = vor.u32 %v12496_v61, %v9235_v1 }
 0x243   :  { %7218 = vmatpush.bf16.msrb.mxu3 %v9044_v5  ;;  %v9380_v5 = vor.u32 %v12532_v51, %v9379_v7  ;;  %v9508_v63 = vor.u32 %v12564_v53, %v9507_v54  ;;  %v12528_v14 = vld [vmem:[%s19901_s1 + $0x9b4] sm:$0xf0]  ;;  %v9491_v15 = vld [vmem:[%s19901_s1 + $0xaa8] sm:$0xf] }
 0x244   :  { %7180 = vmatpush.bf16.msrb.mxu0 %v8644_v24  ;;  %v12560_v17 = vld [vmem:[%s19901_s1 + $0xab4] sm:$0xf0]  ;;  %v9619_v24 = vld [vmem:[%s19901_s1 + $0xba8] sm:$0xf]  ;;  %v9364_v34 = vor.u32 %v12528_v14, %v9363_v11  ;;  %v17096_v47 = vpop.f32.mrf.mxu0 }
 0x245   :  { %7193 = vmatpush.bf16.msrb.mxu1 %v8772_v43  ;;  %v12592_v26 = vld [vmem:[%s19901_s1 + $0xbb4] sm:$0xf0]  ;;  %v9492_v43 = vor.u32 %v12560_v17, %v9491_v15  ;;  %v9347_v62 = vld [vmem:[%s19901_s1 + $0x988] sm:$0xf]  ;;  %v17104_v51 = vpop.f32.mrf.mxu1 }
 0x246   :  { %7206 = vmatpush.bf16.msrb.mxu2 %v8900_v56  ;;  %v9219_v56 = vld [vmem:[%s19901_s1 + $0x888] sm:$0xf]  ;;  %v12492_v36 = vld [vmem:[%s19901_s1 + $0x894] sm:$0xf0] }
 0x247   :  { %7219 = vmatpush.bf16.msrb.mxu3 %v9028_v0  ;;  %7181 = vmatmul.bf16.vlgmr.msrb.gmra.mxu0 %v13736_v41  ;;  %v9620_v0 = vor.u32 %v12592_v26, %v9619_v24  ;;  %v9603_v50 = vld [vmem:[%s19901_s1 + $0xb88] sm:$0xf]  ;;  %v12588_v7 = vld [vmem:[%s19901_s1 + $0xb94] sm:$0xf0] }
 0x248   :  { %7225 = vmatpush.bf16.msra.mxu0 %v9268_v57  ;;  %7194 = vmatmul.bf16.vlgmr.msrb.gmra.mxu1 %v13740_v44  ;;  %v12524_v57 = vld [vmem:[%s19901_s1 + $0x994] sm:$0xf0]  ;;  %v9203_v3 = vld [vmem:[%s19901_s1 + $0x868] sm:$0xf] }
 0x249   :  { %7238 = vmatpush.bf16.msra.mxu1 %v9396_v55  ;;  %7207 = vmatmul.bf16.vlgmr.msrb.gmra.mxu2 %v13728_v38  ;;  %v9475_v55 = vld [vmem:[%s19901_s1 + $0xa88] sm:$0xf]  ;;  %v9348_v54 = vor.u32 %v12524_v57, %v9347_v62  ;;  %v12488_v60 = vld [vmem:[%s19901_s1 + $0x874] sm:$0xf0] }
 0x24a   :  { %7251 = vmatpush.bf16.msra.mxu2 %v9524_v52  ;;  %7220 = vmatmul.bf16.vlgmr.msrb.gmra.mxu3 %v13738_v42  ;;  %v12556_v52 = vld [vmem:[%s19901_s1 + $0xa94] sm:$0xf0]  ;;  %v9459_v1 = vld [vmem:[%s19901_s1 + $0xa68] sm:$0xf]  ;;  %v9204_v14 = vor.u32 %v12488_v60, %v9203_v3 }
 0x24b   :  { %7264 = vmatpush.bf16.msra.mxu3 %v9652_v19  ;;  %v9220_v19 = vor.u32 %v12492_v36, %v9219_v56  ;;  %v9476_v53 = vor.u32 %v12556_v52, %v9475_v55  ;;  %v12552_v61 = vld [vmem:[%s19901_s1 + $0xa74] sm:$0xf0]  ;;  %v9587_v11 = vld [vmem:[%s19901_s1 + $0xb68] sm:$0xf] }
 0x24c   :  { %7226 = vmatpush.bf16.msra.mxu0 %v9252_v59  ;;  %v9331_v59 = vld [vmem:[%s19901_s1 + $0x968] sm:$0xf]  ;;  %v9460_v17 = vor.u32 %v12552_v61, %v9459_v1  ;;  %v12484_v26 = vld [vmem:[%s19901_s1 + $0x854] sm:$0xf0]  ;;  %v6976_v52 = vpop.f32.mrf.mxu0 }
 0x24d   :  { %7239 = vmatpush.bf16.msra.mxu1 %v9380_v5  ;;  %v9604_v5 = vor.u32 %v12588_v7, %v9603_v50  ;;  %v9187_v24 = vld [vmem:[%s19901_s1 + $0x848] sm:$0xf]  ;;  %v12516_v56 = vld [vmem:[%s19901_s1 + $0x954] sm:$0xf0]  ;;  %v6989_v7 = vpop.f32.mrf.mxu1 }
 0x24e   :  { %7252 = vmatpush.bf16.msra.mxu2 %v9508_v63  ;;  %v12520_v63 = vld [vmem:[%s19901_s1 + $0x974] sm:$0xf0]  ;;  %v9443_v36 = vld [vmem:[%s19901_s1 + $0xa48] sm:$0xf]  ;;  %v9188_v50 = vor.u32 %v12484_v26, %v9187_v24 }
 0x24f   :  { %7265 = vmatpush.bf16.msra.mxu3 %v9636_v58  ;;  %v12584_v58 = vld [vmem:[%s19901_s1 + $0xb74] sm:$0xf0]  ;;  %v9332_v15 = vor.u32 %v12520_v63, %v9331_v59  ;;  %v9571_v57 = vld [vmem:[%s19901_s1 + $0xb48] sm:$0xf] }
 0x250   :  { %7227 = vmatpush.bf16.msra.mxu0 %v9236_v48  ;;  %v9315_v48 = vld [vmem:[%s19901_s1 + $0x948] sm:$0xf]  ;;  %v12548_v62 = vld [vmem:[%s19901_s1 + $0xa54] sm:$0xf0] }
 0x251   :  { %7240 = vmatpush.bf16.msra.mxu1 %v9364_v34  ;;  %v9588_v34 = vor.u32 %v12584_v58, %v9587_v11  ;;  %v12580_v55 = vld [vmem:[%s19901_s1 + $0xb54] sm:$0xf0]  ;;  %v9299_v60 = vld [vmem:[%s19901_s1 + $0x928] sm:$0xf] }
 0x252   :  { %7253 = vmatpush.bf16.msra.mxu2 %v9492_v43  ;;  %v17139_v43 = vpop.f32.mrf.mxu2  ;;  %v12480_v3 = vld [vmem:[%s19901_s1 + $0x834] sm:$0xf0]  ;;  %v9572_v59 = vor.u32 %v12580_v55, %v9571_v57  ;;  %v9427_v63 = vld [vmem:[%s19901_s1 + $0xa28] sm:$0xf] }
 0x253   :  { %7266 = vmatpush.bf16.msra.mxu3 %v9620_v0  ;;  %v17150_v0 = vpop.f32.mrf.mxu3  ;;  %v12544_v1 = vld [vmem:[%s19901_s1 + $0xa34] sm:$0xf0]  ;;  %v9555_v61 = vld [vmem:[%s19901_s1 + $0xb28] sm:$0xf] }
 0x254   :  { %7228 = vmatpush.bf16.msra.mxu0 %v9220_v19  ;;  %v9316_v19 = vor.u32 %v12516_v56, %v9315_v48  ;;  %v12576_v11 = vld [vmem:[%s19901_s1 + $0xb34] sm:$0xf0]  ;;  %v9428_v24 = vor.u32 %v12544_v1, %v9427_v63  ;;  %v9283_v26 = vld [vmem:[%s19901_s1 + $0x908] sm:$0xf] }
 0x255   :  { %7241 = vmatpush.bf16.msra.mxu1 %v9348_v54  ;;  %v9444_v54 = vor.u32 %v12548_v62, %v9443_v36  ;;  %v12508_v48 = vld [vmem:[%s19901_s1 + $0x914] sm:$0xf0]  ;;  %v9556_v56 = vor.u32 %v12576_v11, %v9555_v61  ;;  %v9539_v62 = vld [vmem:[%s19901_s1 + $0xb08] sm:$0xf] }
 0x256   :  { %7254 = vmatpush.bf16.msra.mxu2 %v9476_v53  ;;  %v9171_v53 = vld [vmem:[%s19901_s1 + $0x828] sm:$0xf]  ;;  %v12540_v36 = vld [vmem:[%s19901_s1 + $0xa14] sm:$0xf0] }
 0x257   :  { %7267 = vmatpush.bf16.msra.mxu3 %v9604_v5  ;;  %v12512_v5 = vld [vmem:[%s19901_s1 + $0x934] sm:$0xf0]  ;;  %v9172_v58 = vor.u32 %v12480_v3, %v9171_v53  ;;  %v9779_v52 = vld [vmem:[%s19901_s1 + $0xce8] sm:$0xf] }
 0x258   :  { %7229 = vmatpush.bf16.msra.mxu0 %v9204_v14  ;;  %v9155_v14 = vld [vmem:[%s19901_s1 + $0x808] sm:$0xf]  ;;  %v12572_v57 = vld [vmem:[%s19901_s1 + $0xb14] sm:$0xf0] }
 0x259   :  { %7242 = vmatpush.bf16.msra.mxu1 %v9332_v15  ;;  %v12476_v15 = vld [vmem:[%s19901_s1 + $0x814] sm:$0xf0]  ;;  %v9907_v7 = vld [vmem:[%s19901_s1 + $0xde8] sm:$0xf]  ;;  %v9540_v61 = vor.u32 %v12572_v57, %v9539_v62 }
 0x25a   :  { %7255 = vmatpush.bf16.msra.mxu2 %v9460_v17  ;;  %v9300_v17 = vor.u32 %v12512_v5, %v9299_v60  ;;  %v7002_v55 = vpop.f32.mrf.mxu2  ;;  %v12664_v53 = vld [vmem:[%s19901_s1 + $0xdf4] sm:$0xf0]  ;;  %v10035_v3 = vld [vmem:[%s19901_s1 + $0xee8] sm:$0xf] }
 0x25b   :  { %7268 = vmatpush.bf16.msra.mxu3 %v9588_v34  ;;  %v9411_v34 = vld [vmem:[%s19901_s1 + $0xa08] sm:$0xf]  ;;  %v12696_v60 = vld [vmem:[%s19901_s1 + $0xef4] sm:$0xf0] }
 0x25c   :  { %7230 = vmatpush.bf16.msra.mxu0 %v9188_v50  ;;  %v12632_v50 = vld [vmem:[%s19901_s1 + $0xcf4] sm:$0xf0]  ;;  %v9412_v5 = vor.u32 %v12540_v36, %v9411_v34  ;;  %v10163_v63 = vld [vmem:[%s19901_s1 + $0xfe8] sm:$0xf] }
 0x25d   :  { %7243 = vmatpush.bf16.msra.mxu1 %v9316_v19  ;;  %v7015_v19 = vpop.f32.mrf.mxu3  ;;  %v12728_v1 = vld [vmem:[%s19901_s1 + $0xff4] sm:$0xf0]  ;;  %v9780_v11 = vor.u32 %v12632_v50, %v9779_v52  ;;  %v10019_v34 = vld [vmem:[%s19901_s1 + $0xec8] sm:$0xf] }
 0x25e   :  { %7256 = vmatpush.bf16.msra.mxu2 %v9444_v54  ;;  %v9156_v54 = vor.u32 %v12476_v15, %v9155_v14  ;;  %v10036_v14 = vor.u32 %v12696_v60, %v10035_v3  ;;  %v9763_v15 = vld [vmem:[%s19901_s1 + $0xcc8] sm:$0xf]  ;;  %v12724_v62 = vld [vmem:[%s19901_s1 + $0xfd4] sm:$0xf0] }
 0x25f   :  { %7269 = vmatpush.bf16.msra.mxu3 %v9572_v59  ;;  %v9284_v59 = vor.u32 %v12508_v48, %v9283_v26  ;;  %v10164_v26 = vor.u32 %v12728_v1, %v10163_v63  ;;  %v12660_v48 = vld [vmem:[%s19901_s1 + $0xdd4] sm:$0xf0]  ;;  %v10147_v36 = vld [vmem:[%s19901_s1 + $0xfc8] sm:$0xf] }
 0x260   :  { %7231 = vmatpush.bf16.msra.mxu0 %v9172_v58  ;;  %v9908_v58 = vor.u32 %v12664_v53, %v9907_v7  ;;  %v9747_v50 = vld [vmem:[%s19901_s1 + $0xca8] sm:$0xf]  ;;  %v12624_v7 = vld [vmem:[%s19901_s1 + $0xcb4] sm:$0xf0] }
 0x261   :  { %7244 = vmatpush.bf16.msra.mxu1 %v9300_v17  ;;  %v12628_v17 = vld [vmem:[%s19901_s1 + $0xcd4] sm:$0xf0]  ;;  %v9875_v19 = vld [vmem:[%s19901_s1 + $0xda8] sm:$0xf]  ;;  %v9748_v63 = vor.u32 %v12624_v7, %v9747_v50 }
 0x262   :  { %7257 = vmatpush.bf16.msra.mxu2 %v9428_v24  ;;  %v9891_v24 = vld [vmem:[%s19901_s1 + $0xdc8] sm:$0xf]  ;;  %v9764_v57 = vor.u32 %v12628_v17, %v9763_v15  ;;  %v12656_v53 = vld [vmem:[%s19901_s1 + $0xdb4] sm:$0xf0] }
 0x263   :  { %7270 = vmatpush.bf16.msra.mxu3 %v9556_v56  ;;  %v12692_v56 = vld [vmem:[%s19901_s1 + $0xed4] sm:$0xf0]  ;;  %v9892_v55 = vor.u32 %v12660_v48, %v9891_v24  ;;  %v10003_v3 = vld [vmem:[%s19901_s1 + $0xea8] sm:$0xf]  ;;  %v9876_v1 = vor.u32 %v12656_v53, %v9875_v19 }
 0x264   :  { %7232 = vmatpush.bf16.msra.mxu0 %v9156_v54  ;;  %v10020_v52 = vor.u32 %v12692_v56, %v10019_v34  ;;  %v10148_v54 = vor.u32 %v12724_v62, %v10147_v36  ;;  %v12688_v60 = vld [vmem:[%s19901_s1 + $0xeb4] sm:$0xf0]  ;;  %v9987_v24 = vld [vmem:[%s19901_s1 + $0xe88] sm:$0xf]  ;;  %v17300_v48 = vpop.f32.mrf.mxu0 }
 0x265   :  { %7245 = vmatpush.bf16.msra.mxu1 %v9284_v59  ;;  %v10131_v59 = vld [vmem:[%s19901_s1 + $0xfa8] sm:$0xf]  ;;  %v12652_v17 = vld [vmem:[%s19901_s1 + $0xd94] sm:$0xf0]  ;;  %v17308_v62 = vpop.f32.mrf.mxu1 }
 0x266   :  { %7258 = vmatpush.bf16.msra.mxu2 %v9412_v5  ;;  %v12720_v5 = vld [vmem:[%s19901_s1 + $0xfb4] sm:$0xf0]  ;;  %v10115_v34 = vld [vmem:[%s19901_s1 + $0xf88] sm:$0xf] }
 0x267   :  { %7271 = vmatpush.bf16.msra.mxu3 %v9540_v61  ;;  %7233 = vmatmul.bf16.vlgmr.msra.gmra.mxu0 %v13929_v25  ;;  %v10004_v61 = vor.u32 %v12688_v60, %v10003_v3  ;;  %v10132_v15 = vor.u32 %v12720_v5, %v10131_v59  ;;  %v12716_v56 = vld [vmem:[%s19901_s1 + $0xf94] sm:$0xf0]  ;;  %v9843_v7 = vld [vmem:[%s19901_s1 + $0xd68] sm:$0xf] }
 0x268   :  { %7277 = vmatpush.bf16.msrb.mxu0 %v9780_v11  ;;  %7246 = vmatmul.bf16.vlgmr.msra.gmra.mxu1 %v13942_v30  ;;  %v9731_v11 = vld [vmem:[%s19901_s1 + $0xc88] sm:$0xf]  ;;  %v12616_v50 = vld [vmem:[%s19901_s1 + $0xc74] sm:$0xf0]  ;;  %v10116_v19 = vor.u32 %v12716_v56, %v10115_v34  ;;  %v6975_v34 = vadd.f32 %v17096_v47, %v16952_v40 }
 0x269   :  { %7290 = vmatpush.bf16.msrb.mxu1 %v9908_v58  ;;  %7259 = vmatmul.bf16.vlgmr.msra.gmra.mxu2 %v13940_v29  ;;  %v12620_v58 = vld [vmem:[%s19901_s1 + $0xc94] sm:$0xf0]  ;;  %v9971_v53 = vld [vmem:[%s19901_s1 + $0xe68] sm:$0xf] }
 0x26a   :  { %7303 = vmatpush.bf16.msrb.mxu2 %v10036_v14  ;;  %7272 = vmatmul.bf16.vlgmr.msra.gmra.mxu3 %v13950_v33  ;;  %v9859_v14 = vld [vmem:[%s19901_s1 + $0xd88] sm:$0xf]  ;;  %v9732_v36 = vor.u32 %v12620_v58, %v9731_v11  ;;  %v12680_v3 = vld [vmem:[%s19901_s1 + $0xe74] sm:$0xf0] }
 0x26b   :  { %7316 = vmatpush.bf16.msrb.mxu3 %v10164_v26  ;;  %v12684_v26 = vld [vmem:[%s19901_s1 + $0xe94] sm:$0xf0]  ;;  %v10099_v60 = vld [vmem:[%s19901_s1 + $0xf68] sm:$0xf] }
 0x26c   :  { %7278 = vmatpush.bf16.msrb.mxu0 %v9764_v57  ;;  %v9860_v57 = vor.u32 %v12652_v17, %v9859_v14  ;;  %v12712_v59 = vld [vmem:[%s19901_s1 + $0xf74] sm:$0xf0]  ;;  %v9827_v58 = vld [vmem:[%s19901_s1 + $0xd48] sm:$0xf] }
 0x26d   :  { %7291 = vmatpush.bf16.msrb.mxu1 %v9892_v55  ;;  %v9988_v55 = vor.u32 %v12684_v26, %v9987_v24  ;;  %v12612_v11 = vld [vmem:[%s19901_s1 + $0xc54] sm:$0xf0]  ;;  %v10100_v14 = vor.u32 %v12712_v59, %v10099_v60  ;;  %v9955_v24 = vld [vmem:[%s19901_s1 + $0xe48] sm:$0xf]  ;;  %v17356_v56 = vpop.f32.mrf.mxu3 }
 0x26e   :  { %7304 = vmatpush.bf16.msrb.mxu2 %v10020_v52  ;;  %v9715_v52 = vld [vmem:[%s19901_s1 + $0xc68] sm:$0xf]  ;;  %v12644_v17 = vld [vmem:[%s19901_s1 + $0xd54] sm:$0xf0] }
 0x26f   :  { %7317 = vmatpush.bf16.msrb.mxu3 %v10148_v54  ;;  %v12648_v54 = vld [vmem:[%s19901_s1 + $0xd74] sm:$0xf0]  ;;  %v9716_v5 = vor.u32 %v12616_v50, %v9715_v52  ;;  %v7041_v50 = vpop.f32.mrf.mxu1  ;;  %v9683_v40 = vld [vmem:[%s19901_s1 + $0xc28] sm:$0xf] }
 0x270   :  { %7279 = vmatpush.bf16.msrb.mxu0 %v9748_v63  ;;  %v9844_v63 = vor.u32 %v12648_v54, %v9843_v7  ;;  %v12676_v26 = vld [vmem:[%s19901_s1 + $0xe54] sm:$0xf0]  ;;  %v9828_v7 = vor.u32 %v12644_v17, %v9827_v58  ;;  %v9811_v54 = vld [vmem:[%s19901_s1 + $0xd28] sm:$0xf] }
 0x271   :  { %7292 = vmatpush.bf16.msrb.mxu1 %v9876_v1  ;;  %v9972_v1 = vor.u32 %v12680_v3, %v9971_v53  ;;  %v12608_v47 = vld [vmem:[%s19901_s1 + $0xc34] sm:$0xf0]  ;;  %v9939_v60 = vld [vmem:[%s19901_s1 + $0xe28] sm:$0xf] }
 0x272   :  { %7305 = vmatpush.bf16.msrb.mxu2 %v10004_v61  ;;  %v9699_v61 = vld [vmem:[%s19901_s1 + $0xc48] sm:$0xf]  ;;  %v12640_v3 = vld [vmem:[%s19901_s1 + $0xd34] sm:$0xf0] }
 0x273   :  { %7318 = vmatpush.bf16.msrb.mxu3 %v10132_v15  ;;  %v17343_v15 = vpop.f32.mrf.mxu2  ;;  %v9700_v52 = vor.u32 %v12612_v11, %v9699_v61  ;;  %v12672_v59 = vld [vmem:[%s19901_s1 + $0xe34] sm:$0xf0]  ;;  %v9684_v61 = vor.u32 %v12608_v47, %v9683_v40  ;;  %v9667_v11 = vld [vmem:[%s19901_s1 + $0xc08] sm:$0xf] }
 0x274   :  { %7280 = vmatpush.bf16.msrb.mxu0 %v9732_v36  ;;  %v10083_v36 = vld [vmem:[%s19901_s1 + $0xf48] sm:$0xf]  ;;  %v12604_v58 = vld [vmem:[%s19901_s1 + $0xc14] sm:$0xf0]  ;;  %v9940_v17 = vor.u32 %v12672_v59, %v9939_v60 }
 0x275   :  { %7293 = vmatpush.bf16.msrb.mxu1 %v9860_v57  ;;  %v12708_v57 = vld [vmem:[%s19901_s1 + $0xf54] sm:$0xf0]  ;;  %v10291_v50 = vld [vmem:[%s19901_s1 + $0x10e8] sm:$0xf]  ;;  %v7067_v40 = vpop.f32.mrf.mxu3  ;;  %v9668_v47 = vor.u32 %v12604_v58, %v9667_v11 }
 0x276   :  { %7306 = vmatpush.bf16.msrb.mxu2 %v9988_v55  ;;  %v7028_v55 = vpop.f32.mrf.mxu0  ;;  %v10084_v53 = vor.u32 %v12708_v57, %v10083_v36  ;;  %v10051_v57 = vld [vmem:[%s19901_s1 + $0xf08] sm:$0xf] }
 0x277   :  { %7319 = vmatpush.bf16.msrb.mxu3 %v10116_v19  ;;  %v9956_v19 = vor.u32 %v12676_v26, %v9955_v24  ;;  %v9795_v24 = vld [vmem:[%s19901_s1 + $0xd08] sm:$0xf]  ;;  %v12636_v26 = vld [vmem:[%s19901_s1 + $0xd14] sm:$0xf0] }
 0x278   :  { %7281 = vmatpush.bf16.msrb.mxu0 %v9716_v5  ;;  %v6988_v5 = vadd.f32 %v17104_v51, %v6975_v34  ;;  %v9923_v34 = vld [vmem:[%s19901_s1 + $0xe08] sm:$0xf]  ;;  %v12700_v55 = vld [vmem:[%s19901_s1 + $0xf14] sm:$0xf0]  ;;  %v9796_v59 = vor.u32 %v12636_v26, %v9795_v24 }
 0x279   :  { %7294 = vmatpush.bf16.msrb.mxu1 %v9844_v63  ;;  %v10067_v63 = vld [vmem:[%s19901_s1 + $0xf28] sm:$0xf]  ;;  %v12820_v26 = vld [vmem:[%s19901_s1 + $0x12d4] sm:$0xf0] }
 0x27a   :  { %7307 = vmatpush.bf16.msrb.mxu2 %v9972_v1  ;;  %v12704_v1 = vld [vmem:[%s19901_s1 + $0xf34] sm:$0xf0]  ;;  %v7001_v51 = vadd.f32 %v17139_v43, %v6988_v5  ;;  %v10531_v24 = vld [vmem:[%s19901_s1 + $0x12c8] sm:$0xf] }
 0x27b   :  { %7320 = vmatpush.bf16.msrb.mxu3 %v10100_v14  ;;  %v9812_v14 = vor.u32 %v12640_v3, %v9811_v54  ;;  %v10068_v36 = vor.u32 %v12704_v1, %v10067_v63  ;;  %v12668_v43 = vld [vmem:[%s19901_s1 + $0xe14] sm:$0xf0]  ;;  %v10675_v63 = vld [vmem:[%s19901_s1 + $0x13e8] sm:$0xf] }
 0x27c   :  { %7282 = vmatpush.bf16.msrb.mxu0 %v9700_v52  ;;  %v7054_v52 = vpop.f32.mrf.mxu2  ;;  %v12792_v54 = vld [vmem:[%s19901_s1 + $0x11f4] sm:$0xf0]  ;;  %v7014_v60 = vadd.f32 %v17150_v0, %v7001_v51  ;;  %v9924_v5 = vor.u32 %v12668_v43, %v9923_v34  ;;  %v10275_v0 = vld [vmem:[%s19901_s1 + $0x10c8] sm:$0xf] }
 0x27d   :  { %7295 = vmatpush.bf16.msrb.mxu1 %v9828_v7  ;;  %v12760_v7 = vld [vmem:[%s19901_s1 + $0x10f4] sm:$0xf0]  ;;  %v10659_v34 = vld [vmem:[%s19901_s1 + $0x13c8] sm:$0xf] }
 0x27e   :  { %7308 = vmatpush.bf16.msrb.mxu2 %v9956_v19  ;;  %v10419_v19 = vld [vmem:[%s19901_s1 + $0x11e8] sm:$0xf]  ;;  %v12824_v3 = vld [vmem:[%s19901_s1 + $0x12f4] sm:$0xf0]  ;;  %v10292_v11 = vor.u32 %v12760_v7, %v10291_v50  ;;  %v7027_v58 = vadd.f32 %v17300_v48, %v7014_v60  ;;  %v10532_v50 = vor.u32 %v12820_v26, %v10531_v24 }
 0x27f   :  { %7321 = vmatpush.bf16.msrb.mxu3 %v10084_v53  ;;  %v10547_v53 = vld [vmem:[%s19901_s1 + $0x12e8] sm:$0xf]  ;;  %v12856_v1 = vld [vmem:[%s19901_s1 + $0x13f4] sm:$0xf0]  ;;  %v10420_v52 = vor.u32 %v12792_v54, %v10419_v19 }
 0x280   :  { %7283 = vmatpush.bf16.msrb.mxu0 %v9684_v61  ;;  %v10052_v61 = vor.u32 %v12700_v55, %v10051_v57  ;;  %v10548_v40 = vor.u32 %v12824_v3, %v10547_v53  ;;  %v12756_v51 = vld [vmem:[%s19901_s1 + $0x10d4] sm:$0xf0]  ;;  %v7040_v57 = vadd.f32 %v17308_v62, %v7027_v58  ;;  %v10259_v7 = vld [vmem:[%s19901_s1 + $0x10a8] sm:$0xf] }
 0x281   :  { %7296 = vmatpush.bf16.msrb.mxu1 %v9812_v14  ;;  %v10403_v14 = vld [vmem:[%s19901_s1 + $0x11c8] sm:$0xf]  ;;  %v12788_v48 = vld [vmem:[%s19901_s1 + $0x11d4] sm:$0xf0]  ;;  %v10276_v43 = vor.u32 %v12756_v51, %v10275_v0 }
 0x282   :  { %7309 = vmatpush.bf16.msrb.mxu2 %v9940_v17  ;;  %v10676_v17 = vor.u32 %v12856_v1, %v10675_v63  ;;  %v10404_v55 = vor.u32 %v12788_v48, %v10403_v14  ;;  %v12752_v19 = vld [vmem:[%s19901_s1 + $0x10b4] sm:$0xf0]  ;;  %v10515_v53 = vld [vmem:[%s19901_s1 + $0x12a8] sm:$0xf]  ;;  %v7053_v60 = vadd.f32 %v17343_v15, %v7040_v57 }
 0x283   :  { %7322 = vmatpush.bf16.msrb.mxu3 %v10068_v36  ;;  %v12852_v36 = vld [vmem:[%s19901_s1 + $0x13d4] sm:$0xf0]  ;;  %v10260_v63 = vor.u32 %v12752_v19, %v10259_v7  ;;  %v10371_v58 = vld [vmem:[%s19901_s1 + $0x1188] sm:$0xf] }
 0x284   :  { %7284 = vmatpush.bf16.msrb.mxu0 %v9668_v47  ;;  %v10387_v47 = vld [vmem:[%s19901_s1 + $0x11a8] sm:$0xf]  ;;  %v10660_v62 = vor.u32 %v12852_v36, %v10659_v34  ;;  %v12784_v54 = vld [vmem:[%s19901_s1 + $0x11b4] sm:$0xf0]  ;;  %v7066_v14 = vadd.f32 %v17356_v56, %v7053_v60 }
 0x285   :  { %7297 = vmatpush.bf16.msrb.mxu1 %v9796_v59  ;;  %v12816_v3 = vld [vmem:[%s19901_s1 + $0x12b4] sm:$0xf0]  ;;  %v10643_v59 = vld [vmem:[%s19901_s1 + $0x13a8] sm:$0xf]  ;;  %v10388_v1 = vor.u32 %v12784_v54, %v10387_v47  ;;  %v7091_v34 = vpop.f32.mrf.mxu1 }
 0x286   :  { %7310 = vmatpush.bf16.msrb.mxu2 %v9924_v5  ;;  %v12848_v5 = vld [vmem:[%s19901_s1 + $0x13b4] sm:$0xf0]  ;;  %v10516_v15 = vor.u32 %v12816_v3, %v10515_v53  ;;  %v10499_v0 = vld [vmem:[%s19901_s1 + $0x1288] sm:$0xf] }
 0x287   :  { %7323 = vmatpush.bf16.msrb.mxu3 %v10052_v61  ;;  %7285 = vmatmul.bf16.vlgmr.msrb.gmra.mxu0 %v14139_v23  ;;  %v10243_v61 = vld [vmem:[%s19901_s1 + $0x1088] sm:$0xf]  ;;  %v12812_v51 = vld [vmem:[%s19901_s1 + $0x1294] sm:$0xf0] }
 0x288   :  { %7329 = vmatpush.bf16.msra.mxu0 %v10292_v11  ;;  %7298 = vmatmul.bf16.vlgmr.msrb.gmra.mxu1 %v14152_v31  ;;  %v12748_v11 = vld [vmem:[%s19901_s1 + $0x1094] sm:$0xf0]  ;;  %v10627_v48 = vld [vmem:[%s19901_s1 + $0x1388] sm:$0xf]  ;;  %v10500_v57 = vor.u32 %v12812_v51, %v10499_v0 }
 0x289   :  { %7342 = vmatpush.bf16.msra.mxu1 %v10420_v52  ;;  %7311 = vmatmul.bf16.vlgmr.msrb.gmra.mxu2 %v14150_v28  ;;  %v10644_v52 = vor.u32 %v12848_v5, %v10643_v59  ;;  %v12844_v24 = vld [vmem:[%s19901_s1 + $0x1394] sm:$0xf0]  ;;  %v10244_v26 = vor.u32 %v12748_v11, %v10243_v61  ;;  %v10227_v56 = vld [vmem:[%s19901_s1 + $0x1068] sm:$0xf] }
 0x28a   :  { %7355 = vmatpush.bf16.msra.mxu2 %v10548_v40  ;;  %7324 = vmatmul.bf16.vlgmr.msrb.gmra.mxu3 %v14160_v35  ;;  %v12780_v40 = vld [vmem:[%s19901_s1 + $0x1194] sm:$0xf0]  ;;  %v10628_v7 = vor.u32 %v12844_v24, %v10627_v48  ;;  %v10483_v47 = vld [vmem:[%s19901_s1 + $0x1268] sm:$0xf] }
 0x28b   :  { %7368 = vmatpush.bf16.msra.mxu3 %v10676_v17  ;;  %v7078_v17 = vpop.f32.mrf.mxu0  ;;  %v12776_v19 = vld [vmem:[%s19901_s1 + $0x1174] sm:$0xf0]  ;;  %v10611_v54 = vld [vmem:[%s19901_s1 + $0x1368] sm:$0xf] }
 0x28c   :  { %7330 = vmatpush.bf16.msra.mxu0 %v10276_v43  ;;  %v7079_v36 = vadd.f32 %v7078_v17, %v7066_v14  ;;  %v10372_v43 = vor.u32 %v12780_v40, %v10371_v58  ;;  %v12840_v53 = vld [vmem:[%s19901_s1 + $0x1374] sm:$0xf0]  ;;  %v7104_v11 = vpop.f32.mrf.mxu2  ;;  %v10595_v14 = vld [vmem:[%s19901_s1 + $0x1348] sm:$0xf] }
 0x28d   :  { %7343 = vmatpush.bf16.msra.mxu1 %v10404_v55  ;;  %v12744_v55 = vld [vmem:[%s19901_s1 + $0x1074] sm:$0xf0]  ;;  %v10612_v61 = vor.u32 %v12840_v53, %v10611_v54  ;;  %v7117_v51 = vpop.f32.mrf.mxu3 }
 0x28e   :  { %7356 = vmatpush.bf16.msra.mxu2 %v10532_v50  ;;  %v10355_v50 = vld [vmem:[%s19901_s1 + $0x1168] sm:$0xf]  ;;  %v10228_v3 = vor.u32 %v12744_v55, %v10227_v56  ;;  %v7092_v60 = vadd.f32 %v7091_v34, %v7079_v36  ;;  %v12772_v58 = vld [vmem:[%s19901_s1 + $0x1154] sm:$0xf0]  ;;  %v7093_v34 = vpop.f32.mrf.mxu1 }
 0x28f   :  { %7369 = vmatpush.bf16.msra.mxu3 %v10660_v62  ;;  %v12808_v62 = vld [vmem:[%s19901_s1 + $0x1274] sm:$0xf0]  ;;  %v10356_v59 = vor.u32 %v12776_v19, %v10355_v50  ;;  %v10323_v55 = vld [vmem:[%s19901_s1 + $0x1128] sm:$0xf] }
 0x290   :  { %7331 = vmatpush.bf16.msra.mxu0 %v10260_v63  ;;  %v10484_v5 = vor.u32 %v12808_v62, %v10483_v47  ;;  %v10211_v63 = vld [vmem:[%s19901_s1 + $0x1048] sm:$0xf]  ;;  %v12804_v40 = vld [vmem:[%s19901_s1 + $0x1254] sm:$0xf0]  ;;  %v7105_v0 = vadd.f32 %v7104_v11, %v7092_v60 }
 0x291   :  { %7344 = vmatpush.bf16.msra.mxu1 %v10388_v1  ;;  %v12740_v1 = vld [vmem:[%s19901_s1 + $0x1054] sm:$0xf0]  ;;  %v10451_v19 = vld [vmem:[%s19901_s1 + $0x1228] sm:$0xf] }
 0x292   :  { %7357 = vmatpush.bf16.msra.mxu2 %v10516_v15  ;;  %v10339_v15 = vld [vmem:[%s19901_s1 + $0x1148] sm:$0xf]  ;;  %v12836_v17 = vld [vmem:[%s19901_s1 + $0x1354] sm:$0xf0]  ;;  %v10212_v24 = vor.u32 %v12740_v1, %v10211_v63  ;;  %v17570_v36 = vadd.f32 %v7117_v51, %v7105_v0 }
 0x293   :  { %7370 = vmatpush.bf16.msra.mxu3 %v10644_v52  ;;  %v10467_v52 = vld [vmem:[%s19901_s1 + $0x1248] sm:$0xf]  ;;  %v7080_v48 = vpop.f32.mrf.mxu0  ;;  %v12736_v56 = vld [vmem:[%s19901_s1 + $0x1034] sm:$0xf0] }
 0x294   :  { %7332 = vmatpush.bf16.msra.mxu0 %v10244_v26  ;;  %v10195_v26 = vld [vmem:[%s19901_s1 + $0x1028] sm:$0xf]  ;;  %v12768_v50 = vld [vmem:[%s19901_s1 + $0x1134] sm:$0xf0]  ;;  %v7959_v54 = vrot.slane %v17570_v36, 4  ;;  %v7982_v53 = vmul.f32 %v17570_v36, %v17570_v36  ;;  %v7106_v48 = vpop.f32.mrf.mxu2 }
 0x295   :  { %7345 = vmatpush.bf16.msra.mxu1 %v10372_v43  ;;  %v10340_v43 = vor.u32 %v12772_v58, %v10339_v15  ;;  %v12800_v47 = vld [vmem:[%s19901_s1 + $0x1234] sm:$0xf0]  ;;  %v10579_v62 = vld [vmem:[%s19901_s1 + $0x1328] sm:$0xf]  ;;  %v10324_v11 = vor.u32 %v12768_v50, %v10323_v55 }
 0x296   :  { %7358 = vmatpush.bf16.msra.mxu2 %v10500_v57  ;;  %v10468_v57 = vor.u32 %v12804_v40, %v10467_v52  ;;  %v10179_v60 = vld [vmem:[%s19901_s1 + $0x1008] sm:$0xf]  ;;  %v12764_v1 = vld [vmem:[%s19901_s1 + $0x1114] sm:$0xf0]  ;;  %v7960_v15 = vadd.f32 %v7959_v54, %v17570_v36  ;;  %v10452_v58 = vor.u32 %v12800_v47, %v10451_v19 }
 0x297   :  { %7371 = vmatpush.bf16.msra.mxu3 %v10628_v7  ;;  %v10596_v7 = vor.u32 %v12836_v17, %v10595_v14  ;;  %v10307_v63 = vld [vmem:[%s19901_s1 + $0x1108] sm:$0xf]  ;;  %v12796_v40 = vld [vmem:[%s19901_s1 + $0x1214] sm:$0xf0] }
 0x298   :  { %7333 = vmatpush.bf16.msra.mxu0 %v10228_v3  ;;  %v12832_v3 = vld [vmem:[%s19901_s1 + $0x1334] sm:$0xf0]  ;;  %v10435_v52 = vld [vmem:[%s19901_s1 + $0x1208] sm:$0xf] }
 0x299   :  { %7346 = vmatpush.bf16.msra.mxu1 %v10356_v59  ;;  %v10196_v59 = vor.u32 %v12736_v56, %v10195_v26  ;;  %v10580_v0 = vor.u32 %v12832_v3, %v10579_v62  ;;  %v10563_v51 = vld [vmem:[%s19901_s1 + $0x1308] sm:$0xf]  ;;  %v12828_v14 = vld [vmem:[%s19901_s1 + $0x1314] sm:$0xf0]  ;;  %v10308_v62 = vor.u32 %v12764_v1, %v10307_v63  ;;  %v10436_v54 = vor.u32 %v12796_v40, %v10435_v52 }
 0x29a   :  { %7359 = vmatpush.bf16.msra.mxu2 %v10484_v5  ;;  %v12732_v5 = vld [vmem:[%s19901_s1 + $0x1014] sm:$0xf0]  ;;  %v10803_v17 = vld [vmem:[%s19901_s1 + $0x14e8] sm:$0xf] }
 0x29b   :  { %7372 = vmatpush.bf16.msra.mxu3 %v10612_v61  ;;  %v7991_v61 = vrot.slane %v7982_v53, 4  ;;  %v12888_v34 = vld [vmem:[%s19901_s1 + $0x14f4] sm:$0xf0]  ;;  %v10180_v56 = vor.u32 %v12732_v5, %v10179_v60  ;;  %v11059_v50 = vld [vmem:[%s19901_s1 + $0x16e8] sm:$0xf]  ;;  %v10564_v60 = vor.u32 %v12828_v14, %v10563_v51 }
 0x29c   :  { %7334 = vmatpush.bf16.msra.mxu0 %v10212_v24  ;;  %v7961_v24 = vrot.slane %v7960_v15, 2  ;;  %v12920_v55 = vld [vmem:[%s19901_s1 + $0x15f4] sm:$0xf0]  ;;  %v10787_v5 = vld [vmem:[%s19901_s1 + $0x14c8] sm:$0xf] }
 0x29d   :  { %7347 = vmatpush.bf16.msra.mxu1 %v10340_v43  ;;  %v7992_v26 = vadd.f32 %v7991_v61, %v7982_v53  ;;  %v10931_v43 = vld [vmem:[%s19901_s1 + $0x15e8] sm:$0xf]  ;;  %v12984_v3 = vld [vmem:[%s19901_s1 + $0x17f4] sm:$0xf0] }
 0x29e   :  { %7360 = vmatpush.bf16.msra.mxu2 %v10468_v57  ;;  %v7119_v57 = vpop.f32.mrf.mxu3  ;;  %v7962_v19 = vadd.f32 %v7961_v24, %v7960_v15  ;;  %v11187_v53 = vld [vmem:[%s19901_s1 + $0x17e8] sm:$0xf]  ;;  %v12884_v1 = vld [vmem:[%s19901_s1 + $0x14d4] sm:$0xf0] }
 0x29f   :  { %7373 = vmatpush.bf16.msra.mxu3 %v10596_v7  ;;  %v12952_v7 = vld [vmem:[%s19901_s1 + $0x16f4] sm:$0xf0]  ;;  %v7993_v47 = vrot.slane %v7992_v26, 2  ;;  %v11188_v52 = vor.u32 %v12984_v3, %v11187_v53  ;;  %v11171_v48 = vld [vmem:[%s19901_s1 + $0x17c8] sm:$0xf] }
 0x2a0   :  { %7335 = vmatpush.bf16.msra.mxu0 %v10196_v59  ;;  %v10804_v59 = vor.u32 %v12888_v34, %v10803_v17  ;;  %v7963_v15 = vrot.slane %v7962_v19, 1  ;;  %v11060_v63 = vor.u32 %v12952_v7, %v11059_v50  ;;  %v12916_v40 = vld [vmem:[%s19901_s1 + $0x15d4] sm:$0xf0]  ;;  %v10771_v34 = vld [vmem:[%s19901_s1 + $0x14a8] sm:$0xf] }
 0x2a1   :  { %7348 = vmatpush.bf16.msra.mxu1 %v10324_v11  ;;  %v7994_v61 = vadd.f32 %v7993_v47, %v7992_v26  ;;  %v10932_v11 = vor.u32 %v12920_v55, %v10931_v43  ;;  %v12948_v51 = vld [vmem:[%s19901_s1 + $0x16d4] sm:$0xf0]  ;;  %v10788_v26 = vor.u32 %v12884_v1, %v10787_v5  ;;  %v10899_v7 = vld [vmem:[%s19901_s1 + $0x15a8] sm:$0xf] }
 0x2a2   :  { %7361 = vmatpush.bf16.msra.mxu2 %v10452_v58  ;;  %v10915_v58 = vld [vmem:[%s19901_s1 + $0x15c8] sm:$0xf]  ;;  %v7964_v14 = vadd.f32 %v7963_v15, %v7962_v19  ;;  %v12980_v24 = vld [vmem:[%s19901_s1 + $0x17d4] sm:$0xf0] }
 0x2a3   :  { %7374 = vmatpush.bf16.msra.mxu3 %v10580_v0  ;;  %v11043_v0 = vld [vmem:[%s19901_s1 + $0x16c8] sm:$0xf]  ;;  %v7995_v17 = vrot.slane %v7994_v61, 1  ;;  %v12880_v50 = vld [vmem:[%s19901_s1 + $0x14b4] sm:$0xf0]  ;;  %v11172_v19 = vor.u32 %v12980_v24, %v11171_v48 }
 0x2a4   :  { %7336 = vmatpush.bf16.msra.mxu0 %v10180_v56  ;;  %v17672_v43 = vmul.f32 0.125, %v7964_v14  ;;  %v10916_v56 = vor.u32 %v12916_v40, %v10915_v58  ;;  %v11044_v55 = vor.u32 %v12948_v51, %v11043_v0  ;;  %v12912_v47 = vld [vmem:[%s19901_s1 + $0x15b4] sm:$0xf0]  ;;  %v10772_v5 = vor.u32 %v12880_v50, %v10771_v34  ;;  %v10883_v58 = vld [vmem:[%s19901_s1 + $0x1588] sm:$0xf]  ;;  %v7130_v34 = vpop.f32.mrf.mxu0 }
 0x2a5   :  { %7349 = vmatpush.bf16.msra.mxu1 %v10308_v62  ;;  %v7996_v57 = vadd.f32 %v7995_v17, %v7994_v61  ;;  %v11027_v62 = vld [vmem:[%s19901_s1 + $0x16a8] sm:$0xf]  ;;  %v10900_v61 = vor.u32 %v12912_v47, %v10899_v7  ;;  %v12876_v1 = vld [vmem:[%s19901_s1 + $0x1494] sm:$0xf0] }
 0x2a6   :  { %7362 = vmatpush.bf16.msra.mxu2 %v10436_v54  ;;  %v12944_v54 = vld [vmem:[%s19901_s1 + $0x16b4] sm:$0xf0]  ;;  %v8014_v3 = vmul.f32 %v17672_v43, %v17672_v43  ;;  %v11011_v0 = vld [vmem:[%s19901_s1 + $0x1688] sm:$0xf] }
 0x2a7   :  { %7375 = vmatpush.bf16.msra.mxu3 %v10564_v60  ;;  %7337 = vmatmul.bf16.vlgmr.msra.gmra.mxu0 %v14349_v37  ;;  %v8010_v53 = vmul.f32 0.125, %v7996_v57  ;;  %v11155_v60 = vld [vmem:[%s19901_s1 + $0x17a8] sm:$0xf]  ;;  %v12908_v40 = vld [vmem:[%s19901_s1 + $0x1594] sm:$0xf0] }
 0x2a8   :  { %7381 = vmatpush.bf16.msrb.mxu0 %v10804_v59  ;;  %7350 = vmatmul.bf16.vlgmr.msra.gmra.mxu1 %v14362_v46  ;;  %v12976_v59 = vld [vmem:[%s19901_s1 + $0x17b4] sm:$0xf0]  ;;  %v11139_v17 = vld [vmem:[%s19901_s1 + $0x1788] sm:$0xf] }
 0x2a9   :  { %7394 = vmatpush.bf16.msrb.mxu1 %v10932_v11  ;;  %7363 = vmatmul.bf16.vlgmr.msra.gmra.mxu2 %v14360_v45  ;;  %v8018_v15 = vsub.f32 %v8010_v53, %v8014_v3  ;;  %v11028_v11 = vor.u32 %v12944_v54, %v11027_v62  ;;  %v12940_v51 = vld [vmem:[%s19901_s1 + $0x1694] sm:$0xf0]  ;;  %v10867_v7 = vld [vmem:[%s19901_s1 + $0x1568] sm:$0xf] }
 0x2aa   :  { %7407 = vmatpush.bf16.msrb.mxu2 %v11060_v63  ;;  %7376 = vmatmul.bf16.vlgmr.msra.gmra.mxu3 %v14370_v49  ;;  %v10755_v63 = vld [vmem:[%s19901_s1 + $0x1488] sm:$0xf]  ;;  %v12972_v48 = vld [vmem:[%s19901_s1 + $0x1794] sm:$0xf0] }
 0x2ab   :  { %7420 = vmatpush.bf16.msrb.mxu3 %v11188_v52  ;;  %v11156_v52 = vor.u32 %v12976_v59, %v11155_v60  ;;  %v8022_v14 = vmax.f32 %v8018_v15, 0.0  ;;  %v10756_v24 = vor.u32 %v12876_v1, %v10755_v63  ;;  %v12872_v50 = vld [vmem:[%s19901_s1 + $0x1474] sm:$0xf0]  ;;  %v11140_v47 = vor.u32 %v12972_v48, %v11139_v17  ;;  %v10995_v54 = vld [vmem:[%s19901_s1 + $0x1668] sm:$0xf] }
 0x2ac   :  { %7382 = vmatpush.bf16.msrb.mxu0 %v10788_v26  ;;  %v10739_v26 = vld [vmem:[%s19901_s1 + $0x1468] sm:$0xf]  ;;  %v12904_v62 = vld [vmem:[%s19901_s1 + $0x1574] sm:$0xf0] }
 0x2ad   :  { %7395 = vmatpush.bf16.msrb.mxu1 %v10916_v56  ;;  %v17728_v57 = vadd.f32 1e-05, %v8022_v14  ;;  %v10884_v56 = vor.u32 %v12908_v40, %v10883_v58  ;;  %v12936_v53 = vld [vmem:[%s19901_s1 + $0x1674] sm:$0xf0]  ;;  %v11123_v60 = vld [vmem:[%s19901_s1 + $0x1768] sm:$0xf]  ;;  %v10868_v15 = vor.u32 %v12904_v62, %v10867_v7  ;;  %v7156_v58 = vpop.f32.mrf.mxu2  ;;  %v7169_v17 = vpop.f32.mrf.mxu3 }
 0x2ae   :  { %7408 = vmatpush.bf16.msrb.mxu2 %v11044_v55  ;;  %v11012_v55 = vor.u32 %v12940_v51, %v11011_v0  ;;  %v12968_v59 = vld [vmem:[%s19901_s1 + $0x1774] sm:$0xf0]  ;;  %v10851_v1 = vld [vmem:[%s19901_s1 + $0x1548] sm:$0xf] }
 0x2af   :  { %7421 = vmatpush.bf16.msrb.mxu3 %v11172_v19  ;;  %v7143_v19 = vpop.f32.mrf.mxu1  ;;  %13243 = vrsqrt.f32 %v17728_v57  ;;  %v12868_v63 = vld [vmem:[%s19901_s1 + $0x1454] sm:$0xf0]  ;;  %v10979_v0 = vld [vmem:[%s19901_s1 + $0x1648] sm:$0xf]  ;;  %vm8049_vm4 = vweird.f32 %v17728_v57 }
 0x2b0   :  { %7383 = vmatpush.bf16.msrb.mxu0 %v10772_v5  ;;  %v7144_v3 = vadd.f32 %v7143_v19, %v7130_v34  ;;  %v10740_v5 = vor.u32 %v12872_v50, %v10739_v26  ;;  %v12900_v40 = vld [vmem:[%s19901_s1 + $0x1554] sm:$0xf0]  ;;  %v11107_v48 = vld [vmem:[%s19901_s1 + $0x1748] sm:$0xf] }
 0x2b1   :  { %7396 = vmatpush.bf16.msrb.mxu1 %v10900_v61  ;;  %v10996_v61 = vor.u32 %v12936_v53, %v10995_v54  ;;  %v12932_v51 = vld [vmem:[%s19901_s1 + $0x1654] sm:$0xf0]  ;;  %v10852_v50 = vor.u32 %v12900_v40, %v10851_v1  ;;  %v10707_v19 = vld [vmem:[%s19901_s1 + $0x1428] sm:$0xf] }
 0x2b2   :  { %7409 = vmatpush.bf16.msrb.mxu2 %v11028_v11  ;;  %v10723_v11 = vld [vmem:[%s19901_s1 + $0x1448] sm:$0xf]  ;;  %v7157_v14 = vadd.f32 %v7156_v58, %v7144_v3  ;;  %v10980_v7 = vor.u32 %v12932_v51, %v10979_v0  ;;  %v12860_v58 = vld [vmem:[%s19901_s1 + $0x1414] sm:$0xf0] }
 0x2b3   :  { %7422 = vmatpush.bf16.msrb.mxu3 %v11156_v52  ;;  %v11124_v52 = vor.u32 %v12968_v59, %v11123_v60  ;;  %v10724_v26 = vor.u32 %v12868_v63, %v10723_v11  ;;  %v10835_v62 = vld [vmem:[%s19901_s1 + $0x1528] sm:$0xf]  ;;  %v12896_v60 = vld [vmem:[%s19901_s1 + $0x1534] sm:$0xf0] }
 0x2b4   :  { %7384 = vmatpush.bf16.msrb.mxu0 %v10756_v24  ;;  %v12964_v24 = vld [vmem:[%s19901_s1 + $0x1754] sm:$0xf0]  ;;  %v17776_v34 = vadd.f32 %v7169_v17, %v7157_v14  ;;  %v10963_v59 = vld [vmem:[%s19901_s1 + $0x1628] sm:$0xf]  ;;  %v10836_v0 = vor.u32 %v12896_v60, %v10835_v62 }
 0x2b5   :  { %7397 = vmatpush.bf16.msrb.mxu1 %v10884_v56  ;;  %v7132_v56 = vpop.f32.mrf.mxu0  ;;  %v11108_v3 = vor.u32 %v12964_v24, %v11107_v48  ;;  %v10691_v11 = vld [vmem:[%s19901_s1 + $0x1408] sm:$0xf]  ;;  %v12892_v40 = vld [vmem:[%s19901_s1 + $0x1514] sm:$0xf0]  ;;  %v7158_v24 = vpop.f32.mrf.mxu2 }
 0x2b6   :  { %7410 = vmatpush.bf16.msrb.mxu2 %v11012_v55  ;;  %v17778_v55 = vpop.eup %13243  ;;  %v10947_v14 = vld [vmem:[%s19901_s1 + $0x1608] sm:$0xf]  ;;  %v12924_v17 = vld [vmem:[%s19901_s1 + $0x1614] sm:$0xf0] }
 0x2b7   :  { %7423 = vmatpush.bf16.msrb.mxu3 %v11140_v47  ;;  %v12864_v47 = vld [vmem:[%s19901_s1 + $0x1434] sm:$0xf0]  ;;  %v7145_v54 = vpop.f32.mrf.mxu1  ;;  %v8044_v53 = vmul.f32 %v17778_v55, %v17728_v57  ;;  %v11075_v48 = vld [vmem:[%s19901_s1 + $0x1708] sm:$0xf]  ;;  %vm8050_vm3 = vweird.f32 %v17778_v55 }
 0x2b8   :  { %7385 = vmatpush.bf16.msrb.mxu0 %v10740_v5  ;;  %v12928_v5 = vld [vmem:[%s19901_s1 + $0x1634] sm:$0xf0]  ;;  %v10708_v1 = vor.u32 %v12864_v47, %v10707_v19  ;;  %v7171_v19 = vpop.f32.mrf.mxu3  ;;  %v11443_v62 = vld [vmem:[%s19901_s1 + $0x19e8] sm:$0xf]  ;;  %vm8051_vm5 = vmor %vm8049_vm4, %vm8050_vm3 }
 0x2b9   :  { %7398 = vmatpush.bf16.msrb.mxu1 %v10868_v15  ;;  %v11091_v15 = vld [vmem:[%s19901_s1 + $0x1728] sm:$0xf]  ;;  %v8045_v63 = vmul.f32 %v17778_v55, %v8044_v53  ;;  %v10964_v51 = vor.u32 %v12928_v5, %v10963_v59  ;;  %v13016_v47 = vld [vmem:[%s19901_s1 + $0x18f4] sm:$0xf0] }
 0x2ba   :  { %7411 = vmatpush.bf16.msrb.mxu2 %v10996_v61  ;;  %v12960_v61 = vld [vmem:[%s19901_s1 + $0x1734] sm:$0xf0]  ;;  %v11571_v60 = vld [vmem:[%s19901_s1 + $0x1ae8] sm:$0xf] }
 0x2bb   :  { %7424 = vmatpush.bf16.msrb.mxu3 %v11124_v52  ;;  %v10819_v52 = vld [vmem:[%s19901_s1 + $0x1508] sm:$0xf]  ;;  %v11092_v56 = vor.u32 %v12960_v61, %v11091_v15  ;;  %v13048_v54 = vld [vmem:[%s19901_s1 + $0x19f4] sm:$0xf0]  ;;  %v10948_v15 = vor.u32 %v12924_v17, %v10947_v14 }
 0x2bc   :  { %7386 = vmatpush.bf16.msrb.mxu0 %v10724_v26  ;;  %v8046_v26 = vmul.f32 0.5, %v8045_v63  ;;  %v13080_v59 = vld [vmem:[%s19901_s1 + $0x1af4] sm:$0xf0]  ;;  %v10820_v5 = vor.u32 %v12892_v40, %v10819_v52  ;;  %v11699_v61 = vld [vmem:[%s19901_s1 + $0x1be8] sm:$0xf]  ;;  %v8026_v40 = vsub.f32 %v17570_v36, %v17672_v43  ;;  %v11444_v14 = vor.u32 %v13048_v54, %v11443_v62 }
 0x2bd   :  { %7399 = vmatpush.bf16.msrb.mxu1 %v10852_v50  ;;  %v12956_v50 = vld [vmem:[%s19901_s1 + $0x1714] sm:$0xf0]  ;;  %v11299_v52 = vld [vmem:[%s19901_s1 + $0x18c8] sm:$0xf]  ;;  %v11572_v57 = vor.u32 %v13080_v59, %v11571_v60 }
 0x2be   :  { %7412 = vmatpush.bf16.msrb.mxu2 %v10980_v7  ;;  %v11315_v7 = vld [vmem:[%s19901_s1 + $0x18e8] sm:$0xf]  ;;  %v8047_v53 = vsub.f32 1.5, %v8046_v26  ;;  %v13012_v17 = vld [vmem:[%s19901_s1 + $0x18d4] sm:$0xf0] }
 0x2bf   :  { %7425 = vmatpush.bf16.msrb.mxu3 %v11108_v3  ;;  %v10692_v3 = vor.u32 %v12860_v58, %v10691_v11  ;;  %v13112_v11 = vld [vmem:[%s19901_s1 + $0x1bf4] sm:$0xf0]  ;;  %v11316_v58 = vor.u32 %v13016_v47, %v11315_v7  ;;  %v11555_v26 = vld [vmem:[%s19901_s1 + $0x1ac8] sm:$0xf]  ;;  %v13250_v7 = vld [vmem:[%s19904_s3] sm:$0xf]  ;;  %v11300_v62 = vor.u32 %v13012_v17, %v11299_v52 }
 0x2c0   :  { %7387 = vmatpush.bf16.msrb.mxu0 %v10708_v1  ;;  %v8048_v63 = vmul.f32 %v17778_v55, %v8047_v53  ;;  %v11076_v1 = vor.u32 %v12956_v50, %v11075_v48  ;;  %v11427_v48 = vld [vmem:[%s19901_s1 + $0x19c8] sm:$0xf]  ;;  %v11700_v43 = vor.u32 %v13112_v11, %v11699_v61  ;;  %v13044_v24 = vld [vmem:[%s19901_s1 + $0x19d4] sm:$0xf0] }
 0x2c1   :  { %7400 = vmatpush.bf16.msrb.mxu1 %v10836_v0  ;;  %v13249_v0 = vld [vmem:[%s19903_s2] sm:$0xf]  ;;  %v11683_v19 = vld [vmem:[%s19901_s1 + $0x1bc8] sm:$0xf]  ;;  %v13108_v47 = vld [vmem:[%s19901_s1 + $0x1bd4] sm:$0xf0]  ;;  %v11428_v53 = vor.u32 %v13044_v24, %v11427_v48 }
 0x2c2   :  { %7413 = vmatpush.bf16.msrb.mxu2 %v10964_v51  ;;  %v8080_v51 = vperm.slane %v13249_v0, 1  ;;  %v8052_v36 = vsel %vm8051_vm5, %v17778_v55, %v8048_v63  ;;  %v8094_v55 = vperm.slane %v13250_v7, 1  ;;  %v11283_v60 = vld [vmem:[%s19901_s1 + $0x18a8] sm:$0xf]  ;;  %v13008_v59 = vld [vmem:[%s19901_s1 + $0x18b4] sm:$0xf0] }
 0x2c3   :  { %7426 = vmatpush.bf16.msrb.mxu3 %v11092_v56  ;;  %v13076_v56 = vld [vmem:[%s19901_s1 + $0x1ad4] sm:$0xf0]  ;;  %v8074_v50 = vmul.f32 %v8052_v36, %v8026_v40  ;;  %v11539_v11 = vld [vmem:[%s19901_s1 + $0x1aa8] sm:$0xf]  ;;  %v11284_v40 = vor.u32 %v13008_v59, %v11283_v60 }
 0x2c4   :  { %7388 = vmatpush.bf16.msrb.mxu0 %v10692_v3  ;;  %v11556_v3 = vor.u32 %v13076_v56, %v11555_v26  ;;  %v13040_v61 = vld [vmem:[%s19901_s1 + $0x19b4] sm:$0xf0]  ;;  %v11267_v0 = vld [vmem:[%s19901_s1 + $0x1888] sm:$0xf] }
 0x2c5   :  { %7401 = vmatpush.bf16.msrb.mxu1 %v10820_v5  ;;  %v8088_v54 = vmul.f32 %v8080_v51, %v8074_v50  ;;  %v11411_v5 = vld [vmem:[%s19901_s1 + $0x19a8] sm:$0xf]  ;;  %v13072_v63 = vld [vmem:[%s19901_s1 + $0x1ab4] sm:$0xf0]  ;;  %v7195_v59 = vpop.f32.mrf.mxu1 }
 0x2c6   :  { %7414 = vmatpush.bf16.msrb.mxu2 %v10948_v15  ;;  %v11684_v15 = vor.u32 %v13108_v47, %v11683_v19  ;;  %v13104_v52 = vld [vmem:[%s19901_s1 + $0x1bb4] sm:$0xf0]  ;;  %v11395_v48 = vld [vmem:[%s19901_s1 + $0x1988] sm:$0xf]  ;;  %v7182_v47 = vpop.f32.mrf.mxu0 }
 0x2c7   :  { %7427 = vmatpush.bf16.msrb.mxu3 %v11076_v1  ;;  %7389 = vmatmul.bf16.vlgmr.msrb.gmra.mxu0 %v14561_v8  ;;  %v8102_v1 = vadd.f32 %v8094_v55, %v8088_v54  ;;  %v13004_v17 = vld [vmem:[%s19901_s1 + $0x1894] sm:$0xf0]  ;;  %v11523_v24 = vld [vmem:[%s19901_s1 + $0x1a88] sm:$0xf]  ;;  %v7183_v60 = vadd.f32 %v7182_v47, %v17776_v34 }
 0x2c8   :  { %7433 = vmatpush.bf16.msra.mxu0 %v11316_v58  ;;  %7402 = vmatmul.bf16.vlgmr.msrb.gmra.mxu1 %v14574_v13  ;;  %v11667_v58 = vld [vmem:[%s19901_s1 + $0x1ba8] sm:$0xf]  ;;  %v13068_v26 = vld [vmem:[%s19901_s1 + $0x1a94] sm:$0xf0]  ;;  %v11268_v55 = vor.u32 %v13004_v17, %v11267_v0 }
 0x2c9   :  { %7446 = vmatpush.bf16.msra.mxu1 %v11444_v14  ;;  %7415 = vmatmul.bf16.vlgmr.msrb.gmra.mxu2 %v14572_v12  ;;  %v8106_v51 = vmax.f32 %v8102_v1, 0.0  ;;  %v11412_v14 = vor.u32 %v13040_v61, %v11411_v5  ;;  %v11668_v36 = vor.u32 %v13104_v52, %v11667_v58  ;;  %v11651_v50 = vld [vmem:[%s19901_s1 + $0x1b88] sm:$0xf]  ;;  %v13100_v7 = vld [vmem:[%s19901_s1 + $0x1b94] sm:$0xf0]  ;;  %v11524_v54 = vor.u32 %v13068_v26, %v11523_v24 }
 0x2ca   :  { %7459 = vmatpush.bf16.msra.mxu2 %v11572_v57  ;;  %7428 = vmatmul.bf16.vlgmr.msrb.gmra.mxu3 %v14582_v16  ;;  %v11540_v57 = vor.u32 %v13072_v63, %v11539_v11  ;;  %v11251_v19 = vld [vmem:[%s19901_s1 + $0x1868] sm:$0xf]  ;;  %v11652_v5 = vor.u32 %v13100_v7, %v11651_v50  ;;  %v13064_v11 = vld [vmem:[%s19901_s1 + $0x1a74] sm:$0xf0]  ;;  %v7196_v1 = vadd.f32 %v7195_v59, %v7183_v60 }
 0x2cb   :  { %7472 = vmatpush.bf16.msra.mxu3 %v11700_v43  ;;  %v13036_v43 = vld [vmem:[%s19901_s1 + $0x1994] sm:$0xf0]  ;;  %v8110_v56 = vmin.f32 %v8106_v51, 6.0  ;;  %v11507_v61 = vld [vmem:[%s19901_s1 + $0x1a68] sm:$0xf] }
 0x2cc   :  { %7434 = vmatpush.bf16.msra.mxu0 %v11300_v62  ;;  %v11396_v62 = vor.u32 %v13036_v43, %v11395_v48  ;;  %v11635_v63 = vld [vmem:[%s19901_s1 + $0x1b68] sm:$0xf]  ;;  %v13096_v34 = vld [vmem:[%s19901_s1 + $0x1b74] sm:$0xf0] }
 0x2cd   :  { %7447 = vmatpush.bf16.msra.mxu1 %v11428_v53  ;;  %8114 = vst [vmem:[%s19905_s4 + $0x8] sm:$0xff] %v8110_v56  ;;  %v13000_v53 = vld [vmem:[%s19901_s1 + $0x1874] sm:$0xf0]  ;;  %v11235_v0 = vld [vmem:[%s19901_s1 + $0x1848] sm:$0xf]  ;;  %v11636_v17 = vor.u32 %v13096_v34, %v11635_v63  ;;  %v7221_v26 = vpop.f32.mrf.mxu3  ;;  %v7197_v60 = vpop.f32.mrf.mxu1 }
 0x2ce   :  { %7460 = vmatpush.bf16.msra.mxu2 %v11556_v3  ;;  %v11379_v3 = vld [vmem:[%s19901_s1 + $0x1968] sm:$0xf]  ;;  %v11252_v58 = vor.u32 %v13000_v53, %v11251_v19  ;;  %v12996_v51 = vld [vmem:[%s19901_s1 + $0x1854] sm:$0xf0]  ;;  %v7184_v19 = vpop.f32.mrf.mxu0 }
 0x2cf   :  { %7473 = vmatpush.bf16.msra.mxu3 %v11684_v15  ;;  %v13032_v15 = vld [vmem:[%s19901_s1 + $0x1974] sm:$0xf0]  ;;  %v11619_v56 = vld [vmem:[%s19901_s1 + $0x1b48] sm:$0xf]  ;;  %v11236_v7 = vor.u32 %v12996_v51, %v11235_v0 }
 0x2d0   :  { %7435 = vmatpush.bf16.msra.mxu0 %v11284_v40  ;;  %v11380_v52 = vor.u32 %v13032_v15, %v11379_v3  ;;  %v11508_v40 = vor.u32 %v13064_v11, %v11507_v61  ;;  %v13028_v48 = vld [vmem:[%s19901_s1 + $0x1954] sm:$0xf0]  ;;  %v11347_v3 = vld [vmem:[%s19901_s1 + $0x1928] sm:$0xf] }
 0x2d1   :  { %7448 = vmatpush.bf16.msra.mxu1 %v11412_v14  ;;  %v11363_v14 = vld [vmem:[%s19901_s1 + $0x1948] sm:$0xf]  ;;  %v13060_v43 = vld [vmem:[%s19901_s1 + $0x1a54] sm:$0xf0] }
 0x2d2   :  { %7461 = vmatpush.bf16.msra.mxu2 %v11540_v57  ;;  %v7208_v57 = vpop.f32.mrf.mxu2  ;;  %v13092_v50 = vld [vmem:[%s19901_s1 + $0x1b54] sm:$0xf0]  ;;  %v11364_v47 = vor.u32 %v13028_v48, %v11363_v14  ;;  %v11475_v15 = vld [vmem:[%s19901_s1 + $0x1a28] sm:$0xf] }
 0x2d3   :  { %7474 = vmatpush.bf16.msra.mxu3 %v11668_v36  ;;  %v11491_v36 = vld [vmem:[%s19901_s1 + $0x1a48] sm:$0xf]  ;;  %v7209_v24 = vadd.f32 %v7208_v57, %v7196_v1  ;;  %v12992_v53 = vld [vmem:[%s19901_s1 + $0x1834] sm:$0xf0]  ;;  %v11620_v59 = vor.u32 %v13092_v50, %v11619_v56 }
 0x2d4   :  { %7436 = vmatpush.bf16.msra.mxu0 %v11268_v55  ;;  %v13056_v61 = vld [vmem:[%s19901_s1 + $0x1a34] sm:$0xf0]  ;;  %v11603_v11 = vld [vmem:[%s19901_s1 + $0x1b28] sm:$0xf] }
 0x2d5   :  { %7449 = vmatpush.bf16.msra.mxu1 %v11396_v62  ;;  %v17997_v55 = vadd.f32 %v7221_v26, %v7209_v24  ;;  %v11492_v62 = vor.u32 %v13060_v43, %v11491_v36  ;;  %v13088_v63 = vld [vmem:[%s19901_s1 + $0x1b34] sm:$0xf0]  ;;  %v11203_v1 = vld [vmem:[%s19901_s1 + $0x1808] sm:$0xf]  ;;  %v7223_v24 = vpop.f32.mrf.mxu3 }
 0x2d6   :  { %7462 = vmatpush.bf16.msra.mxu2 %v11524_v54  ;;  %v11219_v54 = vld [vmem:[%s19901_s1 + $0x1828] sm:$0xf]  ;;  %v13020_v51 = vld [vmem:[%s19901_s1 + $0x1914] sm:$0xf0] }
 0x2d7   :  { %7475 = vmatpush.bf16.msra.mxu3 %v11652_v5  ;;  %v13024_v5 = vld [vmem:[%s19901_s1 + $0x1934] sm:$0xf0]  ;;  %v11220_v34 = vor.u32 %v12992_v53, %v11219_v54  ;;  %v11331_v0 = vld [vmem:[%s19901_s1 + $0x1908] sm:$0xf] }
 0x2d8   :  { %7437 = vmatpush.bf16.msra.mxu0 %v11252_v58  ;;  %v12988_v58 = vld [vmem:[%s19901_s1 + $0x1814] sm:$0xf0]  ;;  %v11459_v14 = vld [vmem:[%s19901_s1 + $0x1a08] sm:$0xf]  ;;  %v11332_v54 = vor.u32 %v13020_v51, %v11331_v0 }
 0x2d9   :  { %7450 = vmatpush.bf16.msra.mxu1 %v11380_v52  ;;  %v11348_v52 = vor.u32 %v13024_v5, %v11347_v3  ;;  %v13052_v48 = vld [vmem:[%s19901_s1 + $0x1a14] sm:$0xf0]  ;;  %v11587_v36 = vld [vmem:[%s19901_s1 + $0x1b08] sm:$0xf] }
 0x2da   :  { %7463 = vmatpush.bf16.msra.mxu2 %v11508_v40  ;;  %v11476_v40 = vor.u32 %v13056_v61, %v11475_v15  ;;  %v7210_v57 = vpop.f32.mrf.mxu2  ;;  %v13084_v43 = vld [vmem:[%s19901_s1 + $0x1b14] sm:$0xf0]  ;;  %v11827_v26 = vld [vmem:[%s19901_s1 + $0x1ce8] sm:$0xf]  ;;  %v11460_v53 = vor.u32 %v13052_v48, %v11459_v14 }
 0x2db   :  { %7476 = vmatpush.bf16.msra.mxu3 %v11636_v17  ;;  %v11604_v17 = vor.u32 %v13088_v63, %v11603_v11  ;;  %v13144_v56 = vld [vmem:[%s19901_s1 + $0x1cf4] sm:$0xf0]  ;;  %v11955_v50 = vld [vmem:[%s19901_s1 + $0x1de8] sm:$0xf] }
 0x2dc   :  { %7438 = vmatpush.bf16.msra.mxu0 %v11236_v7  ;;  %v11204_v7 = vor.u32 %v12988_v58, %v11203_v1  ;;  %v13176_v19 = vld [vmem:[%s19901_s1 + $0x1df4] sm:$0xf0]  ;;  %v12211_v3 = vld [vmem:[%s19901_s1 + $0x1fe8] sm:$0xf]  ;;  %v11828_v5 = vor.u32 %v13144_v56, %v11827_v26 }
 0x2dd   :  { %7451 = vmatpush.bf16.msra.mxu1 %v11364_v47  ;;  %v12083_v47 = vld [vmem:[%s19901_s1 + $0x1ee8] sm:$0xf]  ;;  %v13240_v60 = vld [vmem:[%s19901_s1 + $0x1ff4] sm:$0xf0]  ;;  %v11956_v15 = vor.u32 %v13176_v19, %v11955_v50 }
 0x2de   :  { %7464 = vmatpush.bf16.msra.mxu2 %v11492_v62  ;;  %v13208_v62 = vld [vmem:[%s19901_s1 + $0x1ef4] sm:$0xf0]  ;;  %v11811_v11 = vld [vmem:[%s19901_s1 + $0x1cc8] sm:$0xf]  ;;  %v12212_v1 = vor.u32 %v13240_v60, %v12211_v3 }
 0x2df   :  { %7477 = vmatpush.bf16.msra.mxu3 %v11620_v59  ;;  %v11588_v59 = vor.u32 %v13084_v43, %v11587_v36  ;;  %v12084_v61 = vor.u32 %v13208_v62, %v12083_v47  ;;  %v13140_v63 = vld [vmem:[%s19901_s1 + $0x1cd4] sm:$0xf0]  ;;  %v12195_v0 = vld [vmem:[%s19901_s1 + $0x1fc8] sm:$0xf] }
 0x2e0   :  { %7439 = vmatpush.bf16.msra.mxu0 %v11220_v34  ;;  %v11939_v34 = vld [vmem:[%s19901_s1 + $0x1dc8] sm:$0xf]  ;;  %v13172_v58 = vld [vmem:[%s19901_s1 + $0x1dd4] sm:$0xf0]  ;;  %v11812_v14 = vor.u32 %v13140_v63, %v11811_v11 }
 0x2e1   :  { %7452 = vmatpush.bf16.msra.mxu1 %v11348_v52  ;;  %v12067_v52 = vld [vmem:[%s19901_s1 + $0x1ec8] sm:$0xf]  ;;  %v13236_v51 = vld [vmem:[%s19901_s1 + $0x1fd4] sm:$0xf0]  ;;  %v11940_v57 = vor.u32 %v13172_v58, %v11939_v34 }
 0x2e2   :  { %7465 = vmatpush.bf16.msra.mxu2 %v11476_v40  ;;  %v13204_v40 = vld [vmem:[%s19901_s1 + $0x1ed4] sm:$0xf0]  ;;  %v11795_v48 = vld [vmem:[%s19901_s1 + $0x1ca8] sm:$0xf]  ;;  %v12196_v24 = vor.u32 %v13236_v51, %v12195_v0 }
 0x2e3   :  { %7478 = vmatpush.bf16.msra.mxu3 %v11604_v17  ;;  %v12068_v17 = vor.u32 %v13204_v40, %v12067_v52  ;;  %v13136_v36 = vld [vmem:[%s19901_s1 + $0x1cb4] sm:$0xf0]  ;;  %v11923_v43 = vld [vmem:[%s19901_s1 + $0x1da8] sm:$0xf] }
 0x2e4   :  { %7440 = vmatpush.bf16.msra.mxu0 %v11204_v7  ;;  %v13168_v26 = vld [vmem:[%s19901_s1 + $0x1db4] sm:$0xf0]  ;;  %v12051_v56 = vld [vmem:[%s19901_s1 + $0x1ea8] sm:$0xf]  ;;  %v11796_v47 = vor.u32 %v13136_v36, %v11795_v48  ;;  %v7234_v11 = vpop.f32.mrf.mxu0 }
 0x2e5   :  { %7453 = vmatpush.bf16.msra.mxu1 %v11332_v54  ;;  %v13200_v50 = vld [vmem:[%s19901_s1 + $0x1eb4] sm:$0xf0]  ;;  %v12179_v7 = vld [vmem:[%s19901_s1 + $0x1fa8] sm:$0xf]  ;;  %v11924_v62 = vor.u32 %v13168_v26, %v11923_v43  ;;  %v7247_v52 = vpop.f32.mrf.mxu1 }
 0x2e6   :  { %7466 = vmatpush.bf16.msra.mxu2 %v11460_v53  ;;  %v13232_v19 = vld [vmem:[%s19901_s1 + $0x1fb4] sm:$0xf0]  ;;  %v12052_v54 = vor.u32 %v13200_v50, %v12051_v56  ;;  %v11779_v53 = vld [vmem:[%s19901_s1 + $0x1c88] sm:$0xf] }
 0x2e7   :  { %7479 = vmatpush.bf16.msra.mxu3 %v11588_v59  ;;  %7441 = vmatmul.bf16.vlgmr.msra.gmra.mxu0 %v14774_v2  ;;  %v13132_v3 = vld [vmem:[%s19901_s1 + $0x1c94] sm:$0xf0]  ;;  %v11907_v60 = vld [vmem:[%s19901_s1 + $0x1d88] sm:$0xf]  ;;  %v12180_v59 = vor.u32 %v13232_v19, %v12179_v7 }
 0x2e8   :  { %7485 = vmatpush.bf16.msrb.mxu0 %v11828_v5  ;;  %7454 = vmatmul.bf16.vlgmr.msra.gmra.mxu1 %v14787_v10  ;;  %v13164_v5 = vld [vmem:[%s19901_s1 + $0x1d94] sm:$0xf0]  ;;  %v12163_v63 = vld [vmem:[%s19901_s1 + $0x1f88] sm:$0xf]  ;;  %v11780_v58 = vor.u32 %v13132_v3, %v11779_v53 }
 0x2e9   :  { %7498 = vmatpush.bf16.msrb.mxu1 %v11956_v15  ;;  %7467 = vmatmul.bf16.vlgmr.msra.gmra.mxu2 %v14785_v9  ;;  %v12035_v15 = vld [vmem:[%s19901_s1 + $0x1e88] sm:$0xf]  ;;  %v13228_v34 = vld [vmem:[%s19901_s1 + $0x1f94] sm:$0xf0]  ;;  %v11908_v40 = vor.u32 %v13164_v5, %v11907_v60 }
 0x2ea   :  { %7511 = vmatpush.bf16.msrb.mxu2 %v12084_v61  ;;  %7480 = vmatmul.bf16.vlgmr.msra.gmra.mxu3 %v14795_v22  ;;  %v13196_v61 = vld [vmem:[%s19901_s1 + $0x1e94] sm:$0xf0]  ;;  %v11763_v51 = vld [vmem:[%s19901_s1 + $0x1c68] sm:$0xf] }
 0x2eb   :  { %7524 = vmatpush.bf16.msrb.mxu3 %v12212_v1  ;;  %v7235_v1 = vadd.f32 %v7234_v11, %v17997_v55  ;;  %v12036_v0 = vor.u32 %v13196_v61, %v12035_v15  ;;  %v12164_v55 = vor.u32 %v13228_v34, %v12163_v63  ;;  %v13160_v48 = vld [vmem:[%s19901_s1 + $0x1d74] sm:$0xf0]  ;;  %v12019_v36 = vld [vmem:[%s19901_s1 + $0x1e68] sm:$0xf] }
 0x2ec   :  { %7486 = vmatpush.bf16.msrb.mxu0 %v11812_v14  ;;  %v13128_v14 = vld [vmem:[%s19901_s1 + $0x1c74] sm:$0xf0]  ;;  %v11747_v19 = vld [vmem:[%s19901_s1 + $0x1c48] sm:$0xf]  ;;  %v7260_v53 = vpop.f32.mrf.mxu2  ;;  %v7236_v63 = vpop.f32.mrf.mxu0 }
 0x2ed   :  { %7499 = vmatpush.bf16.msrb.mxu1 %v11940_v57  ;;  %v11891_v57 = vld [vmem:[%s19901_s1 + $0x1d68] sm:$0xf]  ;;  %v13192_v43 = vld [vmem:[%s19901_s1 + $0x1e74] sm:$0xf0]  ;;  %v11764_v56 = vor.u32 %v13128_v14, %v11763_v51  ;;  %v7273_v15 = vpop.f32.mrf.mxu3 }
 0x2ee   :  { %7512 = vmatpush.bf16.msrb.mxu2 %v12068_v17  ;;  %v7248_v17 = vadd.f32 %v7247_v52, %v7235_v1  ;;  %v13224_v26 = vld [vmem:[%s19901_s1 + $0x1f74] sm:$0xf0]  ;;  %v11892_v50 = vor.u32 %v13160_v48, %v11891_v57  ;;  %v12020_v7 = vor.u32 %v13192_v43, %v12019_v36  ;;  %v12003_v60 = vld [vmem:[%s19901_s1 + $0x1e48] sm:$0xf]  ;;  %v7249_v1 = vpop.f32.mrf.mxu1 }
 0x2ef   :  { %7525 = vmatpush.bf16.msrb.mxu3 %v12196_v24  ;;  %v12147_v24 = vld [vmem:[%s19901_s1 + $0x1f68] sm:$0xf]  ;;  %v13156_v3 = vld [vmem:[%s19901_s1 + $0x1d54] sm:$0xf0]  ;;  %v12310_v1 = vld [vmem:[%s19901_s1 + $0x2ec] sm:$0xf] }
 0x2f0   :  { %7487 = vmatpush.bf16.msrb.mxu0 %v11796_v47  ;;  %v13124_v47 = vld [vmem:[%s19901_s1 + $0x1c54] sm:$0xf0]  ;;  %v7261_v5 = vadd.f32 %v7260_v53, %v7248_v17  ;;  %v12131_v61 = vld [vmem:[%s19901_s1 + $0x1f48] sm:$0xf] }
 0x2f1   :  { %7500 = vmatpush.bf16.msrb.mxu1 %v11924_v62  ;;  %v11875_v62 = vld [vmem:[%s19901_s1 + $0x1d48] sm:$0xf]  ;;  %v13220_v11 = vld [vmem:[%s19901_s1 + $0x1f54] sm:$0xf0]  ;;  %v11748_v34 = vor.u32 %v13124_v47, %v11747_v19 }
 0x2f2   :  { %7513 = vmatpush.bf16.msrb.mxu2 %v12052_v54  ;;  %v12148_v54 = vor.u32 %v13224_v26, %v12147_v24  ;;  %v11876_v52 = vor.u32 %v13156_v3, %v11875_v62  ;;  %v13120_v51 = vld [vmem:[%s19901_s1 + $0x1c34] sm:$0xf0]  ;;  %v11859_v14 = vld [vmem:[%s19901_s1 + $0x1d28] sm:$0xf]  ;;  %v12132_v57 = vor.u32 %v13220_v11, %v12131_v61  ;;  %v12278_v61 = vld [vmem:[%s19901_s1 + $0x1ec] sm:$0xf] }
 0x2f3   :  { %7526 = vmatpush.bf16.msrb.mxu3 %v12180_v59  ;;  %v13188_v59 = vld [vmem:[%s19901_s1 + $0x1e54] sm:$0xf0]  ;;  %v11987_v17 = vld [vmem:[%s19901_s1 + $0x1e28] sm:$0xf] }
 0x2f4   :  { %7488 = vmatpush.bf16.msrb.mxu0 %v11780_v58  ;;  %v18196_v58 = vadd.f32 %v7273_v15, %v7261_v5  ;;  %v13184_v48 = vld [vmem:[%s19901_s1 + $0x1e34] sm:$0xf0]  ;;  %v12115_v36 = vld [vmem:[%s19901_s1 + $0x1f28] sm:$0xf]  ;;  %v12246_v5 = vld [vmem:[%s19901_s1 + $0xec] sm:$0xf] }
 0x2f5   :  { %7501 = vmatpush.bf16.msrb.mxu1 %v11908_v40  ;;  %v12004_v40 = vor.u32 %v13188_v59, %v12003_v60  ;;  %v13216_v43 = vld [vmem:[%s19901_s1 + $0x1f34] sm:$0xf0]  ;;  %v11715_v26 = vld [vmem:[%s19901_s1 + $0x1c08] sm:$0xf]  ;;  %v7262_v59 = vpop.f32.mrf.mxu2  ;;  %v8245_v15 = vld [vmem:[%s19901_s1 + $0xf8] sm:$0xf0]  ;;  %v7275_v11 = vpop.f32.mrf.mxu3 }
 0x2f6   :  { %7514 = vmatpush.bf16.msrb.mxu2 %v12036_v0  ;;  %v11731_v0 = vld [vmem:[%s19901_s1 + $0x1c28] sm:$0xf]  ;;  %v13148_v47 = vld [vmem:[%s19901_s1 + $0x1d14] sm:$0xf0]  ;;  %v12270_v59 = vld [vmem:[%s19901_s1 + $0x1ac] sm:$0xf] }
 0x2f7   :  { %7527 = vmatpush.bf16.msrb.mxu3 %v12164_v55  ;;  %v13152_v55 = vld [vmem:[%s19901_s1 + $0x1d34] sm:$0xf0]  ;;  %v11732_v24 = vor.u32 %v13120_v51, %v11731_v0  ;;  %v11843_v19 = vld [vmem:[%s19901_s1 + $0x1d08] sm:$0xf]  ;;  %v12342_v51 = vld [vmem:[%s19901_s1 + $0x3ec] sm:$0xf] }
 0x2f8   :  { %7489 = vmatpush.bf16.msrb.mxu0 %v11764_v56  ;;  %v13116_v56 = vld [vmem:[%s19901_s1 + $0x1c14] sm:$0xf0]  ;;  %v11971_v62 = vld [vmem:[%s19901_s1 + $0x1e08] sm:$0xf]  ;;  %v8469_v11 = vld [vmem:[%s19901_s1 + $0x2b8] sm:$0xf0] }
 0x2f9   :  { %7502 = vmatpush.bf16.msrb.mxu1 %v11892_v50  ;;  %v11860_v50 = vor.u32 %v13152_v55, %v11859_v14  ;;  %v13180_v53 = vld [vmem:[%s19901_s1 + $0x1e14] sm:$0xf0]  ;;  %v12099_v3 = vld [vmem:[%s19901_s1 + $0x1f08] sm:$0xf]  ;;  %v11716_v63 = vor.u32 %v13116_v56, %v11715_v26  ;;  %v8629_v14 = vld [vmem:[%s19901_s1 + $0x3f8] sm:$0xf0]  ;;  %v8248_v55 = vor.u32 %v12246_v5, %v8245_v15 }
 0x2fa   :  { %7515 = vmatpush.bf16.msrb.mxu2 %v12020_v7  ;;  %v11988_v7 = vor.u32 %v13184_v48, %v11987_v17  ;;  %v13212_v60 = vld [vmem:[%s19901_s1 + $0x1f14] sm:$0xf0]  ;;  %v11972_v0 = vor.u32 %v13180_v53, %v11971_v62  ;;  %v8632_v26 = vor.u32 %v12342_v51, %v8629_v14  ;;  %v8357_v56 = vld [vmem:[%s19901_s1 + $0x1d8] sm:$0xf0]  ;;  %v12266_v14 = vld [vmem:[%s19901_s1 + $0x18c] sm:$0xf] }
 0x2fb   :  { %7528 = vmatpush.bf16.msrb.mxu3 %v12148_v54  ;;  %v12116_v54 = vor.u32 %v13216_v43, %v12115_v36  ;;  %v12242_v36 = vld [vmem:[%s19901_s1 + $0xcc] sm:$0xf]  ;;  %v8229_v43 = vld [vmem:[%s19901_s1 + $0xd8] sm:$0xf0] }
 0x2fc   :  { %7490 = vmatpush.bf16.msrb.mxu0 %v11748_v34  ;;  %v8373_v34 = vld [vmem:[%s19901_s1 + $0x1f8] sm:$0xf0]  ;;  %v8232_v62 = vor.u32 %v12242_v36, %v8229_v43  ;;  %v12330_v43 = vld [vmem:[%s19901_s1 + $0x38c] sm:$0xf] }
 0x2fd   :  { %7503 = vmatpush.bf16.msrb.mxu1 %v11876_v52  ;;  %v8501_v52 = vld [vmem:[%s19901_s1 + $0x2f8] sm:$0xf0]  ;;  %v8376_v17 = vor.u32 %v12278_v61, %v8373_v34  ;;  %v12302_v61 = vld [vmem:[%s19901_s1 + $0x2ac] sm:$0xf] }
 0x2fe   :  { %7516 = vmatpush.bf16.msrb.mxu2 %v12004_v40  ;;  %v11844_v40 = vor.u32 %v13148_v47, %v11843_v19  ;;  %v8504_v48 = vor.u32 %v12310_v1, %v8501_v52  ;;  %v12338_v19 = vld [vmem:[%s19901_s1 + $0x3cc] sm:$0xf]  ;;  %v8613_v47 = vld [vmem:[%s19901_s1 + $0x3d8] sm:$0xf0] }
 0x2ff   :  { %7529 = vmatpush.bf16.msrb.mxu3 %v12132_v57  ;;  %v12100_v57 = vor.u32 %v13212_v60, %v12099_v3  ;;  %v12238_v3 = vld [vmem:[%s19901_s1 + $0xac] sm:$0xf]  ;;  %v8213_v60 = vld [vmem:[%s19901_s1 + $0xb8] sm:$0xf0]  ;;  %v8616_v5 = vor.u32 %v12338_v19, %v8613_v47 }
 0x300   :  { %7491 = vmatpush.bf16.msrb.mxu0 %v11732_v24  ;;  %v12274_v24 = vld [vmem:[%s19901_s1 + $0x1cc] sm:$0xf]  ;;  %v8341_v15 = vld [vmem:[%s19901_s1 + $0x1b8] sm:$0xf0]  ;;  %v8216_v1 = vor.u32 %v12238_v3, %v8213_v60 }
 0x301   :  { %7504 = vmatpush.bf16.msrb.mxu1 %v11860_v50  ;;  %v12306_v50 = vld [vmem:[%s19901_s1 + $0x2cc] sm:$0xf]  ;;  %v8597_v34 = vld [vmem:[%s19901_s1 + $0x3b8] sm:$0xf0]  ;;  %v8344_v52 = vor.u32 %v12270_v59, %v8341_v15 }
 0x302   :  { %7517 = vmatpush.bf16.msrb.mxu2 %v11988_v7  ;;  %v8485_v7 = vld [vmem:[%s19901_s1 + $0x2d8] sm:$0xf0]  ;;  %v12230_v47 = vld [vmem:[%s19901_s1 + $0x6c] sm:$0xf] }
 0x303   :  { %7530 = vmatpush.bf16.msrb.mxu3 %v12116_v54  ;;  %v8360_v54 = vor.u32 %v12274_v24, %v8357_v56  ;;  %v8488_v53 = vor.u32 %v12306_v50, %v8485_v7  ;;  %v8197_v51 = vld [vmem:[%s19901_s1 + $0x98] sm:$0xf0]  ;;  %v12294_v60 = vld [vmem:[%s19901_s1 + $0x26c] sm:$0xf] }
 0x304   :  { %7492 = vmatpush.bf16.msrb.mxu0 %v11716_v63  ;;  %v12334_v63 = vld [vmem:[%s19901_s1 + $0x3ac] sm:$0xf]  ;;  %v7286_v36 = vpop.f32.mrf.mxu0  ;;  %v8581_v24 = vld [vmem:[%s19901_s1 + $0x398] sm:$0xf0] }
 0x305   :  { %7505 = vmatpush.bf16.msrb.mxu1 %v11844_v40  ;;  %v8472_v40 = vor.u32 %v12302_v61, %v8469_v11  ;;  %v7299_v50 = vpop.f32.mrf.mxu1  ;;  %v8309_v3 = vld [vmem:[%s19901_s1 + $0x178] sm:$0xf0] }
 0x306   :  { %7518 = vmatpush.bf16.msrb.mxu2 %v11972_v0  ;;  %v12234_v0 = vld [vmem:[%s19901_s1 + $0x8c] sm:$0xf]  ;;  %v8437_v59 = vld [vmem:[%s19901_s1 + $0x278] sm:$0xf0] }
 0x307   :  { %7531 = vmatpush.bf16.msrb.mxu3 %v12100_v57  ;;  %7493 = vmatmul.bf16.vlgmr.msrb.gmra.mxu0 %v14987_v18  ;;  %v8600_v57 = vor.u32 %v12334_v63, %v8597_v34  ;;  %v8200_v56 = vor.u32 %v12234_v0, %v8197_v51  ;;  %v8565_v15 = vld [vmem:[%s19901_s1 + $0x378] sm:$0xf0]  ;;  %v8440_v63 = vor.u32 %v12294_v60, %v8437_v59  ;;  %v12226_v34 = vld [vmem:[%s19901_s1 + $0x4c] sm:$0xf] }
 0x308   :  { %7537 = vmatpush.bf16.msra.mxu0 %v8248_v55  ;;  %7506 = vmatmul.bf16.vlgmr.msrb.gmra.mxu1 %v15000_v32  ;;  %v8325_v55 = vld [vmem:[%s19901_s1 + $0x198] sm:$0xf0]  ;;  %v12318_v60 = vld [vmem:[%s19901_s1 + $0x32c] sm:$0xf] }
 0x309   :  { %7550 = vmatpush.bf16.msra.mxu1 %v8376_v17  ;;  %7519 = vmatmul.bf16.vlgmr.msrb.gmra.mxu2 %v14998_v27  ;;  %v12298_v17 = vld [vmem:[%s19901_s1 + $0x28c] sm:$0xf]  ;;  %v8328_v7 = vor.u32 %v12266_v14, %v8325_v55  ;;  %v8293_v51 = vld [vmem:[%s19901_s1 + $0x158] sm:$0xf0] }
 0x30a   :  { %7563 = vmatpush.bf16.msra.mxu2 %v8504_v48  ;;  %7532 = vmatmul.bf16.vlgmr.msrb.gmra.mxu3 %v15008_v39  ;;  %v8453_v48 = vld [vmem:[%s19901_s1 + $0x298] sm:$0xf0]  ;;  %v12290_v14 = vld [vmem:[%s19901_s1 + $0x24c] sm:$0xf] }
 0x30b   :  { %7576 = vmatpush.bf16.msra.mxu3 %v8632_v26  ;;  %v7287_v26 = vadd.f32 %v7286_v36, %v18196_v58  ;;  %v8456_v19 = vor.u32 %v12298_v17, %v8453_v48  ;;  %v8584_v58 = vor.u32 %v12330_v43, %v8581_v24  ;;  %v12322_v48 = vld [vmem:[%s19901_s1 + $0x34c] sm:$0xf]  ;;  %v8549_v36 = vld [vmem:[%s19901_s1 + $0x358] sm:$0xf0] }
 0x30c   :  { %7538 = vmatpush.bf16.msra.mxu0 %v8232_v62  ;;  %v8181_v62 = vld [vmem:[%s19901_s1 + $0x78] sm:$0xf0]  ;;  %v7312_v0 = vpop.f32.mrf.mxu2  ;;  %v7288_v43 = vpop.f32.mrf.mxu0 }
 0x30d   :  { %7551 = vmatpush.bf16.msra.mxu1 %v8360_v54  ;;  %v12262_v54 = vld [vmem:[%s19901_s1 + $0x16c] sm:$0xf]  ;;  %v8184_v61 = vor.u32 %v12230_v47, %v8181_v62  ;;  %v7325_v17 = vpop.f32.mrf.mxu3  ;;  %v8149_v47 = vld [vmem:[%s19901_s1 + $0x38] sm:$0xf0] }
 0x30e   :  { %7564 = vmatpush.bf16.msra.mxu2 %v8488_v53  ;;  %v7300_v53 = vadd.f32 %v7299_v50, %v7287_v26  ;;  %v8312_v11 = vor.u32 %v12262_v54, %v8309_v3  ;;  %v7301_v26 = vpop.f32.mrf.mxu1  ;;  %v12254_v62 = vld [vmem:[%s19901_s1 + $0x12c] sm:$0xf]  ;;  %v8552_v54 = vor.u32 %v12322_v48, %v8549_v36  ;;  %v8405_v3 = vld [vmem:[%s19901_s1 + $0x238] sm:$0xf0] }
 0x30f   :  { %7577 = vmatpush.bf16.msra.mxu3 %v8616_v5  ;;  %v12326_v5 = vld [vmem:[%s19901_s1 + $0x36c] sm:$0xf]  ;;  %v8533_v59 = vld [vmem:[%s19901_s1 + $0x338] sm:$0xf0] }
 0x310   :  { %7539 = vmatpush.bf16.msra.mxu0 %v8216_v1  ;;  %v8165_v1 = vld [vmem:[%s19901_s1 + $0x58] sm:$0xf0]  ;;  %v7313_v55 = vadd.f32 %v7312_v0, %v7300_v53  ;;  %v12286_v53 = vld [vmem:[%s19901_s1 + $0x22c] sm:$0xf] }
 0x311   :  { %7552 = vmatpush.bf16.msra.mxu1 %v8344_v52  ;;  %v12258_v52 = vld [vmem:[%s19901_s1 + $0x14c] sm:$0xf]  ;;  %v8168_v24 = vor.u32 %v12226_v34, %v8165_v1  ;;  %v8261_v1 = vld [vmem:[%s19901_s1 + $0x118] sm:$0xf0] }
 0x312   :  { %7565 = vmatpush.bf16.msra.mxu2 %v8472_v40  ;;  %v8568_v40 = vor.u32 %v12326_v5, %v8565_v15  ;;  %v8296_v50 = vor.u32 %v12258_v52, %v8293_v51  ;;  %v12218_v15 = vld [vmem:[%s19901_s1 + $0xc] sm:$0xf]  ;;  %v8389_v0 = vld [vmem:[%s19901_s1 + $0x218] sm:$0xf0] }
 0x313   :  { %7578 = vmatpush.bf16.msra.mxu3 %v8600_v57  ;;  %v8421_v57 = vld [vmem:[%s19901_s1 + $0x258] sm:$0xf0]  ;;  %v12250_v34 = vld [vmem:[%s19901_s1 + $0x10c] sm:$0xf] }
 0x314   :  { %7540 = vmatpush.bf16.msra.mxu0 %v8200_v56  ;;  %v18395_v56 = vadd.f32 %v7325_v17, %v7313_v55  ;;  %v12282_v52 = vld [vmem:[%s19901_s1 + $0x20c] sm:$0xf]  ;;  %v8757_v17 = vld [vmem:[%s19901_s1 + $0x4f8] sm:$0xf0] }
 0x315   :  { %7553 = vmatpush.bf16.msra.mxu1 %v8328_v7  ;;  %v8424_v7 = vor.u32 %v12290_v14, %v8421_v57  ;;  %v12314_v51 = vld [vmem:[%s19901_s1 + $0x30c] sm:$0xf]  ;;  %v8517_v14 = vld [vmem:[%s19901_s1 + $0x318] sm:$0xf0]  ;;  %v7314_v57 = vpop.f32.mrf.mxu2  ;;  %v7327_v36 = vpop.f32.mrf.mxu3 }
 0x316   :  { %7566 = vmatpush.bf16.msra.mxu2 %v8456_v19  ;;  %v12222_v19 = vld [vmem:[%s19901_s1 + $0x2c] sm:$0xf]  ;;  %v8981_v36 = vld [vmem:[%s19901_s1 + $0x6b8] sm:$0xf0] }
 0x317   :  { %7579 = vmatpush.bf16.msra.mxu3 %v8584_v58  ;;  %v8277_v58 = vld [vmem:[%s19901_s1 + $0x138] sm:$0xf0]  ;;  %v8152_v5 = vor.u32 %v12222_v19, %v8149_v47  ;;  %v12374_v55 = vld [vmem:[%s19901_s1 + $0x4ec] sm:$0xf]  ;;  %v8392_v19 = vor.u32 %v12282_v52, %v8389_v0 }
 0x318   :  { %7541 = vmatpush.bf16.msra.mxu0 %v8184_v61  ;;  %v8133_v61 = vld [vmem:[%s19901_s1 + $0x18] sm:$0xf0]  ;;  %v12406_v48 = vld [vmem:[%s19901_s1 + $0x5ec] sm:$0xf] }
 0x319   :  { %7554 = vmatpush.bf16.msra.mxu1 %v8312_v11  ;;  %v8280_v11 = vor.u32 %v12254_v62, %v8277_v58  ;;  %v8136_v43 = vor.u32 %v12218_v15, %v8133_v61  ;;  %v12438_v26 = vld [vmem:[%s19901_s1 + $0x6ec] sm:$0xf]  ;;  %v9141_v62 = vld [vmem:[%s19901_s1 + $0x7f8] sm:$0xf0]  ;;  %v8760_v58 = vor.u32 %v12374_v55, %v8757_v17 }
 0x31a   :  { %7567 = vmatpush.bf16.msra.mxu2 %v8440_v63  ;;  %v8408_v63 = vor.u32 %v12286_v53, %v8405_v3  ;;  %v12470_v47 = vld [vmem:[%s19901_s1 + $0x7ec] sm:$0xf]  ;;  %v8869_v61 = vld [vmem:[%s19901_s1 + $0x5d8] sm:$0xf0] }
 0x31b   :  { %7580 = vmatpush.bf16.msra.mxu3 %v8568_v40  ;;  %v8536_v40 = vor.u32 %v12318_v60, %v8533_v59  ;;  %v12370_v60 = vld [vmem:[%s19901_s1 + $0x4cc] sm:$0xf]  ;;  %v8741_v59 = vld [vmem:[%s19901_s1 + $0x4d8] sm:$0xf0]  ;;  %v9144_v15 = vor.u32 %v12470_v47, %v9141_v62 }
 0x31c   :  { %7542 = vmatpush.bf16.msra.mxu0 %v8168_v24  ;;  %v8885_v24 = vld [vmem:[%s19901_s1 + $0x5f8] sm:$0xf0]  ;;  %v8744_v52 = vor.u32 %v12370_v60, %v8741_v59  ;;  %v12398_v57 = vld [vmem:[%s19901_s1 + $0x5ac] sm:$0xf] }
 0x31d   :  { %7555 = vmatpush.bf16.msra.mxu1 %v8296_v50  ;;  %v9013_v50 = vld [vmem:[%s19901_s1 + $0x6f8] sm:$0xf0]  ;;  %v8888_v53 = vor.u32 %v12406_v48, %v8885_v24  ;;  %v12430_v48 = vld [vmem:[%s19901_s1 + $0x6ac] sm:$0xf] }
 0x31e   :  { %7568 = vmatpush.bf16.msra.mxu2 %v8424_v7  ;;  %v8264_v7 = vor.u32 %v12250_v34, %v8261_v1  ;;  %v9016_v3 = vor.u32 %v12438_v26, %v9013_v50  ;;  %v12466_v34 = vld [vmem:[%s19901_s1 + $0x7cc] sm:$0xf]  ;;  %v9125_v1 = vld [vmem:[%s19901_s1 + $0x7d8] sm:$0xf0] }
 0x31f   :  { %7581 = vmatpush.bf16.msra.mxu3 %v8552_v54  ;;  %v8520_v54 = vor.u32 %v12314_v51, %v8517_v14  ;;  %v12366_v51 = vld [vmem:[%s19901_s1 + $0x4ac] sm:$0xf]  ;;  %v8725_v14 = vld [vmem:[%s19901_s1 + $0x4b8] sm:$0xf0]  ;;  %v9128_v55 = vor.u32 %v12466_v34, %v9125_v1 }
 0x320   :  { %7543 = vmatpush.bf16.msra.mxu0 %v8152_v5  ;;  %v12402_v5 = vld [vmem:[%s19901_s1 + $0x5cc] sm:$0xf]  ;;  %v8853_v17 = vld [vmem:[%s19901_s1 + $0x5b8] sm:$0xf0]  ;;  %v8728_v26 = vor.u32 %v12366_v51, %v8725_v14 }
 0x321   :  { %7556 = vmatpush.bf16.msra.mxu1 %v8280_v11  ;;  %v12434_v11 = vld [vmem:[%s19901_s1 + $0x6cc] sm:$0xf]  ;;  %v9109_v24 = vld [vmem:[%s19901_s1 + $0x7b8] sm:$0xf0]  ;;  %v8856_v50 = vor.u32 %v12398_v57, %v8853_v17 }
 0x322   :  { %7569 = vmatpush.bf16.msra.mxu2 %v8408_v63  ;;  %v8997_v63 = vld [vmem:[%s19901_s1 + $0x6d8] sm:$0xf0]  ;;  %v12426_v47 = vld [vmem:[%s19901_s1 + $0x68c] sm:$0xf] }
 0x323   :  { %7582 = vmatpush.bf16.msra.mxu3 %v8536_v40  ;;  %v8872_v40 = vor.u32 %v12402_v5, %v8869_v61  ;;  %v9000_v0 = vor.u32 %v12434_v11, %v8997_v63  ;;  %v8965_v62 = vld [vmem:[%s19901_s1 + $0x698] sm:$0xf0]  ;;  %v12358_v61 = vld [vmem:[%s19901_s1 + $0x46c] sm:$0xf] }
 0x324   :  { %7544 = vmatpush.bf16.msra.mxu0 %v8136_v43  ;;  %v12462_v43 = vld [vmem:[%s19901_s1 + $0x7ac] sm:$0xf]  ;;  %v8693_v11 = vld [vmem:[%s19901_s1 + $0x478] sm:$0xf0] }
 0x325   :  { %7557 = vmatpush.bf16.msra.mxu1 %v8264_v7  ;;  %v12362_v7 = vld [vmem:[%s19901_s1 + $0x48c] sm:$0xf]  ;;  %v7351_v59 = vpop.f32.mrf.mxu1  ;;  %v8821_v1 = vld [vmem:[%s19901_s1 + $0x578] sm:$0xf0]  ;;  %v8696_v14 = vor.u32 %v12358_v61, %v8693_v11 }
 0x326   :  { %7570 = vmatpush.bf16.msra.mxu2 %v8392_v19  ;;  %v8709_v19 = vld [vmem:[%s19901_s1 + $0x498] sm:$0xf0]  ;;  %v12390_v63 = vld [vmem:[%s19901_s1 + $0x56c] sm:$0xf] }
 0x327   :  { %7583 = vmatpush.bf16.msra.mxu3 %v8520_v54  ;;  %7545 = vmatmul.bf16.vlgmr.msra.gmra.mxu0 %v13577_v20  ;;  %v9112_v20 = vor.u32 %v12462_v43, %v9109_v24  ;;  %v7338_v54 = vpop.f32.mrf.mxu0  ;;  %v8712_v60 = vor.u32 %v12362_v7, %v8709_v19  ;;  %v9077_v51 = vld [vmem:[%s19901_s1 + $0x778] sm:$0xf0]  ;;  %v8824_v57 = vor.u32 %v12390_v63, %v8821_v1  ;;  %v12354_v17 = vld [vmem:[%s19901_s1 + $0x44c] sm:$0xf] }
 0x328   :  { %7589 = vmatpush.bf16.msrb.mxu0 %v8760_v58  ;;  %7558 = vmatmul.bf16.vlgmr.msra.gmra.mxu1 %v13580_v21  ;;  %v8837_v21 = vld [vmem:[%s19901_s1 + $0x598] sm:$0xf0]  ;;  %v12458_v58 = vld [vmem:[%s19901_s1 + $0x78c] sm:$0xf] }
 0x329   :  { %7602 = vmatpush.bf16.msrb.mxu1 %v8888_v53  ;;  %7571 = vmatmul.bf16.vlgmr.msra.gmra.mxu2 %v13545_v4  ;;  %v8984_v4 = vor.u32 %v12430_v48, %v8981_v36  ;;  %v9093_v53 = vld [vmem:[%s19901_s1 + $0x798] sm:$0xf0]  ;;  %v12386_v36 = vld [vmem:[%s19901_s1 + $0x54c] sm:$0xf] }
 0x32a   :  { %7615 = vmatpush.bf16.msrb.mxu2 %v9016_v3  ;;  %7584 = vmatmul.bf16.vlgmr.msra.gmra.mxu3 %v13550_v6  ;;  %v12394_v6 = vld [vmem:[%s19901_s1 + $0x58c] sm:$0xf]  ;;  %v7339_v3 = vadd.f32 %v7338_v54, %v18395_v56  ;;  %v9096_v56 = vor.u32 %v12458_v58, %v9093_v53  ;;  %v8677_v48 = vld [vmem:[%s19901_s1 + $0x458] sm:$0xf0] }
 0x32b   :  { %7628 = vmatpush.bf16.msrb.mxu3 %v9144_v15  ;;  %v8840_v5 = vor.u32 %v12394_v6, %v8837_v21  ;;  %v8968_v15 = vor.u32 %v12426_v47, %v8965_v62  ;;  %v12450_v6 = vld [vmem:[%s19901_s1 + $0x74c] sm:$0xf]  ;;  %v8680_v47 = vor.u32 %v12354_v17, %v8677_v48  ;;  %v8917_v11 = vld [vmem:[%s19901_s1 + $0x638] sm:$0xf0] }
 0x32c   :  { %7590 = vmatpush.bf16.msrb.mxu0 %v8744_v52  ;;  %v7352_v34 = vadd.f32 %v7351_v59, %v7339_v3  ;;  %v12422_v52 = vld [vmem:[%s19901_s1 + $0x66c] sm:$0xf]  ;;  %v7364_v24 = vpop.f32.mrf.mxu2  ;;  %v8901_v17 = vld [vmem:[%s19901_s1 + $0x618] sm:$0xf0] }
 0x32d   :  { %7603 = vmatpush.bf16.msrb.mxu1 %v8872_v40  ;;  %v8949_v40 = vld [vmem:[%s19901_s1 + $0x678] sm:$0xf0]  ;;  %v7377_v19 = vpop.f32.mrf.mxu3  ;;  %v7353_v62 = vpop.f32.mrf.mxu1  ;;  %v12350_v3 = vld [vmem:[%s19901_s1 + $0x42c] sm:$0xf] }
 0x32e   :  { %7616 = vmatpush.bf16.msrb.mxu2 %v9000_v0  ;;  %v12454_v0 = vld [vmem:[%s19901_s1 + $0x76c] sm:$0xf]  ;;  %v7365_v7 = vadd.f32 %v7364_v24, %v7352_v34 }
 0x32f   :  { %7629 = vmatpush.bf16.msrb.mxu3 %v9128_v55  ;;  %v8952_v55 = vor.u32 %v12422_v52, %v8949_v40  ;;  %v9080_v43 = vor.u32 %v12454_v0, %v9077_v51  ;;  %v7340_v21 = vpop.f32.mrf.mxu0  ;;  %v12382_v59 = vld [vmem:[%s19901_s1 + $0x52c] sm:$0xf]  ;;  %v8645_v52 = vld [vmem:[%s19901_s1 + $0x418] sm:$0xf0] }
 0x330   :  { %7591 = vmatpush.bf16.msrb.mxu0 %v8728_v26  ;;  %v8805_v26 = vld [vmem:[%s19901_s1 + $0x558] sm:$0xf0]  ;;  %v18594_v54 = vadd.f32 %v7377_v19, %v7365_v7  ;;  %v12414_v61 = vld [vmem:[%s19901_s1 + $0x62c] sm:$0xf] }
 0x331   :  { %7604 = vmatpush.bf16.msrb.mxu1 %v8856_v50  ;;  %v12418_v50 = vld [vmem:[%s19901_s1 + $0x64c] sm:$0xf]  ;;  %v8808_v58 = vor.u32 %v12386_v36, %v8805_v26  ;;  %v8920_v0 = vor.u32 %v12414_v61, %v8917_v11  ;;  %v9029_v36 = vld [vmem:[%s19901_s1 + $0x718] sm:$0xf0] }
 0x332   :  { %7617 = vmatpush.bf16.msrb.mxu2 %v8984_v4  ;;  %v8933_v4 = vld [vmem:[%s19901_s1 + $0x658] sm:$0xf0]  ;;  %v12446_v63 = vld [vmem:[%s19901_s1 + $0x72c] sm:$0xf] }
 0x333   :  { %7630 = vmatpush.bf16.msrb.mxu3 %v9112_v20  ;;  %v9061_v20 = vld [vmem:[%s19901_s1 + $0x758] sm:$0xf0]  ;;  %v8936_v53 = vor.u32 %v12418_v50, %v8933_v4  ;;  %v12346_v1 = vld [vmem:[%s19901_s1 + $0x40c] sm:$0xf] }
 0x334   :  { %7592 = vmatpush.bf16.msrb.mxu0 %v8712_v60  ;;  %v8661_v60 = vld [vmem:[%s19901_s1 + $0x438] sm:$0xf0]  ;;  %v12378_v51 = vld [vmem:[%s19901_s1 + $0x50c] sm:$0xf]  ;;  %v8648_v7 = vor.u32 %v12346_v1, %v8645_v52 }
 0x335   :  { %7605 = vmatpush.bf16.msrb.mxu1 %v8840_v5  ;;  %v9064_v5 = vor.u32 %v12450_v6, %v9061_v20  ;;  %v8664_v34 = vor.u32 %v12350_v3, %v8661_v60  ;;  %v12442_v48 = vld [vmem:[%s19901_s1 + $0x70c] sm:$0xf]  ;;  %v9269_v26 = vld [vmem:[%s19901_s1 + $0x8f8] sm:$0xf0]  ;;  %v7379_v4 = vpop.f32.mrf.mxu3 }
 0x336   :  { %7618 = vmatpush.bf16.msrb.mxu2 %v8968_v15  ;;  %v8789_v15 = vld [vmem:[%s19901_s1 + $0x538] sm:$0xf0]  ;;  %v12502_v24 = vld [vmem:[%s19901_s1 + $0x8ec] sm:$0xf] }
 0x337   :  { %7631 = vmatpush.bf16.msrb.mxu3 %v9096_v56  ;;  %v9045_v56 = vld [vmem:[%s19901_s1 + $0x738] sm:$0xf0]  ;;  %v8792_v40 = vor.u32 %v12382_v59, %v8789_v15  ;;  %v12534_v50 = vld [vmem:[%s19901_s1 + $0x9ec] sm:$0xf]  ;;  %v9272_v3 = vor.u32 %v12502_v24, %v9269_v26 }
 0x338   :  { %7593 = vmatpush.bf16.msrb.mxu0 %v8696_v14  ;;  %v8773_v14 = vld [vmem:[%s19901_s1 + $0x518] sm:$0xf0]  ;;  %v12566_v6 = vld [vmem:[%s19901_s1 + $0xaec] sm:$0xf] }
 0x339   :  { %7606 = vmatpush.bf16.msrb.mxu1 %v8824_v57  ;;  %v12410_v57 = vld [vmem:[%s19901_s1 + $0x60c] sm:$0xf]  ;;  %v9397_v19 = vld [vmem:[%s19901_s1 + $0x9f8] sm:$0xf0]  ;;  %v8776_v21 = vor.u32 %v12378_v51, %v8773_v14 }
 0x33a   :  { %7619 = vmatpush.bf16.msrb.mxu2 %v8952_v55  ;;  %v9048_v55 = vor.u32 %v12446_v63, %v9045_v56  ;;  %v9525_v20 = vld [vmem:[%s19901_s1 + $0xaf8] sm:$0xf0]  ;;  %v12598_v62 = vld [vmem:[%s19901_s1 + $0xbec] sm:$0xf]  ;;  %v9400_v60 = vor.u32 %v12534_v50, %v9397_v19 }
 0x33b   :  { %7632 = vmatpush.bf16.msrb.mxu3 %v9080_v43  ;;  %v7366_v43 = vpop.f32.mrf.mxu2  ;;  %v9528_v59 = vor.u32 %v12566_v6, %v9525_v20  ;;  %v9253_v15 = vld [vmem:[%s19901_s1 + $0x8d8] sm:$0xf0]  ;;  %v12530_v61 = vld [vmem:[%s19901_s1 + $0x9cc] sm:$0xf] }
 0x33c   :  { %7594 = vmatpush.bf16.msrb.mxu0 %v8680_v47  ;;  %v8904_v47 = vor.u32 %v12410_v57, %v8901_v17  ;;  %v9381_v63 = vld [vmem:[%s19901_s1 + $0x9d8] sm:$0xf0]  ;;  %v12562_v56 = vld [vmem:[%s19901_s1 + $0xacc] sm:$0xf] }
 0x33d   :  { %7607 = vmatpush.bf16.msrb.mxu1 %v8808_v58  ;;  %v9653_v58 = vld [vmem:[%s19901_s1 + $0xbf8] sm:$0xf0]  ;;  %v12594_v1 = vld [vmem:[%s19901_s1 + $0xbcc] sm:$0xf] }
 0x33e   :  { %7620 = vmatpush.bf16.msrb.mxu2 %v8936_v53  ;;  %v9032_v53 = vor.u32 %v12442_v48, %v9029_v36  ;;  %v9656_v11 = vor.u32 %v12598_v62, %v9653_v58  ;;  %v9637_v52 = vld [vmem:[%s19901_s1 + $0xbd8] sm:$0xf0]  ;;  %v12494_v14 = vld [vmem:[%s19901_s1 + $0x8ac] sm:$0xf] }
 0x33f   :  { %7633 = vmatpush.bf16.msrb.mxu3 %v9064_v5  ;;  %v12498_v5 = vld [vmem:[%s19901_s1 + $0x8cc] sm:$0xf]  ;;  %v9237_v57 = vld [vmem:[%s19901_s1 + $0x8b8] sm:$0xf0]  ;;  %v9640_v17 = vor.u32 %v12594_v1, %v9637_v52 }
 0x340   :  { %7595 = vmatpush.bf16.msrb.mxu0 %v8664_v34  ;;  %v9509_v34 = vld [vmem:[%s19901_s1 + $0xad8] sm:$0xf0]  ;;  %v12558_v36 = vld [vmem:[%s19901_s1 + $0xaac] sm:$0xf]  ;;  %v9240_v26 = vor.u32 %v12494_v14, %v9237_v57 }
 0x341   :  { %7608 = vmatpush.bf16.msrb.mxu1 %v8792_v40  ;;  %v9256_v40 = vor.u32 %v12498_v5, %v9253_v15  ;;  %v9512_v51 = vor.u32 %v12562_v56, %v9509_v34  ;;  %v9365_v48 = vld [vmem:[%s19901_s1 + $0x9b8] sm:$0xf0]  ;;  %v12554_v6 = vld [vmem:[%s19901_s1 + $0xa8c] sm:$0xf] }
 0x342   :  { %7621 = vmatpush.bf16.msrb.mxu2 %v8920_v0  ;;  %v9384_v0 = vor.u32 %v12530_v61, %v9381_v63  ;;  %v9493_v43 = vld [vmem:[%s19901_s1 + $0xab8] sm:$0xf0]  ;;  %v12518_v15 = vld [vmem:[%s19901_s1 + $0x96c] sm:$0xf] }
 0x343   :  { %7634 = vmatpush.bf16.msrb.mxu3 %v9048_v55  ;;  %v12526_v55 = vld [vmem:[%s19901_s1 + $0x9ac] sm:$0xf]  ;;  %v9621_v24 = vld [vmem:[%s19901_s1 + $0xbb8] sm:$0xf0]  ;;  %v9496_v4 = vor.u32 %v12558_v36, %v9493_v43 }
 0x344   :  { %7596 = vmatpush.bf16.msrb.mxu0 %v8648_v7  ;;  %v9368_v50 = vor.u32 %v12526_v55, %v9365_v48  ;;  %v12522_v7 = vld [vmem:[%s19901_s1 + $0x98c] sm:$0xf]  ;;  %v9477_v20 = vld [vmem:[%s19901_s1 + $0xa98] sm:$0xf0] }
 0x345   :  { %7609 = vmatpush.bf16.msrb.mxu1 %v8776_v21  ;;  %v18738_v21 = vpop.f32.mrf.mxu0  ;;  %v9605_v62 = vld [vmem:[%s19901_s1 + $0xb98] sm:$0xf0]  ;;  %v12550_v63 = vld [vmem:[%s19901_s1 + $0xa6c] sm:$0xf] }
 0x346   :  { %7622 = vmatpush.bf16.msrb.mxu2 %v8904_v47  ;;  %v12586_v47 = vld [vmem:[%s19901_s1 + $0xb8c] sm:$0xf]  ;;  %v9205_v5 = vld [vmem:[%s19901_s1 + $0x878] sm:$0xf0] }
 0x347   :  { %7635 = vmatpush.bf16.msrb.mxu3 %v9032_v53  ;;  %7597 = vmatmul.bf16.vlgmr.msrb.gmra.mxu0 %v13736_v41  ;;  %v12490_v41 = vld [vmem:[%s19901_s1 + $0x88c] sm:$0xf]  ;;  %v18746_v53 = vpop.f32.mrf.mxu1  ;;  %v9608_v61 = vor.u32 %v12586_v47, %v9605_v62  ;;  %v9461_v56 = vld [vmem:[%s19901_s1 + $0xa78] sm:$0xf0] }
 0x348   :  { %7641 = vmatpush.bf16.msra.mxu0 %v9272_v3  ;;  %7610 = vmatmul.bf16.vlgmr.msrb.gmra.mxu1 %v13740_v44  ;;  %v9349_v44 = vld [vmem:[%s19901_s1 + $0x998] sm:$0xf0]  ;;  %v12582_v34 = vld [vmem:[%s19901_s1 + $0xb6c] sm:$0xf] }
 0x349   :  { %7654 = vmatpush.bf16.msra.mxu1 %v9400_v60  ;;  %7623 = vmatmul.bf16.vlgmr.msrb.gmra.mxu2 %v13728_v38  ;;  %v12590_v38 = vld [vmem:[%s19901_s1 + $0xbac] sm:$0xf]  ;;  %v9352_v3 = vor.u32 %v12522_v7, %v9349_v44  ;;  %v9480_v60 = vor.u32 %v12554_v6, %v9477_v20  ;;  %v9589_v1 = vld [vmem:[%s19901_s1 + $0xb78] sm:$0xf0] }
 0x34a   :  { %7667 = vmatpush.bf16.msra.mxu2 %v9528_v59  ;;  %7636 = vmatmul.bf16.vlgmr.msrb.gmra.mxu3 %v13738_v42  ;;  %v9221_v42 = vld [vmem:[%s19901_s1 + $0x898] sm:$0xf0]  ;;  %v9624_v19 = vor.u32 %v12590_v38, %v9621_v24  ;;  %v12486_v59 = vld [vmem:[%s19901_s1 + $0x86c] sm:$0xf]  ;;  %v9592_v55 = vor.u32 %v12582_v34, %v9589_v1 }
 0x34b   :  { %7680 = vmatpush.bf16.msra.mxu3 %v9656_v11  ;;  %v9224_v58 = vor.u32 %v12490_v41, %v9221_v42  ;;  %v9333_v11 = vld [vmem:[%s19901_s1 + $0x978] sm:$0xf0]  ;;  %v9208_v52 = vor.u32 %v12486_v59, %v9205_v5  ;;  %v12514_v57 = vld [vmem:[%s19901_s1 + $0x94c] sm:$0xf] }
 0x34c   :  { %7642 = vmatpush.bf16.msra.mxu0 %v9256_v40  ;;  %v9336_v40 = vor.u32 %v12518_v15, %v9333_v11  ;;  %v9189_v14 = vld [vmem:[%s19901_s1 + $0x858] sm:$0xf0]  ;;  %v12546_v36 = vld [vmem:[%s19901_s1 + $0xa4c] sm:$0xf] }
 0x34d   :  { %7655 = vmatpush.bf16.msra.mxu1 %v9384_v0  ;;  %v9464_v0 = vor.u32 %v12550_v63, %v9461_v56  ;;  %v9317_v48 = vld [vmem:[%s19901_s1 + $0x958] sm:$0xf0]  ;;  %v18792_v38 = vpop.f32.mrf.mxu3  ;;  %v12578_v24 = vld [vmem:[%s19901_s1 + $0xb4c] sm:$0xf] }
 0x34e   :  { %7668 = vmatpush.bf16.msra.mxu2 %v9512_v51  ;;  %v12482_v51 = vld [vmem:[%s19901_s1 + $0x84c] sm:$0xf]  ;;  %v9445_v43 = vld [vmem:[%s19901_s1 + $0xa58] sm:$0xf0]  ;;  %v9320_v42 = vor.u32 %v12514_v57, %v9317_v48 }
 0x34f   :  { %7681 = vmatpush.bf16.msra.mxu3 %v9640_v17  ;;  %v18781_v17 = vpop.f32.mrf.mxu2  ;;  %v7405_v41 = vpop.f32.mrf.mxu1  ;;  %v9448_v7 = vor.u32 %v12546_v36, %v9445_v43  ;;  %v9173_v44 = vld [vmem:[%s19901_s1 + $0x838] sm:$0xf0]  ;;  %v12510_v6 = vld [vmem:[%s19901_s1 + $0x92c] sm:$0xf] }
 0x350   :  { %7643 = vmatpush.bf16.msra.mxu0 %v9240_v26  ;;  %v9573_v26 = vld [vmem:[%s19901_s1 + $0xb58] sm:$0xf0]  ;;  %v12542_v62 = vld [vmem:[%s19901_s1 + $0xa2c] sm:$0xf] }
 0x351   :  { %7656 = vmatpush.bf16.msra.mxu1 %v9368_v50  ;;  %v7392_v50 = vpop.f32.mrf.mxu0  ;;  %v9576_v20 = vor.u32 %v12578_v24, %v9573_v26  ;;  %v9301_v47 = vld [vmem:[%s19901_s1 + $0x938] sm:$0xf0]  ;;  %v12474_v5 = vld [vmem:[%s19901_s1 + $0x80c] sm:$0xf] }
 0x352   :  { %7669 = vmatpush.bf16.msra.mxu2 %v9496_v4  ;;  %v9192_v4 = vor.u32 %v12482_v51, %v9189_v14  ;;  %v9157_v15 = vld [vmem:[%s19901_s1 + $0x818] sm:$0xf0]  ;;  %v12506_v63 = vld [vmem:[%s19901_s1 + $0x90c] sm:$0xf] }
 0x353   :  { %7682 = vmatpush.bf16.msra.mxu3 %v9624_v19  ;;  %v12478_v19 = vld [vmem:[%s19901_s1 + $0x82c] sm:$0xf]  ;;  %v9285_v56 = vld [vmem:[%s19901_s1 + $0x918] sm:$0xf0]  ;;  %v9160_v36 = vor.u32 %v12474_v5, %v9157_v15 }
 0x354   :  { %7644 = vmatpush.bf16.msra.mxu0 %v9224_v58  ;;  %v9429_v58 = vld [vmem:[%s19901_s1 + $0xa38] sm:$0xf0]  ;;  %v9176_v59 = vor.u32 %v12478_v19, %v9173_v44  ;;  %v12538_v34 = vld [vmem:[%s19901_s1 + $0xa0c] sm:$0xf]  ;;  %v9288_v50 = vor.u32 %v12506_v63, %v9285_v56 }
 0x355   :  { %7657 = vmatpush.bf16.msra.mxu1 %v9352_v3  ;;  %v12574_v3 = vld [vmem:[%s19901_s1 + $0xb2c] sm:$0xf]  ;;  %v9432_v11 = vor.u32 %v12542_v62, %v9429_v58  ;;  %v9781_v57 = vld [vmem:[%s19901_s1 + $0xcf8] sm:$0xf0]  ;;  %v7431_v48 = vpop.f32.mrf.mxu3 }
 0x356   :  { %7670 = vmatpush.bf16.msra.mxu2 %v9480_v60  ;;  %v9557_v60 = vld [vmem:[%s19901_s1 + $0xb38] sm:$0xf0]  ;;  %v12630_v14 = vld [vmem:[%s19901_s1 + $0xcec] sm:$0xf] }
 0x357   :  { %7683 = vmatpush.bf16.msra.mxu3 %v9608_v61  ;;  %v9304_v61 = vor.u32 %v12510_v6, %v9301_v47  ;;  %v9560_v1 = vor.u32 %v12574_v3, %v9557_v60  ;;  %v7418_v51 = vpop.f32.mrf.mxu2  ;;  %v9909_v43 = vld [vmem:[%s19901_s1 + $0xdf8] sm:$0xf0]  ;;  %v12694_v24 = vld [vmem:[%s19901_s1 + $0xeec] sm:$0xf]  ;;  %v9784_v19 = vor.u32 %v12630_v14, %v9781_v57 }
 0x358   :  { %7645 = vmatpush.bf16.msra.mxu0 %v9208_v52  ;;  %v9413_v52 = vld [vmem:[%s19901_s1 + $0xa18] sm:$0xf0]  ;;  %v12726_v41 = vld [vmem:[%s19901_s1 + $0xfec] sm:$0xf] }
 0x359   :  { %7658 = vmatpush.bf16.msra.mxu1 %v9336_v40  ;;  %v12570_v40 = vld [vmem:[%s19901_s1 + $0xb0c] sm:$0xf]  ;;  %v10037_v26 = vld [vmem:[%s19901_s1 + $0xef8] sm:$0xf0] }
 0x35a   :  { %7671 = vmatpush.bf16.msra.mxu2 %v9464_v0  ;;  %v9541_v0 = vld [vmem:[%s19901_s1 + $0xb18] sm:$0xf0]  ;;  %v10040_v6 = vor.u32 %v12694_v24, %v10037_v26  ;;  %v12658_v62 = vld [vmem:[%s19901_s1 + $0xdcc] sm:$0xf] }
 0x35b   :  { %7684 = vmatpush.bf16.msra.mxu3 %v9592_v55  ;;  %v12662_v55 = vld [vmem:[%s19901_s1 + $0xdec] sm:$0xf]  ;;  %v9765_v47 = vld [vmem:[%s19901_s1 + $0xcd8] sm:$0xf0] }
 0x35c   :  { %7646 = vmatpush.bf16.msra.mxu0 %v9192_v4  ;;  %v9416_v4 = vor.u32 %v12538_v34, %v9413_v52  ;;  %v9912_v44 = vor.u32 %v12662_v55, %v9909_v43  ;;  %v9893_v3 = vld [vmem:[%s19901_s1 + $0xdd8] sm:$0xf0]  ;;  %v12690_v60 = vld [vmem:[%s19901_s1 + $0xecc] sm:$0xf] }
 0x35d   :  { %7659 = vmatpush.bf16.msra.mxu1 %v9320_v42  ;;  %v10165_v42 = vld [vmem:[%s19901_s1 + $0xff8] sm:$0xf0]  ;;  %v12722_v5 = vld [vmem:[%s19901_s1 + $0xfcc] sm:$0xf] }
 0x35e   :  { %7672 = vmatpush.bf16.msra.mxu2 %v9448_v7  ;;  %v9544_v7 = vor.u32 %v12570_v40, %v9541_v0  ;;  %v10168_v58 = vor.u32 %v12726_v41, %v10165_v42  ;;  %v10149_v15 = vld [vmem:[%s19901_s1 + $0xfd8] sm:$0xf0]  ;;  %v12622_v56 = vld [vmem:[%s19901_s1 + $0xcac] sm:$0xf] }
 0x35f   :  { %7685 = vmatpush.bf16.msra.mxu3 %v9576_v20  ;;  %v12626_v20 = vld [vmem:[%s19901_s1 + $0xccc] sm:$0xf]  ;;  %v9749_v34 = vld [vmem:[%s19901_s1 + $0xcb8] sm:$0xf0]  ;;  %v10152_v52 = vor.u32 %v12722_v5, %v10149_v15 }
 0x360   :  { %7647 = vmatpush.bf16.msra.mxu0 %v9176_v59  ;;  %v10021_v59 = vld [vmem:[%s19901_s1 + $0xed8] sm:$0xf0]  ;;  %v12686_v0 = vld [vmem:[%s19901_s1 + $0xeac] sm:$0xf]  ;;  %v9752_v57 = vor.u32 %v12622_v56, %v9749_v34 }
 0x361   :  { %7660 = vmatpush.bf16.msra.mxu1 %v9304_v61  ;;  %v9768_v61 = vor.u32 %v12626_v20, %v9765_v47  ;;  %v10024_v63 = vor.u32 %v12690_v60, %v10021_v59  ;;  %v9877_v40 = vld [vmem:[%s19901_s1 + $0xdb8] sm:$0xf0]  ;;  %v12682_v24 = vld [vmem:[%s19901_s1 + $0xe8c] sm:$0xf] }
 0x362   :  { %7673 = vmatpush.bf16.msra.mxu2 %v9432_v11  ;;  %v9896_v11 = vor.u32 %v12658_v62, %v9893_v3  ;;  %v10005_v51 = vld [vmem:[%s19901_s1 + $0xeb8] sm:$0xf0]  ;;  %v12646_v47 = vld [vmem:[%s19901_s1 + $0xd6c] sm:$0xf] }
 0x363   :  { %7686 = vmatpush.bf16.msra.mxu3 %v9560_v1  ;;  %v12654_v1 = vld [vmem:[%s19901_s1 + $0xdac] sm:$0xf]  ;;  %v10133_v14 = vld [vmem:[%s19901_s1 + $0xfb8] sm:$0xf0]  ;;  %v10008_v48 = vor.u32 %v12686_v0, %v10005_v51 }
 0x364   :  { %7648 = vmatpush.bf16.msra.mxu0 %v9160_v36  ;;  %v9880_v55 = vor.u32 %v12654_v1, %v9877_v40  ;;  %v12650_v36 = vld [vmem:[%s19901_s1 + $0xd8c] sm:$0xf]  ;;  %v9861_v43 = vld [vmem:[%s19901_s1 + $0xd98] sm:$0xf0] }
 0x365   :  { %7661 = vmatpush.bf16.msra.mxu1 %v9288_v50  ;;  %v9989_v26 = vld [vmem:[%s19901_s1 + $0xe98] sm:$0xf0]  ;;  %v18942_v50 = vpop.f32.mrf.mxu0  ;;  %v12678_v3 = vld [vmem:[%s19901_s1 + $0xe6c] sm:$0xf] }
 0x366   :  { %7674 = vmatpush.bf16.msra.mxu2 %v9416_v4  ;;  %v12714_v4 = vld [vmem:[%s19901_s1 + $0xf8c] sm:$0xf]  ;;  %v10117_v41 = vld [vmem:[%s19901_s1 + $0xf98] sm:$0xf0] }
 0x367   :  { %7687 = vmatpush.bf16.msra.mxu3 %v9544_v7  ;;  %7649 = vmatmul.bf16.vlgmr.msra.gmra.mxu0 %v13929_v25  ;;  %v12718_v25 = vld [vmem:[%s19901_s1 + $0xfac] sm:$0xf]  ;;  %v18950_v7 = vpop.f32.mrf.mxu1  ;;  %v9717_v20 = vld [vmem:[%s19901_s1 + $0xc78] sm:$0xf0]  ;;  %v10120_v62 = vor.u32 %v12714_v4, %v10117_v41 }
 0x368   :  { %7693 = vmatpush.bf16.msrb.mxu0 %v9784_v19  ;;  %7662 = vmatmul.bf16.vlgmr.msra.gmra.mxu1 %v13942_v30  ;;  %v9733_v30 = vld [vmem:[%s19901_s1 + $0xc98] sm:$0xf0]  ;;  %v9864_v19 = vor.u32 %v12650_v36, %v9861_v43  ;;  %v12710_v59 = vld [vmem:[%s19901_s1 + $0xf6c] sm:$0xf] }
 0x369   :  { %7706 = vmatpush.bf16.msrb.mxu1 %v9912_v44  ;;  %7675 = vmatmul.bf16.vlgmr.msra.gmra.mxu2 %v13940_v29  ;;  %v12618_v29 = vld [vmem:[%s19901_s1 + $0xc8c] sm:$0xf]  ;;  %v9992_v44 = vor.u32 %v12682_v24, %v9989_v26  ;;  %v9973_v60 = vld [vmem:[%s19901_s1 + $0xe78] sm:$0xf0] }
 0x36a   :  { %7719 = vmatpush.bf16.msrb.mxu2 %v10040_v6  ;;  %7688 = vmatmul.bf16.vlgmr.msra.gmra.mxu3 %v13950_v33  ;;  %v10136_v33 = vor.u32 %v12718_v25, %v10133_v14  ;;  %v9736_v42 = vor.u32 %v12618_v29, %v9733_v30  ;;  %v12614_v6 = vld [vmem:[%s19901_s1 + $0xc6c] sm:$0xf]  ;;  %v10101_v5 = vld [vmem:[%s19901_s1 + $0xf78] sm:$0xf0]  ;;  %v7391_v25 = vadd.f32 %v18738_v21, %v18594_v54 }
 0x36b   :  { %7732 = vmatpush.bf16.msrb.mxu3 %v10168_v58  ;;  %v9845_v58 = vld [vmem:[%s19901_s1 + $0xd78] sm:$0xf0]  ;;  %v9720_v15 = vor.u32 %v12614_v6, %v9717_v20  ;;  %v12642_v34 = vld [vmem:[%s19901_s1 + $0xd4c] sm:$0xf]  ;;  %v10104_v1 = vor.u32 %v12710_v59, %v10101_v5 }
 0x36c   :  { %7694 = vmatpush.bf16.msrb.mxu0 %v9768_v61  ;;  %v9848_v61 = vor.u32 %v12646_v47, %v9845_v58  ;;  %v9701_v56 = vld [vmem:[%s19901_s1 + $0xc58] sm:$0xf0]  ;;  %v12674_v0 = vld [vmem:[%s19901_s1 + $0xe4c] sm:$0xf] }
 0x36d   :  { %7707 = vmatpush.bf16.msrb.mxu1 %v9896_v11  ;;  %v9976_v11 = vor.u32 %v12678_v3, %v9973_v60  ;;  %v9829_v40 = vld [vmem:[%s19901_s1 + $0xd58] sm:$0xf0]  ;;  %v18998_v14 = vpop.f32.mrf.mxu3  ;;  %v12606_v54 = vld [vmem:[%s19901_s1 + $0xc2c] sm:$0xf] }
 0x36e   :  { %7720 = vmatpush.bf16.msrb.mxu2 %v10024_v63  ;;  %v12610_v63 = vld [vmem:[%s19901_s1 + $0xc4c] sm:$0xf]  ;;  %v9957_v51 = vld [vmem:[%s19901_s1 + $0xe58] sm:$0xf0]  ;;  %v9832_v36 = vor.u32 %v12642_v34, %v9829_v40 }
 0x36f   :  { %7733 = vmatpush.bf16.msrb.mxu3 %v10152_v52  ;;  %v18985_v52 = vpop.f32.mrf.mxu2  ;;  %v9704_v29 = vor.u32 %v12610_v63, %v9701_v56  ;;  %v7457_v30 = vpop.f32.mrf.mxu1  ;;  %v9685_v21 = vld [vmem:[%s19901_s1 + $0xc38] sm:$0xf0]  ;;  %v12638_v43 = vld [vmem:[%s19901_s1 + $0xd2c] sm:$0xf] }
 0x370   :  { %7695 = vmatpush.bf16.msrb.mxu0 %v9752_v57  ;;  %v12706_v57 = vld [vmem:[%s19901_s1 + $0xf4c] sm:$0xf]  ;;  %v9813_v26 = vld [vmem:[%s19901_s1 + $0xd38] sm:$0xf0]  ;;  %v9688_v6 = vor.u32 %v12606_v54, %v9685_v21 }
 0x371   :  { %7708 = vmatpush.bf16.msrb.mxu1 %v9880_v55  ;;  %v10085_v55 = vld [vmem:[%s19901_s1 + $0xf58] sm:$0xf0]  ;;  %v12670_v4 = vld [vmem:[%s19901_s1 + $0xe2c] sm:$0xf] }
 0x372   :  { %7721 = vmatpush.bf16.msrb.mxu2 %v10008_v48  ;;  %v7444_v48 = vpop.f32.mrf.mxu0  ;;  %v10088_v24 = vor.u32 %v12706_v57, %v10085_v55  ;;  %v9941_v41 = vld [vmem:[%s19901_s1 + $0xe38] sm:$0xf0]  ;;  %v12602_v20 = vld [vmem:[%s19901_s1 + $0xc0c] sm:$0xf] }
 0x373   :  { %7734 = vmatpush.bf16.msrb.mxu3 %v10136_v33  ;;  %v9960_v33 = vor.u32 %v12674_v0, %v9957_v51  ;;  %v9669_v47 = vld [vmem:[%s19901_s1 + $0xc18] sm:$0xf0]  ;;  %v9944_v58 = vor.u32 %v12670_v4, %v9941_v41  ;;  %v12634_v3 = vld [vmem:[%s19901_s1 + $0xd0c] sm:$0xf] }
 0x374   :  { %7696 = vmatpush.bf16.msrb.mxu0 %v9736_v42  ;;  %v7404_v42 = vadd.f32 %v18746_v53, %v7391_v25  ;;  %v9797_v60 = vld [vmem:[%s19901_s1 + $0xd18] sm:$0xf0]  ;;  %v12666_v59 = vld [vmem:[%s19901_s1 + $0xe0c] sm:$0xf]  ;;  %v9672_v40 = vor.u32 %v12602_v20, %v9669_v47 }
 0x375   :  { %7709 = vmatpush.bf16.msrb.mxu1 %v9864_v19  ;;  %v12702_v19 = vld [vmem:[%s19901_s1 + $0xf2c] sm:$0xf]  ;;  %v10293_v56 = vld [vmem:[%s19901_s1 + $0x10f8] sm:$0xf0]  ;;  %v9800_v55 = vor.u32 %v12634_v3, %v9797_v60 }
 0x376   :  { %7722 = vmatpush.bf16.msrb.mxu2 %v9992_v44  ;;  %v10069_v44 = vld [vmem:[%s19901_s1 + $0xf38] sm:$0xf0]  ;;  %v7417_v53 = vadd.f32 %v18781_v17, %v7404_v42  ;;  %v12758_v63 = vld [vmem:[%s19901_s1 + $0x10ec] sm:$0xf] }
 0x377   :  { %7735 = vmatpush.bf16.msrb.mxu3 %v10120_v62  ;;  %v9816_v62 = vor.u32 %v12638_v43, %v9813_v26  ;;  %v10072_v5 = vor.u32 %v12702_v19, %v10069_v44  ;;  %v9925_v17 = vld [vmem:[%s19901_s1 + $0xe18] sm:$0xf0]  ;;  %v12790_v34 = vld [vmem:[%s19901_s1 + $0x11ec] sm:$0xf] }
 0x378   :  { %7697 = vmatpush.bf16.msrb.mxu0 %v9720_v15  ;;  %v12698_v15 = vld [vmem:[%s19901_s1 + $0xf0c] sm:$0xf]  ;;  %v10421_v0 = vld [vmem:[%s19901_s1 + $0x11f8] sm:$0xf0]  ;;  %v7430_v57 = vadd.f32 %v18792_v38, %v7417_v53  ;;  %v9928_v48 = vor.u32 %v12666_v59, %v9925_v17 }
 0x379   :  { %7710 = vmatpush.bf16.msrb.mxu1 %v9848_v61  ;;  %v10053_v61 = vld [vmem:[%s19901_s1 + $0xf18] sm:$0xf0]  ;;  %v12822_v51 = vld [vmem:[%s19901_s1 + $0x12ec] sm:$0xf]  ;;  %v10424_v21 = vor.u32 %v12790_v34, %v10421_v0 }
 0x37a   :  { %7723 = vmatpush.bf16.msrb.mxu2 %v9976_v11  ;;  %v7470_v11 = vpop.f32.mrf.mxu2  ;;  %v10549_v25 = vld [vmem:[%s19901_s1 + $0x12f8] sm:$0xf0]  ;;  %v7443_v54 = vadd.f32 %v18942_v50, %v7430_v57  ;;  %v12754_v38 = vld [vmem:[%s19901_s1 + $0x10cc] sm:$0xf] }
 0x37b   :  { %7736 = vmatpush.bf16.msrb.mxu3 %v10104_v1  ;;  %v7483_v1 = vpop.f32.mrf.mxu3  ;;  %v10677_v30 = vld [vmem:[%s19901_s1 + $0x13f8] sm:$0xf0]  ;;  %v10552_v43 = vor.u32 %v12822_v51, %v10549_v25  ;;  %v12786_v26 = vld [vmem:[%s19901_s1 + $0x11cc] sm:$0xf] }
 0x37c   :  { %7698 = vmatpush.bf16.msrb.mxu0 %v9704_v29  ;;  %v12854_v29 = vld [vmem:[%s19901_s1 + $0x13ec] sm:$0xf]  ;;  %v10405_v50 = vld [vmem:[%s19901_s1 + $0x11d8] sm:$0xf0]  ;;  %v7456_v20 = vadd.f32 %v18950_v7, %v7443_v54 }
 0x37d   :  { %7711 = vmatpush.bf16.msrb.mxu1 %v9832_v36  ;;  %v10056_v36 = vor.u32 %v12698_v15, %v10053_v61  ;;  %v10680_v4 = vor.u32 %v12854_v29, %v10677_v30  ;;  %v12818_v41 = vld [vmem:[%s19901_s1 + $0x12cc] sm:$0xf]  ;;  %v10533_v42 = vld [vmem:[%s19901_s1 + $0x12d8] sm:$0xf0]  ;;  %v10408_v47 = vor.u32 %v12786_v26, %v10405_v50 }
 0x37e   :  { %7724 = vmatpush.bf16.msrb.mxu2 %v9960_v33  ;;  %v10296_v33 = vor.u32 %v12758_v63, %v10293_v56  ;;  %v12850_v19 = vld [vmem:[%s19901_s1 + $0x13cc] sm:$0xf]  ;;  %v10661_v44 = vld [vmem:[%s19901_s1 + $0x13d8] sm:$0xf0]  ;;  %v10536_v53 = vor.u32 %v12818_v41, %v10533_v42  ;;  %v7469_v17 = vadd.f32 %v18985_v52, %v7456_v20 }
 0x37f   :  { %7737 = vmatpush.bf16.msrb.mxu3 %v10088_v24  ;;  %v10277_v24 = vld [vmem:[%s19901_s1 + $0x10d8] sm:$0xf0]  ;;  %v12782_v3 = vld [vmem:[%s19901_s1 + $0x11ac] sm:$0xf]  ;;  %v10664_v7 = vor.u32 %v12850_v19, %v10661_v44 }
 0x380   :  { %7699 = vmatpush.bf16.msrb.mxu0 %v9688_v6  ;;  %v10280_v6 = vor.u32 %v12754_v38, %v10277_v24  ;;  %v10389_v60 = vld [vmem:[%s19901_s1 + $0x11b8] sm:$0xf0]  ;;  %v12814_v59 = vld [vmem:[%s19901_s1 + $0x12ac] sm:$0xf] }
 0x381   :  { %7712 = vmatpush.bf16.msrb.mxu1 %v9816_v62  ;;  %v12750_v62 = vld [vmem:[%s19901_s1 + $0x10ac] sm:$0xf]  ;;  %v10645_v15 = vld [vmem:[%s19901_s1 + $0x13b8] sm:$0xf0]  ;;  %v10392_v11 = vor.u32 %v12782_v3, %v10389_v60 }
 0x382   :  { %7725 = vmatpush.bf16.msrb.mxu2 %v9944_v58  ;;  %v10261_v58 = vld [vmem:[%s19901_s1 + $0x10b8] sm:$0xf0]  ;;  %v12778_v63 = vld [vmem:[%s19901_s1 + $0x118c] sm:$0xf] }
 0x383   :  { %7738 = vmatpush.bf16.msrb.mxu3 %v10072_v5  ;;  %v10517_v5 = vld [vmem:[%s19901_s1 + $0x12b8] sm:$0xf0]  ;;  %v10264_v61 = vor.u32 %v12750_v62, %v10261_v58  ;;  %v12810_v34 = vld [vmem:[%s19901_s1 + $0x128c] sm:$0xf] }
 0x384   :  { %7700 = vmatpush.bf16.msrb.mxu0 %v9672_v40  ;;  %v10520_v52 = vor.u32 %v12814_v59, %v10517_v5  ;;  %v10373_v56 = vld [vmem:[%s19901_s1 + $0x1198] sm:$0xf0]  ;;  %v7482_v40 = vadd.f32 %v18998_v14, %v7469_v17  ;;  %v7494_v0 = vpop.f32.mrf.mxu0  ;;  %v12842_v51 = vld [vmem:[%s19901_s1 + $0x138c] sm:$0xf] }
 0x385   :  { %7713 = vmatpush.bf16.msrb.mxu1 %v9800_v55  ;;  %v10501_v1 = vld [vmem:[%s19901_s1 + $0x1298] sm:$0xf0]  ;;  %v7507_v55 = vpop.f32.mrf.mxu1  ;;  %v10376_v29 = vor.u32 %v12778_v63, %v10373_v56  ;;  %v12742_v14 = vld [vmem:[%s19901_s1 + $0x106c] sm:$0xf] }
 0x386   :  { %7726 = vmatpush.bf16.msrb.mxu2 %v9928_v48  ;;  %v10629_v25 = vld [vmem:[%s19901_s1 + $0x1398] sm:$0xf0]  ;;  %v7495_v48 = vadd.f32 %v7494_v0, %v7482_v40  ;;  %v10504_v30 = vor.u32 %v12810_v34, %v10501_v1  ;;  %v12838_v24 = vld [vmem:[%s19901_s1 + $0x136c] sm:$0xf] }
 0x387   :  { %7739 = vmatpush.bf16.msrb.mxu3 %v10056_v36  ;;  %7701 = vmatmul.bf16.vlgmr.msrb.gmra.mxu0 %v14139_v23  ;;  %v12846_v23 = vld [vmem:[%s19901_s1 + $0x13ac] sm:$0xf]  ;;  %v10229_v36 = vld [vmem:[%s19901_s1 + $0x1078] sm:$0xf0]  ;;  %v10632_v54 = vor.u32 %v12842_v51, %v10629_v25 }
 0x388   :  { %7745 = vmatpush.bf16.msra.mxu0 %v10296_v33  ;;  %7714 = vmatmul.bf16.vlgmr.msrb.gmra.mxu1 %v14152_v31  ;;  %v10245_v31 = vld [vmem:[%s19901_s1 + $0x1098] sm:$0xf0]  ;;  %v12774_v33 = vld [vmem:[%s19901_s1 + $0x116c] sm:$0xf]  ;;  %v7508_v50 = vadd.f32 %v7507_v55, %v7495_v48 }
 0x389   :  { %7758 = vmatpush.bf16.msra.mxu1 %v10424_v21  ;;  %7727 = vmatmul.bf16.vlgmr.msrb.gmra.mxu2 %v14150_v28  ;;  %v12746_v28 = vld [vmem:[%s19901_s1 + $0x108c] sm:$0xf]  ;;  %v10357_v21 = vld [vmem:[%s19901_s1 + $0x1178] sm:$0xf0] }
 0x38a   :  { %7771 = vmatpush.bf16.msra.mxu2 %v10552_v43  ;;  %7740 = vmatmul.bf16.vlgmr.msrb.gmra.mxu3 %v14160_v35  ;;  %v10648_v35 = vor.u32 %v12846_v23, %v10645_v15  ;;  %v10248_v57 = vor.u32 %v12746_v28, %v10245_v31  ;;  %v12806_v43 = vld [vmem:[%s19901_s1 + $0x126c] sm:$0xf]  ;;  %v10485_v38 = vld [vmem:[%s19901_s1 + $0x1278] sm:$0xf0]  ;;  %v10360_v41 = vor.u32 %v12774_v33, %v10357_v21 }
 0x38b   :  { %7784 = vmatpush.bf16.msra.mxu3 %v10680_v4  ;;  %v10613_v26 = vld [vmem:[%s19901_s1 + $0x1378] sm:$0xf0]  ;;  %v10232_v4 = vor.u32 %v12742_v14, %v10229_v36  ;;  %v10488_v42 = vor.u32 %v12806_v43, %v10485_v38  ;;  %v12738_v19 = vld [vmem:[%s19901_s1 + $0x104c] sm:$0xf] }
 0x38c   :  { %7746 = vmatpush.bf16.msra.mxu0 %v10280_v6  ;;  %v10213_v44 = vld [vmem:[%s19901_s1 + $0x1058] sm:$0xf0]  ;;  %v12770_v6 = vld [vmem:[%s19901_s1 + $0x114c] sm:$0xf]  ;;  %v10616_v20 = vor.u32 %v12838_v24, %v10613_v26  ;;  %v7496_v5 = vpop.f32.mrf.mxu0 }
 0x38d   :  { %7759 = vmatpush.bf16.msra.mxu1 %v10408_v47  ;;  %v7520_v47 = vpop.f32.mrf.mxu2  ;;  %v12802_v62 = vld [vmem:[%s19901_s1 + $0x124c] sm:$0xf]  ;;  %v10469_v58 = vld [vmem:[%s19901_s1 + $0x1258] sm:$0xf0]  ;;  %v10216_v17 = vor.u32 %v12738_v19, %v10213_v44  ;;  %v7509_v15 = vpop.f32.mrf.mxu1 }
 0x38e   :  { %7772 = vmatpush.bf16.msra.mxu2 %v10536_v53  ;;  %v10341_v53 = vld [vmem:[%s19901_s1 + $0x1158] sm:$0xf0]  ;;  %v7521_v3 = vadd.f32 %v7520_v47, %v7508_v50  ;;  %v12834_v60 = vld [vmem:[%s19901_s1 + $0x134c] sm:$0xf] }
 0x38f   :  { %7785 = vmatpush.bf16.msra.mxu3 %v10664_v7  ;;  %v7533_v7 = vpop.f32.mrf.mxu3  ;;  %v10597_v59 = vld [vmem:[%s19901_s1 + $0x1358] sm:$0xf0]  ;;  %v12734_v23 = vld [vmem:[%s19901_s1 + $0x102c] sm:$0xf] }
 0x390   :  { %7747 = vmatpush.bf16.msra.mxu0 %v10264_v61  ;;  %v19212_v61 = vadd.f32 %v7533_v7, %v7521_v3  ;;  %v10197_v28 = vld [vmem:[%s19901_s1 + $0x1038] sm:$0xf0]  ;;  %v12766_v31 = vld [vmem:[%s19901_s1 + $0x112c] sm:$0xf] }
 0x391   :  { %7760 = vmatpush.bf16.msra.mxu1 %v10392_v11  ;;  %v10344_v11 = vor.u32 %v12770_v6, %v10341_v53  ;;  %v10325_v63 = vld [vmem:[%s19901_s1 + $0x1138] sm:$0xf0]  ;;  %v12798_v56 = vld [vmem:[%s19901_s1 + $0x122c] sm:$0xf] }
 0x392   :  { %7773 = vmatpush.bf16.msra.mxu2 %v10520_v52  ;;  %v10472_v52 = vor.u32 %v12802_v62, %v10469_v58  ;;  %v10453_v34 = vld [vmem:[%s19901_s1 + $0x1238] sm:$0xf0]  ;;  %v12830_v1 = vld [vmem:[%s19901_s1 + $0x132c] sm:$0xf]  ;;  %v7965_v40 = vrot.slane %v19212_v61, 4  ;;  %v7983_v0 = vmul.f32 %v19212_v61, %v19212_v61  ;;  %v10328_v36 = vor.u32 %v12766_v31, %v10325_v63 }
 0x393   :  { %7786 = vmatpush.bf16.msra.mxu3 %v10648_v35  ;;  %v10600_v35 = vor.u32 %v12834_v60, %v10597_v59  ;;  %v10581_v51 = vld [vmem:[%s19901_s1 + $0x1338] sm:$0xf0]  ;;  %v12730_v25 = vld [vmem:[%s19901_s1 + $0x100c] sm:$0xf]  ;;  %v10456_v33 = vor.u32 %v12798_v56, %v10453_v34 }
 0x394   :  { %7748 = vmatpush.bf16.msra.mxu0 %v10248_v57  ;;  %v10200_v57 = vor.u32 %v12734_v23, %v10197_v28  ;;  %v10181_v55 = vld [vmem:[%s19901_s1 + $0x1018] sm:$0xf0]  ;;  %v12762_v48 = vld [vmem:[%s19901_s1 + $0x110c] sm:$0xf]  ;;  %v7997_v14 = vrot.slane %v7983_v0, 4  ;;  %v10584_v43 = vor.u32 %v12830_v1, %v10581_v51 }
 0x395   :  { %7761 = vmatpush.bf16.msra.mxu1 %v10376_v29  ;;  %v10309_v29 = vld [vmem:[%s19901_s1 + $0x1118] sm:$0xf0]  ;;  %v12826_v38 = vld [vmem:[%s19901_s1 + $0x130c] sm:$0xf]  ;;  %v10184_v6 = vor.u32 %v12730_v25, %v10181_v55 }
 0x396   :  { %7774 = vmatpush.bf16.msra.mxu2 %v10504_v30  ;;  %v7966_v30 = vadd.f32 %v7965_v40, %v19212_v61  ;;  %v10437_v21 = vld [vmem:[%s19901_s1 + $0x1218] sm:$0xf0]  ;;  %v12886_v26 = vld [vmem:[%s19901_s1 + $0x14ec] sm:$0xf]  ;;  %v10312_v3 = vor.u32 %v12762_v48, %v10309_v29 }
 0x397   :  { %7787 = vmatpush.bf16.msra.mxu3 %v10632_v54  ;;  %v12794_v54 = vld [vmem:[%s19901_s1 + $0x120c] sm:$0xf]  ;;  %v10565_v24 = vld [vmem:[%s19901_s1 + $0x1318] sm:$0xf0]  ;;  %v7535_v44 = vpop.f32.mrf.mxu3 }
 0x398   :  { %7749 = vmatpush.bf16.msra.mxu0 %v10232_v4  ;;  %v7522_v4 = vpop.f32.mrf.mxu2  ;;  %v7967_v50 = vrot.slane %v7966_v30, 2  ;;  %v12918_v19 = vld [vmem:[%s19901_s1 + $0x15ec] sm:$0xf]  ;;  %v11061_v53 = vld [vmem:[%s19901_s1 + $0x16f8] sm:$0xf0]  ;;  %v10440_v7 = vor.u32 %v12794_v54, %v10437_v21  ;;  %v10568_v5 = vor.u32 %v12826_v38, %v10565_v24 }
 0x399   :  { %7762 = vmatpush.bf16.msra.mxu1 %v10360_v41  ;;  %v7998_v41 = vadd.f32 %v7997_v14, %v7983_v0  ;;  %v12950_v47 = vld [vmem:[%s19901_s1 + $0x16ec] sm:$0xf]  ;;  %v11189_v59 = vld [vmem:[%s19901_s1 + $0x17f8] sm:$0xf0] }
 0x39a   :  { %7775 = vmatpush.bf16.msra.mxu2 %v10488_v42  ;;  %v10805_v42 = vld [vmem:[%s19901_s1 + $0x14f8] sm:$0xf0]  ;;  %v7968_v62 = vadd.f32 %v7967_v50, %v7966_v30  ;;  %v12982_v60 = vld [vmem:[%s19901_s1 + $0x17ec] sm:$0xf]  ;;  %v11064_v28 = vor.u32 %v12950_v47, %v11061_v53 }
 0x39b   :  { %7788 = vmatpush.bf16.msra.mxu3 %v10616_v20  ;;  %v10933_v20 = vld [vmem:[%s19901_s1 + $0x15f8] sm:$0xf0]  ;;  %v7999_v58 = vrot.slane %v7998_v41, 2  ;;  %v12882_v23 = vld [vmem:[%s19901_s1 + $0x14cc] sm:$0xf] }
 0x39c   :  { %7750 = vmatpush.bf16.msra.mxu0 %v10216_v17  ;;  %v10808_v17 = vor.u32 %v12886_v26, %v10805_v42  ;;  %v7969_v15 = vrot.slane %v7968_v62, 1  ;;  %v10789_v31 = vld [vmem:[%s19901_s1 + $0x14d8] sm:$0xf0]  ;;  %v12914_v63 = vld [vmem:[%s19901_s1 + $0x15cc] sm:$0xf] }
 0x39d   :  { %7763 = vmatpush.bf16.msra.mxu1 %v10344_v11  ;;  %v8000_v11 = vadd.f32 %v7999_v58, %v7998_v41  ;;  %v10917_v56 = vld [vmem:[%s19901_s1 + $0x15d8] sm:$0xf0]  ;;  %v12946_v34 = vld [vmem:[%s19901_s1 + $0x16cc] sm:$0xf] }
 0x39e   :  { %7776 = vmatpush.bf16.msra.mxu2 %v10472_v52  ;;  %v10936_v52 = vor.u32 %v12918_v19, %v10933_v20  ;;  %v11045_v1 = vld [vmem:[%s19901_s1 + $0x16d8] sm:$0xf0]  ;;  %v7970_v40 = vadd.f32 %v7969_v15, %v7968_v62  ;;  %v12978_v51 = vld [vmem:[%s19901_s1 + $0x17cc] sm:$0xf]  ;;  %v10920_v30 = vor.u32 %v12914_v63, %v10917_v56 }
 0x39f   :  { %7789 = vmatpush.bf16.msra.mxu3 %v10600_v35  ;;  %v11192_v35 = vor.u32 %v12982_v60, %v11189_v59  ;;  %v8001_v0 = vrot.slane %v8000_v11, 1  ;;  %v11173_v25 = vld [vmem:[%s19901_s1 + $0x17d8] sm:$0xf0]  ;;  %v12878_v55 = vld [vmem:[%s19901_s1 + $0x14ac] sm:$0xf]  ;;  %v11048_v14 = vor.u32 %v12946_v34, %v11045_v1 }
 0x3a0   :  { %7751 = vmatpush.bf16.msra.mxu0 %v10200_v57  ;;  %v10792_v57 = vor.u32 %v12882_v23, %v10789_v31  ;;  %v19314_v48 = vmul.f32 0.125, %v7970_v40  ;;  %v11176_v54 = vor.u32 %v12978_v51, %v11173_v25  ;;  %v10901_v21 = vld [vmem:[%s19901_s1 + $0x15b8] sm:$0xf0]  ;;  %v12906_v44 = vld [vmem:[%s19901_s1 + $0x158c] sm:$0xf] }
 0x3a1   :  { %7764 = vmatpush.bf16.msra.mxu1 %v10328_v36  ;;  %v8002_v29 = vadd.f32 %v8001_v0, %v8000_v11  ;;  %v10773_v36 = vld [vmem:[%s19901_s1 + $0x14b8] sm:$0xf0]  ;;  %v12938_v20 = vld [vmem:[%s19901_s1 + $0x168c] sm:$0xf] }
 0x3a2   :  { %7777 = vmatpush.bf16.msra.mxu2 %v10456_v33  ;;  %v12910_v33 = vld [vmem:[%s19901_s1 + $0x15ac] sm:$0xf]  ;;  %v11029_v38 = vld [vmem:[%s19901_s1 + $0x16b8] sm:$0xf0]  ;;  %v8015_v26 = vmul.f32 %v19314_v48, %v19314_v48  ;;  %v10776_v50 = vor.u32 %v12878_v55, %v10773_v36 }
 0x3a3   :  { %7790 = vmatpush.bf16.msra.mxu3 %v10584_v43  ;;  %v12942_v43 = vld [vmem:[%s19901_s1 + $0x16ac] sm:$0xf]  ;;  %v8011_v24 = vmul.f32 0.125, %v8002_v29  ;;  %v11157_v4 = vld [vmem:[%s19901_s1 + $0x17b8] sm:$0xf0]  ;;  %v10904_v42 = vor.u32 %v12910_v33, %v10901_v21 }
 0x3a4   :  { %7752 = vmatpush.bf16.msra.mxu0 %v10184_v6  ;;  %v11032_v19 = vor.u32 %v12942_v43, %v11029_v38  ;;  %v10885_v6 = vld [vmem:[%s19901_s1 + $0x1598] sm:$0xf0]  ;;  %v12970_v62 = vld [vmem:[%s19901_s1 + $0x178c] sm:$0xf]  ;;  %v7546_v60 = vpop.f32.mrf.mxu0 }
 0x3a5   :  { %7765 = vmatpush.bf16.msra.mxu1 %v10312_v3  ;;  %v8019_v41 = vsub.f32 %v8011_v24, %v8015_v26  ;;  %v11013_v47 = vld [vmem:[%s19901_s1 + $0x1698] sm:$0xf0]  ;;  %v12902_v15 = vld [vmem:[%s19901_s1 + $0x156c] sm:$0xf]  ;;  %v7559_v11 = vpop.f32.mrf.mxu1 }
 0x3a6   :  { %7778 = vmatpush.bf16.msra.mxu2 %v10440_v7  ;;  %v11141_v58 = vld [vmem:[%s19901_s1 + $0x1798] sm:$0xf0]  ;;  %v12870_v7 = vld [vmem:[%s19901_s1 + $0x146c] sm:$0xf] }
 0x3a7   :  { %7791 = vmatpush.bf16.msra.mxu3 %v10568_v5  ;;  %7753 = vmatmul.bf16.vlgmr.msra.gmra.mxu0 %v14349_v37  ;;  %v12974_v37 = vld [vmem:[%s19901_s1 + $0x17ac] sm:$0xf]  ;;  %v8023_v53 = vmax.f32 %v8019_v41, 0.0  ;;  %v10888_v5 = vor.u32 %v12906_v44, %v10885_v6  ;;  %v10741_v23 = vld [vmem:[%s19901_s1 + $0x1478] sm:$0xf0] }
 0x3a8   :  { %7797 = vmatpush.bf16.msrb.mxu0 %v10808_v17  ;;  %7766 = vmatmul.bf16.vlgmr.msra.gmra.mxu1 %v14362_v46  ;;  %v10757_v46 = vld [vmem:[%s19901_s1 + $0x1498] sm:$0xf0]  ;;  %v11016_v17 = vor.u32 %v12938_v20, %v11013_v47  ;;  %v12934_v31 = vld [vmem:[%s19901_s1 + $0x166c] sm:$0xf]  ;;  %v10744_v1 = vor.u32 %v12870_v7, %v10741_v23 }
 0x3a9   :  { %7810 = vmatpush.bf16.msrb.mxu1 %v10936_v52  ;;  %7779 = vmatmul.bf16.vlgmr.msra.gmra.mxu2 %v14360_v45  ;;  %v12874_v45 = vld [vmem:[%s19901_s1 + $0x148c] sm:$0xf]  ;;  %v19370_v59 = vadd.f32 1e-05, %v8023_v53  ;;  %v11144_v52 = vor.u32 %v12970_v62, %v11141_v58  ;;  %v10997_v63 = vld [vmem:[%s19901_s1 + $0x1678] sm:$0xf0] }
 0x3aa   :  { %7823 = vmatpush.bf16.msrb.mxu2 %v11064_v28  ;;  %7792 = vmatmul.bf16.vlgmr.msra.gmra.mxu3 %v14370_v49  ;;  %v11160_v49 = vor.u32 %v12974_v37, %v11157_v4  ;;  %v10760_v3 = vor.u32 %v12874_v45, %v10757_v46  ;;  %v10869_v28 = vld [vmem:[%s19901_s1 + $0x1578] sm:$0xf0]  ;;  %v12966_v56 = vld [vmem:[%s19901_s1 + $0x176c] sm:$0xf]  ;;  %v11000_v0 = vor.u32 %v12934_v31, %v10997_v63 }
 0x3ab   :  { %7836 = vmatpush.bf16.msrb.mxu3 %v11192_v35  ;;  %v7560_v35 = vadd.f32 %v7559_v11, %v7546_v60  ;;  %13245 = vrsqrt.f32 %v19370_v59  ;;  %v11125_v34 = vld [vmem:[%s19901_s1 + $0x1778] sm:$0xf0]  ;;  %v10872_v40 = vor.u32 %v12902_v15, %v10869_v28  ;;  %v12866_v51 = vld [vmem:[%s19901_s1 + $0x144c] sm:$0xf]  ;;  %vm8059_vm7 = vweird.f32 %v19370_v59 }
 0x3ac   :  { %7798 = vmatpush.bf16.msrb.mxu0 %v10792_v57  ;;  %v10725_v25 = vld [vmem:[%s19901_s1 + $0x1458] sm:$0xf0]  ;;  %v12898_v57 = vld [vmem:[%s19901_s1 + $0x154c] sm:$0xf]  ;;  %v7572_v55 = vpop.f32.mrf.mxu2  ;;  %v11128_v29 = vor.u32 %v12966_v56, %v11125_v34  ;;  %v7548_v26 = vpop.f32.mrf.mxu0 }
 0x3ad   :  { %7811 = vmatpush.bf16.msrb.mxu1 %v10920_v30  ;;  %v10853_v30 = vld [vmem:[%s19901_s1 + $0x1558] sm:$0xf0]  ;;  %v7573_v33 = vadd.f32 %v7572_v55, %v7560_v35  ;;  %v12962_v21 = vld [vmem:[%s19901_s1 + $0x174c] sm:$0xf]  ;;  %v10728_v38 = vor.u32 %v12866_v51, %v10725_v25  ;;  %v7561_v45 = vpop.f32.mrf.mxu1  ;;  %v19510_v26 = vld [vmem:[%s19903_s2] sm:$0xf] }
 0x3ae   :  { %7824 = vmatpush.bf16.msrb.mxu2 %v11048_v14  ;;  %v12930_v14 = vld [vmem:[%s19901_s1 + $0x164c] sm:$0xf]  ;;  %v10981_v36 = vld [vmem:[%s19901_s1 + $0x1658] sm:$0xf0]  ;;  %v10856_v4 = vor.u32 %v12898_v57, %v10853_v30 }
 0x3af   :  { %7837 = vmatpush.bf16.msrb.mxu3 %v11176_v54  ;;  %v7585_v54 = vpop.f32.mrf.mxu3  ;;  %v11109_v43 = vld [vmem:[%s19901_s1 + $0x1758] sm:$0xf0]  ;;  %v12862_v41 = vld [vmem:[%s19901_s1 + $0x142c] sm:$0xf] }
 0x3b0   :  { %7799 = vmatpush.bf16.msrb.mxu0 %v10776_v50  ;;  %v19418_v24 = vadd.f32 %v7585_v54, %v7573_v33  ;;  %v10984_v50 = vor.u32 %v12930_v14, %v10981_v36  ;;  %v11112_v44 = vor.u32 %v12962_v21, %v11109_v43  ;;  %v12926_v6 = vld [vmem:[%s19901_s1 + $0x162c] sm:$0xf]  ;;  %v10965_v20 = vld [vmem:[%s19901_s1 + $0x1638] sm:$0xf0] }
 0x3b1   :  { %7812 = vmatpush.bf16.msrb.mxu1 %v10904_v42  ;;  %v19420_v37 = vpop.eup %13245  ;;  %v10709_v42 = vld [vmem:[%s19901_s1 + $0x1438] sm:$0xf0]  ;;  %v12958_v47 = vld [vmem:[%s19901_s1 + $0x172c] sm:$0xf]  ;;  %v10968_v23 = vor.u32 %v12926_v6, %v10965_v20 }
 0x3b2   :  { %7825 = vmatpush.bf16.msrb.mxu2 %v11032_v19  ;;  %v12894_v19 = vld [vmem:[%s19901_s1 + $0x152c] sm:$0xf]  ;;  %v8054_v46 = vmul.f32 %v19420_v37, %v19370_v59  ;;  %v11093_v53 = vld [vmem:[%s19901_s1 + $0x1738] sm:$0xf0]  ;;  %vm8060_vm6 = vweird.f32 %v19420_v37  ;;  %v8081_v59 = vperm.slane %v19510_v26, 2 }
 0x3b3   :  { %7838 = vmatpush.bf16.msrb.mxu3 %v11160_v49  ;;  %v10837_v49 = vld [vmem:[%s19901_s1 + $0x1538] sm:$0xf0]  ;;  %v12858_v62 = vld [vmem:[%s19901_s1 + $0x140c] sm:$0xf]  ;;  %v11096_v63 = vor.u32 %v12958_v47, %v11093_v53  ;;  %vm8061_vm8 = vmor %vm8059_vm7, %vm8060_vm6 }
 0x3b4   :  { %7800 = vmatpush.bf16.msrb.mxu0 %v10760_v3  ;;  %v8055_v58 = vmul.f32 %v19420_v37, %v8054_v46  ;;  %v10712_v3 = vor.u32 %v12862_v41, %v10709_v42  ;;  %v10693_v7 = vld [vmem:[%s19901_s1 + $0x1418] sm:$0xf0]  ;;  %v12890_v60 = vld [vmem:[%s19901_s1 + $0x150c] sm:$0xf]  ;;  %v7574_v28 = vpop.f32.mrf.mxu2 }
 0x3b5   :  { %7813 = vmatpush.bf16.msrb.mxu1 %v10888_v5  ;;  %v10821_v5 = vld [vmem:[%s19901_s1 + $0x1518] sm:$0xf0]  ;;  %v12922_v15 = vld [vmem:[%s19901_s1 + $0x160c] sm:$0xf]  ;;  %v10696_v25 = vor.u32 %v12858_v62, %v10693_v7 }
 0x3b6   :  { %7826 = vmatpush.bf16.msrb.mxu2 %v11016_v17  ;;  %v10840_v17 = vor.u32 %v12894_v19, %v10837_v49  ;;  %v10949_v11 = vld [vmem:[%s19901_s1 + $0x1618] sm:$0xf0]  ;;  %v8056_v31 = vmul.f32 0.5, %v8055_v58  ;;  %v13014_v56 = vld [vmem:[%s19901_s1 + $0x18ec] sm:$0xf] }
 0x3b7   :  { %7839 = vmatpush.bf16.msrb.mxu3 %v11144_v52  ;;  %v12954_v52 = vld [vmem:[%s19901_s1 + $0x170c] sm:$0xf]  ;;  %v11077_v35 = vld [vmem:[%s19901_s1 + $0x1718] sm:$0xf0]  ;;  %v7587_v34 = vpop.f32.mrf.mxu3  ;;  %v10952_v30 = vor.u32 %v12922_v15, %v10949_v11  ;;  %v19532_v49 = vld [vmem:[%s19904_s3] sm:$0xf] }
 0x3b8   :  { %7801 = vmatpush.bf16.msrb.mxu0 %v10744_v1  ;;  %v11317_v1 = vld [vmem:[%s19901_s1 + $0x18f8] sm:$0xf0]  ;;  %v8057_v51 = vsub.f32 1.5, %v8056_v31  ;;  %v13078_v57 = vld [vmem:[%s19901_s1 + $0x1aec] sm:$0xf]  ;;  %v11080_v54 = vor.u32 %v12954_v52, %v11077_v35 }
 0x3b9   :  { %7814 = vmatpush.bf16.msrb.mxu1 %v10872_v40  ;;  %v13046_v40 = vld [vmem:[%s19901_s1 + $0x19ec] sm:$0xf]  ;;  %v11573_v55 = vld [vmem:[%s19901_s1 + $0x1af8] sm:$0xf0]  ;;  %v11320_v21 = vor.u32 %v13014_v56, %v11317_v1 }
 0x3ba   :  { %7827 = vmatpush.bf16.msrb.mxu2 %v11000_v0  ;;  %v11445_v0 = vld [vmem:[%s19901_s1 + $0x19f8] sm:$0xf0]  ;;  %v13110_v14 = vld [vmem:[%s19901_s1 + $0x1bec] sm:$0xf]  ;;  %v8058_v33 = vmul.f32 %v19420_v37, %v8057_v51 }
 0x3bb   :  { %7840 = vmatpush.bf16.msrb.mxu3 %v11128_v29  ;;  %v10824_v29 = vor.u32 %v12890_v60, %v10821_v5  ;;  %v11701_v36 = vld [vmem:[%s19901_s1 + $0x1bf8] sm:$0xf0]  ;;  %v13010_v43 = vld [vmem:[%s19901_s1 + $0x18cc] sm:$0xf] }
 0x3bc   :  { %7802 = vmatpush.bf16.msrb.mxu0 %v10728_v38  ;;  %v8027_v38 = vsub.f32 %v19212_v61, %v19314_v48  ;;  %v11301_v41 = vld [vmem:[%s19901_s1 + $0x18d8] sm:$0xf0]  ;;  %v13042_v61 = vld [vmem:[%s19901_s1 + $0x19cc] sm:$0xf]  ;;  %v8062_v48 = vsel %vm8061_vm8, %v19420_v37, %v8058_v33  ;;  %v11704_v42 = vor.u32 %v13110_v14, %v11701_v36  ;;  %v8095_v37 = vperm.slane %v19532_v49, 2 }
 0x3bd   :  { %7815 = vmatpush.bf16.msrb.mxu1 %v10856_v4  ;;  %v11448_v4 = vor.u32 %v13046_v40, %v11445_v0  ;;  %v11429_v19 = vld [vmem:[%s19901_s1 + $0x19d8] sm:$0xf0]  ;;  %v13074_v45 = vld [vmem:[%s19901_s1 + $0x1acc] sm:$0xf]  ;;  %v11304_v47 = vor.u32 %v13010_v43, %v11301_v41 }
 0x3be   :  { %7828 = vmatpush.bf16.msrb.mxu2 %v10984_v50  ;;  %v11576_v50 = vor.u32 %v13078_v57, %v11573_v55  ;;  %v11557_v46 = vld [vmem:[%s19901_s1 + $0x1ad8] sm:$0xf0]  ;;  %v13106_v6 = vld [vmem:[%s19901_s1 + $0x1bcc] sm:$0xf]  ;;  %v11432_v62 = vor.u32 %v13042_v61, %v11429_v19 }
 0x3bf   :  { %7841 = vmatpush.bf16.msrb.mxu3 %v11112_v44  ;;  %v8075_v44 = vmul.f32 %v8062_v48, %v8027_v38  ;;  %v11685_v20 = vld [vmem:[%s19901_s1 + $0x1bd8] sm:$0xf0]  ;;  %v11560_v58 = vor.u32 %v13074_v45, %v11557_v46  ;;  %v13038_v60 = vld [vmem:[%s19901_s1 + $0x19ac] sm:$0xf] }
 0x3c0   :  { %7803 = vmatpush.bf16.msrb.mxu0 %v10712_v3  ;;  %v13006_v3 = vld [vmem:[%s19901_s1 + $0x18ac] sm:$0xf]  ;;  %v11285_v7 = vld [vmem:[%s19901_s1 + $0x18b8] sm:$0xf0]  ;;  %v11688_v5 = vor.u32 %v13106_v6, %v11685_v20 }
 0x3c1   :  { %7816 = vmatpush.bf16.msrb.mxu1 %v10840_v17  ;;  %v8089_v53 = vmul.f32 %v8081_v59, %v8075_v44  ;;  %v11413_v17 = vld [vmem:[%s19901_s1 + $0x19b8] sm:$0xf0]  ;;  %v11288_v28 = vor.u32 %v13006_v3, %v11285_v7  ;;  %v13002_v31 = vld [vmem:[%s19901_s1 + $0x188c] sm:$0xf] }
 0x3c2   :  { %7829 = vmatpush.bf16.msrb.mxu2 %v10968_v23  ;;  %v13070_v23 = vld [vmem:[%s19901_s1 + $0x1aac] sm:$0xf]  ;;  %v11541_v15 = vld [vmem:[%s19901_s1 + $0x1ab8] sm:$0xf0] }
 0x3c3   :  { %7842 = vmatpush.bf16.msrb.mxu3 %v11096_v63  ;;  %v8103_v11 = vadd.f32 %v8095_v37, %v8089_v53  ;;  %v11669_v52 = vld [vmem:[%s19901_s1 + $0x1bb8] sm:$0xf0]  ;;  %v13034_v56 = vld [vmem:[%s19901_s1 + $0x198c] sm:$0xf] }
 0x3c4   :  { %7804 = vmatpush.bf16.msrb.mxu0 %v10696_v25  ;;  %v11269_v35 = vld [vmem:[%s19901_s1 + $0x1898] sm:$0xf0]  ;;  %v13066_v1 = vld [vmem:[%s19901_s1 + $0x1a8c] sm:$0xf] }
 0x3c5   :  { %7817 = vmatpush.bf16.msrb.mxu1 %v10824_v29  ;;  %v8107_v63 = vmax.f32 %v8103_v11, 0.0  ;;  %v11397_v34 = vld [vmem:[%s19901_s1 + $0x1998] sm:$0xf0]  ;;  %v13098_v51 = vld [vmem:[%s19901_s1 + $0x1b8c] sm:$0xf]  ;;  %v11272_v57 = vor.u32 %v13002_v31, %v11269_v35  ;;  %v7598_v29 = vpop.f32.mrf.mxu0 }
 0x3c6   :  { %7830 = vmatpush.bf16.msrb.mxu2 %v10952_v30  ;;  %v11525_v40 = vld [vmem:[%s19901_s1 + $0x1a98] sm:$0xf0]  ;;  %v12998_v55 = vld [vmem:[%s19901_s1 + $0x186c] sm:$0xf]  ;;  %v11400_v30 = vor.u32 %v13034_v56, %v11397_v34 }
 0x3c7   :  { %7843 = vmatpush.bf16.msrb.mxu3 %v11080_v54  ;;  %7805 = vmatmul.bf16.vlgmr.msrb.gmra.mxu0 %v14561_v8  ;;  %v13102_v8 = vld [vmem:[%s19901_s1 + $0x1bac] sm:$0xf]  ;;  %v8111_v0 = vmin.f32 %v8107_v63, 6.0  ;;  %v11653_v25 = vld [vmem:[%s19901_s1 + $0x1b98] sm:$0xf0]  ;;  %v11528_v14 = vor.u32 %v13066_v1, %v11525_v40  ;;  %v7599_v54 = vadd.f32 %v7598_v29, %v19418_v24 }
 0x3c8   :  { %7849 = vmatpush.bf16.msra.mxu0 %v11320_v21  ;;  %7818 = vmatmul.bf16.vlgmr.msrb.gmra.mxu1 %v14574_v13  ;;  %v11544_v13 = vor.u32 %v13070_v23, %v11541_v15  ;;  %v11253_v36 = vld [vmem:[%s19901_s1 + $0x1878] sm:$0xf0]  ;;  %v13030_v33 = vld [vmem:[%s19901_s1 + $0x196c] sm:$0xf]  ;;  %v7611_v21 = vpop.f32.mrf.mxu1  ;;  %v11656_v43 = vor.u32 %v13098_v51, %v11653_v25 }
 0x3c9   :  { %7862 = vmatpush.bf16.msra.mxu1 %v11448_v4  ;;  %7831 = vmatmul.bf16.vlgmr.msrb.gmra.mxu2 %v14572_v12  ;;  %v11416_v12 = vor.u32 %v13038_v60, %v11413_v17  ;;  %8115 = vst [vmem:[%s19905_s4 + $0x10] sm:$0xff] %v8111_v0  ;;  %v11381_v38 = vld [vmem:[%s19901_s1 + $0x1978] sm:$0xf0]  ;;  %v13062_v59 = vld [vmem:[%s19901_s1 + $0x1a6c] sm:$0xf]  ;;  %v7612_v41 = vadd.f32 %v7611_v21, %v7599_v54 }
 0x3ca   :  { %7875 = vmatpush.bf16.msra.mxu2 %v11576_v50  ;;  %7844 = vmatmul.bf16.vlgmr.msrb.gmra.mxu3 %v14582_v16  ;;  %v11672_v16 = vor.u32 %v13102_v8, %v11669_v52  ;;  %v11509_v4 = vld [vmem:[%s19901_s1 + $0x1a78] sm:$0xf0]  ;;  %v13094_v50 = vld [vmem:[%s19901_s1 + $0x1b6c] sm:$0xf]  ;;  %v11256_v61 = vor.u32 %v12998_v55, %v11253_v36  ;;  %v11384_v48 = vor.u32 %v13030_v33, %v11381_v38 }
 0x3cb   :  { %7888 = vmatpush.bf16.msra.mxu3 %v11704_v42  ;;  %v11637_v24 = vld [vmem:[%s19901_s1 + $0x1b78] sm:$0xf0]  ;;  %v11512_v42 = vor.u32 %v13062_v59, %v11509_v4  ;;  %v12994_v19 = vld [vmem:[%s19901_s1 + $0x184c] sm:$0xf] }
 0x3cc   :  { %7850 = vmatpush.bf16.msra.mxu0 %v11304_v47  ;;  %v11237_v45 = vld [vmem:[%s19901_s1 + $0x1858] sm:$0xf0]  ;;  %v13026_v46 = vld [vmem:[%s19901_s1 + $0x194c] sm:$0xf]  ;;  %v7624_v44 = vpop.f32.mrf.mxu2  ;;  %v11640_v37 = vor.u32 %v13094_v50, %v11637_v24 }
 0x3cd   :  { %7863 = vmatpush.bf16.msra.mxu1 %v11432_v62  ;;  %v11365_v6 = vld [vmem:[%s19901_s1 + $0x1958] sm:$0xf0]  ;;  %v13058_v20 = vld [vmem:[%s19901_s1 + $0x1a4c] sm:$0xf]  ;;  %v7625_v53 = vadd.f32 %v7624_v44, %v7612_v41  ;;  %v7637_v62 = vpop.f32.mrf.mxu3  ;;  %v11240_v7 = vor.u32 %v12994_v19, %v11237_v45 }
 0x3ce   :  { %7876 = vmatpush.bf16.msra.mxu2 %v11560_v58  ;;  %v11493_v47 = vld [vmem:[%s19901_s1 + $0x1a58] sm:$0xf0]  ;;  %v13090_v58 = vld [vmem:[%s19901_s1 + $0x1b4c] sm:$0xf]  ;;  %v11368_v17 = vor.u32 %v13026_v46, %v11365_v6 }
 0x3cf   :  { %7889 = vmatpush.bf16.msra.mxu3 %v11688_v5  ;;  %v11621_v3 = vld [vmem:[%s19901_s1 + $0x1b58] sm:$0xf0]  ;;  %v19645_v60 = vadd.f32 %v7637_v62, %v7625_v53  ;;  %v7600_v5 = vpop.f32.mrf.mxu0  ;;  %v11496_v23 = vor.u32 %v13058_v20, %v11493_v47  ;;  %v12990_v15 = vld [vmem:[%s19901_s1 + $0x182c] sm:$0xf] }
 0x3d0   :  { %7851 = vmatpush.bf16.msra.mxu0 %v11288_v28  ;;  %v11221_v11 = vld [vmem:[%s19901_s1 + $0x1838] sm:$0xf0]  ;;  %v13022_v8 = vld [vmem:[%s19901_s1 + $0x192c] sm:$0xf]  ;;  %v7613_v52 = vpop.f32.mrf.mxu1  ;;  %v11624_v28 = vor.u32 %v13090_v58, %v11621_v3 }
 0x3d1   :  { %7864 = vmatpush.bf16.msra.mxu1 %v11416_v12  ;;  %v11349_v31 = vld [vmem:[%s19901_s1 + $0x1938] sm:$0xf0]  ;;  %v13054_v63 = vld [vmem:[%s19901_s1 + $0x1a2c] sm:$0xf]  ;;  %v11224_v56 = vor.u32 %v12990_v15, %v11221_v11 }
 0x3d2   :  { %7877 = vmatpush.bf16.msra.mxu2 %v11544_v13  ;;  %v11477_v12 = vld [vmem:[%s19901_s1 + $0x1a38] sm:$0xf0]  ;;  %v13086_v13 = vld [vmem:[%s19901_s1 + $0x1b2c] sm:$0xf]  ;;  %v11352_v1 = vor.u32 %v13022_v8, %v11349_v31 }
 0x3d3   :  { %7890 = vmatpush.bf16.msra.mxu3 %v11672_v16  ;;  %v11605_v35 = vld [vmem:[%s19901_s1 + $0x1b38] sm:$0xf0]  ;;  %v12986_v16 = vld [vmem:[%s19901_s1 + $0x180c] sm:$0xf]  ;;  %v11480_v40 = vor.u32 %v13054_v63, %v11477_v12 }
 0x3d4   :  { %7852 = vmatpush.bf16.msra.mxu0 %v11272_v57  ;;  %v11205_v34 = vld [vmem:[%s19901_s1 + $0x1818] sm:$0xf0]  ;;  %v13018_v0 = vld [vmem:[%s19901_s1 + $0x190c] sm:$0xf]  ;;  %v7626_v57 = vpop.f32.mrf.mxu2  ;;  %v11608_v55 = vor.u32 %v13086_v13, %v11605_v35 }
 0x3d5   :  { %7865 = vmatpush.bf16.msra.mxu1 %v11400_v30  ;;  %v11333_v51 = vld [vmem:[%s19901_s1 + $0x1918] sm:$0xf0]  ;;  %v13050_v25 = vld [vmem:[%s19901_s1 + $0x1a0c] sm:$0xf]  ;;  %v7639_v36 = vpop.f32.mrf.mxu3 }
 0x3d6   :  { %7878 = vmatpush.bf16.msra.mxu2 %v11528_v14  ;;  %v11461_v29 = vld [vmem:[%s19901_s1 + $0x1a18] sm:$0xf0]  ;;  %v13082_v30 = vld [vmem:[%s19901_s1 + $0x1b0c] sm:$0xf]  ;;  %v11336_v50 = vor.u32 %v13018_v0, %v11333_v51 }
 0x3d7   :  { %7891 = vmatpush.bf16.msra.mxu3 %v11656_v43  ;;  %v11589_v14 = vld [vmem:[%s19901_s1 + $0x1b18] sm:$0xf0]  ;;  %v13142_v33 = vld [vmem:[%s19901_s1 + $0x1cec] sm:$0xf]  ;;  %v11208_v43 = vor.u32 %v12986_v16, %v11205_v34  ;;  %v11464_v24 = vor.u32 %v13050_v25, %v11461_v29 }
 0x3d8   :  { %7853 = vmatpush.bf16.msra.mxu0 %v11256_v61  ;;  %v11829_v54 = vld [vmem:[%s19901_s1 + $0x1cf8] sm:$0xf0]  ;;  %v13174_v21 = vld [vmem:[%s19901_s1 + $0x1dec] sm:$0xf] }
 0x3d9   :  { %7866 = vmatpush.bf16.msra.mxu1 %v11384_v48  ;;  %v11957_v38 = vld [vmem:[%s19901_s1 + $0x1df8] sm:$0xf0]  ;;  %v13206_v59 = vld [vmem:[%s19901_s1 + $0x1eec] sm:$0xf]  ;;  %v11592_v48 = vor.u32 %v13082_v30, %v11589_v14 }
 0x3da   :  { %7879 = vmatpush.bf16.msra.mxu2 %v11512_v42  ;;  %v12085_v4 = vld [vmem:[%s19901_s1 + $0x1ef8] sm:$0xf0]  ;;  %v13238_v41 = vld [vmem:[%s19901_s1 + $0x1fec] sm:$0xf]  ;;  %v11832_v42 = vor.u32 %v13142_v33, %v11829_v54  ;;  %v11960_v19 = vor.u32 %v13174_v21, %v11957_v38 }
 0x3db   :  { %7892 = vmatpush.bf16.msra.mxu3 %v11640_v37  ;;  %v12213_v61 = vld [vmem:[%s19901_s1 + $0x1ff8] sm:$0xf0]  ;;  %v12088_v45 = vor.u32 %v13206_v59, %v12085_v4  ;;  %v13138_v46 = vld [vmem:[%s19901_s1 + $0x1ccc] sm:$0xf] }
 0x3dc   :  { %7854 = vmatpush.bf16.msra.mxu0 %v11240_v7  ;;  %v11813_v44 = vld [vmem:[%s19901_s1 + $0x1cd8] sm:$0xf0]  ;;  %v13170_v37 = vld [vmem:[%s19901_s1 + $0x1dcc] sm:$0xf]  ;;  %v12216_v6 = vor.u32 %v13238_v41, %v12213_v61 }
 0x3dd   :  { %7867 = vmatpush.bf16.msra.mxu1 %v11368_v17  ;;  %v11941_v20 = vld [vmem:[%s19901_s1 + $0x1dd8] sm:$0xf0]  ;;  %v13202_v47 = vld [vmem:[%s19901_s1 + $0x1ecc] sm:$0xf]  ;;  %v11816_v3 = vor.u32 %v13138_v46, %v11813_v44 }
 0x3de   :  { %7880 = vmatpush.bf16.msra.mxu2 %v11496_v23  ;;  %v12069_v53 = vld [vmem:[%s19901_s1 + $0x1ed8] sm:$0xf0]  ;;  %v13234_v62 = vld [vmem:[%s19901_s1 + $0x1fcc] sm:$0xf]  ;;  %v11944_v7 = vor.u32 %v13170_v37, %v11941_v20 }
 0x3df   :  { %7893 = vmatpush.bf16.msra.mxu3 %v11624_v28  ;;  %v12197_v58 = vld [vmem:[%s19901_s1 + $0x1fd8] sm:$0xf0]  ;;  %v12072_v5 = vor.u32 %v13202_v47, %v12069_v53  ;;  %v13134_v17 = vld [vmem:[%s19901_s1 + $0x1cac] sm:$0xf] }
 0x3e0   :  { %7855 = vmatpush.bf16.msra.mxu0 %v11224_v56  ;;  %v11797_v23 = vld [vmem:[%s19901_s1 + $0x1cb8] sm:$0xf0]  ;;  %v13166_v15 = vld [vmem:[%s19901_s1 + $0x1dac] sm:$0xf]  ;;  %v12200_v11 = vor.u32 %v13234_v62, %v12197_v58 }
 0x3e1   :  { %7868 = vmatpush.bf16.msra.mxu1 %v11352_v1  ;;  %v11925_v8 = vld [vmem:[%s19901_s1 + $0x1db8] sm:$0xf0]  ;;  %v13198_v52 = vld [vmem:[%s19901_s1 + $0x1eac] sm:$0xf]  ;;  %v11800_v63 = vor.u32 %v13134_v17, %v11797_v23 }
 0x3e2   :  { %7881 = vmatpush.bf16.msra.mxu2 %v11480_v40  ;;  %v12053_v28 = vld [vmem:[%s19901_s1 + $0x1eb8] sm:$0xf0]  ;;  %v11928_v12 = vor.u32 %v13166_v15, %v11925_v8  ;;  %v13162_v35 = vld [vmem:[%s19901_s1 + $0x1d8c] sm:$0xf] }
 0x3e3   :  { %7894 = vmatpush.bf16.msra.mxu3 %v11608_v55  ;;  %v12181_v31 = vld [vmem:[%s19901_s1 + $0x1fb8] sm:$0xf0]  ;;  %v12056_v13 = vor.u32 %v13198_v52, %v12053_v28  ;;  %v13194_v16 = vld [vmem:[%s19901_s1 + $0x1e8c] sm:$0xf] }
 0x3e4   :  { %7856 = vmatpush.bf16.msra.mxu0 %v11208_v43  ;;  %v11909_v56 = vld [vmem:[%s19901_s1 + $0x1d98] sm:$0xf0]  ;;  %v7650_v1 = vpop.f32.mrf.mxu0  ;;  %v13226_v40 = vld [vmem:[%s19901_s1 + $0x1f8c] sm:$0xf] }
 0x3e5   :  { %7869 = vmatpush.bf16.msra.mxu1 %v11336_v50  ;;  %v12037_v34 = vld [vmem:[%s19901_s1 + $0x1e98] sm:$0xf0]  ;;  %v7651_v51 = vadd.f32 %v7650_v1, %v19645_v60  ;;  %v7663_v57 = vpop.f32.mrf.mxu1  ;;  %v11912_v55 = vor.u32 %v13162_v35, %v11909_v56  ;;  %v13126_v30 = vld [vmem:[%s19901_s1 + $0x1c6c] sm:$0xf] }
 0x3e6   :  { %7882 = vmatpush.bf16.msra.mxu2 %v11464_v24  ;;  %v12165_v0 = vld [vmem:[%s19901_s1 + $0x1f98] sm:$0xf0]  ;;  %v12040_v29 = vor.u32 %v13194_v16, %v12037_v34  ;;  %v13158_v36 = vld [vmem:[%s19901_s1 + $0x1d6c] sm:$0xf] }
 0x3e7   :  { %7895 = vmatpush.bf16.msra.mxu3 %v11592_v48  ;;  %7857 = vmatmul.bf16.vlgmr.msra.gmra.mxu0 %v14774_v2  ;;  %v13230_v2 = vld [vmem:[%s19901_s1 + $0x1fac] sm:$0xf]  ;;  %v11765_v14 = vld [vmem:[%s19901_s1 + $0x1c78] sm:$0xf0]  ;;  %v12168_v60 = vor.u32 %v13226_v40, %v12165_v0  ;;  %v7664_v33 = vadd.f32 %v7663_v57, %v7651_v51 }
 0x3e8   :  { %7901 = vmatpush.bf16.msrb.mxu0 %v11832_v42  ;;  %7870 = vmatmul.bf16.vlgmr.msra.gmra.mxu1 %v14787_v10  ;;  %v11781_v10 = vld [vmem:[%s19901_s1 + $0x1c98] sm:$0xf0]  ;;  %v13190_v21 = vld [vmem:[%s19901_s1 + $0x1e6c] sm:$0xf]  ;;  %v11768_v4 = vor.u32 %v13126_v30, %v11765_v14 }
 0x3e9   :  { %7914 = vmatpush.bf16.msrb.mxu1 %v11960_v19  ;;  %7883 = vmatmul.bf16.vlgmr.msra.gmra.mxu2 %v14785_v9  ;;  %v13130_v9 = vld [vmem:[%s19901_s1 + $0x1c8c] sm:$0xf]  ;;  %v11893_v54 = vld [vmem:[%s19901_s1 + $0x1d78] sm:$0xf0] }
 0x3ea   :  { %7927 = vmatpush.bf16.msrb.mxu2 %v12088_v45  ;;  %7896 = vmatmul.bf16.vlgmr.msra.gmra.mxu3 %v14795_v22  ;;  %v12184_v22 = vor.u32 %v13230_v2, %v12181_v31  ;;  %v11784_v25 = vor.u32 %v13130_v9, %v11781_v10  ;;  %v12021_v43 = vld [vmem:[%s19901_s1 + $0x1e78] sm:$0xf0]  ;;  %v13222_v38 = vld [vmem:[%s19901_s1 + $0x1f6c] sm:$0xf]  ;;  %v11896_v50 = vor.u32 %v13158_v36, %v11893_v54 }
 0x3eb   :  { %7940 = vmatpush.bf16.msrb.mxu3 %v12216_v6  ;;  %v12149_v59 = vld [vmem:[%s19901_s1 + $0x1f78] sm:$0xf0]  ;;  %v12024_v24 = vor.u32 %v13190_v21, %v12021_v43  ;;  %v13122_v41 = vld [vmem:[%s19901_s1 + $0x1c4c] sm:$0xf] }
 0x3ec   :  { %7902 = vmatpush.bf16.msrb.mxu0 %v11816_v3  ;;  %v11749_v61 = vld [vmem:[%s19901_s1 + $0x1c58] sm:$0xf0]  ;;  %v13154_v48 = vld [vmem:[%s19901_s1 + $0x1d4c] sm:$0xf]  ;;  %v12152_v42 = vor.u32 %v13222_v38, %v12149_v59  ;;  %v7676_v19 = vpop.f32.mrf.mxu2  ;;  %v7652_v53 = vpop.f32.mrf.mxu0 }
 0x3ed   :  { %7915 = vmatpush.bf16.msrb.mxu1 %v11944_v7  ;;  %v11877_v45 = vld [vmem:[%s19901_s1 + $0x1d58] sm:$0xf0]  ;;  %v13186_v46 = vld [vmem:[%s19901_s1 + $0x1e4c] sm:$0xf]  ;;  %v7677_v37 = vadd.f32 %v7676_v19, %v7664_v33  ;;  %v7689_v6 = vpop.f32.mrf.mxu3  ;;  %v11752_v62 = vor.u32 %v13122_v41, %v11749_v61  ;;  %v7665_v58 = vpop.f32.mrf.mxu1 }
 0x3ee   :  { %7928 = vmatpush.bf16.msrb.mxu2 %v12072_v5  ;;  %v12005_v44 = vld [vmem:[%s19901_s1 + $0x1e58] sm:$0xf0]  ;;  %v13218_v20 = vld [vmem:[%s19901_s1 + $0x1f4c] sm:$0xf]  ;;  %v11880_v7 = vor.u32 %v13154_v48, %v11877_v45 }
 0x3ef   :  { %7941 = vmatpush.bf16.msrb.mxu3 %v12200_v11  ;;  %v12133_v47 = vld [vmem:[%s19901_s1 + $0x1f58] sm:$0xf0]  ;;  %v7690_v3 = vadd.f32 %v7689_v6, %v7677_v37  ;;  %v12008_v5 = vor.u32 %v13186_v46, %v12005_v44  ;;  %v13118_v17 = vld [vmem:[%s19901_s1 + $0x1c2c] sm:$0xf] }
 0x3f0   :  { %7903 = vmatpush.bf16.msrb.mxu0 %v11800_v63  ;;  %v11733_v23 = vld [vmem:[%s19901_s1 + $0x1c38] sm:$0xf0]  ;;  %v13150_v15 = vld [vmem:[%s19901_s1 + $0x1d2c] sm:$0xf]  ;;  %v12136_v11 = vor.u32 %v13218_v20, %v12133_v47 }
 0x3f1   :  { %7916 = vmatpush.bf16.msrb.mxu1 %v11928_v12  ;;  %v11861_v8 = vld [vmem:[%s19901_s1 + $0x1d38] sm:$0xf0]  ;;  %v13182_v52 = vld [vmem:[%s19901_s1 + $0x1e2c] sm:$0xf]  ;;  %v11736_v63 = vor.u32 %v13118_v17, %v11733_v23 }
 0x3f2   :  { %7929 = vmatpush.bf16.msrb.mxu2 %v12056_v13  ;;  %v11989_v28 = vld [vmem:[%s19901_s1 + $0x1e38] sm:$0xf0]  ;;  %v13214_v2 = vld [vmem:[%s19901_s1 + $0x1f2c] sm:$0xf]  ;;  %v11864_v12 = vor.u32 %v13150_v15, %v11861_v8 }
 0x3f3   :  { %7942 = vmatpush.bf16.msrb.mxu3 %v12184_v22  ;;  %v12117_v31 = vld [vmem:[%s19901_s1 + $0x1f38] sm:$0xf0]  ;;  %v11992_v13 = vor.u32 %v13182_v52, %v11989_v28  ;;  %v13114_v9 = vld [vmem:[%s19901_s1 + $0x1c0c] sm:$0xf] }
 0x3f4   :  { %7904 = vmatpush.bf16.msrb.mxu0 %v11784_v25  ;;  %v11717_v10 = vld [vmem:[%s19901_s1 + $0x1c18] sm:$0xf0]  ;;  %v13146_v35 = vld [vmem:[%s19901_s1 + $0x1d0c] sm:$0xf]  ;;  %v12120_v22 = vor.u32 %v13214_v2, %v12117_v31  ;;  %v7678_v1 = vpop.f32.mrf.mxu2 }
 0x3f5   :  { %7917 = vmatpush.bf16.msrb.mxu1 %v11912_v55  ;;  %v11845_v56 = vld [vmem:[%s19901_s1 + $0x1d18] sm:$0xf0]  ;;  %v13178_v16 = vld [vmem:[%s19901_s1 + $0x1e0c] sm:$0xf]  ;;  %v7691_v51 = vpop.f32.mrf.mxu3  ;;  %v11720_v25 = vor.u32 %v13114_v9, %v11717_v10 }
 0x3f6   :  { %7930 = vmatpush.bf16.msrb.mxu2 %v12040_v29  ;;  %v11973_v34 = vld [vmem:[%s19901_s1 + $0x1e18] sm:$0xf0]  ;;  %v13210_v40 = vld [vmem:[%s19901_s1 + $0x1f0c] sm:$0xf]  ;;  %v11848_v57 = vor.u32 %v13146_v35, %v11845_v56 }
 0x3f7   :  { %7943 = vmatpush.bf16.msrb.mxu3 %v12168_v60  ;;  %v12101_v0 = vld [vmem:[%s19901_s1 + $0x1f18] sm:$0xf0]  ;;  %v11976_v55 = vor.u32 %v13178_v16, %v11973_v34 }
 0x3f8   :  { %7905 = vmatpush.bf16.msrb.mxu0 %v11768_v4  ;;  %v12104_v29 = vor.u32 %v13210_v40, %v12101_v0 }
 0x3f9   :  { %7918 = vmatpush.bf16.msrb.mxu1 %v11896_v50 }
 0x3fa   :  { %7931 = vmatpush.bf16.msrb.mxu2 %v12024_v24 }
 0x3fb   :  { %7944 = vmatpush.bf16.msrb.mxu3 %v12152_v42 }
 0x3fc   :  { %7906 = vmatpush.bf16.msrb.mxu0 %v11752_v62 }
 0x3fd   :  { %7919 = vmatpush.bf16.msrb.mxu1 %v11880_v7 }
 0x3fe   :  { %7932 = vmatpush.bf16.msrb.mxu2 %v12008_v5 }
 0x3ff   :  { %7945 = vmatpush.bf16.msrb.mxu3 %v12136_v11 }
 0x400   :  { %7907 = vmatpush.bf16.msrb.mxu0 %v11736_v63 }
 0x401   :  { %7920 = vmatpush.bf16.msrb.mxu1 %v11864_v12 }
 0x402   :  { %7933 = vmatpush.bf16.msrb.mxu2 %v11992_v13 }
 0x403   :  { %7946 = vmatpush.bf16.msrb.mxu3 %v12120_v22 }
 0x404   :  { %7908 = vmatpush.bf16.msrb.mxu0 %v11720_v25  ;;  %v7702_v30 = vpop.f32.mrf.mxu0 }
 0x405   :  { %7921 = vmatpush.bf16.msrb.mxu1 %v11848_v57  ;;  %v7703_v14 = vadd.f32 %v7702_v30, %v7690_v3  ;;  %v7715_v36 = vpop.f32.mrf.mxu1 }
 0x406   :  { %7934 = vmatpush.bf16.msrb.mxu2 %v11976_v55 }
 0x407   :  { %7947 = vmatpush.bf16.msrb.mxu3 %v12104_v29  ;;  %7909 = vmatmul.bf16.vlgmr.msrb.gmra.mxu0 %v14987_v18  ;;  %v7716_v60 = vadd.f32 %v7715_v36, %v7703_v14 }
 0x408   :  { %7922 = vmatmul.bf16.vlgmr.msrb.gmra.mxu1 %v15000_v32 }
 0x409   :  { %7935 = vmatmul.bf16.vlgmr.msrb.gmra.mxu2 %v14998_v27 }
 0x40a   :  { %7948 = vmatmul.bf16.vlgmr.msrb.gmra.mxu3 %v15008_v39 }
 0x40c   :  { %v7728_v33 = vpop.f32.mrf.mxu2  ;;  %v7704_v43 = vpop.f32.mrf.mxu0 }
 0x40d   :  { %v7729_v54 = vadd.f32 %v7728_v33, %v7716_v60  ;;  %v7741_v21 = vpop.f32.mrf.mxu3  ;;  %v7717_v38 = vpop.f32.mrf.mxu1 }
 0x40f   :  { %v7742_v59 = vadd.f32 %v7741_v21, %v7729_v54 }
 0x414   :  { %v7730_v4 = vpop.f32.mrf.mxu2 }
 0x415   :  { %v7743_v50 = vpop.f32.mrf.mxu3 }
 0x424   :  { %v7754_v24 = vpop.f32.mrf.mxu0 }
 0x425   :  { %v7755_v18 = vadd.f32 %v7754_v24, %v7742_v59  ;;  %v7767_v41 = vpop.f32.mrf.mxu1 }
 0x427   :  { %v7768_v32 = vadd.f32 %v7767_v41, %v7755_v18 }
 0x42c   :  { %v7780_v61 = vpop.f32.mrf.mxu2  ;;  %v7756_v39 = vpop.f32.mrf.mxu0 }
 0x42d   :  { %v7781_v27 = vadd.f32 %v7780_v61, %v7768_v32  ;;  %v7793_v48 = vpop.f32.mrf.mxu3  ;;  %v7769_v42 = vpop.f32.mrf.mxu1 }
 0x42f   :  { %v7794_v19 = vadd.f32 %v7793_v48, %v7781_v27 }
 0x434   :  { %v7782_v45 = vpop.f32.mrf.mxu2 }
 0x435   :  { %v7795_v46 = vpop.f32.mrf.mxu3 }
 0x444   :  { %v7806_v44 = vpop.f32.mrf.mxu0 }
 0x445   :  { %v7819_v37 = vpop.f32.mrf.mxu1  ;;  %v7807_v5 = vadd.f32 %v7806_v44, %v7794_v19  ;;  %v8082_v44 = vperm.slane %v19510_v26, 3 }
 0x447   :  { %v7820_v8 = vadd.f32 %v7819_v37, %v7807_v5 }
 0x44c   :  { %v7832_v6 = vpop.f32.mrf.mxu2  ;;  %v7808_v47 = vpop.f32.mrf.mxu0 }
 0x44d   :  { %v7845_v20 = vpop.f32.mrf.mxu3  ;;  %v7821_v53 = vpop.f32.mrf.mxu1  ;;  %v7833_v52 = vadd.f32 %v7832_v6, %v7820_v8 }
 0x44f   :  { %v7846_v31 = vadd.f32 %v7845_v20, %v7833_v52  ;;  %v8096_v20 = vperm.slane %v19532_v49, 3 }
 0x454   :  { %v7834_v62 = vpop.f32.mrf.mxu2 }
 0x455   :  { %v7847_v58 = vpop.f32.mrf.mxu3 }
 0x464   :  { %v7858_v3 = vpop.f32.mrf.mxu0 }
 0x465   :  { %v7871_v7 = vpop.f32.mrf.mxu1  ;;  %v7859_v63 = vadd.f32 %v7858_v3, %v7846_v31 }
 0x467   :  { %v7872_v12 = vadd.f32 %v7871_v7, %v7859_v63 }
 0x46c   :  { %v7884_v17 = vpop.f32.mrf.mxu2  ;;  %v7860_v15 = vpop.f32.mrf.mxu0 }
 0x46d   :  { %v7897_v23 = vpop.f32.mrf.mxu3  ;;  %v7873_v11 = vpop.f32.mrf.mxu1  ;;  %v7885_v13 = vadd.f32 %v7884_v17, %v7872_v12 }
 0x46f   :  { %v7898_v9 = vadd.f32 %v7897_v23, %v7885_v13 }
 0x474   :  { %v7886_v28 = vpop.f32.mrf.mxu2 }
 0x475   :  { %v7899_v2 = vpop.f32.mrf.mxu3 }
 0x484   :  { %v7910_v10 = vpop.f32.mrf.mxu0 }
 0x485   :  { %v7923_v35 = vpop.f32.mrf.mxu1  ;;  %v7911_v22 = vadd.f32 %v7910_v10, %v7898_v9 }
 0x487   :  { %v7924_v56 = vadd.f32 %v7923_v35, %v7911_v22 }
 0x48c   :  { %v7936_v16 = vpop.f32.mrf.mxu2  ;;  %v7912_v40 = vpop.f32.mrf.mxu0 }
 0x48d   :  { %v7937_v34 = vadd.f32 %v7936_v16, %v7924_v56  ;;  %v7949_v1 = vpop.f32.mrf.mxu3  ;;  %v7925_v0 = vpop.f32.mrf.mxu1 }
 0x48f   :  { %v7950_v51 = vadd.f32 %v7949_v1, %v7937_v34 }
 0x491   :  { %v7971_v25 = vrot.slane %v7950_v51, 4  ;;  %v7984_v57 = vmul.f32 %v7950_v51, %v7950_v51 }
 0x493   :  { %v7972_v55 = vadd.f32 %v7971_v25, %v7950_v51  ;;  %v8003_v29 = vrot.slane %v7984_v57, 4 }
 0x494   :  { %v7938_v30 = vpop.f32.mrf.mxu2 }
 0x495   :  { %v7973_v14 = vrot.slane %v7972_v55, 2  ;;  %v8004_v36 = vadd.f32 %v8003_v29, %v7984_v57  ;;  %v7951_v60 = vpop.f32.mrf.mxu3 }
 0x497   :  { %v7974_v33 = vadd.f32 %v7973_v14, %v7972_v55  ;;  %v8005_v54 = vrot.slane %v8004_v36, 2 }
 0x499   :  { %v7975_v21 = vrot.slane %v7974_v33, 1  ;;  %v8006_v43 = vadd.f32 %v8005_v54, %v8004_v36 }
 0x49b   :  { %v7976_v38 = vadd.f32 %v7975_v21, %v7974_v33  ;;  %v8007_v59 = vrot.slane %v8006_v43, 1 }
 0x49d   :  { %v7980_v4 = vmul.f32 0.125, %v7976_v38  ;;  %v8008_v50 = vadd.f32 %v8007_v59, %v8006_v43 }
 0x49f   :  { %v8012_v24 = vmul.f32 0.125, %v8008_v50  ;;  %v8016_v18 = vmul.f32 %v7980_v4, %v7980_v4  ;;  %v8028_v46 = vsub.f32 %v7950_v51, %v7980_v4 }
 0x4a1   :  { %v8020_v41 = vsub.f32 %v8012_v24, %v8016_v18 }
 0x4a3   :  { %v8024_v32 = vmax.f32 %v8020_v41, 0.0 }
 0x4a5   :  { %v8032_v61 = vadd.f32 1e-05, %v8024_v32 }
 0x4a7   :  { %13247 = vrsqrt.f32 %v8032_v61  ;;  %vm8069_vm10 = vweird.f32 %v8032_v61 }
 0x4ad   :  { %v13248_v27 = vpop.eup %13247 }
 0x4ae   :  { %v8064_v48 = vmul.f32 %v13248_v27, %v8032_v61  ;;  %vm8070_vm9 = vweird.f32 %v13248_v27 }
 0x4af   :  { %vm8071_vm11 = vmor %vm8069_vm10, %vm8070_vm9 }
 0x4b0   :  { %v8065_v39 = vmul.f32 %v13248_v27, %v8064_v48 }
 0x4b2   :  { %v8066_v42 = vmul.f32 0.5, %v8065_v39 }
 0x4b4   :  { %v8067_v19 = vsub.f32 1.5, %v8066_v42 }
 0x4b6   :  { %v8068_v45 = vmul.f32 %v13248_v27, %v8067_v19 }
 0x4b8   :  { %v8072_v37 = vsel %vm8071_vm11, %v13248_v27, %v8068_v45 }
 0x4b9   :  { %v8076_v6 = vmul.f32 %v8072_v37, %v8028_v46 }
 0x4bb   :  { %v8090_v47 = vmul.f32 %v8082_v44, %v8076_v6 }
 0x4bd   :  { %v8104_v53 = vadd.f32 %v8096_v20, %v8090_v47 }
 0x4bf   :  { %v8108_v62 = vmax.f32 %v8104_v53, 0.0 }
 0x4c1   :  { %v8112_v58 = vmin.f32 %v8108_v62, 6.0 }
 0x4c3   :  { %8116 = vst [vmem:[%s19905_s4 + $0x18] sm:$0xff] %v8112_v58 }

// kernel: _discriminator_forward.9
= control target key start
LH: loop header
LB: loop body
LE: loop exit
PB: predicated region body
PF: predicated region fallthrough
CT: control target
= control target key end

     0   :  { %vm1326_vm3 = vcmask 7168   ;;  %s2403_s1 = inlined_call_operand.vmem [shape: bf16[2048,1], index: 1, kind: input, shape index: {}]   ;;  %s2404_s0 = inlined_call_operand.vmem [shape: bf16[8,2048], index: 0, kind: input, shape index: {}]   ;;  %s2405_s2 = inlined_call_operand.vmem [shape: f32[8,1], index: 2, kind: output, shape index: {}]  }
   0x1   :  { %v1852_v0 = vld [vmem:[%s2403_s1 + $0x38] sm:$0xff]  ;;  %v1851_v4 = vld [vmem:[%s2403_s1 + $0x30] sm:$0xff]  ;;  %v1850_v8 = vld [vmem:[%s2403_s1 + $0x28] sm:$0xff] }
   0x2   :  { %v1860_v1 = vld [vmem:[%s2403_s1 + $0x78] sm:$0xff]  ;;  %1099 = vmatpush.bf16.msra.mxu0 %v1852_v0  ;;  %v1859_v5 = vld [vmem:[%s2403_s1 + $0x70] sm:$0xff]  ;;  %v1858_v9 = vld [vmem:[%s2403_s1 + $0x68] sm:$0xff] }
   0x3   :  { %v1868_v2 = vld [vmem:[%s2403_s1 + $0xb8] sm:$0xff]  ;;  %1112 = vmatpush.bf16.msra.mxu1 %v1860_v1  ;;  %v1867_v6 = vld [vmem:[%s2403_s1 + $0xb0] sm:$0xff]  ;;  %v1866_v10 = vld [vmem:[%s2403_s1 + $0xa8] sm:$0xff] }
   0x4   :  { %v1876_v3 = vld [vmem:[%s2403_s1 + $0xf8] sm:$0xff]  ;;  %1125 = vmatpush.bf16.msra.mxu2 %v1868_v2  ;;  %v1875_v7 = vld [vmem:[%s2403_s1 + $0xf0] sm:$0xff]  ;;  %v1874_v11 = vld [vmem:[%s2403_s1 + $0xe8] sm:$0xff] }
   0x5   :  { %1138 = vmatpush.bf16.msra.mxu3 %v1876_v3  ;;  %v1849_v12 = vld [vmem:[%s2403_s1 + $0x20] sm:$0xff]  ;;  %v1848_v16 = vld [vmem:[%s2403_s1 + $0x18] sm:$0xff]  ;;  %v1847_v20 = vld [vmem:[%s2403_s1 + $0x10] sm:$0xff] }
   0x6   :  { %1100 = vmatpush.bf16.msra.mxu0 %v1851_v4  ;;  %v1857_v13 = vld [vmem:[%s2403_s1 + $0x60] sm:$0xff]  ;;  %v1856_v17 = vld [vmem:[%s2403_s1 + $0x58] sm:$0xff]  ;;  %v1855_v21 = vld [vmem:[%s2403_s1 + $0x50] sm:$0xff] }
   0x7   :  { %1113 = vmatpush.bf16.msra.mxu1 %v1859_v5  ;;  %v1865_v14 = vld [vmem:[%s2403_s1 + $0xa0] sm:$0xff]  ;;  %v1864_v18 = vld [vmem:[%s2403_s1 + $0x98] sm:$0xff]  ;;  %v1863_v22 = vld [vmem:[%s2403_s1 + $0x90] sm:$0xff] }
   0x8   :  { %1126 = vmatpush.bf16.msra.mxu2 %v1867_v6  ;;  %v1873_v15 = vld [vmem:[%s2403_s1 + $0xe0] sm:$0xff]  ;;  %v1872_v19 = vld [vmem:[%s2403_s1 + $0xd8] sm:$0xff]  ;;  %v1871_v23 = vld [vmem:[%s2403_s1 + $0xd0] sm:$0xff] }
   0x9   :  { %1139 = vmatpush.bf16.msra.mxu3 %v1875_v7  ;;  %v1846_v24 = vld [vmem:[%s2403_s1 + $0x8] sm:$0xff]  ;;  %v11_v29 = vld [vmem:[%s2404_s0] sm:$0xff]  ;;  %v1884_v38 = vld [vmem:[%s2403_s1 + $0x138] sm:$0xff] }
   0xa   :  { %1101 = vmatpush.bf16.msra.mxu0 %v1850_v8  ;;  %v1854_v25 = vld [vmem:[%s2403_s1 + $0x48] sm:$0xff]  ;;  %v1845_v30 = vld [vmem:[%s2403_s1] sm:$0xff]  ;;  %v283_v33 = vunpack.c.l.b16 %v11_v29  ;;  %v284_v37 = vunpack.c.h.b16 %v11_v29  ;;  %v1892_v39 = vld [vmem:[%s2403_s1 + $0x178] sm:$0xff] }
   0xb   :  { %1114 = vmatpush.bf16.msra.mxu1 %v1858_v9  ;;  %v1862_v26 = vld [vmem:[%s2403_s1 + $0x88] sm:$0xff]  ;;  %v1853_v31 = vld [vmem:[%s2403_s1 + $0x40] sm:$0xff]  ;;  %v1900_v40 = vld [vmem:[%s2403_s1 + $0x1b8] sm:$0xff] }
   0xc   :  { %1127 = vmatpush.bf16.msra.mxu2 %v1866_v10  ;;  %v1870_v27 = vld [vmem:[%s2403_s1 + $0xc8] sm:$0xff]  ;;  %v1861_v34 = vld [vmem:[%s2403_s1 + $0x80] sm:$0xff]  ;;  %v1908_v41 = vld [vmem:[%s2403_s1 + $0x1f8] sm:$0xff]  ;;  %v299_v43 = vpack.c.b16 %v283_v33, %v283_v33  ;;  %v300_v45 = vpack.c.b16 %v284_v37, %v284_v37 }
   0xd   :  { %1140 = vmatpush.bf16.msra.mxu3 %v1874_v11  ;;  %v12_v28 = vld [vmem:[%s2404_s0 + $0x8] sm:$0xff]  ;;  %v1869_v35 = vld [vmem:[%s2403_s1 + $0xc0] sm:$0xff]  ;;  %v1883_v46 = vld [vmem:[%s2403_s1 + $0x130] sm:$0xff] }
   0xe   :  { %1102 = vmatpush.bf16.msra.mxu0 %v1849_v12  ;;  %v285_v32 = vunpack.c.l.b16 %v12_v28  ;;  %v286_v36 = vunpack.c.h.b16 %v12_v28  ;;  %v1891_v47 = vld [vmem:[%s2403_s1 + $0x170] sm:$0xff]  ;;  %v1882_v50 = vld [vmem:[%s2403_s1 + $0x128] sm:$0xff]  ;;  %v1881_v54 = vld [vmem:[%s2403_s1 + $0x120] sm:$0xff] }
   0xf   :  { %1115 = vmatpush.bf16.msra.mxu1 %v1857_v13  ;;  %v1899_v48 = vld [vmem:[%s2403_s1 + $0x1b0] sm:$0xff]  ;;  %v1890_v51 = vld [vmem:[%s2403_s1 + $0x168] sm:$0xff]  ;;  %v1889_v55 = vld [vmem:[%s2403_s1 + $0x160] sm:$0xff] }
  0x10   :  { %1128 = vmatpush.bf16.msra.mxu2 %v1865_v14  ;;  %v301_v42 = vpack.c.b16 %v285_v32, %v285_v32  ;;  %v302_v44 = vpack.c.b16 %v286_v36, %v286_v36  ;;  %v1907_v49 = vld [vmem:[%s2403_s1 + $0x1f0] sm:$0xff]  ;;  %v1898_v52 = vld [vmem:[%s2403_s1 + $0x1a8] sm:$0xff]  ;;  %v1897_v56 = vld [vmem:[%s2403_s1 + $0x1a0] sm:$0xff] }
  0x11   :  { %1141 = vmatpush.bf16.msra.mxu3 %v1873_v15  ;;  %v1906_v53 = vld [vmem:[%s2403_s1 + $0x1e8] sm:$0xff]  ;;  %v1905_v57 = vld [vmem:[%s2403_s1 + $0x1e0] sm:$0xff]  ;;  %v1880_v58 = vld [vmem:[%s2403_s1 + $0x118] sm:$0xff] }
  0x12   :  { %1103 = vmatpush.bf16.msra.mxu0 %v1848_v16  ;;  %v1888_v59 = vld [vmem:[%s2403_s1 + $0x158] sm:$0xff]  ;;  %v1879_v62 = vld [vmem:[%s2403_s1 + $0x110] sm:$0xff]  ;;  %v1878_v2 = vld [vmem:[%s2403_s1 + $0x108] sm:$0xff] }
  0x13   :  { %1116 = vmatpush.bf16.msra.mxu1 %v1856_v17  ;;  %v1896_v60 = vld [vmem:[%s2403_s1 + $0x198] sm:$0xff]  ;;  %v1887_v63 = vld [vmem:[%s2403_s1 + $0x150] sm:$0xff]  ;;  %v1886_v3 = vld [vmem:[%s2403_s1 + $0x148] sm:$0xff] }
  0x14   :  { %1129 = vmatpush.bf16.msra.mxu2 %v1864_v18  ;;  %v1904_v61 = vld [vmem:[%s2403_s1 + $0x1d8] sm:$0xff]  ;;  %v1895_v0 = vld [vmem:[%s2403_s1 + $0x190] sm:$0xff]  ;;  %v1894_v4 = vld [vmem:[%s2403_s1 + $0x188] sm:$0xff] }
  0x15   :  { %1142 = vmatpush.bf16.msra.mxu3 %v1872_v19  ;;  %v1903_v1 = vld [vmem:[%s2403_s1 + $0x1d0] sm:$0xff]  ;;  %v1902_v5 = vld [vmem:[%s2403_s1 + $0x1c8] sm:$0xff]  ;;  %v14_v6 = vld [vmem:[%s2404_s0 + $0x18] sm:$0xff] }
  0x16   :  { %1104 = vmatpush.bf16.msra.mxu0 %v1847_v20  ;;  %v13_v7 = vld [vmem:[%s2404_s0 + $0x10] sm:$0xff]  ;;  %v1877_v8 = vld [vmem:[%s2403_s1 + $0x100] sm:$0xff]  ;;  %v289_v10 = vunpack.c.l.b16 %v14_v6  ;;  %v290_v14 = vunpack.c.h.b16 %v14_v6  ;;  %v1916_v16 = vld [vmem:[%s2403_s1 + $0x238] sm:$0xff] }
  0x17   :  { %1117 = vmatpush.bf16.msra.mxu1 %v1855_v21  ;;  %v1885_v9 = vld [vmem:[%s2403_s1 + $0x140] sm:$0xff]  ;;  %v287_v11 = vunpack.c.l.b16 %v13_v7  ;;  %v288_v15 = vunpack.c.h.b16 %v13_v7  ;;  %v1924_v17 = vld [vmem:[%s2403_s1 + $0x278] sm:$0xff]  ;;  %v1914_v28 = vld [vmem:[%s2403_s1 + $0x228] sm:$0xff] }
  0x18   :  { %1130 = vmatpush.bf16.msra.mxu2 %v1863_v22  ;;  %v1893_v12 = vld [vmem:[%s2403_s1 + $0x180] sm:$0xff]  ;;  %v1932_v18 = vld [vmem:[%s2403_s1 + $0x2b8] sm:$0xff]  ;;  %v305_v20 = vpack.c.b16 %v289_v10, %v289_v10  ;;  %v306_v22 = vpack.c.b16 %v290_v14, %v290_v14  ;;  %v1922_v29 = vld [vmem:[%s2403_s1 + $0x268] sm:$0xff] }
  0x19   :  { %1143 = vmatpush.bf16.msra.mxu3 %v1871_v23  ;;  %v1901_v13 = vld [vmem:[%s2403_s1 + $0x1c0] sm:$0xff]  ;;  %v1940_v19 = vld [vmem:[%s2403_s1 + $0x2f8] sm:$0xff]  ;;  %v303_v21 = vpack.c.b16 %v287_v11, %v287_v11  ;;  %v304_v23 = vpack.c.b16 %v288_v15, %v288_v15  ;;  %v1946_v6 = vld [vmem:[%s2403_s1 + $0x328] sm:$0xff] }
  0x1a   :  { %1105 = vmatpush.bf16.msra.mxu0 %v1846_v24  ;;  %v1915_v24 = vld [vmem:[%s2403_s1 + $0x230] sm:$0xff]  ;;  %v1913_v32 = vld [vmem:[%s2403_s1 + $0x220] sm:$0xff]  ;;  %v1912_v36 = vld [vmem:[%s2403_s1 + $0x218] sm:$0xff] }
  0x1b   :  { %1118 = vmatpush.bf16.msra.mxu1 %v1854_v25  ;;  %v1923_v25 = vld [vmem:[%s2403_s1 + $0x270] sm:$0xff]  ;;  %v1921_v33 = vld [vmem:[%s2403_s1 + $0x260] sm:$0xff]  ;;  %v1920_v37 = vld [vmem:[%s2403_s1 + $0x258] sm:$0xff] }
  0x1c   :  { %1131 = vmatpush.bf16.msra.mxu2 %v1862_v26  ;;  %v1931_v26 = vld [vmem:[%s2403_s1 + $0x2b0] sm:$0xff]  ;;  %v1954_v7 = vld [vmem:[%s2403_s1 + $0x368] sm:$0xff]  ;;  %v1945_v10 = vld [vmem:[%s2403_s1 + $0x320] sm:$0xff] }
  0x1d   :  { %1144 = vmatpush.bf16.msra.mxu3 %v1870_v27  ;;  %v1939_v27 = vld [vmem:[%s2403_s1 + $0x2f0] sm:$0xff]  ;;  %v1953_v11 = vld [vmem:[%s2403_s1 + $0x360] sm:$0xff]  ;;  %v1944_v14 = vld [vmem:[%s2403_s1 + $0x318] sm:$0xff] }
  0x1e   :  { %1106 = vmatpush.bf16.msra.mxu0 %v1845_v30  ;;  %v1930_v30 = vld [vmem:[%s2403_s1 + $0x2a8] sm:$0xff]  ;;  %v1952_v15 = vld [vmem:[%s2403_s1 + $0x358] sm:$0xff] }
  0x1f   :  { %1119 = vmatpush.bf16.msra.mxu1 %v1853_v31  ;;  %v1938_v31 = vld [vmem:[%s2403_s1 + $0x2e8] sm:$0xff] }
  0x20   :  { %1132 = vmatpush.bf16.msra.mxu2 %v1861_v34  ;;  %v1929_v34 = vld [vmem:[%s2403_s1 + $0x2a0] sm:$0xff] }
  0x21   :  { %1145 = vmatpush.bf16.msra.mxu3 %v1869_v35  ;;  %1107 = vmatmul.bf16.vlgmr.msra.gmra.mxu0 %v299_v43  ;;  %v1937_v35 = vld [vmem:[%s2403_s1 + $0x2e0] sm:$0xff]  ;;  %v1935_v43 = vld [vmem:[%s2403_s1 + $0x2d0] sm:$0xff] }
  0x22   :  { %1151 = vmatpush.bf16.msrb.mxu0 %v1884_v38  ;;  %1120 = vmatmul.bf16.vlgmr.msra.gmra.mxu1 %v300_v45  ;;  %v1928_v38 = vld [vmem:[%s2403_s1 + $0x298] sm:$0xff]  ;;  %v1918_v45 = vld [vmem:[%s2403_s1 + $0x248] sm:$0xff] }
  0x23   :  { %1164 = vmatpush.bf16.msrb.mxu1 %v1892_v39  ;;  %1133 = vmatmul.bf16.vlgmr.msra.gmra.mxu2 %v301_v42  ;;  %v1936_v39 = vld [vmem:[%s2403_s1 + $0x2d8] sm:$0xff]  ;;  %v1927_v42 = vld [vmem:[%s2403_s1 + $0x290] sm:$0xff] }
  0x24   :  { %1177 = vmatpush.bf16.msrb.mxu2 %v1900_v40  ;;  %1146 = vmatmul.bf16.vlgmr.msra.gmra.mxu3 %v302_v44  ;;  %v1911_v40 = vld [vmem:[%s2403_s1 + $0x210] sm:$0xff]  ;;  %v1910_v44 = vld [vmem:[%s2403_s1 + $0x208] sm:$0xff] }
  0x25   :  { %1190 = vmatpush.bf16.msrb.mxu3 %v1908_v41  ;;  %v1919_v41 = vld [vmem:[%s2403_s1 + $0x250] sm:$0xff] }
  0x26   :  { %1152 = vmatpush.bf16.msrb.mxu0 %v1883_v46  ;;  %v1926_v46 = vld [vmem:[%s2403_s1 + $0x288] sm:$0xff] }
  0x27   :  { %1165 = vmatpush.bf16.msrb.mxu1 %v1891_v47  ;;  %v1934_v47 = vld [vmem:[%s2403_s1 + $0x2c8] sm:$0xff] }
  0x28   :  { %1178 = vmatpush.bf16.msrb.mxu2 %v1899_v48  ;;  %v15_v48 = vld [vmem:[%s2404_s0 + $0x20] sm:$0xff] }
  0x29   :  { %1191 = vmatpush.bf16.msrb.mxu3 %v1907_v49  ;;  %v16_v49 = vld [vmem:[%s2404_s0 + $0x28] sm:$0xff] }
  0x2a   :  { %1153 = vmatpush.bf16.msrb.mxu0 %v1882_v50  ;;  %v1909_v50 = vld [vmem:[%s2403_s1 + $0x200] sm:$0xff] }
  0x2b   :  { %1166 = vmatpush.bf16.msrb.mxu1 %v1890_v51  ;;  %v1917_v51 = vld [vmem:[%s2403_s1 + $0x240] sm:$0xff] }
  0x2c   :  { %1179 = vmatpush.bf16.msrb.mxu2 %v1898_v52  ;;  %v291_v52 = vunpack.c.l.b16 %v15_v48 }
  0x2d   :  { %1192 = vmatpush.bf16.msrb.mxu3 %v1906_v53  ;;  %v293_v53 = vunpack.c.l.b16 %v16_v49 }
  0x2e   :  { %1154 = vmatpush.bf16.msrb.mxu0 %v1881_v54  ;;  %v1925_v54 = vld [vmem:[%s2403_s1 + $0x280] sm:$0xff] }
  0x2f   :  { %1167 = vmatpush.bf16.msrb.mxu1 %v1889_v55  ;;  %v1933_v55 = vld [vmem:[%s2403_s1 + $0x2c0] sm:$0xff] }
  0x30   :  { %1180 = vmatpush.bf16.msrb.mxu2 %v1897_v56  ;;  %v292_v56 = vunpack.c.h.b16 %v15_v48 }
  0x31   :  { %1193 = vmatpush.bf16.msrb.mxu3 %v1905_v57  ;;  %v294_v57 = vunpack.c.h.b16 %v16_v49 }
  0x32   :  { %1155 = vmatpush.bf16.msrb.mxu0 %v1880_v58  ;;  %v1948_v58 = vld [vmem:[%s2403_s1 + $0x338] sm:$0xff] }
  0x33   :  { %1168 = vmatpush.bf16.msrb.mxu1 %v1888_v59  ;;  %v1956_v59 = vld [vmem:[%s2403_s1 + $0x378] sm:$0xff] }
  0x34   :  { %1181 = vmatpush.bf16.msrb.mxu2 %v1896_v60  ;;  %v1964_v60 = vld [vmem:[%s2403_s1 + $0x3b8] sm:$0xff] }
  0x35   :  { %1194 = vmatpush.bf16.msrb.mxu3 %v1904_v61  ;;  %v1972_v61 = vld [vmem:[%s2403_s1 + $0x3f8] sm:$0xff] }
  0x36   :  { %1156 = vmatpush.bf16.msrb.mxu0 %v1879_v62  ;;  %v307_v62 = vpack.c.b16 %v291_v52, %v291_v52 }
  0x37   :  { %1169 = vmatpush.bf16.msrb.mxu1 %v1887_v63  ;;  %v309_v63 = vpack.c.b16 %v293_v53, %v293_v53 }
  0x38   :  { %1182 = vmatpush.bf16.msrb.mxu2 %v1895_v0  ;;  %v308_v0 = vpack.c.b16 %v292_v56, %v292_v56 }
  0x39   :  { %1195 = vmatpush.bf16.msrb.mxu3 %v1903_v1  ;;  %v310_v1 = vpack.c.b16 %v294_v57, %v294_v57 }
  0x3a   :  { %1157 = vmatpush.bf16.msrb.mxu0 %v1878_v2  ;;  %v1947_v2 = vld [vmem:[%s2403_s1 + $0x330] sm:$0xff] }
  0x3b   :  { %1170 = vmatpush.bf16.msrb.mxu1 %v1886_v3  ;;  %v1955_v3 = vld [vmem:[%s2403_s1 + $0x370] sm:$0xff] }
  0x3c   :  { %1183 = vmatpush.bf16.msrb.mxu2 %v1894_v4  ;;  %v1963_v4 = vld [vmem:[%s2403_s1 + $0x3b0] sm:$0xff] }
  0x3d   :  { %1196 = vmatpush.bf16.msrb.mxu3 %v1902_v5  ;;  %v1971_v5 = vld [vmem:[%s2403_s1 + $0x3f0] sm:$0xff] }
  0x3e   :  { %1158 = vmatpush.bf16.msrb.mxu0 %v1877_v8  ;;  %v1962_v8 = vld [vmem:[%s2403_s1 + $0x3a8] sm:$0xff] }
  0x3f   :  { %1171 = vmatpush.bf16.msrb.mxu1 %v1885_v9  ;;  %v1970_v9 = vld [vmem:[%s2403_s1 + $0x3e8] sm:$0xff] }
  0x40   :  { %1184 = vmatpush.bf16.msrb.mxu2 %v1893_v12  ;;  %v1961_v12 = vld [vmem:[%s2403_s1 + $0x3a0] sm:$0xff] }
  0x41   :  { %1197 = vmatpush.bf16.msrb.mxu3 %v1901_v13  ;;  %1159 = vmatmul.bf16.vlgmr.msrb.gmra.mxu0 %v303_v21  ;;  %v1969_v13 = vld [vmem:[%s2403_s1 + $0x3e0] sm:$0xff]  ;;  %v1967_v21 = vld [vmem:[%s2403_s1 + $0x3d0] sm:$0xff] }
  0x42   :  { %1203 = vmatpush.bf16.msra.mxu0 %v1916_v16  ;;  %1172 = vmatmul.bf16.vlgmr.msrb.gmra.mxu1 %v304_v23  ;;  %v1960_v16 = vld [vmem:[%s2403_s1 + $0x398] sm:$0xff]  ;;  %v1950_v23 = vld [vmem:[%s2403_s1 + $0x348] sm:$0xff] }
  0x43   :  { %1216 = vmatpush.bf16.msra.mxu1 %v1924_v17  ;;  %1185 = vmatmul.bf16.vlgmr.msrb.gmra.mxu2 %v305_v20  ;;  %v1968_v17 = vld [vmem:[%s2403_s1 + $0x3d8] sm:$0xff]  ;;  %v1959_v20 = vld [vmem:[%s2403_s1 + $0x390] sm:$0xff] }
  0x44   :  { %1229 = vmatpush.bf16.msra.mxu2 %v1932_v18  ;;  %1198 = vmatmul.bf16.vlgmr.msrb.gmra.mxu3 %v306_v22  ;;  %v1943_v18 = vld [vmem:[%s2403_s1 + $0x310] sm:$0xff]  ;;  %v1942_v22 = vld [vmem:[%s2403_s1 + $0x308] sm:$0xff] }
  0x45   :  { %1242 = vmatpush.bf16.msra.mxu3 %v1940_v19  ;;  %v1951_v19 = vld [vmem:[%s2403_s1 + $0x350] sm:$0xff] }
  0x46   :  { %1204 = vmatpush.bf16.msra.mxu0 %v1915_v24  ;;  %v17_v24 = vld [vmem:[%s2404_s0 + $0x30] sm:$0xff] }
  0x47   :  { %1217 = vmatpush.bf16.msra.mxu1 %v1923_v25  ;;  %v1958_v25 = vld [vmem:[%s2403_s1 + $0x388] sm:$0xff] }
  0x48   :  { %1230 = vmatpush.bf16.msra.mxu2 %v1931_v26  ;;  %v1966_v26 = vld [vmem:[%s2403_s1 + $0x3c8] sm:$0xff] }
  0x49   :  { %1243 = vmatpush.bf16.msra.mxu3 %v1939_v27  ;;  %v18_v27 = vld [vmem:[%s2404_s0 + $0x38] sm:$0xff] }
  0x4a   :  { %1205 = vmatpush.bf16.msra.mxu0 %v1914_v28  ;;  %v295_v28 = vunpack.c.l.b16 %v17_v24 }
  0x4b   :  { %1218 = vmatpush.bf16.msra.mxu1 %v1922_v29  ;;  %v296_v29 = vunpack.c.h.b16 %v17_v24 }
  0x4c   :  { %1231 = vmatpush.bf16.msra.mxu2 %v1930_v30  ;;  %v1941_v30 = vld [vmem:[%s2403_s1 + $0x300] sm:$0xff] }
  0x4d   :  { %1244 = vmatpush.bf16.msra.mxu3 %v1938_v31  ;;  %v1949_v31 = vld [vmem:[%s2403_s1 + $0x340] sm:$0xff] }
  0x4e   :  { %1206 = vmatpush.bf16.msra.mxu0 %v1913_v32  ;;  %v297_v32 = vunpack.c.l.b16 %v18_v27 }
  0x4f   :  { %1219 = vmatpush.bf16.msra.mxu1 %v1921_v33  ;;  %v298_v33 = vunpack.c.h.b16 %v18_v27 }
  0x50   :  { %1232 = vmatpush.bf16.msra.mxu2 %v1929_v34  ;;  %v1957_v34 = vld [vmem:[%s2403_s1 + $0x380] sm:$0xff] }
  0x51   :  { %1245 = vmatpush.bf16.msra.mxu3 %v1937_v35  ;;  %v1965_v35 = vld [vmem:[%s2403_s1 + $0x3c0] sm:$0xff] }
  0x52   :  { %1207 = vmatpush.bf16.msra.mxu0 %v1912_v36  ;;  %v311_v36 = vpack.c.b16 %v295_v28, %v295_v28 }
  0x53   :  { %1220 = vmatpush.bf16.msra.mxu1 %v1920_v37  ;;  %v312_v37 = vpack.c.b16 %v296_v29, %v296_v29 }
  0x54   :  { %1233 = vmatpush.bf16.msra.mxu2 %v1928_v38  ;;  %v313_v38 = vpack.c.b16 %v297_v32, %v297_v32 }
  0x55   :  { %1246 = vmatpush.bf16.msra.mxu3 %v1936_v39  ;;  %v314_v39 = vpack.c.b16 %v298_v33, %v298_v33 }
  0x56   :  { %1208 = vmatpush.bf16.msra.mxu0 %v1911_v40 }
  0x57   :  { %1221 = vmatpush.bf16.msra.mxu1 %v1919_v41 }
  0x58   :  { %1234 = vmatpush.bf16.msra.mxu2 %v1927_v42 }
  0x59   :  { %1247 = vmatpush.bf16.msra.mxu3 %v1935_v43 }
  0x5a   :  { %1209 = vmatpush.bf16.msra.mxu0 %v1910_v44 }
  0x5b   :  { %1222 = vmatpush.bf16.msra.mxu1 %v1918_v45 }
  0x5c   :  { %1235 = vmatpush.bf16.msra.mxu2 %v1926_v46 }
  0x5d   :  { %1248 = vmatpush.bf16.msra.mxu3 %v1934_v47 }
  0x5e   :  { %1210 = vmatpush.bf16.msra.mxu0 %v1909_v50 }
  0x5f   :  { %1223 = vmatpush.bf16.msra.mxu1 %v1917_v51 }
  0x60   :  { %1236 = vmatpush.bf16.msra.mxu2 %v1925_v54 }
  0x61   :  { %1249 = vmatpush.bf16.msra.mxu3 %v1933_v55  ;;  %1211 = vmatmul.bf16.vlgmr.msra.gmra.mxu0 %v307_v62 }
  0x62   :  { %1255 = vmatpush.bf16.msrb.mxu0 %v1948_v58  ;;  %1224 = vmatmul.bf16.vlgmr.msra.gmra.mxu1 %v308_v0 }
  0x63   :  { %1268 = vmatpush.bf16.msrb.mxu1 %v1956_v59  ;;  %1237 = vmatmul.bf16.vlgmr.msra.gmra.mxu2 %v309_v63 }
  0x64   :  { %1281 = vmatpush.bf16.msrb.mxu2 %v1964_v60  ;;  %1250 = vmatmul.bf16.vlgmr.msra.gmra.mxu3 %v310_v1 }
  0x65   :  { %1294 = vmatpush.bf16.msrb.mxu3 %v1972_v61 }
  0x66   :  { %1256 = vmatpush.bf16.msrb.mxu0 %v1947_v2 }
  0x67   :  { %1269 = vmatpush.bf16.msrb.mxu1 %v1955_v3 }
  0x68   :  { %1282 = vmatpush.bf16.msrb.mxu2 %v1963_v4 }
  0x69   :  { %1295 = vmatpush.bf16.msrb.mxu3 %v1971_v5 }
  0x6a   :  { %1257 = vmatpush.bf16.msrb.mxu0 %v1946_v6 }
  0x6b   :  { %1270 = vmatpush.bf16.msrb.mxu1 %v1954_v7 }
  0x6c   :  { %1283 = vmatpush.bf16.msrb.mxu2 %v1962_v8 }
  0x6d   :  { %1296 = vmatpush.bf16.msrb.mxu3 %v1970_v9 }
  0x6e   :  { %1258 = vmatpush.bf16.msrb.mxu0 %v1945_v10 }
  0x6f   :  { %1271 = vmatpush.bf16.msrb.mxu1 %v1953_v11 }
  0x70   :  { %1284 = vmatpush.bf16.msrb.mxu2 %v1961_v12 }
  0x71   :  { %1297 = vmatpush.bf16.msrb.mxu3 %v1969_v13 }
  0x72   :  { %1259 = vmatpush.bf16.msrb.mxu0 %v1944_v14 }
  0x73   :  { %1272 = vmatpush.bf16.msrb.mxu1 %v1952_v15 }
  0x74   :  { %1285 = vmatpush.bf16.msrb.mxu2 %v1960_v16 }
  0x75   :  { %1298 = vmatpush.bf16.msrb.mxu3 %v1968_v17 }
  0x76   :  { %1260 = vmatpush.bf16.msrb.mxu0 %v1943_v18 }
  0x77   :  { %1273 = vmatpush.bf16.msrb.mxu1 %v1951_v19 }
  0x78   :  { %1286 = vmatpush.bf16.msrb.mxu2 %v1959_v20 }
  0x79   :  { %1299 = vmatpush.bf16.msrb.mxu3 %v1967_v21 }
  0x7a   :  { %1261 = vmatpush.bf16.msrb.mxu0 %v1942_v22 }
  0x7b   :  { %1274 = vmatpush.bf16.msrb.mxu1 %v1950_v23 }
  0x7c   :  { %1287 = vmatpush.bf16.msrb.mxu2 %v1958_v25 }
  0x7d   :  { %1300 = vmatpush.bf16.msrb.mxu3 %v1966_v26 }
  0x7e   :  { %1262 = vmatpush.bf16.msrb.mxu0 %v1941_v30 }
  0x7f   :  { %1275 = vmatpush.bf16.msrb.mxu1 %v1949_v31 }
  0x80   :  { %1288 = vmatpush.bf16.msrb.mxu2 %v1957_v34 }
  0x81   :  { %1301 = vmatpush.bf16.msrb.mxu3 %v1965_v35  ;;  %1263 = vmatmul.bf16.vlgmr.msrb.gmra.mxu0 %v311_v36 }
  0x82   :  { %1276 = vmatmul.bf16.vlgmr.msrb.gmra.mxu1 %v312_v37 }
  0x83   :  { %1289 = vmatmul.bf16.vlgmr.msrb.gmra.mxu2 %v313_v38 }
  0x84   :  { %1302 = vmatmul.bf16.vlgmr.msrb.gmra.mxu3 %v314_v39 }
  0x9e   :  { %v1108_v40 = vpop.f32.mrf.mxu0 }
  0x9f   :  { %v1121_v41 = vpop.f32.mrf.mxu1 }
  0xa0   :  { %v1122_v42 = vadd.f32 %v1121_v41, %v1108_v40 }
  0xa6   :  { %v1134_v43 = vpop.f32.mrf.mxu2  ;;  %v1110_v46 = vpop.f32.mrf.mxu0 }
  0xa7   :  { %v1135_v44 = vadd.f32 %v1134_v43, %v1122_v42  ;;  %v1147_v45 = vpop.f32.mrf.mxu3  ;;  %v1123_v48 = vpop.f32.mrf.mxu1 }
  0xa9   :  { %v1148_v47 = vadd.f32 %v1147_v45, %v1135_v44 }
  0xae   :  { %v1136_v49 = vpop.f32.mrf.mxu2 }
  0xaf   :  { %v1149_v50 = vpop.f32.mrf.mxu3 }
  0xbe   :  { %v1160_v51 = vpop.f32.mrf.mxu0 }
  0xbf   :  { %v1173_v52 = vpop.f32.mrf.mxu1  ;;  %v1161_v61 = vadd.f32 %v1160_v51, %v1148_v47 }
  0xc1   :  { %v1174_v1 = vadd.f32 %v1173_v52, %v1161_v61 }
  0xc6   :  { %v1186_v53 = vpop.f32.mrf.mxu2  ;;  %v1162_v55 = vpop.f32.mrf.mxu0 }
  0xc7   :  { %v1199_v54 = vpop.f32.mrf.mxu3  ;;  %v1175_v56 = vpop.f32.mrf.mxu1  ;;  %v1187_v3 = vadd.f32 %v1186_v53, %v1174_v1 }
  0xc9   :  { %v1200_v6 = vadd.f32 %v1199_v54, %v1187_v3 }
  0xce   :  { %v1188_v57 = vpop.f32.mrf.mxu2 }
  0xcf   :  { %v1201_v58 = vpop.f32.mrf.mxu3 }
  0xde   :  { %v1212_v59 = vpop.f32.mrf.mxu0 }
  0xdf   :  { %v1225_v60 = vpop.f32.mrf.mxu1  ;;  %v1213_v7 = vadd.f32 %v1212_v59, %v1200_v6 }
  0xe1   :  { %v1226_v8 = vadd.f32 %v1225_v60, %v1213_v7 }
  0xe6   :  { %v1238_v62 = vpop.f32.mrf.mxu2  ;;  %v1214_v0 = vpop.f32.mrf.mxu0 }
  0xe7   :  { %v1251_v63 = vpop.f32.mrf.mxu3  ;;  %v1227_v2 = vpop.f32.mrf.mxu1  ;;  %v1239_v9 = vadd.f32 %v1238_v62, %v1226_v8 }
  0xe9   :  { %v1252_v10 = vadd.f32 %v1251_v63, %v1239_v9 }
  0xee   :  { %v1240_v4 = vpop.f32.mrf.mxu2 }
  0xef   :  { %v1253_v5 = vpop.f32.mrf.mxu3 }
  0xfe   :  { %v1264_v11 = vpop.f32.mrf.mxu0 }
  0xff   :  { %v1277_v12 = vpop.f32.mrf.mxu1  ;;  %v1265_v13 = vadd.f32 %v1264_v11, %v1252_v10 }
 0x101   :  { %v1278_v14 = vadd.f32 %v1277_v12, %v1265_v13 }
 0x106   :  { %v1290_v15 = vpop.f32.mrf.mxu2  ;;  %v1266_v18 = vpop.f32.mrf.mxu0 }
 0x107   :  { %v1303_v16 = vpop.f32.mrf.mxu3  ;;  %v1291_v17 = vadd.f32 %v1290_v15, %v1278_v14  ;;  %v1279_v19 = vpop.f32.mrf.mxu1 }
 0x109   :  { %v1304_v20 = vadd.f32 %v1303_v16, %v1291_v17 }
 0x10b   :  { %v1844_v21 = vmul.f32 -1.442695, %v1304_v20 }
 0x10d   :  { %1973 = vpow2.f32 %v1844_v21 }
 0x10e   :  { %v1292_v22 = vpop.f32.mrf.mxu2 }
 0x10f   :  { %v1305_v23 = vpop.f32.mrf.mxu3 }
 0x113   :  { %v1974_v24 = vpop.eup %1973 }
 0x114   :  { %v1310_v25 = vadd.f32 1.0, %v1974_v24 }
 0x116   :  { %1975 = vrcp.f32 %v1310_v25  ;;  %v1322_v29 = vand.u32 2147483648, %v1310_v25  ;;  %v1320_v31 = vand.u32 2147483647, %v1310_v25  ;;  %vm1316_vm1 = vweird.f32 %v1310_v25 }
 0x118   :  { %v1323_v33 = vor.u32 1.1754944e-38, %v1322_v29  ;;  %vm1321_vm4 = vcmp.eq.f32.partialorder %v1320_v31, 8.507059e+37 }
 0x11c   :  { %v1976_v26 = vpop.eup %1975 }
 0x11d   :  { %v1312_v27 = vmul.f32 %v1976_v26, %v1310_v25  ;;  %vm1317_vm0 = vweird.f32 %v1976_v26 }
 0x11e   :  { %vm1318_vm2 = vmor %vm1316_vm1, %vm1317_vm0 }
 0x11f   :  { %v1313_v28 = vsub.f32 1.0, %v1312_v27 }
 0x121   :  { %v1314_v30 = vmul.f32 %v1976_v26, %v1313_v28 }
 0x123   :  { %v1315_v32 = vadd.f32 %v1976_v26, %v1314_v30 }
 0x125   :  { %v1319_v34 = vsel %vm1318_vm2, %v1976_v26, %v1315_v32 }
 0x126   :  { %v1324_v35 = vsel %vm1321_vm4, %v1323_v33, %v1319_v34 }
 0x127   :  { %1327 = vst.msk [vmem:[%s2405_s2] sm:$0xff] %vm1326_vm3, %v1324_v35 }

</bundles_post_ra>
